<compile_context>
chip_gen: v7x
topology: tpu7x:2x2x1
jax: 0.10.0
libtpu: 0.0.40
codegen_flags: <defaults>
</compile_context>

<pallas_src>
import functools

import jax
import jax.numpy as jnp
from jax.experimental import pallas as pl
from jax.experimental.pallas import tpu as pltpu

IN_DIM = 12288   # 3 * 64 * 64 (fixed by the module's first Linear)
H1 = 128
H2 = 64
OUT = 10


def _mlp_kernel(x_ref, w1_ref, b1_ref, w2_ref, b2_ref, w3_ref, b3_ref,
                out_ref, acc_ref):
    k = pl.program_id(1)          # K-reduction axis (last grid axis)

    # Initialize the layer-1 accumulator with the bias on the first K-chunk.
    @pl.when(k == 0)
    def _():
        acc_ref[...] = jnp.broadcast_to(
            b1_ref[...].astype(jnp.float32), acc_ref.shape)

    # Accumulate partial x @ W1 over the K dimension (hot path, MXU).
    acc_ref[...] += jnp.dot(x_ref[...], w1_ref[...],
                            preferred_element_type=jnp.float32)

    # On the last K-chunk, finish the network: relu -> fc2 -> relu -> fc3.
    # (Tail weights have constant block indices -> DMA'd once, ~40 KB; per the
    #  perf review this epilogue is noise and is intentionally left simple.)
    @pl.when(k == pl.num_programs(1) - 1)
    def _():
        h1 = jnp.maximum(acc_ref[...], 0.0)
        h2 = jnp.dot(h1, w2_ref[...].astype(jnp.float32),
                     preferred_element_type=jnp.float32)
        h2 = jnp.maximum(h2 + b2_ref[...].astype(jnp.float32), 0.0)
        logits = jnp.dot(h2, w3_ref[...].astype(jnp.float32),
                         preferred_element_type=jnp.float32)
        out_ref[...] = (logits + b3_ref[...].astype(jnp.float32)).astype(out_ref.dtype)


def _round_up(n, m):
    return ((n + m - 1) // m) * m


def _default_tk():
    """Pick the K-chunk size: single grid step where VMEM allows, 2 steps on v5e."""
    try:
        kind = jax.devices()[0].device_kind.lower()
    except Exception:
        kind = ""
    # v5e's 16 MiB default scoped VMEM is tight for a single-step, double-buffered
    # 12288-wide W1 block; two steps capture most of the grid-overhead win there.
    if "v5" in kind:
        return 6144
    return 12288


@functools.partial(jax.jit, static_argnames=("tk", "bm"))
def _forward(x_nchw, params, *, tk, bm):
    w1, b1, w2, b2, w3, b3 = params
    B = x_nchw.shape[0]
    x = x_nchw.reshape(B, -1).astype(w1.dtype)     # matches torch flatten(start_dim=1)
    assert x.shape[1] == IN_DIM
    assert IN_DIM % tk == 0
    nk = IN_DIM // tk

    # Batch tiling: keeps VMEM bounded for large B and gives megacore / the second
    # v7x TensorCore a "parallel" axis to shard.  Pad B to a multiple of the tile
    # (>=16 so bf16 sublane packing is also clean); padded rows are sliced off.
    tb = min(_round_up(B, 16), bm)
    Bp = _round_up(B, tb)
    if Bp != B:
        x = jnp.pad(x, ((0, Bp - B), (0, 0)))
    nb = Bp // tb

    # VMEM budget: double-buffered x/W1 blocks dominate.  Pass an explicit limit
    # so the single-step (tk=12288) layout also compiles under the 16/32 MiB
    # default scoped limits.
    small = (H1 * H2 + H2 * OUT + H1 + H2 + OUT) * w1.dtype.itemsize
    need = (2 * tb * tk * x.dtype.itemsize        # x blocks (double-buffered)
            + 2 * tk * H1 * w1.dtype.itemsize     # W1 blocks (double-buffered)
            + 2 * small                           # tail weights / biases
            + 2 * tb * OUT * 4                    # output blocks
            + tb * H1 * 4)                        # f32 accumulator scratch
    vmem_limit = int(need * 1.25) + (2 << 20)

    out = pl.pallas_call(
        _mlp_kernel,
        out_shape=jax.ShapeDtypeStruct((Bp, OUT), jnp.float32),
        grid_spec=pltpu.PrefetchScalarGridSpec(
            num_scalar_prefetch=0,
            grid=(nb, nk),                                    # reduction axis last
            in_specs=[
                pl.BlockSpec((tb, tk), lambda b, k: (b, k)),   # x chunk
                pl.BlockSpec((tk, H1), lambda b, k: (k, 0)),   # W1 chunk
                pl.BlockSpec((1, H1), lambda b, k: (0, 0)),    # b1
                pl.BlockSpec((H1, H2), lambda b, k: (0, 0)),   # W2
                pl.BlockSpec((1, H2), lambda b, k: (0, 0)),    # b2
                pl.BlockSpec((H2, OUT), lambda b, k: (0, 0)),  # W3
                pl.BlockSpec((1, OUT), lambda b, k: (0, 0)),   # b3
            ],
            out_specs=pl.BlockSpec((tb, OUT), lambda b, k: (b, 0)),
            scratch_shapes=[pltpu.VMEM((tb, H1), jnp.float32)],
        ),
        compiler_params=pltpu.CompilerParams(
            dimension_semantics=("parallel", "arbitrary"),
            vmem_limit_bytes=vmem_limit),
    )(x, w1, b1, w2, b2, w3, b3)

    return out[:B]


def dog_classifier_fc(x_nchw, params, *, tk=None, bm=128):
    """Forward pass. x_nchw: (B, 3, 64, 64) -> (B, 10) float32 logits."""
    if tk is None:
        tk = _default_tk()
    return _forward(x_nchw, params, tk=tk, bm=bm)


def init_params(key, dtype=jnp.float32):
    """Deterministic init matching torch.nn.Linear default (uniform +/- 1/sqrt(fan_in))."""
    ks = jax.random.split(key, 6)

    def lin(kw, kb, fan_in, fan_out):
        bound = 1.0 / jnp.sqrt(fan_in)
        w = jax.random.uniform(kw, (fan_in, fan_out), jnp.float32, -bound, bound)
        b = jax.random.uniform(kb, (1, fan_out), jnp.float32, -bound, bound)
        return w.astype(dtype), b.astype(dtype)

    w1, b1 = lin(ks[0], ks[1], IN_DIM, H1)
    w2, b2 = lin(ks[2], ks[3], H1, H2)
    w3, b3 = lin(ks[4], ks[5], H2, OUT)
    return (w1, b1, w2, b2, w3, b3)


def reference_forward(x_nchw, params):
    """Pure-JAX f32 reference of the torch forward pass."""
    w1, b1, w2, b2, w3, b3 = [p.astype(jnp.float32) for p in params]
    x = x_nchw.reshape(x_nchw.shape[0], -1).astype(jnp.float32)
    h1 = jnp.maximum(x @ w1 + b1, 0.0)
    h2 = jnp.maximum(h1 @ w2 + b2, 0.0)
    return h2 @ w3 + b3


if __name__ == "__main__":
    key = jax.random.PRNGKey(0)
    k_x, k_p = jax.random.split(key)

    # Batch=2, NCHW (2, 3, 64, 64) -> flatten to 12288 features (fixed by the module).
    x = jax.random.normal(k_x, (2, 3, 64, 64), jnp.float32)
    params = init_params(k_p)

    # f32 path: matches the torch module's numerics.
    out = jax.block_until_ready(dog_classifier_fc(x, params))
    ref = reference_forward(x, params)
    assert out.shape == (2, 10)
    assert jnp.allclose(out, ref, atol=1e-4, rtol=1e-4)

    # Optional bf16-weight path (halves W1 HBM traffic; accumulation stays f32).
    params_bf16 = tuple(p.astype(jnp.bfloat16) for p in params)
    out_bf16 = jax.block_until_ready(dog_classifier_fc(x, params_bf16))
    assert out_bf16.shape == (2, 10)
    assert jnp.allclose(out_bf16, ref, atol=1.5e-1, rtol=1.5e-1)

    print("KERNEL_OK")
</pallas_src>

<mosaic_0001>
module attributes {stable_mosaic.version = 11 : i64} {
  func.func @_mlp_kernel(%arg0: i32, %arg1: i32, %arg2: memref<16x12288xf32, #tpu.memory_space<vmem>>, %arg3: memref<12288x128xf32, #tpu.memory_space<vmem>>, %arg4: memref<1x128xf32, #tpu.memory_space<vmem>>, %arg5: memref<128x64xf32, #tpu.memory_space<vmem>>, %arg6: memref<1x64xf32, #tpu.memory_space<vmem>>, %arg7: memref<64x10xf32, #tpu.memory_space<vmem>>, %arg8: memref<1x10xf32, #tpu.memory_space<vmem>>, %arg9: memref<16x10xf32, #tpu.memory_space<vmem>>, %arg10: memref<16x128xf32, #tpu.memory_space<vmem>>) attributes {dimension_semantics = [#tpu.dimension_semantics<parallel>, #tpu.dimension_semantics<arbitrary>], iteration_bounds = array<i64: 1, 1>, scalar_prefetch = 0 : i64, scratch_operands = 1 : i64, tpu.core_type = #tpu.core_type<tc>, window_params = [{transform_indices = @transform_0, window_bounds = array<i64: 16, 12288>}, {transform_indices = @transform_1, window_bounds = array<i64: 12288, 128>}, {pipeline_mode = #tpu.pipeline_mode<synchronous>, transform_indices = @transform_2, window_bounds = array<i64: 1, 128>}, {pipeline_mode = #tpu.pipeline_mode<synchronous>, transform_indices = @transform_3, window_bounds = array<i64: 128, 64>}, {pipeline_mode = #tpu.pipeline_mode<synchronous>, transform_indices = @transform_4, window_bounds = array<i64: 1, 64>}, {pipeline_mode = #tpu.pipeline_mode<synchronous>, transform_indices = @transform_5, window_bounds = array<i64: 64, 10>}, {pipeline_mode = #tpu.pipeline_mode<synchronous>, transform_indices = @transform_6, window_bounds = array<i64: 1, 10>}, {transform_indices = @transform_7, window_bounds = array<i64: 16, 10>}]} {
    %c0_i32 = arith.constant 0 : i32
    %0 = arith.cmpi eq, %arg1, %c0_i32 : i32
    %1 = arith.extui %0 : i1 to i32
    %c0_i32_0 = arith.constant 0 : i32
    %2 = arith.cmpi ne, %1, %c0_i32_0 : i32
    scf.if %2 {
      %c0_10 = arith.constant 0 : index
      %c0_11 = arith.constant 0 : index
      %12 = vector.load %arg4[%c0_10, %c0_11] : memref<1x128xf32, #tpu.memory_space<vmem>>, vector<1x128xf32>
      %13 = vector.shape_cast %12 : vector<1x128xf32> to vector<1x128xf32>
      %14 = vector.broadcast %13 : vector<1x128xf32> to vector<16x128xf32>
      %c0_12 = arith.constant 0 : index
      %c0_13 = arith.constant 0 : index
      %15 = vector.load %arg10[%c0_12, %c0_13] : memref<16x128xf32, #tpu.memory_space<vmem>>, vector<16x128xf32>
      tpu.vector_store %arg10[%c0_12, %c0_13], %14 {strides = array<i32>} : memref<16x128xf32, #tpu.memory_space<vmem>>, vector<16x128xf32>,
    } else {
    }
    %c0 = arith.constant 0 : index
    %c0_1 = arith.constant 0 : index
    %3 = vector.load %arg10[%c0, %c0_1] : memref<16x128xf32, #tpu.memory_space<vmem>>, vector<16x128xf32>
    %c0_2 = arith.constant 0 : index
    %c0_3 = arith.constant 0 : index
    %4 = vector.load %arg2[%c0_2, %c0_3] : memref<16x12288xf32, #tpu.memory_space<vmem>>, vector<16x12288xf32>
    %c0_4 = arith.constant 0 : index
    %c0_5 = arith.constant 0 : index
    %5 = vector.load %arg3[%c0_4, %c0_5] : memref<12288x128xf32, #tpu.memory_space<vmem>>, vector<12288x128xf32>
    %cst = arith.constant dense<0.000000e+00> : vector<16x128xf32>
    %6 = tpu.matmul %4, %5, %cst {dimension_numbers = #tpu.dot_dimension_numbers<[1], [0], [0], [1], [0, 0, 1, 1], [], []>} : vector<16x12288xf32>, vector<12288x128xf32>, vector<16x128xf32> -> vector<16x128xf32>
    %7 = arith.addf %3, %6 : vector<16x128xf32>
    %c0_6 = arith.constant 0 : index
    %c0_7 = arith.constant 0 : index
    %8 = vector.load %arg10[%c0_6, %c0_7] : memref<16x128xf32, #tpu.memory_space<vmem>>, vector<16x128xf32>
    tpu.vector_store %arg10[%c0_6, %c0_7], %7 {strides = array<i32>} : memref<16x128xf32, #tpu.memory_space<vmem>>, vector<16x128xf32>,
    %c0_i32_8 = arith.constant 0 : i32
    %9 = arith.cmpi eq, %arg1, %c0_i32_8 : i32
    %10 = arith.extui %9 : i1 to i32
    %c0_i32_9 = arith.constant 0 : i32
    %11 = arith.cmpi ne, %10, %c0_i32_9 : i32
    scf.if %11 {
      %c0_10 = arith.constant 0 : index
      %c0_11 = arith.constant 0 : index
      %12 = vector.load %arg10[%c0_10, %c0_11] : memref<16x128xf32, #tpu.memory_space<vmem>>, vector<16x128xf32>
      %cst_12 = arith.constant 0.000000e+00 : f32
      %13 = vector.broadcast %cst_12 : f32 to vector<16x128xf32>
      %14 = arith.maximumf %12, %13 : vector<16x128xf32>
      %c0_13 = arith.constant 0 : index
      %c0_14 = arith.constant 0 : index
      %15 = vector.load %arg5[%c0_13, %c0_14] : memref<128x64xf32, #tpu.memory_space<vmem>>, vector<128x64xf32>
      %cst_15 = arith.constant dense<0.000000e+00> : vector<16x64xf32>
      %16 = tpu.matmul %14, %15, %cst_15 {dimension_numbers = #tpu.dot_dimension_numbers<[1], [0], [0], [1], [0, 0, 1, 1], [], []>} : vector<16x128xf32>, vector<128x64xf32>, vector<16x64xf32> -> vector<16x64xf32>
      %c0_16 = arith.constant 0 : index
      %c0_17 = arith.constant 0 : index
      %17 = vector.load %arg6[%c0_16, %c0_17] : memref<1x64xf32, #tpu.memory_space<vmem>>, vector<1x64xf32>
      %18 = vector.broadcast %17 : vector<1x64xf32> to vector<16x64xf32>
      %19 = arith.addf %16, %18 : vector<16x64xf32>
      %cst_18 = arith.constant 0.000000e+00 : f32
      %20 = vector.broadcast %cst_18 : f32 to vector<16x64xf32>
      %21 = arith.maximumf %19, %20 : vector<16x64xf32>
      %c0_19 = arith.constant 0 : index
      %c0_20 = arith.constant 0 : index
      %22 = vector.load %arg7[%c0_19, %c0_20] : memref<64x10xf32, #tpu.memory_space<vmem>>, vector<64x10xf32>
      %cst_21 = arith.constant dense<0.000000e+00> : vector<16x10xf32>
      %23 = tpu.matmul %21, %22, %cst_21 {dimension_numbers = #tpu.dot_dimension_numbers<[1], [0], [0], [1], [0, 0, 1, 1], [], []>} : vector<16x64xf32>, vector<64x10xf32>, vector<16x10xf32> -> vector<16x10xf32>
      %c0_22 = arith.constant 0 : index
      %c0_23 = arith.constant 0 : index
      %24 = vector.load %arg8[%c0_22, %c0_23] : memref<1x10xf32, #tpu.memory_space<vmem>>, vector<1x10xf32>
      %25 = vector.broadcast %24 : vector<1x10xf32> to vector<16x10xf32>
      %26 = arith.addf %23, %25 : vector<16x10xf32>
      %c0_24 = arith.constant 0 : index
      %c0_25 = arith.constant 0 : index
      %27 = vector.load %arg9[%c0_24, %c0_25] : memref<16x10xf32, #tpu.memory_space<vmem>>, vector<16x10xf32>
      tpu.vector_store %arg9[%c0_24, %c0_25], %26 {strides = array<i32>} : memref<16x10xf32, #tpu.memory_space<vmem>>, vector<16x10xf32>,
    } else {
    }
    return
  }
  func.func @transform_0(%arg0: i32, %arg1: i32) -> (i32, i32) {
    %c0_i32 = arith.constant 0 : i32
    return %arg0, %arg1 : i32, i32
  }
  func.func @transform_1(%arg0: i32, %arg1: i32) -> (i32, i32) {
    %c0_i32 = arith.constant 0 : i32
    %c0_i32_0 = arith.constant 0 : i32
    return %arg1, %c0_i32 : i32, i32
  }
  func.func @transform_2(%arg0: i32, %arg1: i32) -> (i32, i32) {
    %c0_i32 = arith.constant 0 : i32
    %c0_i32_0 = arith.constant 0 : i32
    %c0_i32_1 = arith.constant 0 : i32
    return %c0_i32, %c0_i32_0 : i32, i32
  }
  func.func @transform_3(%arg0: i32, %arg1: i32) -> (i32, i32) {
    %c0_i32 = arith.constant 0 : i32
    %c0_i32_0 = arith.constant 0 : i32
    %c0_i32_1 = arith.constant 0 : i32
    return %c0_i32, %c0_i32_0 : i32, i32
  }
  func.func @transform_4(%arg0: i32, %arg1: i32) -> (i32, i32) {
    %c0_i32 = arith.constant 0 : i32
    %c0_i32_0 = arith.constant 0 : i32
    %c0_i32_1 = arith.constant 0 : i32
    return %c0_i32, %c0_i32_0 : i32, i32
  }
  func.func @transform_5(%arg0: i32, %arg1: i32) -> (i32, i32) {
    %c0_i32 = arith.constant 0 : i32
    %c0_i32_0 = arith.constant 0 : i32
    %c0_i32_1 = arith.constant 0 : i32
    return %c0_i32, %c0_i32_0 : i32, i32
  }
  func.func @transform_6(%arg0: i32, %arg1: i32) -> (i32, i32) {
    %c0_i32 = arith.constant 0 : i32
    %c0_i32_0 = arith.constant 0 : i32
    %c0_i32_1 = arith.constant 0 : i32
    return %c0_i32, %c0_i32_0 : i32, i32
  }
  func.func @transform_7(%arg0: i32, %arg1: i32) -> (i32, i32) {
    %c0_i32 = arith.constant 0 : i32
    %c0_i32_0 = arith.constant 0 : i32
    return %arg0, %c0_i32 : i32, i32
  }
}

</mosaic_0001>

<bundles_post_ra>
// kernel: _forward.1
= control target key start
LH: loop header
LB: loop body
LE: loop exit
PB: predicated region body
PF: predicated region fallthrough
CT: control target
= control target key end

     0   :  { %12 = vsyncpa [#allocation4], 0  ;;  %s10082_s0 = inlined_call_operand.vmem [shape: f32[16,12288], index: 0, kind: input, shape index: {}]   ;;  %s10083_s1 = inlined_call_operand.hbm [shape: f32[12288,128], index: 1, kind: input, shape index: {}]   ;;  %s10084_s2 = inlined_call_operand.hbm [shape: f32[1,128], index: 2, kind: input, shape index: {}]   ;;  %s10085_s3 = inlined_call_operand.vmem [shape: f32[128,64], index: 3, kind: input, shape index: {}]   ;;  %s10086_s4 = inlined_call_operand.hbm [shape: f32[1,64], index: 4, kind: input, shape index: {}]   ;;  %s10087_s5 = inlined_call_operand.vmem [shape: f32[64,10], index: 5, kind: input, shape index: {}]   ;;  %s10088_s6 = inlined_call_operand.hbm [shape: f32[1,10], index: 6, kind: input, shape index: {}]   ;;  %s10089_s7 = inlined_call_operand.vmem [shape: f32[16,10], index: 7, kind: output, shape index: {}]  }
   0x1   :  { %13 = vsyncpa [#allocation6], 0 }
   0x2   :  { %14 = vsyncpa [#allocation9], 0  ;;  %s9231_s24 = smov [#allocation5]   ;;  %s9232_s26 = smov [#allocation3]  }
   0x3   :  { %s35_s25 = sshll.u32 %s9231_s24, 4  ;;  %s22_s27 = sshll.u32 %s9232_s26, 4  ;;  %s36_s25 = int_to_ptr.vmem [resolvable:$true] %s35_s25  ;;  %s9277_s27 = int_to_ptr.vmem [resolvable:$true] %s22_s27 }
   0x4   :  { %s9137_s30 = scalar_lea.hbm %s10084_s2, 16 }
   0x5   :  { %p9138_p0 = scmp.ne.s32.totalorder %s10084_s2, %s9137_s30  ;;  %p9141_p1 = scmp.lt.u32.totalorder %s9137_s30, %s10084_s2 }
   0x7   :  { %p9143_p2 = pnand %p9141_p1, %p9138_p0 }
   0x9   :  { %9146 = shalt.err (!%p9143_p2)
}
   0xa   :  { %s9147_s12 = scalar_lea.vmem %s36_s25, 16  ;;  %s9151_s13 = scalar_lea.vmem %s36_s25, 32 }
   0xb   :  { %p9148_p3 = scmp.ne.s32.totalorder %s36_s25, %s9147_s12  ;;  %p9152_p4 = scmp.lt.s32.totalorder %s36_s25, %s36_s25 }
   0xc   :  { %p9153_p5 = scmp.lt.s32.totalorder %s9151_s13, %s9147_s12 }
   0xe   :  { %p9154_p6 = por %p9153_p5, %p9152_p4 }
  0x10   :  { %p9155_p7 = pnand %p9154_p6, %p9148_p3 }
  0x12   :  { %9158 = shalt.err (!%p9155_p7)
}
  0x13   :  { %38 = dma.hbm_to_vmem [thread:$0]  %s10084_s2, 16, %s36_s25, [#allocation6]  }
  0x14   :  { %s9159_s18 = scalar_lea.hbm %s10083_s1, 196608 }
  0x15   :  { %p9160_p8 = scmp.ne.s32.totalorder %s10083_s1, %s9159_s18  ;;  %p9163_p9 = scmp.lt.u32.totalorder %s9159_s18, %s10083_s1 }
  0x17   :  { %p9165_p10 = pnand %p9163_p9, %p9160_p8 }
  0x19   :  { %9168 = shalt.err (!%p9165_p10)
}
  0x1a   :  { %s9169_s23 = scalar_lea.vmem %s9277_s27, 196608  ;;  %p9174_p12 = scmp.lt.s32.totalorder %s9277_s27, %s9277_s27 }
  0x1b   :  { %p9170_p11 = scmp.ne.s32.totalorder %s9277_s27, %s9169_s23  ;;  %p9175_p13 = scmp.lt.s32.totalorder %s9169_s23, %s9169_s23 }
  0x1d   :  { %p9176_p0 = por %p9175_p13, %p9174_p12 }
  0x1f   :  { %p9177_p1 = pnand %p9176_p0, %p9170_p11 }
  0x21   :  { %9180 = shalt.err (!%p9177_p1)
}
  0x22   :  { %s9233_s2 = smov 128   ;;  %s9234_s24 = smov 8  }
  0x23   :  { %28 = dma.hbm_to_vmem [thread:$0]  %s10083_s1, 196608, %s9277_s27, [#allocation4], %s9233_s2, %s9233_s2, %s9234_s24  }
  0x24   :  { %s9235_s28 = smov [#allocation7]   ;;  %s9236_s30 = smov [#allocation8]  }
  0x25   :  { %s47_s29 = sshll.u32 %s9235_s28, 4  ;;  %s59_s8 = sshll.u32 %s9236_s30, 4  ;;  %s48_s29 = int_to_ptr.vmem [resolvable:$true] %s47_s29  ;;  %s60_s8 = int_to_ptr.vmem [resolvable:$true] %s59_s8 }
  0x26   :  { %s9181_s11 = scalar_lea.hbm %s10086_s4, 16 }
  0x27   :  { %p9182_p2 = scmp.ne.s32.totalorder %s10086_s4, %s9181_s11  ;;  %p9185_p3 = scmp.lt.u32.totalorder %s9181_s11, %s10086_s4 }
  0x29   :  { %p9187_p4 = pnand %p9185_p3, %p9182_p2 }
  0x2b   :  { %9190 = shalt.err (!%p9187_p4)
}
  0x2c   :  { %s9191_s1 = scalar_lea.vmem %s48_s29, 16  ;;  %s9195_s27 = scalar_lea.vmem %s48_s29, 32 }
  0x2d   :  { %p9192_p5 = scmp.ne.s32.totalorder %s48_s29, %s9191_s1  ;;  %p9196_p6 = scmp.lt.s32.totalorder %s48_s29, %s48_s29 }
  0x2e   :  { %p9197_p7 = scmp.lt.s32.totalorder %s9195_s27, %s9191_s1 }
  0x30   :  { %p9198_p8 = por %p9197_p7, %p9196_p6 }
  0x32   :  { %p9199_p9 = pnand %p9198_p8, %p9192_p5 }
  0x34   :  { %9202 = shalt.err (!%p9199_p9)
}
  0x35   :  { %50 = dma.hbm_to_vmem [thread:$0]  %s10086_s4, 16, %s48_s29, [#allocation6]  }
  0x36   :  { %s9203_s20 = scalar_lea.hbm %s10088_s6, 16 }
  0x37   :  { %p9204_p10 = scmp.ne.s32.totalorder %s10088_s6, %s9203_s20  ;;  %p9207_p11 = scmp.lt.u32.totalorder %s9203_s20, %s10088_s6 }
  0x39   :  { %p9209_p12 = pnand %p9207_p11, %p9204_p10 }
  0x3b   :  { %9212 = shalt.err (!%p9209_p12)
}
  0x3c   :  { %s9213_s24 = scalar_lea.vmem %s60_s8, 16  ;;  %s9217_s25 = scalar_lea.vmem %s60_s8, 32 }
  0x3d   :  { %p9214_p13 = scmp.ne.s32.totalorder %s60_s8, %s9213_s24  ;;  %p9218_p0 = scmp.lt.s32.totalorder %s60_s8, %s60_s8 }
  0x3e   :  { %p9219_p1 = scmp.lt.s32.totalorder %s9217_s25, %s9213_s24 }
  0x40   :  { %p9220_p2 = por %p9219_p1, %p9218_p0 }
  0x42   :  { %p9221_p3 = pnand %p9220_p2, %p9214_p13 }
  0x44   :  { %9224 = shalt.err (!%p9221_p3)
}
  0x45   :  { %62 = dma.hbm_to_vmem [thread:$0]  %s10088_s6, 16, %s60_s8, [#allocation9]  }
  0x46   :  { %9225 = dma.done.wait [#allocation4], 196608  }
  0x47   :  { %9226 = vsyncadd [#allocation4], 4294770688 }
  0x48   :  { %9227 = dma.done.wait [#allocation6], 32  }
  0x49   :  { %9228 = vsyncadd [#allocation6], 4294967264 }
  0x4a   :  { %9229 = dma.done.wait [#allocation9], 16  }
  0x4b   :  { %9230 = vsyncadd [#allocation9], 4294967280  ;;  %v298_v0 = vld [vmem:[#allocation3 + $0x80] sm:$0xff]  ;;  %v299_v1 = vld [vmem:[#allocation3 + $0x88] sm:$0xff]  ;;  %vm5544_vm0 = vcmask 523264   ;;  %vm5626_vm1 = vcmask 80896  }
  0x4c   :  { %v330_v2 = vld [vmem:[#allocation3 + $0x180] sm:$0xff]  ;;  %v7547_v3 = vpack.c.bf16 %v299_v1, %v298_v0  ;;  %v331_v4 = vld [vmem:[#allocation3 + $0x188] sm:$0xff]  ;;  %v300_v11 = vld [vmem:[#allocation3 + $0x90] sm:$0xff] }
  0x4d   :  { %v282_v5 = vld [vmem:[#allocation3] sm:$0xff]  ;;  %v283_v6 = vld [vmem:[#allocation3 + $0x8] sm:$0xff]  ;;  %v7579_v7 = vpack.c.bf16 %v331_v4, %v330_v2  ;;  %v301_v13 = vld [vmem:[#allocation3 + $0x98] sm:$0xff] }
  0x4e   :  { %v7549_v8 = vpack.c.bf16 %v283_v6, %v282_v5  ;;  %v314_v9 = vld [vmem:[#allocation3 + $0x100] sm:$0xff]  ;;  %v315_v10 = vld [vmem:[#allocation3 + $0x108] sm:$0xff]  ;;  %7548 = vmatprep.subr.bf16.mxu0 %v7547_v3  ;;  %v332_v14 = vld [vmem:[#allocation3 + $0x190] sm:$0xff]  ;;  %v7551_v16 = vpack.c.bf16 %v301_v13, %v300_v11 }
  0x4f   :  { %v7581_v12 = vpack.c.bf16 %v315_v10, %v314_v9  ;;  %v333_v15 = vld [vmem:[#allocation3 + $0x198] sm:$0xff]  ;;  %7580 = vmatprep.subr.bf16.mxu1 %v7579_v7  ;;  %v284_v18 = vld [vmem:[#allocation3 + $0x10] sm:$0xff]  ;;  %v302_v23 = vld [vmem:[#allocation3 + $0xa0] sm:$0xff] }
  0x50   :  { %7550 = vmatpush3.bf16.msra.mxu0 %v7549_v8  ;;  %v7583_v17 = vpack.c.bf16 %v333_v15, %v332_v14  ;;  %v285_v19 = vld [vmem:[#allocation3 + $0x18] sm:$0xff]  ;;  %v316_v20 = vld [vmem:[#allocation3 + $0x110] sm:$0xff]  ;;  %v303_v24 = vld [vmem:[#allocation3 + $0xa8] sm:$0xff] }
  0x51   :  { %7582 = vmatpush3.bf16.msra.mxu1 %v7581_v12  ;;  %v7553_v21 = vpack.c.bf16 %v285_v19, %v284_v18  ;;  %v317_v22 = vld [vmem:[#allocation3 + $0x118] sm:$0xff]  ;;  %7552 = vmatprep.subr.bf16.mxu0 %v7551_v16  ;;  %v7555_v26 = vpack.c.bf16 %v303_v24, %v302_v23  ;;  %v334_v27 = vld [vmem:[#allocation3 + $0x1a0] sm:$0xff]  ;;  %v335_v28 = vld [vmem:[#allocation3 + $0x1a8] sm:$0xff] }
  0x52   :  { %7584 = vmatprep.subr.bf16.mxu1 %v7583_v17  ;;  %v7585_v25 = vpack.c.bf16 %v317_v22, %v316_v20  ;;  %v286_v29 = vld [vmem:[#allocation3 + $0x20] sm:$0xff]  ;;  %v7587_v30 = vpack.c.bf16 %v335_v28, %v334_v27  ;;  %v287_v31 = vld [vmem:[#allocation3 + $0x28] sm:$0xff]  ;;  %v304_v35 = vld [vmem:[#allocation3 + $0xb0] sm:$0xff] }
  0x53   :  { %v318_v32 = vld [vmem:[#allocation3 + $0x120] sm:$0xff]  ;;  %v319_v33 = vld [vmem:[#allocation3 + $0x128] sm:$0xff]  ;;  %v7557_v34 = vpack.c.bf16 %v287_v31, %v286_v29  ;;  %v305_v36 = vld [vmem:[#allocation3 + $0xb8] sm:$0xff] }
  0x54   :  { %7554 = vmatpush3.bf16.msra.mxu0 %v7553_v21  ;;  %v336_v37 = vld [vmem:[#allocation3 + $0x1b0] sm:$0xff]  ;;  %v7589_v38 = vpack.c.bf16 %v319_v33, %v318_v32  ;;  %v7559_v39 = vpack.c.bf16 %v305_v36, %v304_v35  ;;  %v337_v40 = vld [vmem:[#allocation3 + $0x1b8] sm:$0xff]  ;;  %v306_v46 = vld [vmem:[#allocation3 + $0xc0] sm:$0xff] }
  0x55   :  { %7586 = vmatpush3.bf16.msra.mxu1 %v7585_v25  ;;  %7556 = vmatprep.subr.bf16.mxu0 %v7555_v26  ;;  %v288_v41 = vld [vmem:[#allocation3 + $0x30] sm:$0xff]  ;;  %v289_v42 = vld [vmem:[#allocation3 + $0x38] sm:$0xff]  ;;  %v7591_v43 = vpack.c.bf16 %v337_v40, %v336_v37  ;;  %v307_v47 = vld [vmem:[#allocation3 + $0xc8] sm:$0xff] }
  0x56   :  { %7588 = vmatprep.subr.bf16.mxu1 %v7587_v30  ;;  %v320_v44 = vld [vmem:[#allocation3 + $0x130] sm:$0xff]  ;;  %v321_v45 = vld [vmem:[#allocation3 + $0x138] sm:$0xff]  ;;  %v338_v48 = vld [vmem:[#allocation3 + $0x1c0] sm:$0xff]  ;;  %v7561_v50 = vpack.c.bf16 %v289_v42, %v288_v41  ;;  %v7563_v52 = vpack.c.bf16 %v307_v47, %v306_v46 }
  0x57   :  { %v339_v49 = vld [vmem:[#allocation3 + $0x1c8] sm:$0xff]  ;;  %v7593_v51 = vpack.c.bf16 %v321_v45, %v320_v44  ;;  %v290_v53 = vld [vmem:[#allocation3 + $0x40] sm:$0xff]  ;;  %v308_v58 = vld [vmem:[#allocation3 + $0xd0] sm:$0xff] }
  0x58   :  { %7558 = vmatpush3.bf16.msra.mxu0 %v7557_v34  ;;  %v291_v54 = vld [vmem:[#allocation3 + $0x48] sm:$0xff]  ;;  %v322_v55 = vld [vmem:[#allocation3 + $0x140] sm:$0xff]  ;;  %v7595_v56 = vpack.c.bf16 %v339_v49, %v338_v48  ;;  %v309_v59 = vld [vmem:[#allocation3 + $0xd8] sm:$0xff] }
  0x59   :  { %7590 = vmatpush3.bf16.msra.mxu1 %v7589_v38  ;;  %7560 = vmatprep.subr.bf16.mxu0 %v7559_v39  ;;  %v323_v57 = vld [vmem:[#allocation3 + $0x148] sm:$0xff]  ;;  %v340_v60 = vld [vmem:[#allocation3 + $0x1d0] sm:$0xff]  ;;  %v341_v61 = vld [vmem:[#allocation3 + $0x1d8] sm:$0xff]  ;;  %v7565_v62 = vpack.c.bf16 %v291_v54, %v290_v53  ;;  %v7567_v0 = vpack.c.bf16 %v309_v59, %v308_v58 }
  0x5a   :  { %7592 = vmatprep.subr.bf16.mxu1 %v7591_v43  ;;  %v7597_v63 = vpack.c.bf16 %v323_v57, %v322_v55  ;;  %v292_v1 = vld [vmem:[#allocation3 + $0x50] sm:$0xff]  ;;  %v293_v2 = vld [vmem:[#allocation3 + $0x58] sm:$0xff]  ;;  %v7599_v4 = vpack.c.bf16 %v341_v61, %v340_v60  ;;  %v310_v6 = vld [vmem:[#allocation3 + $0xe0] sm:$0xff] }
  0x5b   :  { %v324_v3 = vld [vmem:[#allocation3 + $0x150] sm:$0xff]  ;;  %v325_v5 = vld [vmem:[#allocation3 + $0x158] sm:$0xff]  ;;  %v311_v7 = vld [vmem:[#allocation3 + $0xe8] sm:$0xff]  ;;  %v7569_v10 = vpack.c.bf16 %v293_v2, %v292_v1 }
  0x5c   :  { %7562 = vmatpush3.bf16.msra.mxu0 %v7561_v50  ;;  %v342_v8 = vld [vmem:[#allocation3 + $0x1e0] sm:$0xff]  ;;  %v343_v9 = vld [vmem:[#allocation3 + $0x1e8] sm:$0xff]  ;;  %v7601_v13 = vpack.c.bf16 %v325_v5, %v324_v3  ;;  %v7571_v14 = vpack.c.bf16 %v311_v7, %v310_v6  ;;  %v93_v17 = vld [vmem:[%s10082_s0 + $0x18] sm:$0xff] }
  0x5d   :  { %7594 = vmatpush3.bf16.msra.mxu1 %v7593_v51  ;;  %7564 = vmatprep.subr.bf16.mxu0 %v7563_v52  ;;  %v294_v11 = vld [vmem:[#allocation3 + $0x60] sm:$0xff]  ;;  %v295_v12 = vld [vmem:[#allocation3 + $0x68] sm:$0xff]  ;;  %v7603_v18 = vpack.c.bf16 %v343_v9, %v342_v8  ;;  %v312_v20 = vld [vmem:[#allocation3 + $0xf0] sm:$0xff] }
  0x5e   :  { %7596 = vmatprep.subr.bf16.mxu1 %v7595_v56  ;;  %v326_v15 = vld [vmem:[#allocation3 + $0x160] sm:$0xff]  ;;  %v91_v16 = vld [vmem:[%s10082_s0 + $0x8] sm:$0xff]  ;;  %v313_v21 = vld [vmem:[#allocation3 + $0xf8] sm:$0xff]  ;;  %1957 = vmatprep.mubr.f32.mxu1 %v93_v17  ;;  %v7573_v24 = vpack.c.bf16 %v295_v12, %v294_v11 }
  0x5f   :  { %v327_v19 = vld [vmem:[#allocation3 + $0x168] sm:$0xff]  ;;  %1882 = vmatprep.mubr.f32.mxu0 %v91_v16  ;;  %v344_v22 = vld [vmem:[#allocation3 + $0x1f0] sm:$0xff]  ;;  %v345_v23 = vld [vmem:[#allocation3 + $0x1f8] sm:$0xff]  ;;  %v7575_v26 = vpack.c.bf16 %v313_v21, %v312_v20 }
  0x60   :  { %7566 = vmatpush3.bf16.msra.mxu0 %v7565_v62  ;;  %v7605_v25 = vpack.c.bf16 %v327_v19, %v326_v15  ;;  %v296_v27 = vld [vmem:[#allocation3 + $0x70] sm:$0xff]  ;;  %v297_v28 = vld [vmem:[#allocation3 + $0x78] sm:$0xff]  ;;  %v7607_v30 = vpack.c.bf16 %v345_v23, %v344_v22  ;;  %v362_v32 = vld [vmem:[#allocation3 + $0x280] sm:$0xff] }
  0x61   :  { %7598 = vmatpush3.bf16.msra.mxu1 %v7597_v63  ;;  %7568 = vmatprep.subr.bf16.mxu0 %v7567_v0  ;;  %v328_v29 = vld [vmem:[#allocation3 + $0x170] sm:$0xff]  ;;  %v329_v31 = vld [vmem:[#allocation3 + $0x178] sm:$0xff]  ;;  %v363_v33 = vld [vmem:[#allocation3 + $0x288] sm:$0xff]  ;;  %v7577_v36 = vpack.c.bf16 %v297_v28, %v296_v27 }
  0x62   :  { %7600 = vmatprep.subr.bf16.mxu1 %v7599_v4  ;;  %v394_v34 = vld [vmem:[#allocation3 + $0x380] sm:$0xff]  ;;  %v395_v35 = vld [vmem:[#allocation3 + $0x388] sm:$0xff]  ;;  %v7609_v37 = vpack.c.bf16 %v329_v31, %v328_v29  ;;  %v7611_v38 = vpack.c.bf16 %v363_v33, %v362_v32  ;;  %v364_v44 = vld [vmem:[#allocation3 + $0x290] sm:$0xff] }
  0x63   :  { %v346_v39 = vld [vmem:[#allocation3 + $0x200] sm:$0xff]  ;;  %v347_v40 = vld [vmem:[#allocation3 + $0x208] sm:$0xff]  ;;  %v7643_v42 = vpack.c.bf16 %v395_v35, %v394_v34  ;;  %v365_v45 = vld [vmem:[#allocation3 + $0x298] sm:$0xff] }
  0x64   :  { %7570 = vmatpush3.bf16.msra.mxu0 %v7569_v10  ;;  %v378_v41 = vld [vmem:[#allocation3 + $0x300] sm:$0xff]  ;;  %v379_v43 = vld [vmem:[#allocation3 + $0x308] sm:$0xff]  ;;  %v396_v46 = vld [vmem:[#allocation3 + $0x390] sm:$0xff]  ;;  %v7613_v50 = vpack.c.bf16 %v347_v40, %v346_v39  ;;  %v7615_v52 = vpack.c.bf16 %v365_v45, %v364_v44 }
  0x65   :  { %7602 = vmatpush3.bf16.msra.mxu1 %v7601_v13  ;;  %7572 = vmatprep.subr.bf16.mxu0 %v7571_v14  ;;  %v397_v47 = vld [vmem:[#allocation3 + $0x398] sm:$0xff]  ;;  %v90_v48 = vld [vmem:[%s10082_s0] sm:$0xff]  ;;  %v92_v49 = vld [vmem:[%s10082_s0 + $0x10] sm:$0xff]  ;;  %v7645_v51 = vpack.c.bf16 %v379_v43, %v378_v41 }
  0x66   :  { %7604 = vmatprep.subr.bf16.mxu1 %v7603_v18  ;;  %v348_v53 = vld [vmem:[#allocation3 + $0x210] sm:$0xff]  ;;  %v349_v54 = vld [vmem:[#allocation3 + $0x218] sm:$0xff]  ;;  %v7647_v56 = vpack.c.bf16 %v397_v47, %v396_v46  ;;  %v366_v58 = vld [vmem:[#allocation3 + $0x2a0] sm:$0xff] }
  0x67   :  { %v380_v55 = vld [vmem:[#allocation3 + $0x310] sm:$0xff]  ;;  %v381_v57 = vld [vmem:[#allocation3 + $0x318] sm:$0xff]  ;;  %v367_v59 = vld [vmem:[#allocation3 + $0x2a8] sm:$0xff]  ;;  %v7617_v62 = vpack.c.bf16 %v349_v54, %v348_v53 }
  0x68   :  { %7574 = vmatpush3.bf16.msra.mxu0 %v7573_v24  ;;  %v398_v60 = vld [vmem:[#allocation3 + $0x3a0] sm:$0xff]  ;;  %v399_v61 = vld [vmem:[#allocation3 + $0x3a8] sm:$0xff]  ;;  %v7649_v63 = vpack.c.bf16 %v381_v57, %v380_v55  ;;  %v7619_v0 = vpack.c.bf16 %v367_v59, %v366_v58  ;;  %v368_v6 = vld [vmem:[#allocation3 + $0x2b0] sm:$0xff] }
  0x69   :  { %7606 = vmatpush3.bf16.msra.mxu1 %v7605_v25  ;;  %7576 = vmatprep.subr.bf16.mxu0 %v7575_v26  ;;  %v350_v1 = vld [vmem:[#allocation3 + $0x220] sm:$0xff]  ;;  %v351_v2 = vld [vmem:[#allocation3 + $0x228] sm:$0xff]  ;;  %v7651_v4 = vpack.c.bf16 %v399_v61, %v398_v60  ;;  %v369_v7 = vld [vmem:[#allocation3 + $0x2b8] sm:$0xff] }
  0x6a   :  { %7608 = vmatprep.subr.bf16.mxu1 %v7607_v30  ;;  %v382_v3 = vld [vmem:[#allocation3 + $0x320] sm:$0xff]  ;;  %v383_v5 = vld [vmem:[#allocation3 + $0x328] sm:$0xff]  ;;  %v352_v8 = vld [vmem:[#allocation3 + $0x230] sm:$0xff]  ;;  %v7621_v11 = vpack.c.bf16 %v351_v2, %v350_v1  ;;  %v7623_v16 = vpack.c.bf16 %v369_v7, %v368_v6 }
  0x6b   :  { %v400_v9 = vld [vmem:[#allocation3 + $0x3b0] sm:$0xff]  ;;  %v401_v10 = vld [vmem:[#allocation3 + $0x3b8] sm:$0xff]  ;;  %v7653_v15 = vpack.c.bf16 %v383_v5, %v382_v3  ;;  %v370_v17 = vld [vmem:[#allocation3 + $0x2c0] sm:$0xff] }
  0x6c   :  { %7578 = vmatpush3.bf16.msra.mxu0 %v7577_v36  ;;  %v353_v12 = vld [vmem:[#allocation3 + $0x238] sm:$0xff]  ;;  %v384_v13 = vld [vmem:[#allocation3 + $0x330] sm:$0xff]  ;;  %v187_v18 = vld [vmem:[%s10082_s0 + $0x308] sm:$0xff]  ;;  %v7655_v20 = vpack.c.bf16 %v401_v10, %v400_v9 }
  0x6d   :  { %7610 = vmatpush3.bf16.msra.mxu1 %v7609_v37  ;;  %7612 = vmatprep.subr.bf16.mxu0 %v7611_v38  ;;  %v385_v14 = vld [vmem:[#allocation3 + $0x338] sm:$0xff]  ;;  %v371_v21 = vld [vmem:[#allocation3 + $0x2c8] sm:$0xff]  ;;  %v186_v22 = vld [vmem:[%s10082_s0 + $0x300] sm:$0xff]  ;;  %v7625_v26 = vpack.c.bf16 %v353_v12, %v352_v8 }
  0x6e   :  { %7644 = vmatprep.subr.bf16.mxu1 %v7643_v42  ;;  %v189_v19 = vld [vmem:[%s10082_s0 + $0x318] sm:$0xff]  ;;  %v188_v23 = vld [vmem:[%s10082_s0 + $0x310] sm:$0xff]  ;;  %v402_v24 = vld [vmem:[#allocation3 + $0x3c0] sm:$0xff]  ;;  %v7657_v29 = vpack.c.bf16 %v385_v14, %v384_v13  ;;  %v7627_v30 = vpack.c.bf16 %v371_v21, %v370_v17 }
  0x6f   :  { %1883 = vmatmul.mubr.f32.vlgmr.msra.gmra.mrb[0].mxu0 %v90_v48  ;;  %v403_v25 = vld [vmem:[#allocation3 + $0x3c8] sm:$0xff]  ;;  %v354_v27 = vld [vmem:[#allocation3 + $0x240] sm:$0xff]  ;;  %v372_v35 = vld [vmem:[#allocation3 + $0x2d0] sm:$0xff] }
  0x70   :  { %1958 = vmatmul.mubr.f32.vlgmr.msra.gmra.mrb[0].mxu1 %v92_v49  ;;  %7614 = vmatpush3.bf16.msra.mxu0 %v7613_v50  ;;  %v355_v28 = vld [vmem:[#allocation3 + $0x248] sm:$0xff]  ;;  %v386_v31 = vld [vmem:[#allocation3 + $0x340] sm:$0xff]  ;;  %v7659_v34 = vpack.c.bf16 %v403_v25, %v402_v24  ;;  %v373_v36 = vld [vmem:[#allocation3 + $0x2d8] sm:$0xff] }
  0x71   :  { %7646 = vmatpush3.bf16.msra.mxu1 %v7645_v51  ;;  %7616 = vmatprep.subr.bf16.mxu0 %v7615_v52  ;;  %v387_v32 = vld [vmem:[#allocation3 + $0x348] sm:$0xff]  ;;  %v97_v37 = vld [vmem:[%s10082_s0 + $0x38] sm:$0xff]  ;;  %v404_v38 = vld [vmem:[#allocation3 + $0x3d0] sm:$0xff]  ;;  %v7629_v40 = vpack.c.bf16 %v355_v28, %v354_v27  ;;  %v7631_v42 = vpack.c.bf16 %v373_v36, %v372_v35 }
  0x72   :  { %7648 = vmatprep.subr.bf16.mxu1 %v7647_v56  ;;  %1887 = vmatprep.mubr.f32.mxu0 %v187_v18  ;;  %v95_v33 = vld [vmem:[%s10082_s0 + $0x28] sm:$0xff]  ;;  %v405_v39 = vld [vmem:[#allocation3 + $0x3d8] sm:$0xff]  ;;  %v7661_v41 = vpack.c.bf16 %v387_v32, %v386_v31  ;;  %v356_v43 = vld [vmem:[#allocation3 + $0x250] sm:$0xff] }
  0x73   :  { %1962 = vmatprep.mubr.f32.mxu1 %v189_v19  ;;  %1888 = vmatmul.mubr.f32.gmra.mrb[2].mxu0 %v186_v22  ;;  %v357_v44 = vld [vmem:[#allocation3 + $0x258] sm:$0xff]  ;;  %v388_v45 = vld [vmem:[#allocation3 + $0x350] sm:$0xff]  ;;  %v7663_v46 = vpack.c.bf16 %v405_v39, %v404_v38  ;;  %v374_v48 = vld [vmem:[#allocation3 + $0x2e0] sm:$0xff] }
  0x74   :  { %7618 = vmatpush3.bf16.msra.mxu0 %v7617_v62  ;;  %1963 = vmatmul.mubr.f32.gmra.mrb[2].mxu1 %v188_v23  ;;  %v389_v47 = vld [vmem:[#allocation3 + $0x358] sm:$0xff]  ;;  %v375_v49 = vld [vmem:[#allocation3 + $0x2e8] sm:$0xff]  ;;  %v406_v50 = vld [vmem:[#allocation3 + $0x3e0] sm:$0xff]  ;;  %v7633_v52 = vpack.c.bf16 %v357_v44, %v356_v43 }
  0x75   :  { %7650 = vmatpush3.bf16.msra.mxu1 %v7649_v63  ;;  %7620 = vmatprep.subr.bf16.mxu0 %v7619_v0  ;;  %v407_v51 = vld [vmem:[#allocation3 + $0x3e8] sm:$0xff]  ;;  %v7665_v53 = vpack.c.bf16 %v389_v47, %v388_v45  ;;  %v7635_v54 = vpack.c.bf16 %v375_v49, %v374_v48  ;;  %v358_v55 = vld [vmem:[#allocation3 + $0x260] sm:$0xff]  ;;  %v376_v60 = vld [vmem:[#allocation3 + $0x2f0] sm:$0xff] }
  0x76   :  { %7652 = vmatprep.subr.bf16.mxu1 %v7651_v4  ;;  %2032 = vmatprep.mubr.f32.mxu0 %v95_v33  ;;  %v359_v56 = vld [vmem:[#allocation3 + $0x268] sm:$0xff]  ;;  %v390_v57 = vld [vmem:[#allocation3 + $0x360] sm:$0xff]  ;;  %v7667_v58 = vpack.c.bf16 %v407_v51, %v406_v50  ;;  %v377_v61 = vld [vmem:[#allocation3 + $0x2f8] sm:$0xff] }
  0x77   :  { %2107 = vmatprep.mubr.f32.mxu1 %v97_v37  ;;  %v391_v59 = vld [vmem:[#allocation3 + $0x368] sm:$0xff]  ;;  %v408_v62 = vld [vmem:[#allocation3 + $0x3f0] sm:$0xff]  ;;  %v409_v63 = vld [vmem:[#allocation3 + $0x3f8] sm:$0xff]  ;;  %v7637_v0 = vpack.c.bf16 %v359_v56, %v358_v55  ;;  %v7639_v2 = vpack.c.bf16 %v377_v61, %v376_v60 }
  0x78   :  { %7622 = vmatpush3.bf16.msra.mxu0 %v7621_v11  ;;  %v7669_v1 = vpack.c.bf16 %v391_v59, %v390_v57  ;;  %v360_v3 = vld [vmem:[#allocation3 + $0x270] sm:$0xff]  ;;  %v361_v4 = vld [vmem:[#allocation3 + $0x278] sm:$0xff]  ;;  %v7671_v6 = vpack.c.bf16 %v409_v63, %v408_v62  ;;  %v426_v8 = vld [vmem:[#allocation3 + $0x480] sm:$0xff] }
  0x79   :  { %7654 = vmatpush3.bf16.msra.mxu1 %v7653_v15  ;;  %7624 = vmatprep.subr.bf16.mxu0 %v7623_v16  ;;  %v392_v5 = vld [vmem:[#allocation3 + $0x370] sm:$0xff]  ;;  %v393_v7 = vld [vmem:[#allocation3 + $0x378] sm:$0xff]  ;;  %v427_v9 = vld [vmem:[#allocation3 + $0x488] sm:$0xff]  ;;  %v7641_v12 = vpack.c.bf16 %v361_v4, %v360_v3 }
  0x7a   :  { %7656 = vmatprep.subr.bf16.mxu1 %v7655_v20  ;;  %v458_v10 = vld [vmem:[#allocation3 + $0x580] sm:$0xff]  ;;  %v459_v11 = vld [vmem:[#allocation3 + $0x588] sm:$0xff]  ;;  %v7673_v13 = vpack.c.bf16 %v393_v7, %v392_v5  ;;  %v7675_v14 = vpack.c.bf16 %v427_v9, %v426_v8  ;;  %v96_v21 = vld [vmem:[%s10082_s0 + $0x30] sm:$0xff] }
  0x7b   :  { %v410_v15 = vld [vmem:[#allocation3 + $0x400] sm:$0xff]  ;;  %v411_v16 = vld [vmem:[#allocation3 + $0x408] sm:$0xff]  ;;  %v7707_v18 = vpack.c.bf16 %v459_v11, %v458_v10  ;;  %v428_v22 = vld [vmem:[#allocation3 + $0x490] sm:$0xff] }
  0x7c   :  { %7626 = vmatpush3.bf16.msra.mxu0 %v7625_v26  ;;  %v94_v17 = vld [vmem:[%s10082_s0 + $0x20] sm:$0xff]  ;;  %v443_v20 = vld [vmem:[#allocation3 + $0x508] sm:$0xff]  ;;  %v429_v23 = vld [vmem:[#allocation3 + $0x498] sm:$0xff]  ;;  %v7677_v24 = vpack.c.bf16 %v411_v16, %v410_v15 }
  0x7d   :  { %7658 = vmatpush3.bf16.msra.mxu1 %v7657_v29  ;;  %7628 = vmatprep.subr.bf16.mxu0 %v7627_v30  ;;  %v442_v19 = vld [vmem:[#allocation3 + $0x500] sm:$0xff]  ;;  %v191_v25 = vld [vmem:[%s10082_s0 + $0x328] sm:$0xff]  ;;  %v460_v26 = vld [vmem:[#allocation3 + $0x590] sm:$0xff]  ;;  %v7679_v32 = vpack.c.bf16 %v429_v23, %v428_v22 }
  0x7e   :  { %7660 = vmatprep.subr.bf16.mxu1 %v7659_v34  ;;  %v461_v27 = vld [vmem:[#allocation3 + $0x598] sm:$0xff]  ;;  %v7709_v28 = vpack.c.bf16 %v443_v20, %v442_v19  ;;  %v412_v29 = vld [vmem:[#allocation3 + $0x410] sm:$0xff]  ;;  %v430_v34 = vld [vmem:[#allocation3 + $0x4a0] sm:$0xff] }
  0x7f   :  { %v413_v30 = vld [vmem:[#allocation3 + $0x418] sm:$0xff]  ;;  %v444_v31 = vld [vmem:[#allocation3 + $0x510] sm:$0xff]  ;;  %v431_v35 = vld [vmem:[#allocation3 + $0x4a8] sm:$0xff]  ;;  %v7711_v37 = vpack.c.bf16 %v461_v27, %v460_v26 }
  0x80   :  { %7630 = vmatpush3.bf16.msra.mxu0 %v7629_v40  ;;  %v445_v33 = vld [vmem:[#allocation3 + $0x518] sm:$0xff]  ;;  %v462_v38 = vld [vmem:[#allocation3 + $0x5a0] sm:$0xff]  ;;  %v463_v39 = vld [vmem:[#allocation3 + $0x5a8] sm:$0xff]  ;;  %v7683_v44 = vpack.c.bf16 %v431_v35, %v430_v34 }
  0x81   :  { %7662 = vmatpush3.bf16.msra.mxu1 %v7661_v41  ;;  %7632 = vmatprep.subr.bf16.mxu0 %v7631_v42  ;;  %v193_v36 = vld [vmem:[%s10082_s0 + $0x338] sm:$0xff]  ;;  %v190_v40 = vld [vmem:[%s10082_s0 + $0x320] sm:$0xff]  ;;  %v7681_v41 = vpack.c.bf16 %v413_v30, %v412_v29  ;;  %v192_v42 = vld [vmem:[%s10082_s0 + $0x330] sm:$0xff]  ;;  %v7713_v43 = vpack.c.bf16 %v445_v33, %v444_v31  ;;  %v7715_v48 = vpack.c.bf16 %v463_v39, %v462_v38 }
  0x82   :  { %7664 = vmatprep.subr.bf16.mxu1 %v7663_v46  ;;  %v414_v45 = vld [vmem:[#allocation3 + $0x420] sm:$0xff]  ;;  %v415_v46 = vld [vmem:[#allocation3 + $0x428] sm:$0xff]  ;;  %v432_v50 = vld [vmem:[#allocation3 + $0x4b0] sm:$0xff] }
  0x83   :  { %v446_v47 = vld [vmem:[#allocation3 + $0x520] sm:$0xff]  ;;  %v447_v49 = vld [vmem:[#allocation3 + $0x528] sm:$0xff]  ;;  %v433_v51 = vld [vmem:[#allocation3 + $0x4b8] sm:$0xff]  ;;  %v7685_v55 = vpack.c.bf16 %v415_v46, %v414_v45 }
  0x84   :  { %7634 = vmatpush3.bf16.msra.mxu0 %v7633_v52  ;;  %v464_v52 = vld [vmem:[#allocation3 + $0x5b0] sm:$0xff]  ;;  %v101_v56 = vld [vmem:[%s10082_s0 + $0x58] sm:$0xff]  ;;  %v7717_v57 = vpack.c.bf16 %v447_v49, %v446_v47  ;;  %v467_v3 = vld [vmem:[#allocation3 + $0x5c8] sm:$0xff] }
  0x85   :  { %7666 = vmatpush3.bf16.msra.mxu1 %v7665_v53  ;;  %7636 = vmatprep.subr.bf16.mxu0 %v7635_v54  ;;  %v465_v53 = vld [vmem:[#allocation3 + $0x5b8] sm:$0xff]  ;;  %v99_v54 = vld [vmem:[%s10082_s0 + $0x48] sm:$0xff]  ;;  %v416_v59 = vld [vmem:[#allocation3 + $0x430] sm:$0xff] }
  0x86   :  { %7668 = vmatprep.subr.bf16.mxu1 %v7667_v58  ;;  %v7687_v58 = vpack.c.bf16 %v433_v51, %v432_v50  ;;  %v417_v60 = vld [vmem:[#allocation3 + $0x438] sm:$0xff]  ;;  %v448_v61 = vld [vmem:[#allocation3 + $0x530] sm:$0xff]  ;;  %v7719_v62 = vpack.c.bf16 %v465_v53, %v464_v52  ;;  %v418_v7 = vld [vmem:[#allocation3 + $0x440] sm:$0xff] }
  0x87   :  { %v449_v63 = vld [vmem:[#allocation3 + $0x538] sm:$0xff]  ;;  %v7689_v4 = vpack.c.bf16 %v417_v60, %v416_v59  ;;  %v419_v8 = vld [vmem:[#allocation3 + $0x448] sm:$0xff]  ;;  %v450_v9 = vld [vmem:[#allocation3 + $0x540] sm:$0xff] }
  0x88   :  { %7638 = vmatpush3.bf16.msra.mxu0 %v7637_v0  ;;  %v434_v0 = vld [vmem:[#allocation3 + $0x4c0] sm:$0xff]  ;;  %v7721_v5 = vpack.c.bf16 %v449_v63, %v448_v61  ;;  %v451_v11 = vld [vmem:[#allocation3 + $0x548] sm:$0xff]  ;;  %v469_v15 = vld [vmem:[#allocation3 + $0x5d8] sm:$0xff]  ;;  %v7693_v16 = vpack.c.bf16 %v419_v8, %v418_v7 }
  0x89   :  { %7670 = vmatpush3.bf16.msra.mxu1 %v7669_v1  ;;  %7640 = vmatprep.subr.bf16.mxu0 %v7639_v2  ;;  %v435_v1 = vld [vmem:[#allocation3 + $0x4c8] sm:$0xff]  ;;  %v466_v2 = vld [vmem:[#allocation3 + $0x5c0] sm:$0xff]  ;;  %v420_v19 = vld [vmem:[#allocation3 + $0x450] sm:$0xff] }
  0x8a   :  { %7672 = vmatprep.subr.bf16.mxu1 %v7671_v6  ;;  %v7691_v6 = vpack.c.bf16 %v435_v1, %v434_v0  ;;  %v7723_v10 = vpack.c.bf16 %v467_v3, %v466_v2  ;;  %v421_v20 = vld [vmem:[#allocation3 + $0x458] sm:$0xff]  ;;  %v470_v26 = vld [vmem:[#allocation3 + $0x5e0] sm:$0xff]  ;;  %v471_v27 = vld [vmem:[#allocation3 + $0x5e8] sm:$0xff] }
  0x8b   :  { %v453_v23 = vld [vmem:[#allocation3 + $0x558] sm:$0xff]  ;;  %v422_v31 = vld [vmem:[#allocation3 + $0x460] sm:$0xff]  ;;  %v7731_v34 = vpack.c.bf16 %v471_v27, %v470_v26  ;;  %v455_v35 = vld [vmem:[#allocation3 + $0x568] sm:$0xff] }
  0x8c   :  { %7642 = vmatpush3.bf16.msra.mxu0 %v7641_v12  ;;  %v436_v12 = vld [vmem:[#allocation3 + $0x4d0] sm:$0xff]  ;;  %v454_v33 = vld [vmem:[#allocation3 + $0x560] sm:$0xff]  ;;  %v473_v39 = vld [vmem:[#allocation3 + $0x5f8] sm:$0xff] }
  0x8d   :  { %7674 = vmatpush3.bf16.msra.mxu1 %v7673_v13  ;;  %7676 = vmatprep.subr.bf16.mxu0 %v7675_v14  ;;  %v437_v13 = vld [vmem:[#allocation3 + $0x4d8] sm:$0xff]  ;;  %v468_v14 = vld [vmem:[#allocation3 + $0x5d0] sm:$0xff]  ;;  %v491_v49 = vld [vmem:[#allocation3 + $0x688] sm:$0xff] }
  0x8e   :  { %7708 = vmatprep.subr.bf16.mxu1 %v7707_v18  ;;  %v7695_v18 = vpack.c.bf16 %v437_v13, %v436_v12  ;;  %v7727_v22 = vpack.c.bf16 %v469_v15, %v468_v14  ;;  %v472_v38 = vld [vmem:[#allocation3 + $0x5f0] sm:$0xff]  ;;  %v457_v47 = vld [vmem:[#allocation3 + $0x578] sm:$0xff]  ;;  %v522_v50 = vld [vmem:[#allocation3 + $0x780] sm:$0xff] }
  0x8f   :  { %2033 = vmatmul.mubr.f32.vlgmr.msra.gmra.mrb[4].mxu0 %v94_v17  ;;  %v7725_v17 = vpack.c.bf16 %v451_v11, %v450_v9  ;;  %v456_v45 = vld [vmem:[#allocation3 + $0x570] sm:$0xff]  ;;  %v7735_v46 = vpack.c.bf16 %v473_v39, %v472_v38  ;;  %v523_v51 = vld [vmem:[#allocation3 + $0x788] sm:$0xff]  ;;  %v506_v59 = vld [vmem:[#allocation3 + $0x700] sm:$0xff] }
  0x90   :  { %7678 = vmatpush3.bf16.msra.mxu0 %v7677_v24  ;;  %2108 = vmatmul.mubr.f32.vlgmr.msra.gmra.mrb[4].mxu1 %v96_v21  ;;  %v452_v21 = vld [vmem:[#allocation3 + $0x550] sm:$0xff]  ;;  %v438_v24 = vld [vmem:[#allocation3 + $0x4e0] sm:$0xff]  ;;  %v7737_v53 = vpack.c.bf16 %v457_v47, %v456_v45  ;;  %v507_v60 = vld [vmem:[#allocation3 + $0x708] sm:$0xff] }
  0x91   :  { %7710 = vmatpush3.bf16.msra.mxu1 %v7709_v28  ;;  %2037 = vmatprep.mubr.f32.mxu0 %v191_v25  ;;  %v439_v25 = vld [vmem:[#allocation3 + $0x4e8] sm:$0xff]  ;;  %v7697_v28 = vpack.c.bf16 %v421_v20, %v420_v19  ;;  %v7729_v29 = vpack.c.bf16 %v453_v23, %v452_v21  ;;  %v100_v61 = vld [vmem:[%s10082_s0 + $0x50] sm:$0xff]  ;;  %v493_v63 = vld [vmem:[#allocation3 + $0x698] sm:$0xff] }
  0x92   :  { %7680 = vmatprep.subr.bf16.mxu0 %v7679_v32  ;;  %2112 = vmatprep.mubr.f32.mxu1 %v193_v36  ;;  %v7699_v30 = vpack.c.bf16 %v439_v25, %v438_v24  ;;  %v423_v32 = vld [vmem:[#allocation3 + $0x468] sm:$0xff]  ;;  %v440_v36 = vld [vmem:[#allocation3 + $0x4f0] sm:$0xff]  ;;  %v525_v3 = vld [vmem:[#allocation3 + $0x798] sm:$0xff] }
  0x93   :  { %2038 = vmatmul.mubr.f32.gmra.mrb[6].mxu0 %v190_v40  ;;  %7712 = vmatprep.subr.bf16.mxu1 %v7711_v37  ;;  %v441_v37 = vld [vmem:[#allocation3 + $0x4f8] sm:$0xff]  ;;  %v7701_v40 = vpack.c.bf16 %v423_v32, %v422_v31  ;;  %v195_v1 = vld [vmem:[%s10082_s0 + $0x348] sm:$0xff]  ;;  %v524_v2 = vld [vmem:[#allocation3 + $0x790] sm:$0xff] }
  0x94   :  { %7682 = vmatpush3.bf16.msra.mxu0 %v7681_v41  ;;  %2113 = vmatmul.mubr.f32.gmra.mrb[6].mxu1 %v192_v42  ;;  %v7733_v41 = vpack.c.bf16 %v455_v35, %v454_v33  ;;  %v7703_v42 = vpack.c.bf16 %v441_v37, %v440_v36  ;;  %v508_v7 = vld [vmem:[#allocation3 + $0x710] sm:$0xff]  ;;  %v509_v9 = vld [vmem:[#allocation3 + $0x718] sm:$0xff]  ;;  %v495_v11 = vld [vmem:[#allocation3 + $0x6a8] sm:$0xff]  ;;  %v7775_v13 = vpack.c.bf16 %v525_v3, %v524_v2 }
  0x95   :  { %7714 = vmatpush3.bf16.msra.mxu1 %v7713_v43  ;;  %7684 = vmatprep.subr.bf16.mxu0 %v7683_v44  ;;  %v424_v43 = vld [vmem:[#allocation3 + $0x470] sm:$0xff]  ;;  %v425_v44 = vld [vmem:[#allocation3 + $0x478] sm:$0xff]  ;;  %v526_v14 = vld [vmem:[#allocation3 + $0x7a0] sm:$0xff]  ;;  %v7777_v19 = vpack.c.bf16 %v509_v9, %v508_v7 }
  0x96   :  { %7716 = vmatprep.subr.bf16.mxu1 %v7715_v48  ;;  %2182 = vmatprep.mubr.f32.mxu0 %v99_v54  ;;  %v490_v48 = vld [vmem:[#allocation3 + $0x680] sm:$0xff]  ;;  %v7705_v52 = vpack.c.bf16 %v425_v44, %v424_v43  ;;  %v197_v12 = vld [vmem:[%s10082_s0 + $0x358] sm:$0xff]  ;;  %v527_v15 = vld [vmem:[#allocation3 + $0x7a8] sm:$0xff] }
  0x97   :  { %2257 = vmatprep.mubr.f32.mxu1 %v101_v56  ;;  %v7739_v54 = vpack.c.bf16 %v491_v49, %v490_v48  ;;  %v475_v56 = vld [vmem:[#allocation3 + $0x608] sm:$0xff]  ;;  %v478_v21 = vld [vmem:[#allocation3 + $0x620] sm:$0xff]  ;;  %v7779_v24 = vpack.c.bf16 %v527_v15, %v526_v14  ;;  %v496_v26 = vld [vmem:[#allocation3 + $0x6b0] sm:$0xff] }
  0x98   :  { %7686 = vmatpush3.bf16.msra.mxu0 %v7685_v55  ;;  %v474_v55 = vld [vmem:[#allocation3 + $0x600] sm:$0xff]  ;;  %v511_v25 = vld [vmem:[#allocation3 + $0x728] sm:$0xff]  ;;  %v497_v27 = vld [vmem:[#allocation3 + $0x6b8] sm:$0xff] }
  0x99   :  { %7718 = vmatpush3.bf16.msra.mxu1 %v7717_v57  ;;  %7688 = vmatprep.subr.bf16.mxu0 %v7687_v58  ;;  %v98_v57 = vld [vmem:[%s10082_s0 + $0x40] sm:$0xff]  ;;  %v7771_v58 = vpack.c.bf16 %v523_v51, %v522_v50  ;;  %v7741_v0 = vpack.c.bf16 %v475_v56, %v474_v55  ;;  %v105_v32 = vld [vmem:[%s10082_s0 + $0x78] sm:$0xff]  ;;  %v480_v35 = vld [vmem:[#allocation3 + $0x630] sm:$0xff] }
  0x9a   :  { %7720 = vmatprep.subr.bf16.mxu1 %v7719_v62  ;;  %v492_v62 = vld [vmem:[#allocation3 + $0x690] sm:$0xff]  ;;  %v510_v23 = vld [vmem:[#allocation3 + $0x720] sm:$0xff]  ;;  %v481_v36 = vld [vmem:[#allocation3 + $0x638] sm:$0xff] }
  0x9b   :  { %v7743_v8 = vpack.c.bf16 %v493_v63, %v492_v62  ;;  %v7781_v33 = vpack.c.bf16 %v511_v25, %v510_v23  ;;  %v512_v37 = vld [vmem:[#allocation3 + $0x730] sm:$0xff]  ;;  %v513_v39 = vld [vmem:[#allocation3 + $0x738] sm:$0xff]  ;;  %v531_v43 = vld [vmem:[#allocation3 + $0x7c8] sm:$0xff]  ;;  %v7753_v44 = vpack.c.bf16 %v481_v36, %v480_v35 }
  0x9c   :  { %7690 = vmatpush3.bf16.msra.mxu0 %v7689_v4  ;;  %v7773_v4 = vpack.c.bf16 %v507_v60, %v506_v59  ;;  %v7785_v45 = vpack.c.bf16 %v513_v39, %v512_v37  ;;  %v482_v47 = vld [vmem:[#allocation3 + $0x640] sm:$0xff]  ;;  %v483_v48 = vld [vmem:[#allocation3 + $0x648] sm:$0xff]  ;;  %v533_v55 = vld [vmem:[#allocation3 + $0x7d8] sm:$0xff] }
  0x9d   :  { %7722 = vmatpush3.bf16.msra.mxu1 %v7721_v5  ;;  %7692 = vmatprep.subr.bf16.mxu0 %v7691_v6  ;;  %v476_v5 = vld [vmem:[#allocation3 + $0x610] sm:$0xff]  ;;  %v477_v6 = vld [vmem:[#allocation3 + $0x618] sm:$0xff]  ;;  %v514_v49 = vld [vmem:[#allocation3 + $0x740] sm:$0xff]  ;;  %v7757_v56 = vpack.c.bf16 %v483_v48, %v482_v47 }
  0x9e   :  { %7724 = vmatprep.subr.bf16.mxu1 %v7723_v10  ;;  %v494_v10 = vld [vmem:[#allocation3 + $0x6a0] sm:$0xff]  ;;  %v515_v51 = vld [vmem:[#allocation3 + $0x748] sm:$0xff]  ;;  %v484_v59 = vld [vmem:[#allocation3 + $0x650] sm:$0xff] }
  0x9f   :  { %v7747_v20 = vpack.c.bf16 %v495_v11, %v494_v10  ;;  %v485_v60 = vld [vmem:[#allocation3 + $0x658] sm:$0xff]  ;;  %v534_v2 = vld [vmem:[#allocation3 + $0x7e0] sm:$0xff]  ;;  %v535_v3 = vld [vmem:[#allocation3 + $0x7e8] sm:$0xff] }
  0xa0   :  { %7694 = vmatpush3.bf16.msra.mxu0 %v7693_v16  ;;  %v194_v16 = vld [vmem:[%s10082_s0 + $0x340] sm:$0xff]  ;;  %v517_v63 = vld [vmem:[#allocation3 + $0x758] sm:$0xff]  ;;  %v7795_v10 = vpack.c.bf16 %v535_v3, %v534_v2  ;;  %v519_v11 = vld [vmem:[#allocation3 + $0x768] sm:$0xff] }
  0xa1   :  { %7726 = vmatpush3.bf16.msra.mxu1 %v7725_v17  ;;  %7696 = vmatprep.subr.bf16.mxu0 %v7695_v18  ;;  %v7745_v17 = vpack.c.bf16 %v477_v6, %v476_v5  ;;  %v196_v18 = vld [vmem:[%s10082_s0 + $0x350] sm:$0xff]  ;;  %v486_v7 = vld [vmem:[#allocation3 + $0x660] sm:$0xff]  ;;  %v537_v15 = vld [vmem:[#allocation3 + $0x7f8] sm:$0xff] }
  0xa2   :  { %7728 = vmatprep.subr.bf16.mxu1 %v7727_v22  ;;  %v479_v22 = vld [vmem:[#allocation3 + $0x628] sm:$0xff]  ;;  %v518_v9 = vld [vmem:[#allocation3 + $0x760] sm:$0xff]  ;;  %v536_v14 = vld [vmem:[#allocation3 + $0x7f0] sm:$0xff] }
  0xa3   :  { %v7749_v31 = vpack.c.bf16 %v479_v22, %v478_v21  ;;  %v520_v21 = vld [vmem:[#allocation3 + $0x770] sm:$0xff]  ;;  %v7799_v22 = vpack.c.bf16 %v537_v15, %v536_v14  ;;  %v521_v23 = vld [vmem:[#allocation3 + $0x778] sm:$0xff]  ;;  %v555_v25 = vld [vmem:[#allocation3 + $0x888] sm:$0xff] }
  0xa4   :  { %7698 = vmatpush3.bf16.msra.mxu0 %v7697_v28  ;;  %v528_v28 = vld [vmem:[#allocation3 + $0x7b0] sm:$0xff]  ;;  %v570_v35 = vld [vmem:[#allocation3 + $0x900] sm:$0xff]  ;;  %v571_v36 = vld [vmem:[#allocation3 + $0x908] sm:$0xff] }
  0xa5   :  { %7730 = vmatpush3.bf16.msra.mxu1 %v7729_v29  ;;  %7700 = vmatprep.subr.bf16.mxu0 %v7699_v30  ;;  %v529_v29 = vld [vmem:[#allocation3 + $0x7b8] sm:$0xff]  ;;  %v103_v30 = vld [vmem:[%s10082_s0 + $0x68] sm:$0xff]  ;;  %v104_v37 = vld [vmem:[%s10082_s0 + $0x70] sm:$0xff] }
  0xa6   :  { %7732 = vmatprep.subr.bf16.mxu1 %v7731_v34  ;;  %v7751_v34 = vpack.c.bf16 %v497_v27, %v496_v26  ;;  %v7783_v38 = vpack.c.bf16 %v529_v29, %v528_v28  ;;  %v586_v26 = vld [vmem:[#allocation3 + $0x980] sm:$0xff]  ;;  %v587_v27 = vld [vmem:[#allocation3 + $0x988] sm:$0xff]  ;;  %v7801_v29 = vpack.c.bf16 %v521_v23, %v520_v21  ;;  %v557_v39 = vld [vmem:[#allocation3 + $0x898] sm:$0xff] }
  0xa7   :  { %v572_v47 = vld [vmem:[#allocation3 + $0x910] sm:$0xff]  ;;  %v561_v3 = vld [vmem:[#allocation3 + $0x8b8] sm:$0xff]  ;;  %v546_v23 = vld [vmem:[#allocation3 + $0x840] sm:$0xff] }
  0xa8   :  { %7702 = vmatpush3.bf16.msra.mxu0 %v7701_v40  ;;  %v498_v40 = vld [vmem:[#allocation3 + $0x6c0] sm:$0xff]  ;;  %v560_v2 = vld [vmem:[#allocation3 + $0x8b0] sm:$0xff]  ;;  %v577_v15 = vld [vmem:[#allocation3 + $0x938] sm:$0xff] }
  0xa9   :  { %7734 = vmatpush3.bf16.msra.mxu1 %v7733_v41  ;;  %7704 = vmatprep.subr.bf16.mxu0 %v7703_v42  ;;  %v499_v41 = vld [vmem:[#allocation3 + $0x6c8] sm:$0xff]  ;;  %v530_v42 = vld [vmem:[#allocation3 + $0x7c0] sm:$0xff] }
  0xaa   :  { %7736 = vmatprep.subr.bf16.mxu1 %v7735_v46  ;;  %v7755_v46 = vpack.c.bf16 %v499_v41, %v498_v40  ;;  %v7787_v50 = vpack.c.bf16 %v531_v43, %v530_v42  ;;  %v199_v41 = vld [vmem:[%s10082_s0 + $0x368] sm:$0xff]  ;;  %v588_v42 = vld [vmem:[#allocation3 + $0x990] sm:$0xff]  ;;  %v589_v43 = vld [vmem:[#allocation3 + $0x998] sm:$0xff] }
  0xac   :  { %7706 = vmatpush3.bf16.msra.mxu0 %v7705_v52  ;;  %v500_v52 = vld [vmem:[#allocation3 + $0x6d0] sm:$0xff] }
  0xad   :  { %7738 = vmatpush3.bf16.msra.mxu1 %v7737_v53  ;;  %7740 = vmatprep.subr.bf16.mxu0 %v7739_v54  ;;  %v501_v53 = vld [vmem:[#allocation3 + $0x6d8] sm:$0xff]  ;;  %v532_v54 = vld [vmem:[#allocation3 + $0x7d0] sm:$0xff] }
  0xae   :  { %7772 = vmatprep.subr.bf16.mxu1 %v7771_v58  ;;  %v7759_v58 = vpack.c.bf16 %v501_v53, %v500_v52  ;;  %v7791_v62 = vpack.c.bf16 %v533_v55, %v532_v54  ;;  %v201_v52 = vld [vmem:[%s10082_s0 + $0x378] sm:$0xff]  ;;  %v7839_v53 = vpack.c.bf16 %v589_v43, %v588_v42  ;;  %v590_v54 = vld [vmem:[#allocation3 + $0x9a0] sm:$0xff]  ;;  %v591_v55 = vld [vmem:[#allocation3 + $0x9a8] sm:$0xff] }
  0xaf   :  { %2183 = vmatmul.mubr.f32.vlgmr.msra.gmra.mrb[8].mxu0 %v98_v57  ;;  %v7789_v57 = vpack.c.bf16 %v515_v51, %v514_v49  ;;  %v573_v49 = vld [vmem:[#allocation3 + $0x918] sm:$0xff]  ;;  %v559_v51 = vld [vmem:[#allocation3 + $0x8a8] sm:$0xff]  ;;  %v598_v42 = vld [vmem:[#allocation3 + $0x9e0] sm:$0xff] }
  0xb0   :  { %7742 = vmatpush3.bf16.msra.mxu0 %v7741_v0  ;;  %2258 = vmatmul.mubr.f32.vlgmr.msra.gmra.mrb[8].mxu1 %v100_v61  ;;  %v516_v61 = vld [vmem:[#allocation3 + $0x750] sm:$0xff]  ;;  %v502_v0 = vld [vmem:[#allocation3 + $0x6e0] sm:$0xff]  ;;  %v599_v43 = vld [vmem:[#allocation3 + $0x9e8] sm:$0xff] }
  0xb1   :  { %7774 = vmatpush3.bf16.msra.mxu1 %v7773_v4  ;;  %2187 = vmatprep.mubr.f32.mxu0 %v195_v1  ;;  %v503_v1 = vld [vmem:[#allocation3 + $0x6e8] sm:$0xff]  ;;  %v7761_v4 = vpack.c.bf16 %v485_v60, %v484_v59  ;;  %v7793_v5 = vpack.c.bf16 %v517_v63, %v516_v61  ;;  %v7841_v59 = vpack.c.bf16 %v573_v49, %v572_v47  ;;  %v542_v61 = vld [vmem:[#allocation3 + $0x820] sm:$0xff] }
  0xb2   :  { %7744 = vmatprep.subr.bf16.mxu0 %v7743_v8  ;;  %2262 = vmatprep.mubr.f32.mxu1 %v197_v12  ;;  %v7763_v6 = vpack.c.bf16 %v503_v1, %v502_v0  ;;  %v487_v8 = vld [vmem:[#allocation3 + $0x668] sm:$0xff]  ;;  %v504_v12 = vld [vmem:[#allocation3 + $0x6f0] sm:$0xff]  ;;  %v574_v63 = vld [vmem:[#allocation3 + $0x920] sm:$0xff]  ;;  %v7843_v0 = vpack.c.bf16 %v591_v55, %v590_v54 }
  0xb3   :  { %2188 = vmatmul.mubr.f32.gmra.mrb[10].mxu0 %v194_v16  ;;  %7776 = vmatprep.subr.bf16.mxu1 %v7775_v13  ;;  %v505_v13 = vld [vmem:[#allocation3 + $0x6f8] sm:$0xff]  ;;  %v7765_v16 = vpack.c.bf16 %v487_v8, %v486_v7  ;;  %v575_v1 = vld [vmem:[#allocation3 + $0x928] sm:$0xff]  ;;  %v550_v47 = vld [vmem:[#allocation3 + $0x860] sm:$0xff] }
  0xb4   :  { %7746 = vmatpush3.bf16.msra.mxu0 %v7745_v17  ;;  %2263 = vmatmul.mubr.f32.gmra.mrb[10].mxu1 %v196_v18  ;;  %v7797_v17 = vpack.c.bf16 %v519_v11, %v518_v9  ;;  %v7767_v18 = vpack.c.bf16 %v505_v13, %v504_v12  ;;  %v109_v8 = vld [vmem:[%s10082_s0 + $0x98] sm:$0xff]  ;;  %v7845_v9 = vpack.c.bf16 %v575_v1, %v574_v63  ;;  %v544_v11 = vld [vmem:[#allocation3 + $0x830] sm:$0xff]  ;;  %v582_v49 = vld [vmem:[#allocation3 + $0x960] sm:$0xff] }
  0xb5   :  { %7778 = vmatpush3.bf16.msra.mxu1 %v7777_v19  ;;  %7748 = vmatprep.subr.bf16.mxu0 %v7747_v20  ;;  %v488_v19 = vld [vmem:[#allocation3 + $0x670] sm:$0xff]  ;;  %v489_v20 = vld [vmem:[#allocation3 + $0x678] sm:$0xff]  ;;  %v619_v1 = vld [vmem:[#allocation3 + $0xa88] sm:$0xff] }
  0xb6   :  { %7780 = vmatprep.subr.bf16.mxu1 %v7779_v24  ;;  %2332 = vmatprep.mubr.f32.mxu0 %v103_v30  ;;  %v554_v24 = vld [vmem:[#allocation3 + $0x880] sm:$0xff]  ;;  %v7769_v28 = vpack.c.bf16 %v489_v20, %v488_v19  ;;  %v545_v12 = vld [vmem:[#allocation3 + $0x838] sm:$0xff]  ;;  %v576_v13 = vld [vmem:[#allocation3 + $0x930] sm:$0xff] }
  0xb7   :  { %2407 = vmatprep.mubr.f32.mxu1 %v105_v32  ;;  %v7803_v30 = vpack.c.bf16 %v555_v25, %v554_v24  ;;  %v539_v32 = vld [vmem:[#allocation3 + $0x808] sm:$0xff]  ;;  %v7817_v20 = vpack.c.bf16 %v545_v12, %v544_v11  ;;  %v7849_v21 = vpack.c.bf16 %v577_v15, %v576_v13  ;;  %v578_v25 = vld [vmem:[#allocation3 + $0x940] sm:$0xff]  ;;  %v600_v54 = vld [vmem:[#allocation3 + $0x9f0] sm:$0xff] }
  0xb8   :  { %7750 = vmatpush3.bf16.msra.mxu0 %v7749_v31  ;;  %v538_v31 = vld [vmem:[#allocation3 + $0x800] sm:$0xff]  ;;  %v595_v19 = vld [vmem:[#allocation3 + $0x9c8] sm:$0xff]  ;;  %v601_v55 = vld [vmem:[#allocation3 + $0x9f8] sm:$0xff] }
  0xb9   :  { %7782 = vmatpush3.bf16.msra.mxu1 %v7781_v33  ;;  %7752 = vmatprep.subr.bf16.mxu0 %v7751_v34  ;;  %v102_v33 = vld [vmem:[%s10082_s0 + $0x60] sm:$0xff]  ;;  %v7835_v34 = vpack.c.bf16 %v587_v27, %v586_v26  ;;  %v7805_v40 = vpack.c.bf16 %v539_v32, %v538_v31  ;;  %v547_v24 = vld [vmem:[#allocation3 + $0x848] sm:$0xff]  ;;  %v597_v31 = vld [vmem:[#allocation3 + $0x9d8] sm:$0xff] }
  0xba   :  { %7784 = vmatprep.subr.bf16.mxu1 %v7783_v38  ;;  %v556_v38 = vld [vmem:[#allocation3 + $0x890] sm:$0xff]  ;;  %v579_v27 = vld [vmem:[#allocation3 + $0x948] sm:$0xff]  ;;  %v7821_v32 = vpack.c.bf16 %v547_v24, %v546_v23  ;;  %v585_v63 = vld [vmem:[#allocation3 + $0x978] sm:$0xff] }
  0xbb   :  { %v7807_v48 = vpack.c.bf16 %v557_v39, %v556_v38  ;;  %v581_v39 = vld [vmem:[#allocation3 + $0x958] sm:$0xff]  ;;  %v634_v11 = vld [vmem:[#allocation3 + $0xb00] sm:$0xff]  ;;  %v635_v12 = vld [vmem:[#allocation3 + $0xb08] sm:$0xff] }
  0xbc   :  { %7754 = vmatpush3.bf16.msra.mxu0 %v7753_v44  ;;  %v7837_v44 = vpack.c.bf16 %v571_v36, %v570_v35  ;;  %v548_v35 = vld [vmem:[#allocation3 + $0x850] sm:$0xff]  ;;  %v549_v36 = vld [vmem:[#allocation3 + $0x858] sm:$0xff] }
  0xbd   :  { %7786 = vmatpush3.bf16.msra.mxu1 %v7785_v45  ;;  %7756 = vmatprep.subr.bf16.mxu0 %v7755_v46  ;;  %v540_v45 = vld [vmem:[#allocation3 + $0x810] sm:$0xff]  ;;  %v541_v46 = vld [vmem:[#allocation3 + $0x818] sm:$0xff] }
  0xbe   :  { %7788 = vmatprep.subr.bf16.mxu1 %v7787_v50  ;;  %v558_v50 = vld [vmem:[#allocation3 + $0x8a0] sm:$0xff]  ;;  %v108_v13 = vld [vmem:[%s10082_s0 + $0x90] sm:$0xff]  ;;  %v621_v15 = vld [vmem:[#allocation3 + $0xa98] sm:$0xff] }
  0xbf   :  { %v7811_v60 = vpack.c.bf16 %v559_v51, %v558_v50  ;;  %v7859_v50 = vpack.c.bf16 %v599_v43, %v598_v42  ;;  %v583_v51 = vld [vmem:[#allocation3 + $0x968] sm:$0xff]  ;;  %v636_v23 = vld [vmem:[#allocation3 + $0xb10] sm:$0xff]  ;;  %v625_v43 = vld [vmem:[#allocation3 + $0xab8] sm:$0xff] }
  0xc0   :  { %7758 = vmatpush3.bf16.msra.mxu0 %v7757_v56  ;;  %v198_v56 = vld [vmem:[%s10082_s0 + $0x360] sm:$0xff]  ;;  %v624_v42 = vld [vmem:[#allocation3 + $0xab0] sm:$0xff] }
  0xc1   :  { %7790 = vmatpush3.bf16.msra.mxu1 %v7789_v57  ;;  %7760 = vmatprep.subr.bf16.mxu0 %v7759_v58  ;;  %v7809_v57 = vpack.c.bf16 %v541_v46, %v540_v45  ;;  %v200_v58 = vld [vmem:[%s10082_s0 + $0x370] sm:$0xff] }
  0xc2   :  { %7792 = vmatprep.subr.bf16.mxu1 %v7791_v62  ;;  %v543_v62 = vld [vmem:[#allocation3 + $0x828] sm:$0xff] }
  0xc3   :  { %v7813_v7 = vpack.c.bf16 %v543_v62, %v542_v61  ;;  %v584_v61 = vld [vmem:[#allocation3 + $0x970] sm:$0xff]  ;;  %v7863_v62 = vpack.c.bf16 %v601_v55, %v600_v54  ;;  %v641_v55 = vld [vmem:[#allocation3 + $0xb38] sm:$0xff] }
  0xc4   :  { %7762 = vmatpush3.bf16.msra.mxu0 %v7761_v4  ;;  %v592_v4 = vld [vmem:[#allocation3 + $0x9b0] sm:$0xff] }
  0xc5   :  { %7794 = vmatpush3.bf16.msra.mxu1 %v7793_v5  ;;  %7764 = vmatprep.subr.bf16.mxu0 %v7763_v6  ;;  %v593_v5 = vld [vmem:[#allocation3 + $0x9b8] sm:$0xff]  ;;  %v107_v6 = vld [vmem:[%s10082_s0 + $0x88] sm:$0xff] }
  0xc6   :  { %7796 = vmatprep.subr.bf16.mxu1 %v7795_v10  ;;  %v7815_v10 = vpack.c.bf16 %v561_v3, %v560_v2  ;;  %v7847_v14 = vpack.c.bf16 %v593_v5, %v592_v4  ;;  %v650_v2 = vld [vmem:[#allocation3 + $0xb80] sm:$0xff]  ;;  %v651_v3 = vld [vmem:[#allocation3 + $0xb88] sm:$0xff]  ;;  %v7865_v5 = vpack.c.bf16 %v585_v63, %v584_v61 }
  0xc7   :  { %v610_v63 = vld [vmem:[#allocation3 + $0xa40] sm:$0xff] }
  0xc8   :  { %7766 = vmatpush3.bf16.msra.mxu0 %v7765_v16  ;;  %v562_v16 = vld [vmem:[#allocation3 + $0x8c0] sm:$0xff] }
  0xc9   :  { %7798 = vmatpush3.bf16.msra.mxu1 %v7797_v17  ;;  %7768 = vmatprep.subr.bf16.mxu0 %v7767_v18  ;;  %v563_v17 = vld [vmem:[#allocation3 + $0x8c8] sm:$0xff]  ;;  %v594_v18 = vld [vmem:[#allocation3 + $0x9c0] sm:$0xff] }
  0xca   :  { %7800 = vmatprep.subr.bf16.mxu1 %v7799_v22  ;;  %v7819_v22 = vpack.c.bf16 %v563_v17, %v562_v16  ;;  %v7851_v26 = vpack.c.bf16 %v595_v19, %v594_v18  ;;  %v203_v17 = vld [vmem:[%s10082_s0 + $0x388] sm:$0xff]  ;;  %v652_v18 = vld [vmem:[#allocation3 + $0xb90] sm:$0xff]  ;;  %v653_v19 = vld [vmem:[#allocation3 + $0xb98] sm:$0xff] }
  0xcc   :  { %7770 = vmatpush3.bf16.msra.mxu0 %v7769_v28  ;;  %v564_v28 = vld [vmem:[#allocation3 + $0x8d0] sm:$0xff] }
  0xcd   :  { %7802 = vmatpush3.bf16.msra.mxu1 %v7801_v29  ;;  %7804 = vmatprep.subr.bf16.mxu0 %v7803_v30  ;;  %v565_v29 = vld [vmem:[#allocation3 + $0x8d8] sm:$0xff]  ;;  %v596_v30 = vld [vmem:[#allocation3 + $0x9d0] sm:$0xff] }
  0xce   :  { %7836 = vmatprep.subr.bf16.mxu1 %v7835_v34  ;;  %v7823_v34 = vpack.c.bf16 %v565_v29, %v564_v28  ;;  %v7855_v38 = vpack.c.bf16 %v597_v31, %v596_v30  ;;  %v205_v28 = vld [vmem:[%s10082_s0 + $0x398] sm:$0xff]  ;;  %v7903_v29 = vpack.c.bf16 %v653_v19, %v652_v18  ;;  %v654_v30 = vld [vmem:[#allocation3 + $0xba0] sm:$0xff]  ;;  %v655_v31 = vld [vmem:[#allocation3 + $0xba8] sm:$0xff] }
  0xcf   :  { %2333 = vmatmul.mubr.f32.vlgmr.msra.gmra.mrb[12].mxu0 %v102_v33  ;;  %v7853_v33 = vpack.c.bf16 %v579_v27, %v578_v25  ;;  %v637_v25 = vld [vmem:[#allocation3 + $0xb18] sm:$0xff]  ;;  %v623_v27 = vld [vmem:[#allocation3 + $0xaa8] sm:$0xff]  ;;  %v662_v18 = vld [vmem:[#allocation3 + $0xbe0] sm:$0xff] }
  0xd0   :  { %7806 = vmatpush3.bf16.msra.mxu0 %v7805_v40  ;;  %2408 = vmatmul.mubr.f32.vlgmr.msra.gmra.mrb[12].mxu1 %v104_v37  ;;  %v580_v37 = vld [vmem:[#allocation3 + $0x950] sm:$0xff]  ;;  %v566_v40 = vld [vmem:[#allocation3 + $0x8e0] sm:$0xff]  ;;  %v663_v19 = vld [vmem:[#allocation3 + $0xbe8] sm:$0xff] }
  0xd1   :  { %7838 = vmatpush3.bf16.msra.mxu1 %v7837_v44  ;;  %2337 = vmatprep.mubr.f32.mxu0 %v199_v41  ;;  %v567_v41 = vld [vmem:[#allocation3 + $0x8e8] sm:$0xff]  ;;  %v7825_v44 = vpack.c.bf16 %v549_v36, %v548_v35  ;;  %v7857_v45 = vpack.c.bf16 %v581_v39, %v580_v37  ;;  %v7905_v35 = vpack.c.bf16 %v637_v25, %v636_v23  ;;  %v606_v37 = vld [vmem:[#allocation3 + $0xa20] sm:$0xff] }
  0xd2   :  { %7808 = vmatprep.subr.bf16.mxu0 %v7807_v48  ;;  %2412 = vmatprep.mubr.f32.mxu1 %v201_v52  ;;  %v7827_v46 = vpack.c.bf16 %v567_v41, %v566_v40  ;;  %v551_v48 = vld [vmem:[#allocation3 + $0x868] sm:$0xff]  ;;  %v568_v52 = vld [vmem:[#allocation3 + $0x8f0] sm:$0xff]  ;;  %v638_v39 = vld [vmem:[#allocation3 + $0xb20] sm:$0xff]  ;;  %v7907_v40 = vpack.c.bf16 %v655_v31, %v654_v30 }
  0xd3   :  { %2338 = vmatmul.mubr.f32.gmra.mrb[14].mxu0 %v198_v56  ;;  %7840 = vmatprep.subr.bf16.mxu1 %v7839_v53  ;;  %v569_v53 = vld [vmem:[#allocation3 + $0x8f8] sm:$0xff]  ;;  %v7829_v56 = vpack.c.bf16 %v551_v48, %v550_v47  ;;  %v639_v41 = vld [vmem:[#allocation3 + $0xb28] sm:$0xff]  ;;  %v614_v23 = vld [vmem:[#allocation3 + $0xa60] sm:$0xff] }
  0xd4   :  { %7810 = vmatpush3.bf16.msra.mxu0 %v7809_v57  ;;  %2413 = vmatmul.mubr.f32.gmra.mrb[14].mxu1 %v200_v58  ;;  %v7861_v57 = vpack.c.bf16 %v583_v51, %v582_v49  ;;  %v7831_v58 = vpack.c.bf16 %v569_v53, %v568_v52  ;;  %v113_v48 = vld [vmem:[%s10082_s0 + $0xb8] sm:$0xff]  ;;  %v7909_v49 = vpack.c.bf16 %v639_v41, %v638_v39  ;;  %v608_v51 = vld [vmem:[#allocation3 + $0xa30] sm:$0xff]  ;;  %v646_v25 = vld [vmem:[#allocation3 + $0xb60] sm:$0xff] }
  0xd5   :  { %7842 = vmatpush3.bf16.msra.mxu1 %v7841_v59  ;;  %7812 = vmatprep.subr.bf16.mxu0 %v7811_v60  ;;  %v552_v59 = vld [vmem:[#allocation3 + $0x870] sm:$0xff]  ;;  %v553_v60 = vld [vmem:[#allocation3 + $0x878] sm:$0xff]  ;;  %v683_v41 = vld [vmem:[#allocation3 + $0xc88] sm:$0xff] }
  0xd6   :  { %7844 = vmatprep.subr.bf16.mxu1 %v7843_v0  ;;  %2482 = vmatprep.mubr.f32.mxu0 %v107_v6  ;;  %v618_v0 = vld [vmem:[#allocation3 + $0xa80] sm:$0xff]  ;;  %v7833_v4 = vpack.c.bf16 %v553_v60, %v552_v59  ;;  %v609_v52 = vld [vmem:[#allocation3 + $0xa38] sm:$0xff]  ;;  %v640_v53 = vld [vmem:[#allocation3 + $0xb30] sm:$0xff] }
  0xd7   :  { %2557 = vmatprep.mubr.f32.mxu1 %v109_v8  ;;  %v7867_v6 = vpack.c.bf16 %v619_v1, %v618_v0  ;;  %v603_v8 = vld [vmem:[#allocation3 + $0xa08] sm:$0xff]  ;;  %v7881_v60 = vpack.c.bf16 %v609_v52, %v608_v51  ;;  %v7913_v61 = vpack.c.bf16 %v641_v55, %v640_v53  ;;  %v642_v1 = vld [vmem:[#allocation3 + $0xb40] sm:$0xff]  ;;  %v664_v30 = vld [vmem:[#allocation3 + $0xbf0] sm:$0xff] }
  0xd8   :  { %7814 = vmatpush3.bf16.msra.mxu0 %v7813_v7  ;;  %v602_v7 = vld [vmem:[#allocation3 + $0xa00] sm:$0xff]  ;;  %v659_v59 = vld [vmem:[#allocation3 + $0xbc8] sm:$0xff]  ;;  %v665_v31 = vld [vmem:[#allocation3 + $0xbf8] sm:$0xff] }
  0xd9   :  { %7846 = vmatpush3.bf16.msra.mxu1 %v7845_v9  ;;  %7816 = vmatprep.subr.bf16.mxu0 %v7815_v10  ;;  %v106_v9 = vld [vmem:[%s10082_s0 + $0x80] sm:$0xff]  ;;  %v7899_v10 = vpack.c.bf16 %v651_v3, %v650_v2  ;;  %v7869_v16 = vpack.c.bf16 %v603_v8, %v602_v7  ;;  %v611_v0 = vld [vmem:[#allocation3 + $0xa48] sm:$0xff]  ;;  %v661_v7 = vld [vmem:[#allocation3 + $0xbd8] sm:$0xff] }
  0xda   :  { %7848 = vmatprep.subr.bf16.mxu1 %v7847_v14  ;;  %v620_v14 = vld [vmem:[#allocation3 + $0xa90] sm:$0xff]  ;;  %v643_v3 = vld [vmem:[#allocation3 + $0xb48] sm:$0xff]  ;;  %v7885_v8 = vpack.c.bf16 %v611_v0, %v610_v63  ;;  %v649_v39 = vld [vmem:[#allocation3 + $0xb78] sm:$0xff] }
  0xdb   :  { %v7871_v24 = vpack.c.bf16 %v621_v15, %v620_v14  ;;  %v645_v15 = vld [vmem:[#allocation3 + $0xb58] sm:$0xff]  ;;  %v698_v51 = vld [vmem:[#allocation3 + $0xd00] sm:$0xff]  ;;  %v699_v52 = vld [vmem:[#allocation3 + $0xd08] sm:$0xff] }
  0xdc   :  { %7818 = vmatpush3.bf16.msra.mxu0 %v7817_v20  ;;  %v7901_v20 = vpack.c.bf16 %v635_v12, %v634_v11  ;;  %v612_v11 = vld [vmem:[#allocation3 + $0xa50] sm:$0xff]  ;;  %v613_v12 = vld [vmem:[#allocation3 + $0xa58] sm:$0xff] }
  0xdd   :  { %7850 = vmatpush3.bf16.msra.mxu1 %v7849_v21  ;;  %7820 = vmatprep.subr.bf16.mxu0 %v7819_v22  ;;  %v604_v21 = vld [vmem:[#allocation3 + $0xa10] sm:$0xff]  ;;  %v605_v22 = vld [vmem:[#allocation3 + $0xa18] sm:$0xff] }
  0xde   :  { %7852 = vmatprep.subr.bf16.mxu1 %v7851_v26  ;;  %v622_v26 = vld [vmem:[#allocation3 + $0xaa0] sm:$0xff]  ;;  %v112_v53 = vld [vmem:[%s10082_s0 + $0xb0] sm:$0xff]  ;;  %v685_v55 = vld [vmem:[#allocation3 + $0xc98] sm:$0xff] }
  0xdf   :  { %v7875_v36 = vpack.c.bf16 %v623_v27, %v622_v26  ;;  %v7923_v26 = vpack.c.bf16 %v663_v19, %v662_v18  ;;  %v647_v27 = vld [vmem:[#allocation3 + $0xb68] sm:$0xff]  ;;  %v700_v63 = vld [vmem:[#allocation3 + $0xd10] sm:$0xff]  ;;  %v689_v19 = vld [vmem:[#allocation3 + $0xcb8] sm:$0xff] }
  0xe0   :  { %7822 = vmatpush3.bf16.msra.mxu0 %v7821_v32  ;;  %v202_v32 = vld [vmem:[%s10082_s0 + $0x380] sm:$0xff]  ;;  %v688_v18 = vld [vmem:[#allocation3 + $0xcb0] sm:$0xff] }
  0xe1   :  { %7854 = vmatpush3.bf16.msra.mxu1 %v7853_v33  ;;  %7824 = vmatprep.subr.bf16.mxu0 %v7823_v34  ;;  %v7873_v33 = vpack.c.bf16 %v605_v22, %v604_v21  ;;  %v204_v34 = vld [vmem:[%s10082_s0 + $0x390] sm:$0xff] }
  0xe2   :  { %7856 = vmatprep.subr.bf16.mxu1 %v7855_v38  ;;  %v607_v38 = vld [vmem:[#allocation3 + $0xa28] sm:$0xff] }
  0xe3   :  { %v7877_v47 = vpack.c.bf16 %v607_v38, %v606_v37  ;;  %v648_v37 = vld [vmem:[#allocation3 + $0xb70] sm:$0xff]  ;;  %v7927_v38 = vpack.c.bf16 %v665_v31, %v664_v30  ;;  %v705_v31 = vld [vmem:[#allocation3 + $0xd38] sm:$0xff] }
  0xe4   :  { %7826 = vmatpush3.bf16.msra.mxu0 %v7825_v44  ;;  %v656_v44 = vld [vmem:[#allocation3 + $0xbb0] sm:$0xff] }
  0xe5   :  { %7858 = vmatpush3.bf16.msra.mxu1 %v7857_v45  ;;  %7828 = vmatprep.subr.bf16.mxu0 %v7827_v46  ;;  %v657_v45 = vld [vmem:[#allocation3 + $0xbb8] sm:$0xff]  ;;  %v111_v46 = vld [vmem:[%s10082_s0 + $0xa8] sm:$0xff] }
  0xe6   :  { %7860 = vmatprep.subr.bf16.mxu1 %v7859_v50  ;;  %v7879_v50 = vpack.c.bf16 %v625_v43, %v624_v42  ;;  %v7911_v54 = vpack.c.bf16 %v657_v45, %v656_v44  ;;  %v714_v42 = vld [vmem:[#allocation3 + $0xd80] sm:$0xff]  ;;  %v715_v43 = vld [vmem:[#allocation3 + $0xd88] sm:$0xff]  ;;  %v7929_v45 = vpack.c.bf16 %v649_v39, %v648_v37 }
  0xe7   :  { %v674_v39 = vld [vmem:[#allocation3 + $0xc40] sm:$0xff] }
  0xe8   :  { %7830 = vmatpush3.bf16.msra.mxu0 %v7829_v56  ;;  %v626_v56 = vld [vmem:[#allocation3 + $0xac0] sm:$0xff] }
  0xe9   :  { %7862 = vmatpush3.bf16.msra.mxu1 %v7861_v57  ;;  %7832 = vmatprep.subr.bf16.mxu0 %v7831_v58  ;;  %v627_v57 = vld [vmem:[#allocation3 + $0xac8] sm:$0xff]  ;;  %v658_v58 = vld [vmem:[#allocation3 + $0xbc0] sm:$0xff] }
  0xea   :  { %7864 = vmatprep.subr.bf16.mxu1 %v7863_v62  ;;  %v7883_v62 = vpack.c.bf16 %v627_v57, %v626_v56  ;;  %v7915_v2 = vpack.c.bf16 %v659_v59, %v658_v58  ;;  %v207_v57 = vld [vmem:[%s10082_s0 + $0x3a8] sm:$0xff]  ;;  %v716_v58 = vld [vmem:[#allocation3 + $0xd90] sm:$0xff]  ;;  %v717_v59 = vld [vmem:[#allocation3 + $0xd98] sm:$0xff] }
  0xec   :  { %7834 = vmatpush3.bf16.msra.mxu0 %v7833_v4  ;;  %v628_v4 = vld [vmem:[#allocation3 + $0xad0] sm:$0xff] }
  0xed   :  { %7866 = vmatpush3.bf16.msra.mxu1 %v7865_v5  ;;  %7868 = vmatprep.subr.bf16.mxu0 %v7867_v6  ;;  %v629_v5 = vld [vmem:[#allocation3 + $0xad8] sm:$0xff]  ;;  %v660_v6 = vld [vmem:[#allocation3 + $0xbd0] sm:$0xff] }
  0xee   :  { %7900 = vmatprep.subr.bf16.mxu1 %v7899_v10  ;;  %v7887_v10 = vpack.c.bf16 %v629_v5, %v628_v4  ;;  %v7919_v14 = vpack.c.bf16 %v661_v7, %v660_v6  ;;  %v209_v4 = vld [vmem:[%s10082_s0 + $0x3b8] sm:$0xff]  ;;  %v7967_v5 = vpack.c.bf16 %v717_v59, %v716_v58  ;;  %v718_v6 = vld [vmem:[#allocation3 + $0xda0] sm:$0xff]  ;;  %v719_v7 = vld [vmem:[#allocation3 + $0xda8] sm:$0xff] }
  0xef   :  { %2483 = vmatmul.mubr.f32.vlgmr.msra.gmra.mrb[16].mxu0 %v106_v9  ;;  %v7917_v9 = vpack.c.bf16 %v643_v3, %v642_v1  ;;  %v701_v1 = vld [vmem:[#allocation3 + $0xd18] sm:$0xff]  ;;  %v687_v3 = vld [vmem:[#allocation3 + $0xca8] sm:$0xff]  ;;  %v726_v58 = vld [vmem:[#allocation3 + $0xde0] sm:$0xff] }
  0xf0   :  { %7870 = vmatpush3.bf16.msra.mxu0 %v7869_v16  ;;  %2558 = vmatmul.mubr.f32.vlgmr.msra.gmra.mrb[16].mxu1 %v108_v13  ;;  %v644_v13 = vld [vmem:[#allocation3 + $0xb50] sm:$0xff]  ;;  %v630_v16 = vld [vmem:[#allocation3 + $0xae0] sm:$0xff]  ;;  %v727_v59 = vld [vmem:[#allocation3 + $0xde8] sm:$0xff] }
  0xf1   :  { %7902 = vmatpush3.bf16.msra.mxu1 %v7901_v20  ;;  %2487 = vmatprep.mubr.f32.mxu0 %v203_v17  ;;  %v631_v17 = vld [vmem:[#allocation3 + $0xae8] sm:$0xff]  ;;  %v7889_v20 = vpack.c.bf16 %v613_v12, %v612_v11  ;;  %v7921_v21 = vpack.c.bf16 %v645_v15, %v644_v13  ;;  %v7969_v11 = vpack.c.bf16 %v701_v1, %v700_v63  ;;  %v670_v13 = vld [vmem:[#allocation3 + $0xc20] sm:$0xff] }
  0xf2   :  { %7872 = vmatprep.subr.bf16.mxu0 %v7871_v24  ;;  %2562 = vmatprep.mubr.f32.mxu1 %v205_v28  ;;  %v7891_v22 = vpack.c.bf16 %v631_v17, %v630_v16  ;;  %v615_v24 = vld [vmem:[#allocation3 + $0xa68] sm:$0xff]  ;;  %v632_v28 = vld [vmem:[#allocation3 + $0xaf0] sm:$0xff]  ;;  %v702_v15 = vld [vmem:[#allocation3 + $0xd20] sm:$0xff]  ;;  %v7971_v16 = vpack.c.bf16 %v719_v7, %v718_v6 }
  0xf3   :  { %2488 = vmatmul.mubr.f32.gmra.mrb[18].mxu0 %v202_v32  ;;  %7904 = vmatprep.subr.bf16.mxu1 %v7903_v29  ;;  %v633_v29 = vld [vmem:[#allocation3 + $0xaf8] sm:$0xff]  ;;  %v7893_v32 = vpack.c.bf16 %v615_v24, %v614_v23  ;;  %v703_v17 = vld [vmem:[#allocation3 + $0xd28] sm:$0xff]  ;;  %v678_v63 = vld [vmem:[#allocation3 + $0xc60] sm:$0xff] }
  0xf4   :  { %7874 = vmatpush3.bf16.msra.mxu0 %v7873_v33  ;;  %2563 = vmatmul.mubr.f32.gmra.mrb[18].mxu1 %v204_v34  ;;  %v7925_v33 = vpack.c.bf16 %v647_v27, %v646_v25  ;;  %v7895_v34 = vpack.c.bf16 %v633_v29, %v632_v28  ;;  %v117_v24 = vld [vmem:[%s10082_s0 + $0xd8] sm:$0xff]  ;;  %v7973_v25 = vpack.c.bf16 %v703_v17, %v702_v15  ;;  %v672_v27 = vld [vmem:[#allocation3 + $0xc30] sm:$0xff]  ;;  %v710_v1 = vld [vmem:[#allocation3 + $0xd60] sm:$0xff] }
  0xf5   :  { %7906 = vmatpush3.bf16.msra.mxu1 %v7905_v35  ;;  %7876 = vmatprep.subr.bf16.mxu0 %v7875_v36  ;;  %v616_v35 = vld [vmem:[#allocation3 + $0xa70] sm:$0xff]  ;;  %v617_v36 = vld [vmem:[#allocation3 + $0xa78] sm:$0xff]  ;;  %v747_v17 = vld [vmem:[#allocation3 + $0xe88] sm:$0xff] }
  0xf6   :  { %7908 = vmatprep.subr.bf16.mxu1 %v7907_v40  ;;  %2632 = vmatprep.mubr.f32.mxu0 %v111_v46  ;;  %v682_v40 = vld [vmem:[#allocation3 + $0xc80] sm:$0xff]  ;;  %v7897_v44 = vpack.c.bf16 %v617_v36, %v616_v35  ;;  %v673_v28 = vld [vmem:[#allocation3 + $0xc38] sm:$0xff]  ;;  %v704_v29 = vld [vmem:[#allocation3 + $0xd30] sm:$0xff] }
  0xf7   :  { %2707 = vmatprep.mubr.f32.mxu1 %v113_v48  ;;  %v7931_v46 = vpack.c.bf16 %v683_v41, %v682_v40  ;;  %v667_v48 = vld [vmem:[#allocation3 + $0xc08] sm:$0xff]  ;;  %v7945_v36 = vpack.c.bf16 %v673_v28, %v672_v27  ;;  %v7977_v37 = vpack.c.bf16 %v705_v31, %v704_v29  ;;  %v706_v41 = vld [vmem:[#allocation3 + $0xd40] sm:$0xff]  ;;  %v728_v6 = vld [vmem:[#allocation3 + $0xdf0] sm:$0xff] }
  0xf8   :  { %7878 = vmatpush3.bf16.msra.mxu0 %v7877_v47  ;;  %v666_v47 = vld [vmem:[#allocation3 + $0xc00] sm:$0xff]  ;;  %v723_v35 = vld [vmem:[#allocation3 + $0xdc8] sm:$0xff]  ;;  %v729_v7 = vld [vmem:[#allocation3 + $0xdf8] sm:$0xff] }
  0xf9   :  { %7910 = vmatpush3.bf16.msra.mxu1 %v7909_v49  ;;  %7880 = vmatprep.subr.bf16.mxu0 %v7879_v50  ;;  %v110_v49 = vld [vmem:[%s10082_s0 + $0xa0] sm:$0xff]  ;;  %v7963_v50 = vpack.c.bf16 %v715_v43, %v714_v42  ;;  %v7933_v56 = vpack.c.bf16 %v667_v48, %v666_v47  ;;  %v675_v40 = vld [vmem:[#allocation3 + $0xc48] sm:$0xff]  ;;  %v725_v47 = vld [vmem:[#allocation3 + $0xdd8] sm:$0xff] }
  0xfa   :  { %7912 = vmatprep.subr.bf16.mxu1 %v7911_v54  ;;  %v684_v54 = vld [vmem:[#allocation3 + $0xc90] sm:$0xff]  ;;  %v707_v43 = vld [vmem:[#allocation3 + $0xd48] sm:$0xff]  ;;  %v7949_v48 = vpack.c.bf16 %v675_v40, %v674_v39  ;;  %v713_v15 = vld [vmem:[#allocation3 + $0xd78] sm:$0xff] }
  0xfb   :  { %v7935_v0 = vpack.c.bf16 %v685_v55, %v684_v54  ;;  %v709_v55 = vld [vmem:[#allocation3 + $0xd58] sm:$0xff]  ;;  %v762_v27 = vld [vmem:[#allocation3 + $0xf00] sm:$0xff]  ;;  %v763_v28 = vld [vmem:[#allocation3 + $0xf08] sm:$0xff] }
  0xfc   :  { %7882 = vmatpush3.bf16.msra.mxu0 %v7881_v60  ;;  %v7965_v60 = vpack.c.bf16 %v699_v52, %v698_v51  ;;  %v676_v51 = vld [vmem:[#allocation3 + $0xc50] sm:$0xff]  ;;  %v677_v52 = vld [vmem:[#allocation3 + $0xc58] sm:$0xff] }
  0xfd   :  { %7914 = vmatpush3.bf16.msra.mxu1 %v7913_v61  ;;  %7884 = vmatprep.subr.bf16.mxu0 %v7883_v62  ;;  %v668_v61 = vld [vmem:[#allocation3 + $0xc10] sm:$0xff]  ;;  %v669_v62 = vld [vmem:[#allocation3 + $0xc18] sm:$0xff] }
  0xfe   :  { %7916 = vmatprep.subr.bf16.mxu1 %v7915_v2  ;;  %v686_v2 = vld [vmem:[#allocation3 + $0xca0] sm:$0xff]  ;;  %v116_v29 = vld [vmem:[%s10082_s0 + $0xd0] sm:$0xff]  ;;  %v749_v31 = vld [vmem:[#allocation3 + $0xe98] sm:$0xff] }
  0xff   :  { %v7939_v12 = vpack.c.bf16 %v687_v3, %v686_v2  ;;  %v7987_v2 = vpack.c.bf16 %v727_v59, %v726_v58  ;;  %v711_v3 = vld [vmem:[#allocation3 + $0xd68] sm:$0xff]  ;;  %v764_v39 = vld [vmem:[#allocation3 + $0xf10] sm:$0xff]  ;;  %v753_v59 = vld [vmem:[#allocation3 + $0xeb8] sm:$0xff] }
 0x100   :  { %7886 = vmatpush3.bf16.msra.mxu0 %v7885_v8  ;;  %v206_v8 = vld [vmem:[%s10082_s0 + $0x3a0] sm:$0xff]  ;;  %v752_v58 = vld [vmem:[#allocation3 + $0xeb0] sm:$0xff] }
 0x101   :  { %7918 = vmatpush3.bf16.msra.mxu1 %v7917_v9  ;;  %7888 = vmatprep.subr.bf16.mxu0 %v7887_v10  ;;  %v7937_v9 = vpack.c.bf16 %v669_v62, %v668_v61  ;;  %v208_v10 = vld [vmem:[%s10082_s0 + $0x3b0] sm:$0xff] }
 0x102   :  { %7920 = vmatprep.subr.bf16.mxu1 %v7919_v14  ;;  %v671_v14 = vld [vmem:[#allocation3 + $0xc28] sm:$0xff] }
 0x103   :  { %v7941_v23 = vpack.c.bf16 %v671_v14, %v670_v13  ;;  %v712_v13 = vld [vmem:[#allocation3 + $0xd70] sm:$0xff]  ;;  %v7991_v14 = vpack.c.bf16 %v729_v7, %v728_v6  ;;  %v769_v7 = vld [vmem:[#allocation3 + $0xf38] sm:$0xff] }
 0x104   :  { %7890 = vmatpush3.bf16.msra.mxu0 %v7889_v20  ;;  %v720_v20 = vld [vmem:[#allocation3 + $0xdb0] sm:$0xff] }
 0x105   :  { %7922 = vmatpush3.bf16.msra.mxu1 %v7921_v21  ;;  %7892 = vmatprep.subr.bf16.mxu0 %v7891_v22  ;;  %v721_v21 = vld [vmem:[#allocation3 + $0xdb8] sm:$0xff]  ;;  %v115_v22 = vld [vmem:[%s10082_s0 + $0xc8] sm:$0xff] }
 0x106   :  { %7924 = vmatprep.subr.bf16.mxu1 %v7923_v26  ;;  %v7943_v26 = vpack.c.bf16 %v689_v19, %v688_v18  ;;  %v7975_v30 = vpack.c.bf16 %v721_v21, %v720_v20  ;;  %v778_v18 = vld [vmem:[#allocation3 + $0xf80] sm:$0xff]  ;;  %v779_v19 = vld [vmem:[#allocation3 + $0xf88] sm:$0xff]  ;;  %v7993_v21 = vpack.c.bf16 %v713_v15, %v712_v13 }
 0x107   :  { %v738_v15 = vld [vmem:[#allocation3 + $0xe40] sm:$0xff] }
 0x108   :  { %7894 = vmatpush3.bf16.msra.mxu0 %v7893_v32  ;;  %v690_v32 = vld [vmem:[#allocation3 + $0xcc0] sm:$0xff] }
 0x109   :  { %7926 = vmatpush3.bf16.msra.mxu1 %v7925_v33  ;;  %7896 = vmatprep.subr.bf16.mxu0 %v7895_v34  ;;  %v691_v33 = vld [vmem:[#allocation3 + $0xcc8] sm:$0xff]  ;;  %v722_v34 = vld [vmem:[#allocation3 + $0xdc0] sm:$0xff] }
 0x10a   :  { %7928 = vmatprep.subr.bf16.mxu1 %v7927_v38  ;;  %v7947_v38 = vpack.c.bf16 %v691_v33, %v690_v32  ;;  %v7979_v42 = vpack.c.bf16 %v723_v35, %v722_v34  ;;  %v211_v33 = vld [vmem:[%s10082_s0 + $0x3c8] sm:$0xff]  ;;  %v780_v34 = vld [vmem:[#allocation3 + $0xf90] sm:$0xff]  ;;  %v781_v35 = vld [vmem:[#allocation3 + $0xf98] sm:$0xff] }
 0x10c   :  { %7898 = vmatpush3.bf16.msra.mxu0 %v7897_v44  ;;  %v692_v44 = vld [vmem:[#allocation3 + $0xcd0] sm:$0xff] }
 0x10d   :  { %7930 = vmatpush3.bf16.msra.mxu1 %v7929_v45  ;;  %7932 = vmatprep.subr.bf16.mxu0 %v7931_v46  ;;  %v693_v45 = vld [vmem:[#allocation3 + $0xcd8] sm:$0xff]  ;;  %v724_v46 = vld [vmem:[#allocation3 + $0xdd0] sm:$0xff] }
 0x10e   :  { %7964 = vmatprep.subr.bf16.mxu1 %v7963_v50  ;;  %v7951_v50 = vpack.c.bf16 %v693_v45, %v692_v44  ;;  %v7983_v54 = vpack.c.bf16 %v725_v47, %v724_v46  ;;  %v213_v44 = vld [vmem:[%s10082_s0 + $0x3d8] sm:$0xff]  ;;  %v8031_v45 = vpack.c.bf16 %v781_v35, %v780_v34  ;;  %v782_v46 = vld [vmem:[#allocation3 + $0xfa0] sm:$0xff]  ;;  %v783_v47 = vld [vmem:[#allocation3 + $0xfa8] sm:$0xff] }
 0x10f   :  { %2633 = vmatmul.mubr.f32.vlgmr.msra.gmra.mrb[20].mxu0 %v110_v49  ;;  %v7981_v49 = vpack.c.bf16 %v707_v43, %v706_v41  ;;  %v765_v41 = vld [vmem:[#allocation3 + $0xf18] sm:$0xff]  ;;  %v751_v43 = vld [vmem:[#allocation3 + $0xea8] sm:$0xff]  ;;  %v790_v34 = vld [vmem:[#allocation3 + $0xfe0] sm:$0xff] }
 0x110   :  { %7934 = vmatpush3.bf16.msra.mxu0 %v7933_v56  ;;  %2708 = vmatmul.mubr.f32.vlgmr.msra.gmra.mrb[20].mxu1 %v112_v53  ;;  %v708_v53 = vld [vmem:[#allocation3 + $0xd50] sm:$0xff]  ;;  %v694_v56 = vld [vmem:[#allocation3 + $0xce0] sm:$0xff]  ;;  %v791_v35 = vld [vmem:[#allocation3 + $0xfe8] sm:$0xff] }
 0x111   :  { %7966 = vmatpush3.bf16.msra.mxu1 %v7965_v60  ;;  %2637 = vmatprep.mubr.f32.mxu0 %v207_v57  ;;  %v695_v57 = vld [vmem:[#allocation3 + $0xce8] sm:$0xff]  ;;  %v7953_v60 = vpack.c.bf16 %v677_v52, %v676_v51  ;;  %v7985_v61 = vpack.c.bf16 %v709_v55, %v708_v53  ;;  %v8033_v51 = vpack.c.bf16 %v765_v41, %v764_v39  ;;  %v734_v53 = vld [vmem:[#allocation3 + $0xe20] sm:$0xff] }
 0x112   :  { %7936 = vmatprep.subr.bf16.mxu0 %v7935_v0  ;;  %2712 = vmatprep.mubr.f32.mxu1 %v209_v4  ;;  %v7955_v62 = vpack.c.bf16 %v695_v57, %v694_v56  ;;  %v679_v0 = vld [vmem:[#allocation3 + $0xc68] sm:$0xff]  ;;  %v696_v4 = vld [vmem:[#allocation3 + $0xcf0] sm:$0xff]  ;;  %v766_v55 = vld [vmem:[#allocation3 + $0xf20] sm:$0xff]  ;;  %v8035_v56 = vpack.c.bf16 %v783_v47, %v782_v46 }
 0x113   :  { %2638 = vmatmul.mubr.f32.gmra.mrb[22].mxu0 %v206_v8  ;;  %7968 = vmatprep.subr.bf16.mxu1 %v7967_v5  ;;  %v697_v5 = vld [vmem:[#allocation3 + $0xcf8] sm:$0xff]  ;;  %v7957_v8 = vpack.c.bf16 %v679_v0, %v678_v63  ;;  %v767_v57 = vld [vmem:[#allocation3 + $0xf28] sm:$0xff]  ;;  %v742_v39 = vld [vmem:[#allocation3 + $0xe60] sm:$0xff] }
 0x114   :  { %7938 = vmatpush3.bf16.msra.mxu0 %v7937_v9  ;;  %2713 = vmatmul.mubr.f32.gmra.mrb[22].mxu1 %v208_v10  ;;  %v7989_v9 = vpack.c.bf16 %v711_v3, %v710_v1  ;;  %v7959_v10 = vpack.c.bf16 %v697_v5, %v696_v4  ;;  %v121_v0 = vld [vmem:[%s10082_s0 + $0xf8] sm:$0xff]  ;;  %v8037_v1 = vpack.c.bf16 %v767_v57, %v766_v55  ;;  %v736_v3 = vld [vmem:[#allocation3 + $0xe30] sm:$0xff]  ;;  %v774_v41 = vld [vmem:[#allocation3 + $0xf60] sm:$0xff] }
 0x115   :  { %7970 = vmatpush3.bf16.msra.mxu1 %v7969_v11  ;;  %7940 = vmatprep.subr.bf16.mxu0 %v7939_v12  ;;  %v680_v11 = vld [vmem:[#allocation3 + $0xc70] sm:$0xff]  ;;  %v681_v12 = vld [vmem:[#allocation3 + $0xc78] sm:$0xff] }
 0x116   :  { %7972 = vmatprep.subr.bf16.mxu1 %v7971_v16  ;;  %2782 = vmatprep.mubr.f32.mxu0 %v115_v22  ;;  %v746_v16 = vld [vmem:[#allocation3 + $0xe80] sm:$0xff]  ;;  %v7961_v20 = vpack.c.bf16 %v681_v12, %v680_v11  ;;  %v737_v4 = vld [vmem:[#allocation3 + $0xe38] sm:$0xff]  ;;  %v768_v5 = vld [vmem:[#allocation3 + $0xf30] sm:$0xff] }
 0x117   :  { %2857 = vmatprep.mubr.f32.mxu1 %v117_v24  ;;  %v7995_v22 = vpack.c.bf16 %v747_v17, %v746_v16  ;;  %v731_v24 = vld [vmem:[#allocation3 + $0xe08] sm:$0xff]  ;;  %v8009_v12 = vpack.c.bf16 %v737_v4, %v736_v3  ;;  %v8041_v13 = vpack.c.bf16 %v769_v7, %v768_v5  ;;  %v770_v17 = vld [vmem:[#allocation3 + $0xf40] sm:$0xff]  ;;  %v761_v46 = vld [vmem:[#allocation3 + $0xef8] sm:$0xff] }
 0x118   :  { %7942 = vmatpush3.bf16.msra.mxu0 %v7941_v23  ;;  %v730_v23 = vld [vmem:[#allocation3 + $0xe00] sm:$0xff]  ;;  %v787_v11 = vld [vmem:[#allocation3 + $0xfc8] sm:$0xff]  ;;  %v744_v57 = vld [vmem:[#allocation3 + $0xe70] sm:$0xff] }
 0x119   :  { %7974 = vmatpush3.bf16.msra.mxu1 %v7973_v25  ;;  %7944 = vmatprep.subr.bf16.mxu0 %v7943_v26  ;;  %v114_v25 = vld [vmem:[%s10082_s0 + $0xc0] sm:$0xff]  ;;  %v8027_v26 = vpack.c.bf16 %v779_v19, %v778_v18  ;;  %v7997_v32 = vpack.c.bf16 %v731_v24, %v730_v23  ;;  %v739_v16 = vld [vmem:[#allocation3 + $0xe48] sm:$0xff]  ;;  %v789_v23 = vld [vmem:[#allocation3 + $0xfd8] sm:$0xff] }
 0x11a   :  { %7976 = vmatprep.subr.bf16.mxu1 %v7975_v30  ;;  %v748_v30 = vld [vmem:[#allocation3 + $0xe90] sm:$0xff]  ;;  %v771_v19 = vld [vmem:[#allocation3 + $0xf48] sm:$0xff]  ;;  %v8013_v24 = vpack.c.bf16 %v739_v16, %v738_v15  ;;  %v813_v15 = vld [vmem:[#allocation3 + $0x1098] sm:$0xff] }
 0x11b   :  { %v7999_v40 = vpack.c.bf16 %v749_v31, %v748_v30  ;;  %v773_v31 = vld [vmem:[#allocation3 + $0xf58] sm:$0xff]  ;;  %v795_v7 = vld [vmem:[#allocation3 + $0x1008] sm:$0xff] }
 0x11c   :  { %7946 = vmatpush3.bf16.msra.mxu0 %v7945_v36  ;;  %v8029_v36 = vpack.c.bf16 %v763_v28, %v762_v27  ;;  %v740_v27 = vld [vmem:[#allocation3 + $0xe50] sm:$0xff]  ;;  %v741_v28 = vld [vmem:[#allocation3 + $0xe58] sm:$0xff] }
 0x11d   :  { %7978 = vmatpush3.bf16.msra.mxu1 %v7977_v37  ;;  %7948 = vmatprep.subr.bf16.mxu0 %v7947_v38  ;;  %v732_v37 = vld [vmem:[#allocation3 + $0xe10] sm:$0xff]  ;;  %v733_v38 = vld [vmem:[#allocation3 + $0xe18] sm:$0xff] }
 0x11e   :  { %7980 = vmatprep.subr.bf16.mxu1 %v7979_v42  ;;  %v750_v42 = vld [vmem:[#allocation3 + $0xea0] sm:$0xff] }
 0x11f   :  { %v8003_v52 = vpack.c.bf16 %v751_v43, %v750_v42  ;;  %v8051_v43 = vpack.c.bf16 %v791_v35, %v790_v34  ;;  %v846_v35 = vld [vmem:[#allocation3 + $0x11a0] sm:$0xff] }
 0x120   :  { %7950 = vmatpush3.bf16.msra.mxu0 %v7949_v48  ;;  %v210_v48 = vld [vmem:[%s10082_s0 + $0x3c0] sm:$0xff] }
 0x121   :  { %7982 = vmatpush3.bf16.msra.mxu1 %v7981_v49  ;;  %7952 = vmatprep.subr.bf16.mxu0 %v7951_v50  ;;  %v8001_v49 = vpack.c.bf16 %v733_v38, %v732_v37  ;;  %v212_v50 = vld [vmem:[%s10082_s0 + $0x3d0] sm:$0xff] }
 0x122   :  { %7984 = vmatprep.subr.bf16.mxu1 %v7983_v54  ;;  %v735_v54 = vld [vmem:[#allocation3 + $0xe28] sm:$0xff] }
 0x123   :  { %v8005_v63 = vpack.c.bf16 %v735_v54, %v734_v53 }
 0x124   :  { %7954 = vmatpush3.bf16.msra.mxu0 %v7953_v60  ;;  %v784_v60 = vld [vmem:[#allocation3 + $0xfb0] sm:$0xff] }
 0x125   :  { %7986 = vmatpush3.bf16.msra.mxu1 %v7985_v61  ;;  %7956 = vmatprep.subr.bf16.mxu0 %v7955_v62  ;;  %v785_v61 = vld [vmem:[#allocation3 + $0xfb8] sm:$0xff]  ;;  %v119_v62 = vld [vmem:[%s10082_s0 + $0xe8] sm:$0xff] }
 0x126   :  { %7988 = vmatprep.subr.bf16.mxu1 %v7987_v2  ;;  %v8007_v2 = vpack.c.bf16 %v753_v59, %v752_v58  ;;  %v8039_v6 = vpack.c.bf16 %v785_v61, %v784_v60  ;;  %v745_v58 = vld [vmem:[#allocation3 + $0xe78] sm:$0xff]  ;;  %v776_v59 = vld [vmem:[#allocation3 + $0xf70] sm:$0xff] }
 0x127   :  { %v777_v61 = vld [vmem:[#allocation3 + $0xf78] sm:$0xff]  ;;  %v8025_v3 = vpack.c.bf16 %v745_v58, %v744_v57  ;;  %v800_v57 = vld [vmem:[#allocation3 + $0x1030] sm:$0xff] }
 0x128   :  { %7958 = vmatpush3.bf16.msra.mxu0 %v7957_v8  ;;  %v754_v8 = vld [vmem:[#allocation3 + $0xec0] sm:$0xff]  ;;  %v8057_v4 = vpack.c.bf16 %v777_v61, %v776_v59  ;;  %v801_v58 = vld [vmem:[#allocation3 + $0x1038] sm:$0xff]  ;;  %v832_v59 = vld [vmem:[#allocation3 + $0x1130] sm:$0xff] }
 0x129   :  { %7990 = vmatpush3.bf16.msra.mxu1 %v7989_v9  ;;  %7960 = vmatprep.subr.bf16.mxu0 %v7959_v10  ;;  %v755_v9 = vld [vmem:[#allocation3 + $0xec8] sm:$0xff]  ;;  %v786_v10 = vld [vmem:[#allocation3 + $0xfc0] sm:$0xff]  ;;  %v833_v61 = vld [vmem:[#allocation3 + $0x1138] sm:$0xff] }
 0x12a   :  { %7992 = vmatprep.subr.bf16.mxu1 %v7991_v14  ;;  %v8011_v14 = vpack.c.bf16 %v755_v9, %v754_v8  ;;  %v8043_v18 = vpack.c.bf16 %v787_v11, %v786_v10  ;;  %v118_v8 = vld [vmem:[%s10082_s0 + $0xe0] sm:$0xff]  ;;  %v827_v11 = vld [vmem:[#allocation3 + $0x1108] sm:$0xff] }
 0x12b   :  { %v826_v10 = vld [vmem:[#allocation3 + $0x1100] sm:$0xff] }
 0x12c   :  { %7962 = vmatpush3.bf16.msra.mxu0 %v7961_v20  ;;  %v756_v20 = vld [vmem:[#allocation3 + $0xed0] sm:$0xff] }
 0x12d   :  { %7994 = vmatpush3.bf16.msra.mxu1 %v7993_v21  ;;  %7996 = vmatprep.subr.bf16.mxu0 %v7995_v22  ;;  %v757_v21 = vld [vmem:[#allocation3 + $0xed8] sm:$0xff]  ;;  %v788_v22 = vld [vmem:[#allocation3 + $0xfd0] sm:$0xff] }
 0x12e   :  { %8028 = vmatprep.subr.bf16.mxu1 %v8027_v26  ;;  %v8015_v26 = vpack.c.bf16 %v757_v21, %v756_v20  ;;  %v8047_v30 = vpack.c.bf16 %v789_v23, %v788_v22  ;;  %v844_v20 = vld [vmem:[#allocation3 + $0x1190] sm:$0xff]  ;;  %v845_v21 = vld [vmem:[#allocation3 + $0x1198] sm:$0xff] }
 0x12f   :  { %2783 = vmatmul.mubr.f32.vlgmr.msra.gmra.mrb[24].mxu0 %v114_v25  ;;  %v8045_v25 = vpack.c.bf16 %v771_v19, %v770_v17  ;;  %v215_v19 = vld [vmem:[%s10082_s0 + $0x3e8] sm:$0xff]  ;;  %v8095_v34 = vpack.c.bf16 %v845_v21, %v844_v20  ;;  %v836_v20 = vld [vmem:[#allocation3 + $0x1150] sm:$0xff] }
 0x130   :  { %7998 = vmatpush3.bf16.msra.mxu0 %v7997_v32  ;;  %2858 = vmatmul.mubr.f32.vlgmr.msra.gmra.mrb[24].mxu1 %v116_v29  ;;  %v772_v29 = vld [vmem:[#allocation3 + $0xf50] sm:$0xff]  ;;  %v758_v32 = vld [vmem:[#allocation3 + $0xee0] sm:$0xff] }
 0x131   :  { %8030 = vmatpush3.bf16.msra.mxu1 %v8029_v36  ;;  %2787 = vmatprep.mubr.f32.mxu0 %v211_v33  ;;  %v759_v33 = vld [vmem:[#allocation3 + $0xee8] sm:$0xff]  ;;  %v8017_v36 = vpack.c.bf16 %v741_v28, %v740_v27  ;;  %v8049_v37 = vpack.c.bf16 %v773_v31, %v772_v29  ;;  %v828_v27 = vld [vmem:[#allocation3 + $0x1110] sm:$0xff]  ;;  %v814_v31 = vld [vmem:[#allocation3 + $0x10a0] sm:$0xff] }
 0x132   :  { %8000 = vmatprep.subr.bf16.mxu0 %v7999_v40  ;;  %2862 = vmatprep.mubr.f32.mxu1 %v213_v44  ;;  %v8019_v38 = vpack.c.bf16 %v759_v33, %v758_v32  ;;  %v743_v40 = vld [vmem:[#allocation3 + $0xe68] sm:$0xff]  ;;  %v217_v33 = vld [vmem:[%s10082_s0 + $0x3f8] sm:$0xff] }
 0x133   :  { %2788 = vmatmul.mubr.f32.gmra.mrb[26].mxu0 %v210_v48  ;;  %8032 = vmatprep.subr.bf16.mxu1 %v8031_v45  ;;  %v775_v44 = vld [vmem:[#allocation3 + $0xf68] sm:$0xff]  ;;  %v760_v45 = vld [vmem:[#allocation3 + $0xef0] sm:$0xff]  ;;  %v8021_v53 = vpack.c.bf16 %v743_v40, %v742_v39 }
 0x134   :  { %8002 = vmatpush3.bf16.msra.mxu0 %v8001_v49  ;;  %2863 = vmatmul.mubr.f32.gmra.mrb[26].mxu1 %v212_v50  ;;  %v792_v49 = vld [vmem:[#allocation3 + $0xff0] sm:$0xff]  ;;  %v793_v50 = vld [vmem:[#allocation3 + $0xff8] sm:$0xff]  ;;  %v8053_v55 = vpack.c.bf16 %v775_v44, %v774_v41  ;;  %v815_v32 = vld [vmem:[#allocation3 + $0x10a8] sm:$0xff] }
 0x135   :  { %8034 = vmatpush3.bf16.msra.mxu1 %v8033_v51  ;;  %8004 = vmatprep.subr.bf16.mxu0 %v8003_v52  ;;  %v8055_v60 = vpack.c.bf16 %v793_v50, %v792_v49  ;;  %v216_v40 = vld [vmem:[%s10082_s0 + $0x3f0] sm:$0xff]  ;;  %v799_v44 = vld [vmem:[#allocation3 + $0x1028] sm:$0xff]  ;;  %v817_v49 = vld [vmem:[#allocation3 + $0x10b8] sm:$0xff] }
 0x136   :  { %8036 = vmatprep.subr.bf16.mxu1 %v8035_v56  ;;  %2932 = vmatprep.mubr.f32.mxu0 %v119_v62  ;;  %v8023_v56 = vpack.c.bf16 %v761_v46, %v760_v45  ;;  %v810_v62 = vld [vmem:[#allocation3 + $0x1080] sm:$0xff]  ;;  %v848_v50 = vld [vmem:[#allocation3 + $0x11b0] sm:$0xff] }
 0x137   :  { %3007 = vmatprep.mubr.f32.mxu1 %v121_v0  ;;  %v830_v45 = vld [vmem:[#allocation3 + $0x1120] sm:$0xff] }
 0x138   :  { %8006 = vmatpush3.bf16.msra.mxu0 %v8005_v63  ;;  %v811_v63 = vld [vmem:[#allocation3 + $0x1088] sm:$0xff] }
 0x139   :  { %8038 = vmatpush3.bf16.msra.mxu1 %v8037_v1  ;;  %8008 = vmatprep.subr.bf16.mxu0 %v8007_v2  ;;  %v842_v1 = vld [vmem:[#allocation3 + $0x1180] sm:$0xff]  ;;  %v843_v2 = vld [vmem:[#allocation3 + $0x1188] sm:$0xff]  ;;  %v8059_v5 = vpack.c.bf16 %v811_v63, %v810_v62 }
 0x13a   :  { %8040 = vmatprep.subr.bf16.mxu1 %v8039_v6  ;;  %v794_v6 = vld [vmem:[#allocation3 + $0x1000] sm:$0xff]  ;;  %v8091_v9 = vpack.c.bf16 %v843_v2, %v842_v1  ;;  %v819_v63 = vld [vmem:[#allocation3 + $0x10c8] sm:$0xff] }
 0x13b   :  { %v818_v62 = vld [vmem:[#allocation3 + $0x10c0] sm:$0xff]  ;;  %v851_v2 = vld [vmem:[#allocation3 + $0x11c8] sm:$0xff] }
 0x13c   :  { %8010 = vmatpush3.bf16.msra.mxu0 %v8009_v12  ;;  %v850_v1 = vld [vmem:[#allocation3 + $0x11c0] sm:$0xff] }
 0x13d   :  { %8042 = vmatpush3.bf16.msra.mxu1 %v8041_v13  ;;  %8012 = vmatprep.subr.bf16.mxu0 %v8011_v14  ;;  %v120_v13 = vld [vmem:[%s10082_s0 + $0xf0] sm:$0xff] }
 0x13e   :  { %8044 = vmatprep.subr.bf16.mxu1 %v8043_v18  ;;  %v812_v14 = vld [vmem:[#allocation3 + $0x1090] sm:$0xff]  ;;  %v8061_v18 = vpack.c.bf16 %v795_v7, %v794_v6  ;;  %v802_v6 = vld [vmem:[#allocation3 + $0x1040] sm:$0xff]  ;;  %v803_v7 = vld [vmem:[#allocation3 + $0x1048] sm:$0xff] }
 0x13f   :  { %v8063_v29 = vpack.c.bf16 %v813_v15, %v812_v14  ;;  %v853_v14 = vld [vmem:[#allocation3 + $0x11d8] sm:$0xff]  ;;  %v8077_v15 = vpack.c.bf16 %v803_v7, %v802_v6  ;;  %v859_v6 = vld [vmem:[#allocation3 + $0x1208] sm:$0xff] }
 0x140   :  { %8014 = vmatpush3.bf16.msra.mxu0 %v8013_v24  ;;  %v8093_v24 = vpack.c.bf16 %v827_v11, %v826_v10  ;;  %v835_v10 = vld [vmem:[#allocation3 + $0x1148] sm:$0xff]  ;;  %v820_v11 = vld [vmem:[#allocation3 + $0x10d0] sm:$0xff] }
 0x141   :  { %8046 = vmatpush3.bf16.msra.mxu1 %v8045_v25  ;;  %8016 = vmatprep.subr.bf16.mxu0 %v8015_v26  ;;  %v796_v25 = vld [vmem:[#allocation3 + $0x1010] sm:$0xff]  ;;  %v797_v26 = vld [vmem:[#allocation3 + $0x1018] sm:$0xff] }
 0x142   :  { %v5673_v42 = vpop.f32.mrb[0].mxu0  ;;  %8048 = vmatprep.subr.bf16.mxu1 %v8047_v30  ;;  %v829_v30 = vld [vmem:[#allocation3 + $0x1118] sm:$0xff]  ;;  %v8065_v39 = vpack.c.bf16 %v797_v26, %v796_v25  ;;  %v854_v25 = vld [vmem:[#allocation3 + $0x11e0] sm:$0xff]  ;;  %v855_v26 = vld [vmem:[#allocation3 + $0x11e8] sm:$0xff] }
 0x143   :  { %v5711_v47 = vpop.f32.mrb[0].mxu1  ;;  %v5674_v48 = vpop.f32.mrb[1].mxu0  ;;  %v8097_v41 = vpack.c.bf16 %v829_v30, %v828_v27  ;;  %v806_v30 = vld [vmem:[#allocation3 + $0x1060] sm:$0xff] }
 0x144   :  { %v5675_v51 = vadd.f32 %v5674_v48, %v5673_v42  ;;  %v5712_v52 = vpop.f32.mrb[1].mxu1  ;;  %8018 = vmatpush3.bf16.msra.mxu0 %v8017_v36  ;;  %v847_v36 = vld [vmem:[#allocation3 + $0x11a8] sm:$0xff]  ;;  %v8067_v42 = vpack.c.bf16 %v815_v32, %v814_v31  ;;  %v816_v48 = vld [vmem:[#allocation3 + $0x10b0] sm:$0xff]  ;;  %v838_v32 = vld [vmem:[#allocation3 + $0x1160] sm:$0xff] }
 0x145   :  { %v5713_v54 = vadd.f32 %v5712_v52, %v5711_v47  ;;  %8050 = vmatpush3.bf16.msra.mxu1 %v8049_v37  ;;  %8020 = vmatprep.subr.bf16.mxu0 %v8019_v38  ;;  %v214_v38 = vld [vmem:[%s10082_s0 + $0x3e0] sm:$0xff]  ;;  %v8099_v46 = vpack.c.bf16 %v847_v36, %v846_v35  ;;  %v831_v47 = vld [vmem:[#allocation3 + $0x1128] sm:$0xff]  ;;  %v824_v36 = vld [vmem:[#allocation3 + $0x10f0] sm:$0xff] }
 0x146   :  { %8052 = vmatprep.subr.bf16.mxu1 %v8051_v43  ;;  %v5676_v12 = vpop.f32.mrb[2].mxu0  ;;  %v798_v43 = vld [vmem:[#allocation3 + $0x1020] sm:$0xff]  ;;  %v123_v52 = vld [vmem:[%s10082_s0 + $0x108] sm:$0xff] }
 0x147   :  { %v9506_v0 = vadd.f32 %v5713_v54, %v5675_v51  ;;  %v5714_v16 = vpop.f32.mrb[2].mxu1  ;;  %v5677_v17 = vpop.f32.mrb[3].mxu0  ;;  %v849_v51 = vld [vmem:[#allocation3 + $0x11b8] sm:$0xff]  ;;  %v807_v31 = vld [vmem:[#allocation3 + $0x1068] sm:$0xff] }
 0x148   :  { %8022 = vmatpush3.bf16.msra.mxu0 %v8021_v53  ;;  %v5678_v22 = vadd.f32 %v5677_v17, %v5676_v12  ;;  %v5715_v23 = vpop.f32.mrb[3].mxu1  ;;  %v8069_v53 = vpack.c.bf16 %v799_v44, %v798_v43  ;;  %v125_v54 = vld [vmem:[%s10082_s0 + $0x118] sm:$0xff]  ;;  %v839_v35 = vld [vmem:[#allocation3 + $0x1168] sm:$0xff] }
 0x149   :  { %8054 = vmatpush3.bf16.msra.mxu1 %v8053_v55  ;;  %8024 = vmatprep.subr.bf16.mxu0 %v8023_v56  ;;  %v5716_v28 = vadd.f32 %v5715_v23, %v5714_v16  ;;  %v8101_v55 = vpack.c.bf16 %v831_v47, %v830_v45  ;;  %v8071_v56 = vpack.c.bf16 %v817_v49, %v816_v48  ;;  %v821_v12 = vld [vmem:[#allocation3 + $0x10d8] sm:$0xff]  ;;  %v822_v23 = vld [vmem:[#allocation3 + $0x10e0] sm:$0xff]  ;;  %v808_v49 = vld [vmem:[#allocation3 + $0x1070] sm:$0xff] }
 0x14a   :  { %8056 = vmatprep.subr.bf16.mxu1 %v8055_v60  ;;  %v8103_v60 = vpack.c.bf16 %v849_v51, %v848_v50  ;;  %v8079_v17 = vpack.c.bf16 %v821_v12, %v820_v11  ;;  %v8085_v45 = vpack.c.bf16 %v807_v31, %v806_v30  ;;  %v8117_v47 = vpack.c.bf16 %v839_v35, %v838_v32  ;;  %v809_v50 = vld [vmem:[#allocation3 + $0x1078] sm:$0xff]  ;;  %v840_v51 = vld [vmem:[#allocation3 + $0x1170] sm:$0xff]  ;;  %v891_v11 = vld [vmem:[#allocation3 + $0x1308] sm:$0xff] }
 0x14b   :  { %v9520_v37 = vadd.f32 %v5716_v28, %v5678_v22  ;;  %v837_v22 = vld [vmem:[#allocation3 + $0x1158] sm:$0xff]  ;;  %v124_v12 = vld [vmem:[%s10082_s0 + $0x110] sm:$0xff]  ;;  %v911_v30 = vld [vmem:[#allocation3 + $0x13a8] sm:$0xff] }
 0x14c   :  { %8026 = vmatpush3.bf16.msra.mxu0 %v8025_v3  ;;  %v8073_v3 = vpack.c.bf16 %v801_v58, %v800_v57  ;;  %v8113_v28 = vpack.c.bf16 %v837_v22, %v836_v20  ;;  %v875_v57 = vld [vmem:[#allocation3 + $0x1288] sm:$0xff]  ;;  %v860_v20 = vld [vmem:[#allocation3 + $0x1210] sm:$0xff]  ;;  %v218_v31 = vld [vmem:[%s10082_s0 + $0x400] sm:$0xff] }
 0x14d   :  { %8058 = vmatpush3.bf16.msra.mxu1 %v8057_v4  ;;  %8060 = vmatprep.subr.bf16.mxu0 %v8059_v5  ;;  %v8105_v4 = vpack.c.bf16 %v833_v61, %v832_v59  ;;  %v8075_v5 = vpack.c.bf16 %v819_v63, %v818_v62  ;;  %v907_v61 = vld [vmem:[#allocation3 + $0x1388] sm:$0xff]  ;;  %v892_v22 = vld [vmem:[#allocation3 + $0x1310] sm:$0xff] }
 0x14e   :  { %8092 = vmatprep.subr.bf16.mxu1 %v8091_v9  ;;  %v8107_v9 = vpack.c.bf16 %v851_v2, %v850_v1  ;;  %v8089_v2 = vpack.c.bf16 %v809_v50, %v808_v49 }
 0x14f   :  { %2933 = vmatmul.mubr.f32.vlgmr.msra.gmra.mrb[28].mxu0 %v118_v8  ;;  %v834_v8 = vld [vmem:[#allocation3 + $0x1140] sm:$0xff] }
 0x150   :  { %8062 = vmatpush3.bf16.msra.mxu0 %v8061_v18  ;;  %3008 = vmatmul.mubr.f32.vlgmr.msra.gmra.mrb[28].mxu1 %v120_v13  ;;  %v852_v13 = vld [vmem:[#allocation3 + $0x11d0] sm:$0xff]  ;;  %v8109_v16 = vpack.c.bf16 %v835_v10, %v834_v8  ;;  %v122_v8 = vld [vmem:[%s10082_s0 + $0x100] sm:$0xff] }
 0x151   :  { %8094 = vmatpush3.bf16.msra.mxu1 %v8093_v24  ;;  %2937 = vmatprep.mubr.f32.mxu0 %v215_v19  ;;  %v804_v18 = vld [vmem:[#allocation3 + $0x1050] sm:$0xff]  ;;  %v805_v19 = vld [vmem:[#allocation3 + $0x1058] sm:$0xff]  ;;  %v8111_v21 = vpack.c.bf16 %v853_v14, %v852_v13  ;;  %v823_v24 = vld [vmem:[#allocation3 + $0x10e8] sm:$0xff] }
 0x152   :  { %8064 = vmatprep.subr.bf16.mxu0 %v8063_v29  ;;  %3012 = vmatprep.mubr.f32.mxu1 %v217_v33  ;;  %v8081_v27 = vpack.c.bf16 %v805_v19, %v804_v18  ;;  %v8083_v29 = vpack.c.bf16 %v823_v24, %v822_v23  ;;  %v890_v10 = vld [vmem:[#allocation3 + $0x1300] sm:$0xff]  ;;  %v876_v13 = vld [vmem:[#allocation3 + $0x1290] sm:$0xff]  ;;  %v877_v14 = vld [vmem:[#allocation3 + $0x1298] sm:$0xff] }
 0x153   :  { %2938 = vmatmul.mubr.f32.gmra.mrb[30].mxu0 %v214_v38  ;;  %8096 = vmatprep.subr.bf16.mxu1 %v8095_v34  ;;  %v8115_v34 = vpack.c.bf16 %v855_v26, %v854_v25  ;;  %v825_v38 = vld [vmem:[#allocation3 + $0x10f8] sm:$0xff]  ;;  %v8157_v19 = vpack.c.bf16 %v891_v11, %v890_v10  ;;  %v8127_v23 = vpack.c.bf16 %v877_v14, %v876_v13  ;;  %v878_v25 = vld [vmem:[#allocation3 + $0x12a0] sm:$0xff]  ;;  %v879_v26 = vld [vmem:[#allocation3 + $0x12a8] sm:$0xff] }
 0x154   :  { %8066 = vmatpush3.bf16.msra.mxu0 %v8065_v39  ;;  %3013 = vmatmul.mubr.f32.gmra.mrb[30].mxu1 %v216_v40  ;;  %v8087_v48 = vpack.c.bf16 %v825_v38, %v824_v36  ;;  %v909_v18 = vld [vmem:[#allocation3 + $0x1398] sm:$0xff]  ;;  %v8131_v35 = vpack.c.bf16 %v879_v26, %v878_v25  ;;  %v862_v36 = vld [vmem:[#allocation3 + $0x1220] sm:$0xff]  ;;  %v863_v38 = vld [vmem:[#allocation3 + $0x1228] sm:$0xff] }
 0x155   :  { %8098 = vmatpush3.bf16.msra.mxu1 %v8097_v41  ;;  %8068 = vmatprep.subr.bf16.mxu0 %v8067_v42  ;;  %v856_v41 = vld [vmem:[#allocation3 + $0x11f0] sm:$0xff]  ;;  %v857_v42 = vld [vmem:[#allocation3 + $0x11f8] sm:$0xff]  ;;  %v871_v25 = vld [vmem:[#allocation3 + $0x1268] sm:$0xff] }
 0x156   :  { %8100 = vmatprep.subr.bf16.mxu1 %v8099_v46  ;;  %3082 = vmatprep.mubr.f32.mxu0 %v123_v52  ;;  %v893_v24 = vld [vmem:[#allocation3 + $0x1318] sm:$0xff]  ;;  %v900_v14 = vld [vmem:[#allocation3 + $0x1350] sm:$0xff]  ;;  %v902_v26 = vld [vmem:[#allocation3 + $0x1360] sm:$0xff] }
 0x157   :  { %3157 = vmatprep.mubr.f32.mxu1 %v125_v54  ;;  %v8119_v54 = vpack.c.bf16 %v857_v42, %v856_v41  ;;  %v895_v41 = vld [vmem:[#allocation3 + $0x1328] sm:$0xff]  ;;  %v880_v42 = vld [vmem:[#allocation3 + $0x12b0] sm:$0xff]  ;;  %v869_v13 = vld [vmem:[#allocation3 + $0x1258] sm:$0xff] }
 0x158   :  { %8070 = vmatpush3.bf16.msra.mxu0 %v8069_v53 }
 0x159   :  { %8102 = vmatpush3.bf16.msra.mxu1 %v8101_v55  ;;  %8072 = vmatprep.subr.bf16.mxu0 %v8071_v56  ;;  %v841_v55 = vld [vmem:[#allocation3 + $0x1178] sm:$0xff]  ;;  %v874_v56 = vld [vmem:[#allocation3 + $0x1280] sm:$0xff] }
 0x15a   :  { %8104 = vmatprep.subr.bf16.mxu1 %v8103_v60  ;;  %v906_v60 = vld [vmem:[#allocation3 + $0x1380] sm:$0xff] }
 0x15c   :  { %8074 = vmatpush3.bf16.msra.mxu0 %v8073_v3 }
 0x15d   :  { %8106 = vmatpush3.bf16.msra.mxu1 %v8105_v4  ;;  %8076 = vmatprep.subr.bf16.mxu0 %v8075_v5  ;;  %v8123_v4 = vpack.c.bf16 %v875_v57, %v874_v56  ;;  %v858_v5 = vld [vmem:[#allocation3 + $0x1200] sm:$0xff]  ;;  %v883_v57 = vld [vmem:[#allocation3 + $0x12c8] sm:$0xff] }
 0x15e   :  { %8108 = vmatprep.subr.bf16.mxu1 %v8107_v9  ;;  %v8155_v9 = vpack.c.bf16 %v907_v61, %v906_v60  ;;  %v882_v56 = vld [vmem:[#allocation3 + $0x12c0] sm:$0xff] }
 0x160   :  { %8078 = vmatpush3.bf16.msra.mxu0 %v8077_v15 }
 0x161   :  { %8110 = vmatpush3.bf16.msra.mxu1 %v8109_v16  ;;  %8080 = vmatprep.subr.bf16.mxu0 %v8079_v17  ;;  %v8125_v16 = vpack.c.bf16 %v859_v6, %v858_v5  ;;  %v908_v17 = vld [vmem:[#allocation3 + $0x1390] sm:$0xff]  ;;  %v885_v6 = vld [vmem:[#allocation3 + $0x12d8] sm:$0xff] }
 0x162   :  { %v5749_v33 = vpop.f32.mrb[4].mxu0  ;;  %8112 = vmatprep.subr.bf16.mxu1 %v8111_v21  ;;  %v861_v21 = vld [vmem:[#allocation3 + $0x1218] sm:$0xff]  ;;  %v884_v5 = vld [vmem:[#allocation3 + $0x12d0] sm:$0xff] }
 0x163   :  { %v5750_v39 = vpop.f32.mrb[5].mxu0  ;;  %v5787_v40 = vpop.f32.mrb[4].mxu1  ;;  %v8129_v32 = vpack.c.bf16 %v861_v21, %v860_v20  ;;  %v8143_v11 = vpack.c.bf16 %v885_v6, %v884_v5  ;;  %v919_v20 = vld [vmem:[#allocation3 + $0x13e8] sm:$0xff]  ;;  %v128_v6 = vld [vmem:[%s10082_s0 + $0x130] sm:$0xff] }
 0x164   :  { %v5751_v43 = vadd.f32 %v5750_v39, %v5749_v33  ;;  %8082 = vmatpush3.bf16.msra.mxu0 %v8081_v27  ;;  %v5788_v44 = vpop.f32.mrb[5].mxu1  ;;  %v221_v27 = vld [vmem:[%s10082_s0 + $0x418] sm:$0xff]  ;;  %v220_v33 = vld [vmem:[%s10082_s0 + $0x410] sm:$0xff]  ;;  %v894_v39 = vld [vmem:[#allocation3 + $0x1320] sm:$0xff] }
 0x165   :  { %v5789_v46 = vadd.f32 %v5788_v44, %v5787_v40  ;;  %8114 = vmatpush3.bf16.msra.mxu1 %v8113_v28  ;;  %8084 = vmatprep.subr.bf16.mxu0 %v8083_v29  ;;  %v8159_v28 = vpack.c.bf16 %v909_v18, %v908_v17  ;;  %v910_v29 = vld [vmem:[#allocation3 + $0x13a0] sm:$0xff]  ;;  %v912_v44 = vld [vmem:[#allocation3 + $0x13b0] sm:$0xff]  ;;  %v8165_v49 = vpack.c.bf16 %v895_v41, %v894_v39  ;;  %v887_v18 = vld [vmem:[#allocation3 + $0x12e8] sm:$0xff] }
 0x166   :  { %v2035_v52 = vadd.f32 %v5751_v43, %v9506_v0  ;;  %v5752_v53 = vpop.f32.mrb[6].mxu0  ;;  %8116 = vmatprep.subr.bf16.mxu1 %v8115_v34  ;;  %v8121_v0 = vpack.c.bf16 %v841_v55, %v840_v51  ;;  %v8161_v34 = vpack.c.bf16 %v893_v24, %v892_v22  ;;  %v8163_v40 = vpack.c.bf16 %v911_v30, %v910_v29  ;;  %v881_v43 = vld [vmem:[#allocation3 + $0x12b8] sm:$0xff]  ;;  %v864_v51 = vld [vmem:[#allocation3 + $0x1230] sm:$0xff]  ;;  %v886_v17 = vld [vmem:[#allocation3 + $0x12e0] sm:$0xff] }
 0x167   :  { %v5753_v58 = vpop.f32.mrb[7].mxu0  ;;  %v5790_v59 = vpop.f32.mrb[6].mxu1  ;;  %v8135_v50 = vpack.c.bf16 %v881_v43, %v880_v42  ;;  %v897_v55 = vld [vmem:[#allocation3 + $0x1338] sm:$0xff]  ;;  %v870_v24 = vld [vmem:[#allocation3 + $0x1260] sm:$0xff]  ;;  %v903_v29 = vld [vmem:[#allocation3 + $0x1368] sm:$0xff] }
 0x168   :  { %v9535_v62 = vadd.f32 %v5789_v46, %v2035_v52  ;;  %v5754_v63 = vadd.f32 %v5753_v58, %v5752_v53  ;;  %8086 = vmatpush3.bf16.msra.mxu0 %v8085_v45  ;;  %v5791_v1 = vpop.f32.mrb[7].mxu1  ;;  %v913_v45 = vld [vmem:[#allocation3 + $0x13b8] sm:$0xff]  ;;  %v127_v46 = vld [vmem:[%s10082_s0 + $0x128] sm:$0xff]  ;;  %v896_v53 = vld [vmem:[#allocation3 + $0x1330] sm:$0xff]  ;;  %v8149_v39 = vpack.c.bf16 %v871_v25, %v870_v24  ;;  %v8181_v41 = vpack.c.bf16 %v903_v29, %v902_v26 }
 0x169   :  { %v5792_v3 = vadd.f32 %v5791_v1, %v5790_v59  ;;  %8118 = vmatpush3.bf16.msra.mxu1 %v8117_v47  ;;  %8088 = vmatprep.subr.bf16.mxu0 %v8087_v48  ;;  %v8133_v47 = vpack.c.bf16 %v863_v38, %v862_v36  ;;  %v129_v48 = vld [vmem:[%s10082_s0 + $0x138] sm:$0xff]  ;;  %v914_v58 = vld [vmem:[#allocation3 + $0x13c0] sm:$0xff]  ;;  %v915_v59 = vld [vmem:[#allocation3 + $0x13c8] sm:$0xff]  ;;  %v8169_v61 = vpack.c.bf16 %v897_v55, %v896_v53 }
 0x16a   :  { %v2040_v7 = vadd.f32 %v5754_v63, %v9520_v37  ;;  %8120 = vmatprep.subr.bf16.mxu1 %v8119_v54  ;;  %v219_v37 = vld [vmem:[%s10082_s0 + $0x408] sm:$0xff]  ;;  %v865_v52 = vld [vmem:[#allocation3 + $0x1238] sm:$0xff]  ;;  %v8167_v54 = vpack.c.bf16 %v913_v45, %v912_v44  ;;  %v8139_v63 = vpack.c.bf16 %v883_v57, %v882_v56  ;;  %v866_v1 = vld [vmem:[#allocation3 + $0x1240] sm:$0xff] }
 0x16b   :  { %v8137_v60 = vpack.c.bf16 %v865_v52, %v864_v51  ;;  %v888_v30 = vld [vmem:[#allocation3 + $0x12f0] sm:$0xff]  ;;  %v873_v44 = vld [vmem:[#allocation3 + $0x1278] sm:$0xff]  ;;  %v939_v51 = vld [vmem:[#allocation3 + $0x1488] sm:$0xff] }
 0x16c   :  { %v9544_v15 = vadd.f32 %v5792_v3, %v2040_v7  ;;  %8090 = vmatpush3.bf16.msra.mxu0 %v8089_v2  ;;  %v867_v2 = vld [vmem:[#allocation3 + $0x1248] sm:$0xff]  ;;  %v898_v3 = vld [vmem:[#allocation3 + $0x1340] sm:$0xff]  ;;  %v916_v7 = vld [vmem:[#allocation3 + $0x13d0] sm:$0xff] }
 0x16d   :  { %8122 = vmatpush3.bf16.msra.mxu1 %v8121_v0  ;;  %8124 = vmatprep.subr.bf16.mxu0 %v8123_v4  ;;  %v8171_v0 = vpack.c.bf16 %v915_v59, %v914_v58  ;;  %v899_v4 = vld [vmem:[#allocation3 + $0x1348] sm:$0xff]  ;;  %v872_v43 = vld [vmem:[#allocation3 + $0x1270] sm:$0xff]  ;;  %v222_v25 = vld [vmem:[%s10082_s0 + $0x420] sm:$0xff] }
 0x16e   :  { %8156 = vmatprep.subr.bf16.mxu1 %v8155_v9  ;;  %v8141_v9 = vpack.c.bf16 %v867_v2, %v866_v1  ;;  %v8173_v10 = vpack.c.bf16 %v899_v4, %v898_v3  ;;  %v904_v45 = vld [vmem:[#allocation3 + $0x1370] sm:$0xff]  ;;  %v971_v55 = vld [vmem:[#allocation3 + $0x1588] sm:$0xff]  ;;  %v8153_v59 = vpack.c.bf16 %v873_v44, %v872_v43  ;;  %v126_v3 = vld [vmem:[%s10082_s0 + $0x120] sm:$0xff] }
 0x16f   :  { %3083 = vmatmul.mubr.f32.vlgmr.msra.gmra.mrb[32].mxu0 %v122_v8  ;;  %v917_v8 = vld [vmem:[#allocation3 + $0x13d8] sm:$0xff]  ;;  %v923_v1 = vld [vmem:[#allocation3 + $0x1408] sm:$0xff]  ;;  %v954_v4 = vld [vmem:[#allocation3 + $0x1500] sm:$0xff] }
 0x170   :  { %8126 = vmatpush3.bf16.msra.mxu0 %v8125_v16  ;;  %3158 = vmatmul.mubr.f32.vlgmr.msra.gmra.mrb[32].mxu1 %v124_v12  ;;  %v868_v12 = vld [vmem:[#allocation3 + $0x1250] sm:$0xff]  ;;  %v8175_v16 = vpack.c.bf16 %v917_v8, %v916_v7  ;;  %v955_v5 = vld [vmem:[#allocation3 + $0x1508] sm:$0xff]  ;;  %v941_v8 = vld [vmem:[#allocation3 + $0x1498] sm:$0xff] }
 0x171   :  { %8158 = vmatpush3.bf16.msra.mxu1 %v8157_v19  ;;  %3087 = vmatprep.mubr.f32.mxu0 %v219_v37  ;;  %v901_v37 = vld [vmem:[#allocation3 + $0x1358] sm:$0xff]  ;;  %v918_v19 = vld [vmem:[#allocation3 + $0x13e0] sm:$0xff]  ;;  %v8145_v21 = vpack.c.bf16 %v869_v13, %v868_v12  ;;  %v940_v7 = vld [vmem:[#allocation3 + $0x1490] sm:$0xff]  ;;  %v8221_v13 = vpack.c.bf16 %v955_v5, %v954_v4 }
 0x172   :  { %8128 = vmatprep.subr.bf16.mxu0 %v8127_v23  ;;  %3162 = vmatprep.mubr.f32.mxu1 %v221_v27  ;;  %v8177_v22 = vpack.c.bf16 %v901_v37, %v900_v14  ;;  %v8147_v23 = vpack.c.bf16 %v887_v18, %v886_v17  ;;  %v973_v12 = vld [vmem:[#allocation3 + $0x1598] sm:$0xff]  ;;  %v924_v14 = vld [vmem:[#allocation3 + $0x1410] sm:$0xff]  ;;  %v8191_v17 = vpack.c.bf16 %v941_v8, %v940_v7  ;;  %v975_v24 = vld [vmem:[#allocation3 + $0x15a8] sm:$0xff] }
 0x173   :  { %3088 = vmatmul.mubr.f32.gmra.mrb[34].mxu0 %v218_v31  ;;  %8160 = vmatprep.subr.bf16.mxu1 %v8159_v28  ;;  %v8179_v28 = vpack.c.bf16 %v919_v20, %v918_v19  ;;  %v889_v31 = vld [vmem:[#allocation3 + $0x12f8] sm:$0xff]  ;;  %v956_v37 = vld [vmem:[#allocation3 + $0x1510] sm:$0xff]  ;;  %v942_v19 = vld [vmem:[#allocation3 + $0x14a0] sm:$0xff] }
 0x174   :  { %8130 = vmatpush3.bf16.msra.mxu0 %v8129_v32  ;;  %3163 = vmatmul.mubr.f32.gmra.mrb[34].mxu1 %v220_v33  ;;  %v8151_v42 = vpack.c.bf16 %v889_v31, %v888_v30  ;;  %v957_v18 = vld [vmem:[#allocation3 + $0x1518] sm:$0xff]  ;;  %v943_v20 = vld [vmem:[#allocation3 + $0x14a8] sm:$0xff]  ;;  %v926_v30 = vld [vmem:[#allocation3 + $0x1420] sm:$0xff] }
 0x175   :  { %8162 = vmatpush3.bf16.msra.mxu1 %v8161_v34  ;;  %8132 = vmatprep.subr.bf16.mxu0 %v8131_v35  ;;  %v920_v34 = vld [vmem:[#allocation3 + $0x13f0] sm:$0xff]  ;;  %v921_v35 = vld [vmem:[#allocation3 + $0x13f8] sm:$0xff]  ;;  %v8195_v29 = vpack.c.bf16 %v943_v20, %v942_v19  ;;  %v927_v31 = vld [vmem:[#allocation3 + $0x1428] sm:$0xff] }
 0x176   :  { %8164 = vmatprep.subr.bf16.mxu1 %v8163_v40  ;;  %3232 = vmatprep.mubr.f32.mxu0 %v127_v46  ;;  %v933_v7 = vld [vmem:[#allocation3 + $0x1458] sm:$0xff]  ;;  %v964_v8 = vld [vmem:[#allocation3 + $0x1550] sm:$0xff]  ;;  %v935_v19 = vld [vmem:[#allocation3 + $0x1468] sm:$0xff] }
 0x177   :  { %3307 = vmatprep.mubr.f32.mxu1 %v129_v48  ;;  %v8183_v48 = vpack.c.bf16 %v921_v35, %v920_v34  ;;  %v959_v34 = vld [vmem:[#allocation3 + $0x1528] sm:$0xff]  ;;  %v944_v35 = vld [vmem:[#allocation3 + $0x14b0] sm:$0xff]  ;;  %v966_v20 = vld [vmem:[#allocation3 + $0x1560] sm:$0xff] }
 0x178   :  { %8134 = vmatpush3.bf16.msra.mxu0 %v8133_v47 }
 0x179   :  { %8166 = vmatpush3.bf16.msra.mxu1 %v8165_v49  ;;  %8136 = vmatprep.subr.bf16.mxu0 %v8135_v50  ;;  %v905_v49 = vld [vmem:[#allocation3 + $0x1378] sm:$0xff]  ;;  %v938_v50 = vld [vmem:[#allocation3 + $0x1480] sm:$0xff] }
 0x17a   :  { %8168 = vmatprep.subr.bf16.mxu1 %v8167_v54  ;;  %v970_v54 = vld [vmem:[#allocation3 + $0x1580] sm:$0xff] }
 0x17c   :  { %8138 = vmatpush3.bf16.msra.mxu0 %v8137_v60 }
 0x17d   :  { %8170 = vmatpush3.bf16.msra.mxu1 %v8169_v61  ;;  %8140 = vmatprep.subr.bf16.mxu0 %v8139_v63  ;;  %v8187_v61 = vpack.c.bf16 %v939_v51, %v938_v50  ;;  %v922_v63 = vld [vmem:[#allocation3 + $0x1400] sm:$0xff]  ;;  %v947_v51 = vld [vmem:[#allocation3 + $0x14c8] sm:$0xff] }
 0x17e   :  { %8172 = vmatprep.subr.bf16.mxu1 %v8171_v0  ;;  %v8219_v0 = vpack.c.bf16 %v971_v55, %v970_v54  ;;  %v946_v50 = vld [vmem:[#allocation3 + $0x14c0] sm:$0xff] }
 0x180   :  { %8142 = vmatpush3.bf16.msra.mxu0 %v8141_v9 }
 0x181   :  { %8174 = vmatpush3.bf16.msra.mxu1 %v8173_v10  ;;  %8144 = vmatprep.subr.bf16.mxu0 %v8143_v11  ;;  %v8189_v10 = vpack.c.bf16 %v923_v1, %v922_v63  ;;  %v972_v11 = vld [vmem:[#allocation3 + $0x1590] sm:$0xff]  ;;  %v949_v1 = vld [vmem:[#allocation3 + $0x14d8] sm:$0xff] }
 0x182   :  { %v5825_v27 = vpop.f32.mrb[8].mxu0  ;;  %8176 = vmatprep.subr.bf16.mxu1 %v8175_v16  ;;  %v925_v16 = vld [vmem:[#allocation3 + $0x1418] sm:$0xff]  ;;  %v948_v63 = vld [vmem:[#allocation3 + $0x14d0] sm:$0xff] }
 0x183   :  { %v5826_v32 = vpop.f32.mrb[9].mxu0  ;;  %v5863_v33 = vpop.f32.mrb[8].mxu1  ;;  %v8193_v26 = vpack.c.bf16 %v925_v16, %v924_v14  ;;  %v8207_v5 = vpack.c.bf16 %v949_v1, %v948_v63  ;;  %v983_v14 = vld [vmem:[#allocation3 + $0x15e8] sm:$0xff]  ;;  %v132_v1 = vld [vmem:[%s10082_s0 + $0x150] sm:$0xff] }
 0x184   :  { %v5827_v36 = vadd.f32 %v5826_v32, %v5825_v27  ;;  %8146 = vmatpush3.bf16.msra.mxu0 %v8145_v21  ;;  %v5864_v38 = vpop.f32.mrb[9].mxu1  ;;  %v225_v21 = vld [vmem:[%s10082_s0 + $0x438] sm:$0xff]  ;;  %v224_v27 = vld [vmem:[%s10082_s0 + $0x430] sm:$0xff]  ;;  %v958_v32 = vld [vmem:[#allocation3 + $0x1520] sm:$0xff] }
 0x185   :  { %v5865_v40 = vadd.f32 %v5864_v38, %v5863_v33  ;;  %8178 = vmatpush3.bf16.msra.mxu1 %v8177_v22  ;;  %8148 = vmatprep.subr.bf16.mxu0 %v8147_v23  ;;  %v8223_v22 = vpack.c.bf16 %v973_v12, %v972_v11  ;;  %v974_v23 = vld [vmem:[#allocation3 + $0x15a0] sm:$0xff]  ;;  %v976_v38 = vld [vmem:[#allocation3 + $0x15b0] sm:$0xff]  ;;  %v8229_v43 = vpack.c.bf16 %v959_v34, %v958_v32  ;;  %v951_v12 = vld [vmem:[#allocation3 + $0x14e8] sm:$0xff] }
 0x186   :  { %v2185_v46 = vadd.f32 %v5827_v36, %v9535_v62  ;;  %v5828_v47 = vpop.f32.mrb[10].mxu0  ;;  %8180 = vmatprep.subr.bf16.mxu1 %v8179_v28  ;;  %v8185_v62 = vpack.c.bf16 %v905_v49, %v904_v45  ;;  %v8225_v28 = vpack.c.bf16 %v957_v18, %v956_v37  ;;  %v8227_v33 = vpack.c.bf16 %v975_v24, %v974_v23  ;;  %v945_v36 = vld [vmem:[#allocation3 + $0x14b8] sm:$0xff]  ;;  %v928_v45 = vld [vmem:[#allocation3 + $0x1430] sm:$0xff]  ;;  %v950_v11 = vld [vmem:[#allocation3 + $0x14e0] sm:$0xff] }
 0x187   :  { %v5829_v52 = vpop.f32.mrb[11].mxu0  ;;  %v5866_v53 = vpop.f32.mrb[10].mxu1  ;;  %v8199_v44 = vpack.c.bf16 %v945_v36, %v944_v35  ;;  %v961_v49 = vld [vmem:[#allocation3 + $0x1538] sm:$0xff]  ;;  %v934_v18 = vld [vmem:[#allocation3 + $0x1460] sm:$0xff]  ;;  %v967_v23 = vld [vmem:[#allocation3 + $0x1568] sm:$0xff] }
 0x188   :  { %v9565_v56 = vadd.f32 %v5865_v40, %v2185_v46  ;;  %v5830_v57 = vadd.f32 %v5829_v52, %v5828_v47  ;;  %8150 = vmatpush3.bf16.msra.mxu0 %v8149_v39  ;;  %v5867_v58 = vpop.f32.mrb[11].mxu1  ;;  %v977_v39 = vld [vmem:[#allocation3 + $0x15b8] sm:$0xff]  ;;  %v131_v40 = vld [vmem:[%s10082_s0 + $0x148] sm:$0xff]  ;;  %v960_v47 = vld [vmem:[#allocation3 + $0x1530] sm:$0xff]  ;;  %v8213_v32 = vpack.c.bf16 %v935_v19, %v934_v18  ;;  %v8245_v34 = vpack.c.bf16 %v967_v23, %v966_v20 }
 0x189   :  { %v5868_v60 = vadd.f32 %v5867_v58, %v5866_v53  ;;  %8182 = vmatpush3.bf16.msra.mxu1 %v8181_v41  ;;  %8152 = vmatprep.subr.bf16.mxu0 %v8151_v42  ;;  %v8197_v41 = vpack.c.bf16 %v927_v31, %v926_v30  ;;  %v133_v42 = vld [vmem:[%s10082_s0 + $0x158] sm:$0xff]  ;;  %v978_v52 = vld [vmem:[#allocation3 + $0x15c0] sm:$0xff]  ;;  %v979_v53 = vld [vmem:[#allocation3 + $0x15c8] sm:$0xff]  ;;  %v8233_v55 = vpack.c.bf16 %v961_v49, %v960_v47 }
 0x18a   :  { %v2190_v2 = vadd.f32 %v5830_v57, %v9544_v15  ;;  %8184 = vmatprep.subr.bf16.mxu1 %v8183_v48  ;;  %v223_v15 = vld [vmem:[%s10082_s0 + $0x428] sm:$0xff]  ;;  %v929_v46 = vld [vmem:[#allocation3 + $0x1438] sm:$0xff]  ;;  %v8231_v48 = vpack.c.bf16 %v977_v39, %v976_v38  ;;  %v8203_v57 = vpack.c.bf16 %v947_v51, %v946_v50  ;;  %v930_v58 = vld [vmem:[#allocation3 + $0x1440] sm:$0xff] }
 0x18b   :  { %v8201_v54 = vpack.c.bf16 %v929_v46, %v928_v45  ;;  %v952_v24 = vld [vmem:[#allocation3 + $0x14f0] sm:$0xff]  ;;  %v937_v38 = vld [vmem:[#allocation3 + $0x1478] sm:$0xff]  ;;  %v1003_v45 = vld [vmem:[#allocation3 + $0x1688] sm:$0xff] }
 0x18c   :  { %v9574_v9 = vadd.f32 %v5868_v60, %v2190_v2  ;;  %8154 = vmatpush3.bf16.msra.mxu0 %v8153_v59  ;;  %v931_v59 = vld [vmem:[#allocation3 + $0x1448] sm:$0xff]  ;;  %v962_v60 = vld [vmem:[#allocation3 + $0x1540] sm:$0xff]  ;;  %v980_v2 = vld [vmem:[#allocation3 + $0x15d0] sm:$0xff] }
 0x18d   :  { %8186 = vmatpush3.bf16.msra.mxu1 %v8185_v62  ;;  %8188 = vmatprep.subr.bf16.mxu0 %v8187_v61  ;;  %v8235_v62 = vpack.c.bf16 %v979_v53, %v978_v52  ;;  %v963_v61 = vld [vmem:[#allocation3 + $0x1548] sm:$0xff]  ;;  %v936_v36 = vld [vmem:[#allocation3 + $0x1470] sm:$0xff]  ;;  %v226_v19 = vld [vmem:[%s10082_s0 + $0x440] sm:$0xff] }
 0x18e   :  { %8220 = vmatprep.subr.bf16.mxu1 %v8219_v0  ;;  %v8205_v0 = vpack.c.bf16 %v931_v59, %v930_v58  ;;  %v8237_v4 = vpack.c.bf16 %v963_v61, %v962_v60  ;;  %v968_v39 = vld [vmem:[#allocation3 + $0x1570] sm:$0xff]  ;;  %v1035_v49 = vld [vmem:[#allocation3 + $0x1788] sm:$0xff]  ;;  %v8217_v53 = vpack.c.bf16 %v937_v38, %v936_v36  ;;  %v130_v60 = vld [vmem:[%s10082_s0 + $0x140] sm:$0xff] }
 0x18f   :  { %3233 = vmatmul.mubr.f32.vlgmr.msra.gmra.mrb[36].mxu0 %v126_v3  ;;  %v981_v3 = vld [vmem:[#allocation3 + $0x15d8] sm:$0xff]  ;;  %v987_v58 = vld [vmem:[#allocation3 + $0x1608] sm:$0xff]  ;;  %v1018_v61 = vld [vmem:[#allocation3 + $0x1700] sm:$0xff] }
 0x190   :  { %8190 = vmatpush3.bf16.msra.mxu0 %v8189_v10  ;;  %3308 = vmatmul.mubr.f32.vlgmr.msra.gmra.mrb[36].mxu1 %v128_v6  ;;  %v932_v6 = vld [vmem:[#allocation3 + $0x1450] sm:$0xff]  ;;  %v8239_v10 = vpack.c.bf16 %v981_v3, %v980_v2  ;;  %v1019_v63 = vld [vmem:[#allocation3 + $0x1708] sm:$0xff]  ;;  %v1005_v3 = vld [vmem:[#allocation3 + $0x1698] sm:$0xff] }
 0x191   :  { %8222 = vmatpush3.bf16.msra.mxu1 %v8221_v13  ;;  %3237 = vmatprep.mubr.f32.mxu0 %v223_v15  ;;  %v965_v15 = vld [vmem:[#allocation3 + $0x1558] sm:$0xff]  ;;  %v982_v13 = vld [vmem:[#allocation3 + $0x15e0] sm:$0xff]  ;;  %v8209_v16 = vpack.c.bf16 %v933_v7, %v932_v6  ;;  %v1004_v2 = vld [vmem:[#allocation3 + $0x1690] sm:$0xff]  ;;  %v8285_v7 = vpack.c.bf16 %v1019_v63, %v1018_v61 }
 0x192   :  { %8192 = vmatprep.subr.bf16.mxu0 %v8191_v17  ;;  %3312 = vmatprep.mubr.f32.mxu1 %v225_v21  ;;  %v8241_v37 = vpack.c.bf16 %v965_v15, %v964_v8  ;;  %v8211_v17 = vpack.c.bf16 %v951_v12, %v950_v11  ;;  %v1037_v6 = vld [vmem:[#allocation3 + $0x1798] sm:$0xff]  ;;  %v988_v8 = vld [vmem:[#allocation3 + $0x1610] sm:$0xff]  ;;  %v8255_v11 = vpack.c.bf16 %v1005_v3, %v1004_v2  ;;  %v1039_v18 = vld [vmem:[#allocation3 + $0x17a8] sm:$0xff] }
 0x193   :  { %3238 = vmatmul.mubr.f32.gmra.mrb[38].mxu0 %v222_v25  ;;  %8224 = vmatprep.subr.bf16.mxu1 %v8223_v22  ;;  %v8243_v22 = vpack.c.bf16 %v983_v14, %v982_v13  ;;  %v953_v25 = vld [vmem:[#allocation3 + $0x14f8] sm:$0xff]  ;;  %v1020_v15 = vld [vmem:[#allocation3 + $0x1710] sm:$0xff]  ;;  %v1006_v13 = vld [vmem:[#allocation3 + $0x16a0] sm:$0xff] }
 0x194   :  { %8194 = vmatpush3.bf16.msra.mxu0 %v8193_v26  ;;  %3313 = vmatmul.mubr.f32.gmra.mrb[38].mxu1 %v224_v27  ;;  %v8215_v35 = vpack.c.bf16 %v953_v25, %v952_v24  ;;  %v1021_v12 = vld [vmem:[#allocation3 + $0x1718] sm:$0xff]  ;;  %v1007_v14 = vld [vmem:[#allocation3 + $0x16a8] sm:$0xff]  ;;  %v990_v24 = vld [vmem:[#allocation3 + $0x1620] sm:$0xff] }
 0x195   :  { %8226 = vmatpush3.bf16.msra.mxu1 %v8225_v28  ;;  %8196 = vmatprep.subr.bf16.mxu0 %v8195_v29  ;;  %v984_v28 = vld [vmem:[#allocation3 + $0x15f0] sm:$0xff]  ;;  %v985_v29 = vld [vmem:[#allocation3 + $0x15f8] sm:$0xff]  ;;  %v8259_v23 = vpack.c.bf16 %v1007_v14, %v1006_v13  ;;  %v991_v25 = vld [vmem:[#allocation3 + $0x1628] sm:$0xff] }
 0x196   :  { %8228 = vmatprep.subr.bf16.mxu1 %v8227_v33  ;;  %3382 = vmatprep.mubr.f32.mxu0 %v131_v40  ;;  %v997_v2 = vld [vmem:[#allocation3 + $0x1658] sm:$0xff]  ;;  %v1028_v3 = vld [vmem:[#allocation3 + $0x1750] sm:$0xff]  ;;  %v999_v13 = vld [vmem:[#allocation3 + $0x1668] sm:$0xff] }
 0x197   :  { %3457 = vmatprep.mubr.f32.mxu1 %v133_v42  ;;  %v8247_v42 = vpack.c.bf16 %v985_v29, %v984_v28  ;;  %v1023_v28 = vld [vmem:[#allocation3 + $0x1728] sm:$0xff]  ;;  %v1008_v29 = vld [vmem:[#allocation3 + $0x16b0] sm:$0xff]  ;;  %v1030_v14 = vld [vmem:[#allocation3 + $0x1760] sm:$0xff] }
 0x198   :  { %8198 = vmatpush3.bf16.msra.mxu0 %v8197_v41 }
 0x199   :  { %8230 = vmatpush3.bf16.msra.mxu1 %v8229_v43  ;;  %8200 = vmatprep.subr.bf16.mxu0 %v8199_v44  ;;  %v969_v43 = vld [vmem:[#allocation3 + $0x1578] sm:$0xff]  ;;  %v1002_v44 = vld [vmem:[#allocation3 + $0x1680] sm:$0xff] }
 0x19a   :  { %8232 = vmatprep.subr.bf16.mxu1 %v8231_v48  ;;  %v1034_v48 = vld [vmem:[#allocation3 + $0x1780] sm:$0xff] }
 0x19c   :  { %8202 = vmatpush3.bf16.msra.mxu0 %v8201_v54 }
 0x19d   :  { %8234 = vmatpush3.bf16.msra.mxu1 %v8233_v55  ;;  %8204 = vmatprep.subr.bf16.mxu0 %v8203_v57  ;;  %v8251_v55 = vpack.c.bf16 %v1003_v45, %v1002_v44  ;;  %v986_v57 = vld [vmem:[#allocation3 + $0x1600] sm:$0xff]  ;;  %v1011_v45 = vld [vmem:[#allocation3 + $0x16c8] sm:$0xff] }
 0x19e   :  { %8236 = vmatprep.subr.bf16.mxu1 %v8235_v62  ;;  %v8283_v62 = vpack.c.bf16 %v1035_v49, %v1034_v48  ;;  %v1010_v44 = vld [vmem:[#allocation3 + $0x16c0] sm:$0xff] }
 0x1a0   :  { %8206 = vmatpush3.bf16.msra.mxu0 %v8205_v0 }
 0x1a1   :  { %8238 = vmatpush3.bf16.msra.mxu1 %v8237_v4  ;;  %8208 = vmatprep.subr.bf16.mxu0 %v8207_v5  ;;  %v8253_v4 = vpack.c.bf16 %v987_v58, %v986_v57  ;;  %v1036_v5 = vld [vmem:[#allocation3 + $0x1790] sm:$0xff]  ;;  %v1013_v58 = vld [vmem:[#allocation3 + $0x16d8] sm:$0xff] }
 0x1a2   :  { %v5901_v21 = vpop.f32.mrb[12].mxu0  ;;  %8240 = vmatprep.subr.bf16.mxu1 %v8239_v10  ;;  %v989_v10 = vld [vmem:[#allocation3 + $0x1618] sm:$0xff]  ;;  %v1012_v57 = vld [vmem:[#allocation3 + $0x16d0] sm:$0xff] }
 0x1a3   :  { %v5902_v26 = vpop.f32.mrb[13].mxu0  ;;  %v5939_v27 = vpop.f32.mrb[12].mxu1  ;;  %v8257_v20 = vpack.c.bf16 %v989_v10, %v988_v8  ;;  %v8271_v63 = vpack.c.bf16 %v1013_v58, %v1012_v57  ;;  %v1047_v8 = vld [vmem:[#allocation3 + $0x17e8] sm:$0xff]  ;;  %v136_v58 = vld [vmem:[%s10082_s0 + $0x170] sm:$0xff] }
 0x1a4   :  { %v5903_v30 = vadd.f32 %v5902_v26, %v5901_v21  ;;  %8210 = vmatpush3.bf16.msra.mxu0 %v8209_v16  ;;  %v5940_v31 = vpop.f32.mrb[13].mxu1  ;;  %v229_v16 = vld [vmem:[%s10082_s0 + $0x458] sm:$0xff]  ;;  %v228_v21 = vld [vmem:[%s10082_s0 + $0x450] sm:$0xff]  ;;  %v1022_v26 = vld [vmem:[#allocation3 + $0x1720] sm:$0xff] }
 0x1a5   :  { %v5941_v33 = vadd.f32 %v5940_v31, %v5939_v27  ;;  %8242 = vmatpush3.bf16.msra.mxu1 %v8241_v37  ;;  %8212 = vmatprep.subr.bf16.mxu0 %v8211_v17  ;;  %v8287_v37 = vpack.c.bf16 %v1037_v6, %v1036_v5  ;;  %v1038_v17 = vld [vmem:[#allocation3 + $0x17a0] sm:$0xff]  ;;  %v1040_v31 = vld [vmem:[#allocation3 + $0x17b0] sm:$0xff]  ;;  %v8293_v36 = vpack.c.bf16 %v1023_v28, %v1022_v26  ;;  %v1015_v6 = vld [vmem:[#allocation3 + $0x16e8] sm:$0xff] }
 0x1a6   :  { %v2335_v40 = vadd.f32 %v5903_v30, %v9565_v56  ;;  %v5904_v41 = vpop.f32.mrb[14].mxu0  ;;  %8244 = vmatprep.subr.bf16.mxu1 %v8243_v22  ;;  %v8249_v56 = vpack.c.bf16 %v969_v43, %v968_v39  ;;  %v8289_v22 = vpack.c.bf16 %v1021_v12, %v1020_v15  ;;  %v8291_v27 = vpack.c.bf16 %v1039_v18, %v1038_v17  ;;  %v1009_v30 = vld [vmem:[#allocation3 + $0x16b8] sm:$0xff]  ;;  %v992_v39 = vld [vmem:[#allocation3 + $0x1630] sm:$0xff]  ;;  %v1014_v5 = vld [vmem:[#allocation3 + $0x16e0] sm:$0xff] }
 0x1a7   :  { %v5905_v46 = vpop.f32.mrb[15].mxu0  ;;  %v5942_v47 = vpop.f32.mrb[14].mxu1  ;;  %v8263_v38 = vpack.c.bf16 %v1009_v30, %v1008_v29  ;;  %v1025_v43 = vld [vmem:[#allocation3 + $0x1738] sm:$0xff]  ;;  %v998_v12 = vld [vmem:[#allocation3 + $0x1660] sm:$0xff]  ;;  %v1031_v17 = vld [vmem:[#allocation3 + $0x1768] sm:$0xff] }
 0x1a8   :  { %v9595_v50 = vadd.f32 %v5941_v33, %v2335_v40  ;;  %v5906_v51 = vadd.f32 %v5905_v46, %v5904_v41  ;;  %8214 = vmatpush3.bf16.msra.mxu0 %v8213_v32  ;;  %v5943_v52 = vpop.f32.mrb[15].mxu1  ;;  %v1041_v32 = vld [vmem:[#allocation3 + $0x17b8] sm:$0xff]  ;;  %v135_v33 = vld [vmem:[%s10082_s0 + $0x168] sm:$0xff]  ;;  %v1024_v41 = vld [vmem:[#allocation3 + $0x1730] sm:$0xff]  ;;  %v8277_v26 = vpack.c.bf16 %v999_v13, %v998_v12  ;;  %v8309_v28 = vpack.c.bf16 %v1031_v17, %v1030_v14 }
 0x1a9   :  { %v5944_v54 = vadd.f32 %v5943_v52, %v5942_v47  ;;  %8246 = vmatpush3.bf16.msra.mxu1 %v8245_v34  ;;  %8216 = vmatprep.subr.bf16.mxu0 %v8215_v35  ;;  %v8261_v34 = vpack.c.bf16 %v991_v25, %v990_v24  ;;  %v137_v35 = vld [vmem:[%s10082_s0 + $0x178] sm:$0xff]  ;;  %v1042_v46 = vld [vmem:[#allocation3 + $0x17c0] sm:$0xff]  ;;  %v1043_v47 = vld [vmem:[#allocation3 + $0x17c8] sm:$0xff]  ;;  %v8297_v49 = vpack.c.bf16 %v1025_v43, %v1024_v41 }
 0x1aa   :  { %v2340_v59 = vadd.f32 %v5906_v51, %v9574_v9  ;;  %8248 = vmatprep.subr.bf16.mxu1 %v8247_v42  ;;  %v227_v9 = vld [vmem:[%s10082_s0 + $0x448] sm:$0xff]  ;;  %v993_v40 = vld [vmem:[#allocation3 + $0x1638] sm:$0xff]  ;;  %v8295_v42 = vpack.c.bf16 %v1041_v32, %v1040_v31  ;;  %v8267_v51 = vpack.c.bf16 %v1011_v45, %v1010_v44  ;;  %v994_v52 = vld [vmem:[#allocation3 + $0x1640] sm:$0xff] }
 0x1ab   :  { %v8265_v48 = vpack.c.bf16 %v993_v40, %v992_v39  ;;  %v1016_v18 = vld [vmem:[#allocation3 + $0x16f0] sm:$0xff]  ;;  %v1001_v31 = vld [vmem:[#allocation3 + $0x1678] sm:$0xff]  ;;  %v1067_v39 = vld [vmem:[#allocation3 + $0x1888] sm:$0xff] }
 0x1ac   :  { %v9604_v0 = vadd.f32 %v5944_v54, %v2340_v59  ;;  %8218 = vmatpush3.bf16.msra.mxu0 %v8217_v53  ;;  %v995_v53 = vld [vmem:[#allocation3 + $0x1648] sm:$0xff]  ;;  %v1026_v54 = vld [vmem:[#allocation3 + $0x1740] sm:$0xff]  ;;  %v1044_v59 = vld [vmem:[#allocation3 + $0x17d0] sm:$0xff] }
 0x1ad   :  { %8250 = vmatpush3.bf16.msra.mxu1 %v8249_v56  ;;  %8252 = vmatprep.subr.bf16.mxu0 %v8251_v55  ;;  %v8299_v56 = vpack.c.bf16 %v1043_v47, %v1042_v46  ;;  %v1027_v55 = vld [vmem:[#allocation3 + $0x1748] sm:$0xff]  ;;  %v1000_v30 = vld [vmem:[#allocation3 + $0x1670] sm:$0xff]  ;;  %v230_v13 = vld [vmem:[%s10082_s0 + $0x460] sm:$0xff] }
 0x1ae   :  { %8284 = vmatprep.subr.bf16.mxu1 %v8283_v62  ;;  %v8269_v62 = vpack.c.bf16 %v995_v53, %v994_v52  ;;  %v8301_v61 = vpack.c.bf16 %v1027_v55, %v1026_v54  ;;  %v1032_v32 = vld [vmem:[#allocation3 + $0x1770] sm:$0xff]  ;;  %v1099_v43 = vld [vmem:[#allocation3 + $0x1988] sm:$0xff]  ;;  %v8281_v47 = vpack.c.bf16 %v1001_v31, %v1000_v30  ;;  %v134_v54 = vld [vmem:[%s10082_s0 + $0x160] sm:$0xff] }
 0x1af   :  { %3383 = vmatmul.mubr.f32.vlgmr.msra.gmra.mrb[40].mxu0 %v130_v60  ;;  %v1045_v60 = vld [vmem:[#allocation3 + $0x17d8] sm:$0xff]  ;;  %v1051_v52 = vld [vmem:[#allocation3 + $0x1808] sm:$0xff]  ;;  %v1082_v55 = vld [vmem:[#allocation3 + $0x1900] sm:$0xff] }
 0x1b0   :  { %8254 = vmatpush3.bf16.msra.mxu0 %v8253_v4  ;;  %3458 = vmatmul.mubr.f32.vlgmr.msra.gmra.mrb[40].mxu1 %v132_v1  ;;  %v996_v1 = vld [vmem:[#allocation3 + $0x1650] sm:$0xff]  ;;  %v8303_v4 = vpack.c.bf16 %v1045_v60, %v1044_v59  ;;  %v1083_v57 = vld [vmem:[#allocation3 + $0x1908] sm:$0xff]  ;;  %v1069_v60 = vld [vmem:[#allocation3 + $0x1898] sm:$0xff] }
 0x1b1   :  { %8286 = vmatpush3.bf16.msra.mxu1 %v8285_v7  ;;  %3387 = vmatprep.mubr.f32.mxu0 %v227_v9  ;;  %v1029_v9 = vld [vmem:[#allocation3 + $0x1758] sm:$0xff]  ;;  %v1046_v7 = vld [vmem:[#allocation3 + $0x17e0] sm:$0xff]  ;;  %v8273_v10 = vpack.c.bf16 %v997_v2, %v996_v1  ;;  %v1068_v59 = vld [vmem:[#allocation3 + $0x1890] sm:$0xff]  ;;  %v8349_v2 = vpack.c.bf16 %v1083_v57, %v1082_v55 }
 0x1b2   :  { %8256 = vmatprep.subr.bf16.mxu0 %v8255_v11  ;;  %3462 = vmatprep.mubr.f32.mxu1 %v229_v16  ;;  %v8305_v15 = vpack.c.bf16 %v1029_v9, %v1028_v3  ;;  %v8275_v11 = vpack.c.bf16 %v1015_v6, %v1014_v5  ;;  %v1101_v1 = vld [vmem:[#allocation3 + $0x1998] sm:$0xff]  ;;  %v1052_v3 = vld [vmem:[#allocation3 + $0x1810] sm:$0xff]  ;;  %v8319_v5 = vpack.c.bf16 %v1069_v60, %v1068_v59  ;;  %v1103_v12 = vld [vmem:[#allocation3 + $0x19a8] sm:$0xff] }
 0x1b3   :  { %3388 = vmatmul.mubr.f32.gmra.mrb[42].mxu0 %v226_v19  ;;  %8288 = vmatprep.subr.bf16.mxu1 %v8287_v37  ;;  %v8307_v37 = vpack.c.bf16 %v1047_v8, %v1046_v7  ;;  %v1017_v19 = vld [vmem:[#allocation3 + $0x16f8] sm:$0xff]  ;;  %v1084_v9 = vld [vmem:[#allocation3 + $0x1910] sm:$0xff]  ;;  %v1070_v7 = vld [vmem:[#allocation3 + $0x18a0] sm:$0xff] }
 0x1b4   :  { %8258 = vmatpush3.bf16.msra.mxu0 %v8257_v20  ;;  %3463 = vmatmul.mubr.f32.gmra.mrb[42].mxu1 %v228_v21  ;;  %v8279_v29 = vpack.c.bf16 %v1017_v19, %v1016_v18  ;;  %v1085_v6 = vld [vmem:[#allocation3 + $0x1918] sm:$0xff]  ;;  %v1071_v8 = vld [vmem:[#allocation3 + $0x18a8] sm:$0xff]  ;;  %v1054_v18 = vld [vmem:[#allocation3 + $0x1820] sm:$0xff] }
 0x1b5   :  { %8290 = vmatpush3.bf16.msra.mxu1 %v8289_v22  ;;  %8260 = vmatprep.subr.bf16.mxu0 %v8259_v23  ;;  %v1048_v22 = vld [vmem:[#allocation3 + $0x17f0] sm:$0xff]  ;;  %v1049_v23 = vld [vmem:[#allocation3 + $0x17f8] sm:$0xff]  ;;  %v8323_v17 = vpack.c.bf16 %v1071_v8, %v1070_v7  ;;  %v1055_v19 = vld [vmem:[#allocation3 + $0x1828] sm:$0xff] }
 0x1b6   :  { %8292 = vmatprep.subr.bf16.mxu1 %v8291_v27  ;;  %3532 = vmatprep.mubr.f32.mxu0 %v135_v33  ;;  %v1061_v59 = vld [vmem:[#allocation3 + $0x1858] sm:$0xff]  ;;  %v1092_v60 = vld [vmem:[#allocation3 + $0x1950] sm:$0xff]  ;;  %v1063_v7 = vld [vmem:[#allocation3 + $0x1868] sm:$0xff] }
 0x1b7   :  { %3607 = vmatprep.mubr.f32.mxu1 %v137_v35  ;;  %v8311_v35 = vpack.c.bf16 %v1049_v23, %v1048_v22  ;;  %v1087_v22 = vld [vmem:[#allocation3 + $0x1928] sm:$0xff]  ;;  %v1072_v23 = vld [vmem:[#allocation3 + $0x18b0] sm:$0xff]  ;;  %v1094_v8 = vld [vmem:[#allocation3 + $0x1960] sm:$0xff] }
 0x1b8   :  { %8262 = vmatpush3.bf16.msra.mxu0 %v8261_v34 }
 0x1b9   :  { %8294 = vmatpush3.bf16.msra.mxu1 %v8293_v36  ;;  %8264 = vmatprep.subr.bf16.mxu0 %v8263_v38  ;;  %v1033_v36 = vld [vmem:[#allocation3 + $0x1778] sm:$0xff]  ;;  %v1066_v38 = vld [vmem:[#allocation3 + $0x1880] sm:$0xff] }
 0x1ba   :  { %8296 = vmatprep.subr.bf16.mxu1 %v8295_v42  ;;  %v1098_v42 = vld [vmem:[#allocation3 + $0x1980] sm:$0xff] }
 0x1bc   :  { %8266 = vmatpush3.bf16.msra.mxu0 %v8265_v48 }
 0x1bd   :  { %8298 = vmatpush3.bf16.msra.mxu1 %v8297_v49  ;;  %8268 = vmatprep.subr.bf16.mxu0 %v8267_v51  ;;  %v8315_v49 = vpack.c.bf16 %v1067_v39, %v1066_v38  ;;  %v1050_v51 = vld [vmem:[#allocation3 + $0x1800] sm:$0xff]  ;;  %v1075_v39 = vld [vmem:[#allocation3 + $0x18c8] sm:$0xff] }
 0x1be   :  { %8300 = vmatprep.subr.bf16.mxu1 %v8299_v56  ;;  %v8347_v56 = vpack.c.bf16 %v1099_v43, %v1098_v42  ;;  %v1074_v38 = vld [vmem:[#allocation3 + $0x18c0] sm:$0xff] }
 0x1c0   :  { %8270 = vmatpush3.bf16.msra.mxu0 %v8269_v62 }
 0x1c1   :  { %8302 = vmatpush3.bf16.msra.mxu1 %v8301_v61  ;;  %8272 = vmatprep.subr.bf16.mxu0 %v8271_v63  ;;  %v8317_v61 = vpack.c.bf16 %v1051_v52, %v1050_v51  ;;  %v1100_v63 = vld [vmem:[#allocation3 + $0x1990] sm:$0xff]  ;;  %v1077_v52 = vld [vmem:[#allocation3 + $0x18d8] sm:$0xff] }
 0x1c2   :  { %v5977_v16 = vpop.f32.mrb[16].mxu0  ;;  %8304 = vmatprep.subr.bf16.mxu1 %v8303_v4  ;;  %v1053_v4 = vld [vmem:[#allocation3 + $0x1818] sm:$0xff]  ;;  %v1076_v51 = vld [vmem:[#allocation3 + $0x18d0] sm:$0xff] }
 0x1c3   :  { %v5978_v20 = vpop.f32.mrb[17].mxu0  ;;  %v6015_v21 = vpop.f32.mrb[16].mxu1  ;;  %v8321_v14 = vpack.c.bf16 %v1053_v4, %v1052_v3  ;;  %v8335_v57 = vpack.c.bf16 %v1077_v52, %v1076_v51  ;;  %v1111_v3 = vld [vmem:[#allocation3 + $0x19e8] sm:$0xff]  ;;  %v140_v52 = vld [vmem:[%s10082_s0 + $0x190] sm:$0xff] }
 0x1c4   :  { %v5979_v24 = vadd.f32 %v5978_v20, %v5977_v16  ;;  %8274 = vmatpush3.bf16.msra.mxu0 %v8273_v10  ;;  %v6016_v25 = vpop.f32.mrb[17].mxu1  ;;  %v233_v10 = vld [vmem:[%s10082_s0 + $0x478] sm:$0xff]  ;;  %v232_v16 = vld [vmem:[%s10082_s0 + $0x470] sm:$0xff]  ;;  %v1086_v20 = vld [vmem:[#allocation3 + $0x1920] sm:$0xff] }
 0x1c5   :  { %v6017_v27 = vadd.f32 %v6016_v25, %v6015_v21  ;;  %8306 = vmatpush3.bf16.msra.mxu1 %v8305_v15  ;;  %8276 = vmatprep.subr.bf16.mxu0 %v8275_v11  ;;  %v8351_v15 = vpack.c.bf16 %v1101_v1, %v1100_v63  ;;  %v1102_v11 = vld [vmem:[#allocation3 + $0x19a0] sm:$0xff]  ;;  %v1104_v25 = vld [vmem:[#allocation3 + $0x19b0] sm:$0xff]  ;;  %v8357_v30 = vpack.c.bf16 %v1087_v22, %v1086_v20  ;;  %v1079_v1 = vld [vmem:[#allocation3 + $0x18e8] sm:$0xff] }
 0x1c6   :  { %v2485_v33 = vadd.f32 %v5979_v24, %v9595_v50  ;;  %v5980_v34 = vpop.f32.mrb[18].mxu0  ;;  %8308 = vmatprep.subr.bf16.mxu1 %v8307_v37  ;;  %v8313_v50 = vpack.c.bf16 %v1033_v36, %v1032_v32  ;;  %v8353_v37 = vpack.c.bf16 %v1085_v6, %v1084_v9  ;;  %v8355_v21 = vpack.c.bf16 %v1103_v12, %v1102_v11  ;;  %v1073_v24 = vld [vmem:[#allocation3 + $0x18b8] sm:$0xff]  ;;  %v1056_v32 = vld [vmem:[#allocation3 + $0x1830] sm:$0xff]  ;;  %v1078_v63 = vld [vmem:[#allocation3 + $0x18e0] sm:$0xff] }
 0x1c7   :  { %v5981_v40 = vpop.f32.mrb[19].mxu0  ;;  %v6018_v41 = vpop.f32.mrb[18].mxu1  ;;  %v8327_v31 = vpack.c.bf16 %v1073_v24, %v1072_v23  ;;  %v1089_v36 = vld [vmem:[#allocation3 + $0x1938] sm:$0xff]  ;;  %v1062_v6 = vld [vmem:[#allocation3 + $0x1860] sm:$0xff]  ;;  %v1095_v11 = vld [vmem:[#allocation3 + $0x1968] sm:$0xff] }
 0x1c8   :  { %v9625_v44 = vadd.f32 %v6017_v27, %v2485_v33  ;;  %v5982_v45 = vadd.f32 %v5981_v40, %v5980_v34  ;;  %8278 = vmatpush3.bf16.msra.mxu0 %v8277_v26  ;;  %v6019_v46 = vpop.f32.mrb[19].mxu1  ;;  %v1105_v26 = vld [vmem:[#allocation3 + $0x19b8] sm:$0xff]  ;;  %v139_v27 = vld [vmem:[%s10082_s0 + $0x188] sm:$0xff]  ;;  %v1088_v34 = vld [vmem:[#allocation3 + $0x1930] sm:$0xff]  ;;  %v8341_v20 = vpack.c.bf16 %v1063_v7, %v1062_v6  ;;  %v8373_v22 = vpack.c.bf16 %v1095_v11, %v1094_v8 }
 0x1c9   :  { %v6020_v48 = vadd.f32 %v6019_v46, %v6018_v41  ;;  %8310 = vmatpush3.bf16.msra.mxu1 %v8309_v28  ;;  %8280 = vmatprep.subr.bf16.mxu0 %v8279_v29  ;;  %v8325_v28 = vpack.c.bf16 %v1055_v19, %v1054_v18  ;;  %v141_v29 = vld [vmem:[%s10082_s0 + $0x198] sm:$0xff]  ;;  %v1106_v40 = vld [vmem:[#allocation3 + $0x19c0] sm:$0xff]  ;;  %v1107_v41 = vld [vmem:[#allocation3 + $0x19c8] sm:$0xff]  ;;  %v8361_v43 = vpack.c.bf16 %v1089_v36, %v1088_v34 }
 0x1ca   :  { %v2490_v53 = vadd.f32 %v5982_v45, %v9604_v0  ;;  %8312 = vmatprep.subr.bf16.mxu1 %v8311_v35  ;;  %v231_v0 = vld [vmem:[%s10082_s0 + $0x468] sm:$0xff]  ;;  %v1057_v33 = vld [vmem:[#allocation3 + $0x1838] sm:$0xff]  ;;  %v8359_v35 = vpack.c.bf16 %v1105_v26, %v1104_v25  ;;  %v8331_v45 = vpack.c.bf16 %v1075_v39, %v1074_v38  ;;  %v1058_v46 = vld [vmem:[#allocation3 + $0x1840] sm:$0xff] }
 0x1cb   :  { %v8329_v42 = vpack.c.bf16 %v1057_v33, %v1056_v32  ;;  %v1080_v12 = vld [vmem:[#allocation3 + $0x18f0] sm:$0xff]  ;;  %v1065_v25 = vld [vmem:[#allocation3 + $0x1878] sm:$0xff]  ;;  %v1131_v32 = vld [vmem:[#allocation3 + $0x1a88] sm:$0xff] }
 0x1cc   :  { %v9634_v62 = vadd.f32 %v6020_v48, %v2490_v53  ;;  %8282 = vmatpush3.bf16.msra.mxu0 %v8281_v47  ;;  %v1059_v47 = vld [vmem:[#allocation3 + $0x1848] sm:$0xff]  ;;  %v1090_v48 = vld [vmem:[#allocation3 + $0x1940] sm:$0xff]  ;;  %v1108_v53 = vld [vmem:[#allocation3 + $0x19d0] sm:$0xff] }
 0x1cd   :  { %8314 = vmatpush3.bf16.msra.mxu1 %v8313_v50  ;;  %8316 = vmatprep.subr.bf16.mxu0 %v8315_v49  ;;  %v8363_v50 = vpack.c.bf16 %v1107_v41, %v1106_v40  ;;  %v1091_v49 = vld [vmem:[#allocation3 + $0x1948] sm:$0xff]  ;;  %v1064_v24 = vld [vmem:[#allocation3 + $0x1870] sm:$0xff]  ;;  %v234_v7 = vld [vmem:[%s10082_s0 + $0x480] sm:$0xff] }
 0x1ce   :  { %8348 = vmatprep.subr.bf16.mxu1 %v8347_v56  ;;  %v8333_v56 = vpack.c.bf16 %v1059_v47, %v1058_v46  ;;  %v8365_v55 = vpack.c.bf16 %v1091_v49, %v1090_v48  ;;  %v1096_v26 = vld [vmem:[#allocation3 + $0x1970] sm:$0xff]  ;;  %v1163_v36 = vld [vmem:[#allocation3 + $0x1b88] sm:$0xff]  ;;  %v8345_v41 = vpack.c.bf16 %v1065_v25, %v1064_v24  ;;  %v138_v48 = vld [vmem:[%s10082_s0 + $0x180] sm:$0xff] }
 0x1cf   :  { %3533 = vmatmul.mubr.f32.vlgmr.msra.gmra.mrb[44].mxu0 %v134_v54  ;;  %v1109_v54 = vld [vmem:[#allocation3 + $0x19d8] sm:$0xff]  ;;  %v1115_v46 = vld [vmem:[#allocation3 + $0x1a08] sm:$0xff]  ;;  %v1146_v49 = vld [vmem:[#allocation3 + $0x1b00] sm:$0xff] }
 0x1d0   :  { %8318 = vmatpush3.bf16.msra.mxu0 %v8317_v61  ;;  %3608 = vmatmul.mubr.f32.vlgmr.msra.gmra.mrb[44].mxu1 %v136_v58  ;;  %v1060_v58 = vld [vmem:[#allocation3 + $0x1850] sm:$0xff]  ;;  %v8367_v61 = vpack.c.bf16 %v1109_v54, %v1108_v53  ;;  %v1147_v51 = vld [vmem:[#allocation3 + $0x1b08] sm:$0xff]  ;;  %v1133_v54 = vld [vmem:[#allocation3 + $0x1a98] sm:$0xff] }
 0x1d1   :  { %8350 = vmatpush3.bf16.msra.mxu1 %v8349_v2  ;;  %3537 = vmatprep.mubr.f32.mxu0 %v231_v0  ;;  %v1093_v0 = vld [vmem:[#allocation3 + $0x1958] sm:$0xff]  ;;  %v1110_v2 = vld [vmem:[#allocation3 + $0x19e0] sm:$0xff]  ;;  %v8337_v4 = vpack.c.bf16 %v1061_v59, %v1060_v58  ;;  %v1132_v53 = vld [vmem:[#allocation3 + $0x1a90] sm:$0xff]  ;;  %v8413_v59 = vpack.c.bf16 %v1147_v51, %v1146_v49 }
 0x1d2   :  { %8320 = vmatprep.subr.bf16.mxu0 %v8319_v5  ;;  %3612 = vmatprep.mubr.f32.mxu1 %v233_v10  ;;  %v8369_v9 = vpack.c.bf16 %v1093_v0, %v1092_v60  ;;  %v8339_v5 = vpack.c.bf16 %v1079_v1, %v1078_v63  ;;  %v1165_v58 = vld [vmem:[#allocation3 + $0x1b98] sm:$0xff]  ;;  %v1116_v60 = vld [vmem:[#allocation3 + $0x1a10] sm:$0xff]  ;;  %v8383_v63 = vpack.c.bf16 %v1133_v54, %v1132_v53  ;;  %v1167_v6 = vld [vmem:[#allocation3 + $0x1ba8] sm:$0xff] }
 0x1d3   :  { %3538 = vmatmul.mubr.f32.gmra.mrb[46].mxu0 %v230_v13  ;;  %8352 = vmatprep.subr.bf16.mxu1 %v8351_v15  ;;  %v8371_v15 = vpack.c.bf16 %v1111_v3, %v1110_v2  ;;  %v1081_v13 = vld [vmem:[#allocation3 + $0x18f8] sm:$0xff]  ;;  %v1148_v0 = vld [vmem:[#allocation3 + $0x1b10] sm:$0xff]  ;;  %v1134_v2 = vld [vmem:[#allocation3 + $0x1aa0] sm:$0xff] }
 0x1d4   :  { %8322 = vmatpush3.bf16.msra.mxu0 %v8321_v14  ;;  %3613 = vmatmul.mubr.f32.gmra.mrb[46].mxu1 %v232_v16  ;;  %v8343_v23 = vpack.c.bf16 %v1081_v13, %v1080_v12  ;;  %v1149_v1 = vld [vmem:[#allocation3 + $0x1b18] sm:$0xff]  ;;  %v1135_v3 = vld [vmem:[#allocation3 + $0x1aa8] sm:$0xff]  ;;  %v1118_v12 = vld [vmem:[#allocation3 + $0x1a20] sm:$0xff] }
 0x1d5   :  { %8354 = vmatpush3.bf16.msra.mxu1 %v8353_v37  ;;  %8324 = vmatprep.subr.bf16.mxu0 %v8323_v17  ;;  %v1112_v37 = vld [vmem:[#allocation3 + $0x19f0] sm:$0xff]  ;;  %v1113_v17 = vld [vmem:[#allocation3 + $0x19f8] sm:$0xff]  ;;  %v8387_v11 = vpack.c.bf16 %v1135_v3, %v1134_v2  ;;  %v1119_v13 = vld [vmem:[#allocation3 + $0x1a28] sm:$0xff] }
 0x1d6   :  { %8356 = vmatprep.subr.bf16.mxu1 %v8355_v21  ;;  %3682 = vmatprep.mubr.f32.mxu0 %v139_v27  ;;  %v1125_v53 = vld [vmem:[#allocation3 + $0x1a58] sm:$0xff]  ;;  %v1156_v54 = vld [vmem:[#allocation3 + $0x1b50] sm:$0xff]  ;;  %v1127_v2 = vld [vmem:[#allocation3 + $0x1a68] sm:$0xff] }
 0x1d7   :  { %3757 = vmatprep.mubr.f32.mxu1 %v141_v29  ;;  %v8375_v29 = vpack.c.bf16 %v1113_v17, %v1112_v37  ;;  %v1151_v37 = vld [vmem:[#allocation3 + $0x1b28] sm:$0xff]  ;;  %v1136_v17 = vld [vmem:[#allocation3 + $0x1ab0] sm:$0xff]  ;;  %v1158_v3 = vld [vmem:[#allocation3 + $0x1b60] sm:$0xff] }
 0x1d8   :  { %8326 = vmatpush3.bf16.msra.mxu0 %v8325_v28 }
 0x1d9   :  { %8358 = vmatpush3.bf16.msra.mxu1 %v8357_v30  ;;  %8328 = vmatprep.subr.bf16.mxu0 %v8327_v31  ;;  %v1097_v30 = vld [vmem:[#allocation3 + $0x1978] sm:$0xff]  ;;  %v1130_v31 = vld [vmem:[#allocation3 + $0x1a80] sm:$0xff] }
 0x1da   :  { %8360 = vmatprep.subr.bf16.mxu1 %v8359_v35  ;;  %v1162_v35 = vld [vmem:[#allocation3 + $0x1b80] sm:$0xff] }
 0x1dc   :  { %8330 = vmatpush3.bf16.msra.mxu0 %v8329_v42 }
 0x1dd   :  { %8362 = vmatpush3.bf16.msra.mxu1 %v8361_v43  ;;  %8332 = vmatprep.subr.bf16.mxu0 %v8331_v45  ;;  %v8379_v43 = vpack.c.bf16 %v1131_v32, %v1130_v31  ;;  %v1114_v45 = vld [vmem:[#allocation3 + $0x1a00] sm:$0xff]  ;;  %v1139_v32 = vld [vmem:[#allocation3 + $0x1ac8] sm:$0xff] }
 0x1de   :  { %8364 = vmatprep.subr.bf16.mxu1 %v8363_v50  ;;  %v8411_v50 = vpack.c.bf16 %v1163_v36, %v1162_v35  ;;  %v1138_v31 = vld [vmem:[#allocation3 + $0x1ac0] sm:$0xff] }
 0x1e0   :  { %8334 = vmatpush3.bf16.msra.mxu0 %v8333_v56 }
 0x1e1   :  { %8366 = vmatpush3.bf16.msra.mxu1 %v8365_v55  ;;  %8336 = vmatprep.subr.bf16.mxu0 %v8335_v57  ;;  %v8381_v55 = vpack.c.bf16 %v1115_v46, %v1114_v45  ;;  %v1164_v57 = vld [vmem:[#allocation3 + $0x1b90] sm:$0xff]  ;;  %v1141_v46 = vld [vmem:[#allocation3 + $0x1ad8] sm:$0xff] }
 0x1e2   :  { %v6053_v10 = vpop.f32.mrb[20].mxu0  ;;  %8368 = vmatprep.subr.bf16.mxu1 %v8367_v61  ;;  %v1117_v61 = vld [vmem:[#allocation3 + $0x1a18] sm:$0xff]  ;;  %v1140_v45 = vld [vmem:[#allocation3 + $0x1ad0] sm:$0xff] }
 0x1e3   :  { %v6054_v14 = vpop.f32.mrb[21].mxu0  ;;  %v6091_v16 = vpop.f32.mrb[20].mxu1  ;;  %v8385_v8 = vpack.c.bf16 %v1117_v61, %v1116_v60  ;;  %v8399_v51 = vpack.c.bf16 %v1141_v46, %v1140_v45  ;;  %v1175_v60 = vld [vmem:[#allocation3 + $0x1be8] sm:$0xff]  ;;  %v144_v46 = vld [vmem:[%s10082_s0 + $0x1b0] sm:$0xff] }
 0x1e4   :  { %v6055_v18 = vadd.f32 %v6054_v14, %v6053_v10  ;;  %8338 = vmatpush3.bf16.msra.mxu0 %v8337_v4  ;;  %v6092_v19 = vpop.f32.mrb[21].mxu1  ;;  %v237_v4 = vld [vmem:[%s10082_s0 + $0x498] sm:$0xff]  ;;  %v236_v10 = vld [vmem:[%s10082_s0 + $0x490] sm:$0xff]  ;;  %v1150_v14 = vld [vmem:[#allocation3 + $0x1b20] sm:$0xff] }
 0x1e5   :  { %v6093_v21 = vadd.f32 %v6092_v19, %v6091_v16  ;;  %8370 = vmatpush3.bf16.msra.mxu1 %v8369_v9  ;;  %8340 = vmatprep.subr.bf16.mxu0 %v8339_v5  ;;  %v8415_v9 = vpack.c.bf16 %v1165_v58, %v1164_v57  ;;  %v1166_v5 = vld [vmem:[#allocation3 + $0x1ba0] sm:$0xff]  ;;  %v1168_v19 = vld [vmem:[#allocation3 + $0x1bb0] sm:$0xff]  ;;  %v8421_v24 = vpack.c.bf16 %v1151_v37, %v1150_v14  ;;  %v1143_v58 = vld [vmem:[#allocation3 + $0x1ae8] sm:$0xff] }
 0x1e6   :  { %v2635_v27 = vadd.f32 %v6055_v18, %v9625_v44  ;;  %v6056_v28 = vpop.f32.mrb[22].mxu0  ;;  %8372 = vmatprep.subr.bf16.mxu1 %v8371_v15  ;;  %v8377_v44 = vpack.c.bf16 %v1097_v30, %v1096_v26  ;;  %v8417_v15 = vpack.c.bf16 %v1149_v1, %v1148_v0  ;;  %v8419_v16 = vpack.c.bf16 %v1167_v6, %v1166_v5  ;;  %v1137_v18 = vld [vmem:[#allocation3 + $0x1ab8] sm:$0xff]  ;;  %v1120_v26 = vld [vmem:[#allocation3 + $0x1a30] sm:$0xff]  ;;  %v1142_v57 = vld [vmem:[#allocation3 + $0x1ae0] sm:$0xff] }
 0x1e7   :  { %v6057_v33 = vpop.f32.mrb[23].mxu0  ;;  %v6094_v34 = vpop.f32.mrb[22].mxu1  ;;  %v8391_v25 = vpack.c.bf16 %v1137_v18, %v1136_v17  ;;  %v1153_v30 = vld [vmem:[#allocation3 + $0x1b38] sm:$0xff]  ;;  %v1126_v1 = vld [vmem:[#allocation3 + $0x1a60] sm:$0xff]  ;;  %v1159_v5 = vld [vmem:[#allocation3 + $0x1b68] sm:$0xff] }
 0x1e8   :  { %v9655_v38 = vadd.f32 %v6093_v21, %v2635_v27  ;;  %v6058_v39 = vadd.f32 %v6057_v33, %v6056_v28  ;;  %8342 = vmatpush3.bf16.msra.mxu0 %v8341_v20  ;;  %v6095_v40 = vpop.f32.mrb[23].mxu1  ;;  %v1169_v20 = vld [vmem:[#allocation3 + $0x1bb8] sm:$0xff]  ;;  %v143_v21 = vld [vmem:[%s10082_s0 + $0x1a8] sm:$0xff]  ;;  %v1152_v28 = vld [vmem:[#allocation3 + $0x1b30] sm:$0xff]  ;;  %v8405_v14 = vpack.c.bf16 %v1127_v2, %v1126_v1  ;;  %v8437_v37 = vpack.c.bf16 %v1159_v5, %v1158_v3 }
 0x1e9   :  { %v6096_v42 = vadd.f32 %v6095_v40, %v6094_v34  ;;  %8374 = vmatpush3.bf16.msra.mxu1 %v8373_v22  ;;  %8344 = vmatprep.subr.bf16.mxu0 %v8343_v23  ;;  %v8389_v22 = vpack.c.bf16 %v1119_v13, %v1118_v12  ;;  %v145_v23 = vld [vmem:[%s10082_s0 + $0x1b8] sm:$0xff]  ;;  %v1170_v33 = vld [vmem:[#allocation3 + $0x1bc0] sm:$0xff]  ;;  %v1171_v34 = vld [vmem:[#allocation3 + $0x1bc8] sm:$0xff]  ;;  %v8425_v36 = vpack.c.bf16 %v1153_v30, %v1152_v28 }
 0x1ea   :  { %v2640_v47 = vadd.f32 %v6058_v39, %v9634_v62  ;;  %8376 = vmatprep.subr.bf16.mxu1 %v8375_v29  ;;  %v235_v62 = vld [vmem:[%s10082_s0 + $0x488] sm:$0xff]  ;;  %v1121_v27 = vld [vmem:[#allocation3 + $0x1a38] sm:$0xff]  ;;  %v8423_v29 = vpack.c.bf16 %v1169_v20, %v1168_v19  ;;  %v8395_v39 = vpack.c.bf16 %v1139_v32, %v1138_v31  ;;  %v1122_v40 = vld [vmem:[#allocation3 + $0x1a40] sm:$0xff] }
 0x1eb   :  { %v8393_v35 = vpack.c.bf16 %v1121_v27, %v1120_v26  ;;  %v1144_v6 = vld [vmem:[#allocation3 + $0x1af0] sm:$0xff]  ;;  %v1129_v19 = vld [vmem:[#allocation3 + $0x1a78] sm:$0xff]  ;;  %v1195_v26 = vld [vmem:[#allocation3 + $0x1c88] sm:$0xff] }
 0x1ec   :  { %v9664_v56 = vadd.f32 %v6096_v42, %v2640_v47  ;;  %8346 = vmatpush3.bf16.msra.mxu0 %v8345_v41  ;;  %v1123_v41 = vld [vmem:[#allocation3 + $0x1a48] sm:$0xff]  ;;  %v1154_v42 = vld [vmem:[#allocation3 + $0x1b40] sm:$0xff]  ;;  %v1172_v47 = vld [vmem:[#allocation3 + $0x1bd0] sm:$0xff] }
 0x1ed   :  { %8378 = vmatpush3.bf16.msra.mxu1 %v8377_v44  ;;  %8380 = vmatprep.subr.bf16.mxu0 %v8379_v43  ;;  %v8427_v44 = vpack.c.bf16 %v1171_v34, %v1170_v33  ;;  %v1155_v43 = vld [vmem:[#allocation3 + $0x1b48] sm:$0xff]  ;;  %v1128_v18 = vld [vmem:[#allocation3 + $0x1a70] sm:$0xff]  ;;  %v238_v2 = vld [vmem:[%s10082_s0 + $0x4a0] sm:$0xff] }
 0x1ee   :  { %8412 = vmatprep.subr.bf16.mxu1 %v8411_v50  ;;  %v8397_v50 = vpack.c.bf16 %v1123_v41, %v1122_v40  ;;  %v8429_v49 = vpack.c.bf16 %v1155_v43, %v1154_v42  ;;  %v1160_v20 = vld [vmem:[#allocation3 + $0x1b70] sm:$0xff]  ;;  %v1227_v30 = vld [vmem:[#allocation3 + $0x1d88] sm:$0xff]  ;;  %v8409_v34 = vpack.c.bf16 %v1129_v19, %v1128_v18  ;;  %v142_v42 = vld [vmem:[%s10082_s0 + $0x1a0] sm:$0xff] }
 0x1ef   :  { %3683 = vmatmul.mubr.f32.vlgmr.msra.gmra.mrb[48].mxu0 %v138_v48  ;;  %v1173_v48 = vld [vmem:[#allocation3 + $0x1bd8] sm:$0xff]  ;;  %v1179_v40 = vld [vmem:[#allocation3 + $0x1c08] sm:$0xff]  ;;  %v1210_v43 = vld [vmem:[#allocation3 + $0x1d00] sm:$0xff] }
 0x1f0   :  { %8382 = vmatpush3.bf16.msra.mxu0 %v8381_v55  ;;  %3758 = vmatmul.mubr.f32.vlgmr.msra.gmra.mrb[48].mxu1 %v140_v52  ;;  %v1124_v52 = vld [vmem:[#allocation3 + $0x1a50] sm:$0xff]  ;;  %v8431_v55 = vpack.c.bf16 %v1173_v48, %v1172_v47  ;;  %v1211_v45 = vld [vmem:[#allocation3 + $0x1d08] sm:$0xff]  ;;  %v1197_v48 = vld [vmem:[#allocation3 + $0x1c98] sm:$0xff] }
 0x1f1   :  { %8414 = vmatpush3.bf16.msra.mxu1 %v8413_v59  ;;  %3687 = vmatprep.mubr.f32.mxu0 %v235_v62  ;;  %v1157_v62 = vld [vmem:[#allocation3 + $0x1b58] sm:$0xff]  ;;  %v1174_v59 = vld [vmem:[#allocation3 + $0x1be0] sm:$0xff]  ;;  %v8401_v61 = vpack.c.bf16 %v1125_v53, %v1124_v52  ;;  %v1196_v47 = vld [vmem:[#allocation3 + $0x1c90] sm:$0xff]  ;;  %v8477_v53 = vpack.c.bf16 %v1211_v45, %v1210_v43 }
 0x1f2   :  { %8384 = vmatprep.subr.bf16.mxu0 %v8383_v63  ;;  %3762 = vmatprep.mubr.f32.mxu1 %v237_v4  ;;  %v8433_v0 = vpack.c.bf16 %v1157_v62, %v1156_v54  ;;  %v8403_v63 = vpack.c.bf16 %v1143_v58, %v1142_v57  ;;  %v1229_v52 = vld [vmem:[#allocation3 + $0x1d98] sm:$0xff]  ;;  %v1180_v54 = vld [vmem:[#allocation3 + $0x1c10] sm:$0xff]  ;;  %v8447_v57 = vpack.c.bf16 %v1197_v48, %v1196_v47  ;;  %v1231_v1 = vld [vmem:[#allocation3 + $0x1da8] sm:$0xff] }
 0x1f3   :  { %3688 = vmatmul.mubr.f32.gmra.mrb[50].mxu0 %v234_v7  ;;  %8416 = vmatprep.subr.bf16.mxu1 %v8415_v9  ;;  %v8435_v9 = vpack.c.bf16 %v1175_v60, %v1174_v59  ;;  %v1145_v7 = vld [vmem:[#allocation3 + $0x1af8] sm:$0xff]  ;;  %v1212_v62 = vld [vmem:[#allocation3 + $0x1d10] sm:$0xff]  ;;  %v1198_v59 = vld [vmem:[#allocation3 + $0x1ca0] sm:$0xff] }
 0x1f4   :  { %8386 = vmatpush3.bf16.msra.mxu0 %v8385_v8  ;;  %3763 = vmatmul.mubr.f32.gmra.mrb[50].mxu1 %v236_v10  ;;  %v8407_v17 = vpack.c.bf16 %v1145_v7, %v1144_v6  ;;  %v1213_v58 = vld [vmem:[#allocation3 + $0x1d18] sm:$0xff]  ;;  %v1199_v60 = vld [vmem:[#allocation3 + $0x1ca8] sm:$0xff]  ;;  %v1182_v6 = vld [vmem:[#allocation3 + $0x1c20] sm:$0xff] }
 0x1f5   :  { %8418 = vmatpush3.bf16.msra.mxu1 %v8417_v15  ;;  %8388 = vmatprep.subr.bf16.mxu0 %v8387_v11  ;;  %v1176_v15 = vld [vmem:[#allocation3 + $0x1bf0] sm:$0xff]  ;;  %v1177_v11 = vld [vmem:[#allocation3 + $0x1bf8] sm:$0xff]  ;;  %v8451_v5 = vpack.c.bf16 %v1199_v60, %v1198_v59  ;;  %v1183_v7 = vld [vmem:[#allocation3 + $0x1c28] sm:$0xff] }
 0x1f6   :  { %8420 = vmatprep.subr.bf16.mxu1 %v8419_v16  ;;  %3832 = vmatprep.mubr.f32.mxu0 %v143_v21  ;;  %v1189_v47 = vld [vmem:[#allocation3 + $0x1c58] sm:$0xff]  ;;  %v1220_v48 = vld [vmem:[#allocation3 + $0x1d50] sm:$0xff]  ;;  %v1191_v59 = vld [vmem:[#allocation3 + $0x1c68] sm:$0xff] }
 0x1f7   :  { %3907 = vmatprep.mubr.f32.mxu1 %v145_v23  ;;  %v8439_v23 = vpack.c.bf16 %v1177_v11, %v1176_v15  ;;  %v1215_v15 = vld [vmem:[#allocation3 + $0x1d28] sm:$0xff]  ;;  %v1200_v11 = vld [vmem:[#allocation3 + $0x1cb0] sm:$0xff]  ;;  %v1222_v60 = vld [vmem:[#allocation3 + $0x1d60] sm:$0xff] }
 0x1f8   :  { %8390 = vmatpush3.bf16.msra.mxu0 %v8389_v22 }
 0x1f9   :  { %8422 = vmatpush3.bf16.msra.mxu1 %v8421_v24  ;;  %8392 = vmatprep.subr.bf16.mxu0 %v8391_v25  ;;  %v1161_v24 = vld [vmem:[#allocation3 + $0x1b78] sm:$0xff]  ;;  %v1194_v25 = vld [vmem:[#allocation3 + $0x1c80] sm:$0xff] }
 0x1fa   :  { %8424 = vmatprep.subr.bf16.mxu1 %v8423_v29  ;;  %v1226_v29 = vld [vmem:[#allocation3 + $0x1d80] sm:$0xff] }
 0x1fc   :  { %8394 = vmatpush3.bf16.msra.mxu0 %v8393_v35 }
 0x1fd   :  { %8426 = vmatpush3.bf16.msra.mxu1 %v8425_v36  ;;  %8396 = vmatprep.subr.bf16.mxu0 %v8395_v39  ;;  %v8443_v36 = vpack.c.bf16 %v1195_v26, %v1194_v25  ;;  %v1178_v39 = vld [vmem:[#allocation3 + $0x1c00] sm:$0xff]  ;;  %v1203_v26 = vld [vmem:[#allocation3 + $0x1cc8] sm:$0xff] }
 0x1fe   :  { %8428 = vmatprep.subr.bf16.mxu1 %v8427_v44  ;;  %v8475_v44 = vpack.c.bf16 %v1227_v30, %v1226_v29  ;;  %v1202_v25 = vld [vmem:[#allocation3 + $0x1cc0] sm:$0xff] }
 0x200   :  { %8398 = vmatpush3.bf16.msra.mxu0 %v8397_v50 }
 0x201   :  { %8430 = vmatpush3.bf16.msra.mxu1 %v8429_v49  ;;  %8400 = vmatprep.subr.bf16.mxu0 %v8399_v51  ;;  %v8445_v49 = vpack.c.bf16 %v1179_v40, %v1178_v39  ;;  %v1228_v51 = vld [vmem:[#allocation3 + $0x1d90] sm:$0xff]  ;;  %v1205_v40 = vld [vmem:[#allocation3 + $0x1cd8] sm:$0xff] }
 0x202   :  { %v6129_v4 = vpop.f32.mrb[24].mxu0  ;;  %8432 = vmatprep.subr.bf16.mxu1 %v8431_v55  ;;  %v1181_v55 = vld [vmem:[#allocation3 + $0x1c18] sm:$0xff]  ;;  %v1204_v39 = vld [vmem:[#allocation3 + $0x1cd0] sm:$0xff] }
 0x203   :  { %v6130_v8 = vpop.f32.mrb[25].mxu0  ;;  %v6167_v10 = vpop.f32.mrb[24].mxu1  ;;  %v8449_v3 = vpack.c.bf16 %v1181_v55, %v1180_v54  ;;  %v8463_v45 = vpack.c.bf16 %v1205_v40, %v1204_v39  ;;  %v1239_v54 = vld [vmem:[#allocation3 + $0x1de8] sm:$0xff]  ;;  %v148_v40 = vld [vmem:[%s10082_s0 + $0x1d0] sm:$0xff] }
 0x204   :  { %v6131_v12 = vadd.f32 %v6130_v8, %v6129_v4  ;;  %8402 = vmatpush3.bf16.msra.mxu0 %v8401_v61  ;;  %v6168_v13 = vpop.f32.mrb[25].mxu1  ;;  %v241_v61 = vld [vmem:[%s10082_s0 + $0x4b8] sm:$0xff]  ;;  %v240_v4 = vld [vmem:[%s10082_s0 + $0x4b0] sm:$0xff]  ;;  %v1214_v8 = vld [vmem:[#allocation3 + $0x1d20] sm:$0xff] }
 0x205   :  { %v6169_v16 = vadd.f32 %v6168_v13, %v6167_v10  ;;  %8434 = vmatpush3.bf16.msra.mxu1 %v8433_v0  ;;  %8404 = vmatprep.subr.bf16.mxu0 %v8403_v63  ;;  %v8479_v0 = vpack.c.bf16 %v1229_v52, %v1228_v51  ;;  %v1230_v63 = vld [vmem:[#allocation3 + $0x1da0] sm:$0xff]  ;;  %v1232_v13 = vld [vmem:[#allocation3 + $0x1db0] sm:$0xff]  ;;  %v8485_v18 = vpack.c.bf16 %v1215_v15, %v1214_v8  ;;  %v1207_v52 = vld [vmem:[#allocation3 + $0x1ce8] sm:$0xff] }
 0x206   :  { %v2785_v21 = vadd.f32 %v6131_v12, %v9655_v38  ;;  %v6132_v22 = vpop.f32.mrb[26].mxu0  ;;  %8436 = vmatprep.subr.bf16.mxu1 %v8435_v9  ;;  %v8441_v38 = vpack.c.bf16 %v1161_v24, %v1160_v20  ;;  %v8481_v9 = vpack.c.bf16 %v1213_v58, %v1212_v62  ;;  %v8483_v10 = vpack.c.bf16 %v1231_v1, %v1230_v63  ;;  %v1201_v12 = vld [vmem:[#allocation3 + $0x1cb8] sm:$0xff]  ;;  %v1184_v20 = vld [vmem:[#allocation3 + $0x1c30] sm:$0xff]  ;;  %v1206_v51 = vld [vmem:[#allocation3 + $0x1ce0] sm:$0xff] }
 0x207   :  { %v6133_v27 = vpop.f32.mrb[27].mxu0  ;;  %v6170_v28 = vpop.f32.mrb[26].mxu1  ;;  %v8455_v19 = vpack.c.bf16 %v1201_v12, %v1200_v11  ;;  %v1217_v24 = vld [vmem:[#allocation3 + $0x1d38] sm:$0xff]  ;;  %v1190_v58 = vld [vmem:[#allocation3 + $0x1c60] sm:$0xff]  ;;  %v1223_v63 = vld [vmem:[#allocation3 + $0x1d68] sm:$0xff] }
 0x208   :  { %v9685_v31 = vadd.f32 %v6169_v16, %v2785_v21  ;;  %v6134_v32 = vadd.f32 %v6133_v27, %v6132_v22  ;;  %8406 = vmatpush3.bf16.msra.mxu0 %v8405_v14  ;;  %v6171_v33 = vpop.f32.mrb[27].mxu1  ;;  %v1233_v14 = vld [vmem:[#allocation3 + $0x1db8] sm:$0xff]  ;;  %v147_v16 = vld [vmem:[%s10082_s0 + $0x1c8] sm:$0xff]  ;;  %v1216_v22 = vld [vmem:[#allocation3 + $0x1d30] sm:$0xff]  ;;  %v8469_v8 = vpack.c.bf16 %v1191_v59, %v1190_v58  ;;  %v8501_v15 = vpack.c.bf16 %v1223_v63, %v1222_v60 }
 0x209   :  { %v6172_v35 = vadd.f32 %v6171_v33, %v6170_v28  ;;  %8438 = vmatpush3.bf16.msra.mxu1 %v8437_v37  ;;  %8408 = vmatprep.subr.bf16.mxu0 %v8407_v17  ;;  %v8453_v37 = vpack.c.bf16 %v1183_v7, %v1182_v6  ;;  %v149_v17 = vld [vmem:[%s10082_s0 + $0x1d8] sm:$0xff]  ;;  %v1234_v27 = vld [vmem:[#allocation3 + $0x1dc0] sm:$0xff]  ;;  %v1235_v28 = vld [vmem:[#allocation3 + $0x1dc8] sm:$0xff]  ;;  %v8489_v30 = vpack.c.bf16 %v1217_v24, %v1216_v22 }
 0x20a   :  { %v2790_v41 = vadd.f32 %v6134_v32, %v9664_v56  ;;  %8440 = vmatprep.subr.bf16.mxu1 %v8439_v23  ;;  %v239_v56 = vld [vmem:[%s10082_s0 + $0x4a8] sm:$0xff]  ;;  %v1185_v21 = vld [vmem:[#allocation3 + $0x1c38] sm:$0xff]  ;;  %v8487_v23 = vpack.c.bf16 %v1233_v14, %v1232_v13  ;;  %v8459_v32 = vpack.c.bf16 %v1203_v26, %v1202_v25  ;;  %v1186_v33 = vld [vmem:[#allocation3 + $0x1c40] sm:$0xff] }
 0x20b   :  { %v8457_v29 = vpack.c.bf16 %v1185_v21, %v1184_v20  ;;  %v1208_v1 = vld [vmem:[#allocation3 + $0x1cf0] sm:$0xff]  ;;  %v1193_v13 = vld [vmem:[#allocation3 + $0x1c78] sm:$0xff]  ;;  %v1259_v20 = vld [vmem:[#allocation3 + $0x1e88] sm:$0xff] }
 0x20c   :  { %v9694_v50 = vadd.f32 %v6172_v35, %v2790_v41  ;;  %8410 = vmatpush3.bf16.msra.mxu0 %v8409_v34  ;;  %v1187_v34 = vld [vmem:[#allocation3 + $0x1c48] sm:$0xff]  ;;  %v1218_v35 = vld [vmem:[#allocation3 + $0x1d40] sm:$0xff]  ;;  %v1236_v41 = vld [vmem:[#allocation3 + $0x1dd0] sm:$0xff] }
 0x20d   :  { %8442 = vmatpush3.bf16.msra.mxu1 %v8441_v38  ;;  %8444 = vmatprep.subr.bf16.mxu0 %v8443_v36  ;;  %v8491_v38 = vpack.c.bf16 %v1235_v28, %v1234_v27  ;;  %v1219_v36 = vld [vmem:[#allocation3 + $0x1d48] sm:$0xff]  ;;  %v1192_v12 = vld [vmem:[#allocation3 + $0x1c70] sm:$0xff]  ;;  %v242_v59 = vld [vmem:[%s10082_s0 + $0x4c0] sm:$0xff] }
 0x20e   :  { %8476 = vmatprep.subr.bf16.mxu1 %v8475_v44  ;;  %v8461_v44 = vpack.c.bf16 %v1187_v34, %v1186_v33  ;;  %v8493_v43 = vpack.c.bf16 %v1219_v36, %v1218_v35  ;;  %v1224_v14 = vld [vmem:[#allocation3 + $0x1d70] sm:$0xff]  ;;  %v1291_v24 = vld [vmem:[#allocation3 + $0x1f88] sm:$0xff]  ;;  %v8473_v28 = vpack.c.bf16 %v1193_v13, %v1192_v12  ;;  %v146_v35 = vld [vmem:[%s10082_s0 + $0x1c0] sm:$0xff] }
 0x20f   :  { %3833 = vmatmul.mubr.f32.vlgmr.msra.gmra.mrb[52].mxu0 %v142_v42  ;;  %v1237_v42 = vld [vmem:[#allocation3 + $0x1dd8] sm:$0xff]  ;;  %v1243_v33 = vld [vmem:[#allocation3 + $0x1e08] sm:$0xff]  ;;  %v1274_v36 = vld [vmem:[#allocation3 + $0x1f00] sm:$0xff] }
 0x210   :  { %8446 = vmatpush3.bf16.msra.mxu0 %v8445_v49  ;;  %3908 = vmatmul.mubr.f32.vlgmr.msra.gmra.mrb[52].mxu1 %v144_v46  ;;  %v1188_v46 = vld [vmem:[#allocation3 + $0x1c50] sm:$0xff]  ;;  %v8495_v49 = vpack.c.bf16 %v1237_v42, %v1236_v41  ;;  %v1275_v39 = vld [vmem:[#allocation3 + $0x1f08] sm:$0xff]  ;;  %v1261_v42 = vld [vmem:[#allocation3 + $0x1e98] sm:$0xff] }
 0x211   :  { %8478 = vmatpush3.bf16.msra.mxu1 %v8477_v53  ;;  %3837 = vmatprep.mubr.f32.mxu0 %v239_v56  ;;  %v1221_v56 = vld [vmem:[#allocation3 + $0x1d58] sm:$0xff]  ;;  %v1238_v53 = vld [vmem:[#allocation3 + $0x1de0] sm:$0xff]  ;;  %v8465_v55 = vpack.c.bf16 %v1189_v47, %v1188_v46  ;;  %v1260_v41 = vld [vmem:[#allocation3 + $0x1e90] sm:$0xff]  ;;  %v8541_v47 = vpack.c.bf16 %v1275_v39, %v1274_v36 }
 0x212   :  { %8448 = vmatprep.subr.bf16.mxu0 %v8447_v57  ;;  %3912 = vmatprep.mubr.f32.mxu1 %v241_v61  ;;  %v8497_v62 = vpack.c.bf16 %v1221_v56, %v1220_v48  ;;  %v8467_v57 = vpack.c.bf16 %v1207_v52, %v1206_v51  ;;  %v1293_v46 = vld [vmem:[#allocation3 + $0x1f98] sm:$0xff]  ;;  %v1244_v48 = vld [vmem:[#allocation3 + $0x1e10] sm:$0xff]  ;;  %v8511_v51 = vpack.c.bf16 %v1261_v42, %v1260_v41  ;;  %v1295_v58 = vld [vmem:[#allocation3 + $0x1fa8] sm:$0xff] }
 0x213   :  { %3838 = vmatmul.mubr.f32.gmra.mrb[54].mxu0 %v238_v2  ;;  %8480 = vmatprep.subr.bf16.mxu1 %v8479_v0  ;;  %v8499_v0 = vpack.c.bf16 %v1239_v54, %v1238_v53  ;;  %v1209_v2 = vld [vmem:[#allocation3 + $0x1cf8] sm:$0xff]  ;;  %v1276_v56 = vld [vmem:[#allocation3 + $0x1f10] sm:$0xff]  ;;  %v1262_v53 = vld [vmem:[#allocation3 + $0x1ea0] sm:$0xff] }
 0x214   :  { %8450 = vmatpush3.bf16.msra.mxu0 %v8449_v3  ;;  %3913 = vmatmul.mubr.f32.gmra.mrb[54].mxu1 %v240_v4  ;;  %v8471_v11 = vpack.c.bf16 %v1209_v2, %v1208_v1  ;;  %v1277_v52 = vld [vmem:[#allocation3 + $0x1f18] sm:$0xff]  ;;  %v1263_v54 = vld [vmem:[#allocation3 + $0x1ea8] sm:$0xff]  ;;  %v1246_v1 = vld [vmem:[#allocation3 + $0x1e20] sm:$0xff] }
 0x215   :  { %8482 = vmatpush3.bf16.msra.mxu1 %v8481_v9  ;;  %8452 = vmatprep.subr.bf16.mxu0 %v8451_v5  ;;  %v1240_v9 = vld [vmem:[#allocation3 + $0x1df0] sm:$0xff]  ;;  %v1241_v5 = vld [vmem:[#allocation3 + $0x1df8] sm:$0xff]  ;;  %v8515_v63 = vpack.c.bf16 %v1263_v54, %v1262_v53  ;;  %v1247_v2 = vld [vmem:[#allocation3 + $0x1e28] sm:$0xff] }
 0x216   :  { %8484 = vmatprep.subr.bf16.mxu1 %v8483_v10  ;;  %3982 = vmatprep.mubr.f32.mxu0 %v147_v16  ;;  %v1253_v41 = vld [vmem:[#allocation3 + $0x1e58] sm:$0xff]  ;;  %v1284_v42 = vld [vmem:[#allocation3 + $0x1f50] sm:$0xff]  ;;  %v1255_v53 = vld [vmem:[#allocation3 + $0x1e68] sm:$0xff] }
 0x217   :  { %4057 = vmatprep.mubr.f32.mxu1 %v149_v17  ;;  %v8503_v17 = vpack.c.bf16 %v1241_v5, %v1240_v9  ;;  %v1279_v9 = vld [vmem:[#allocation3 + $0x1f28] sm:$0xff]  ;;  %v1264_v5 = vld [vmem:[#allocation3 + $0x1eb0] sm:$0xff]  ;;  %v1286_v54 = vld [vmem:[#allocation3 + $0x1f60] sm:$0xff] }
 0x218   :  { %8454 = vmatpush3.bf16.msra.mxu0 %v8453_v37 }
 0x219   :  { %8486 = vmatpush3.bf16.msra.mxu1 %v8485_v18  ;;  %8456 = vmatprep.subr.bf16.mxu0 %v8455_v19  ;;  %v1225_v18 = vld [vmem:[#allocation3 + $0x1d78] sm:$0xff]  ;;  %v1258_v19 = vld [vmem:[#allocation3 + $0x1e80] sm:$0xff] }
 0x21a   :  { %8488 = vmatprep.subr.bf16.mxu1 %v8487_v23  ;;  %v1290_v23 = vld [vmem:[#allocation3 + $0x1f80] sm:$0xff] }
 0x21c   :  { %8458 = vmatpush3.bf16.msra.mxu0 %v8457_v29 }
 0x21d   :  { %8490 = vmatpush3.bf16.msra.mxu1 %v8489_v30  ;;  %8460 = vmatprep.subr.bf16.mxu0 %v8459_v32  ;;  %v8507_v30 = vpack.c.bf16 %v1259_v20, %v1258_v19  ;;  %v1242_v32 = vld [vmem:[#allocation3 + $0x1e00] sm:$0xff]  ;;  %v1267_v20 = vld [vmem:[#allocation3 + $0x1ec8] sm:$0xff] }
 0x21e   :  { %8492 = vmatprep.subr.bf16.mxu1 %v8491_v38  ;;  %v8539_v38 = vpack.c.bf16 %v1291_v24, %v1290_v23  ;;  %v1266_v19 = vld [vmem:[#allocation3 + $0x1ec0] sm:$0xff] }
 0x220   :  { %8462 = vmatpush3.bf16.msra.mxu0 %v8461_v44 }
 0x221   :  { %8494 = vmatpush3.bf16.msra.mxu1 %v8493_v43  ;;  %8464 = vmatprep.subr.bf16.mxu0 %v8463_v45  ;;  %v8509_v43 = vpack.c.bf16 %v1243_v33, %v1242_v32  ;;  %v1292_v45 = vld [vmem:[#allocation3 + $0x1f90] sm:$0xff]  ;;  %v1269_v33 = vld [vmem:[#allocation3 + $0x1ed8] sm:$0xff] }
 0x222   :  { %v6205_v61 = vpop.f32.mrb[28].mxu0  ;;  %8496 = vmatprep.subr.bf16.mxu1 %v8495_v49  ;;  %v1245_v49 = vld [vmem:[#allocation3 + $0x1e18] sm:$0xff]  ;;  %v1268_v32 = vld [vmem:[#allocation3 + $0x1ed0] sm:$0xff] }
 0x223   :  { %v6206_v3 = vpop.f32.mrb[29].mxu0  ;;  %v6243_v4 = vpop.f32.mrb[28].mxu1  ;;  %v8513_v60 = vpack.c.bf16 %v1245_v49, %v1244_v48  ;;  %v8527_v39 = vpack.c.bf16 %v1269_v33, %v1268_v32  ;;  %v1303_v48 = vld [vmem:[#allocation3 + $0x1fe8] sm:$0xff]  ;;  %v152_v33 = vld [vmem:[%s10082_s0 + $0x1f0] sm:$0xff] }
 0x224   :  { %v6207_v6 = vadd.f32 %v6206_v3, %v6205_v61  ;;  %8466 = vmatpush3.bf16.msra.mxu0 %v8465_v55  ;;  %v6244_v7 = vpop.f32.mrb[29].mxu1  ;;  %v245_v55 = vld [vmem:[%s10082_s0 + $0x4d8] sm:$0xff]  ;;  %v244_v61 = vld [vmem:[%s10082_s0 + $0x4d0] sm:$0xff]  ;;  %v1278_v3 = vld [vmem:[#allocation3 + $0x1f20] sm:$0xff] }
 0x225   :  { %v6245_v10 = vadd.f32 %v6244_v7, %v6243_v4  ;;  %8498 = vmatpush3.bf16.msra.mxu1 %v8497_v62  ;;  %8468 = vmatprep.subr.bf16.mxu0 %v8467_v57  ;;  %v8543_v62 = vpack.c.bf16 %v1293_v46, %v1292_v45  ;;  %v1294_v57 = vld [vmem:[#allocation3 + $0x1fa0] sm:$0xff]  ;;  %v1296_v7 = vld [vmem:[#allocation3 + $0x1fb0] sm:$0xff]  ;;  %v8549_v12 = vpack.c.bf16 %v1279_v9, %v1278_v3  ;;  %v1271_v46 = vld [vmem:[#allocation3 + $0x1ee8] sm:$0xff] }
 0x226   :  { %v2935_v16 = vadd.f32 %v6207_v6, %v9685_v31  ;;  %v6208_v37 = vpop.f32.mrb[30].mxu0  ;;  %8500 = vmatprep.subr.bf16.mxu1 %v8499_v0  ;;  %v8505_v31 = vpack.c.bf16 %v1225_v18, %v1224_v14  ;;  %v8545_v0 = vpack.c.bf16 %v1277_v52, %v1276_v56  ;;  %v8547_v4 = vpack.c.bf16 %v1295_v58, %v1294_v57  ;;  %v1265_v6 = vld [vmem:[#allocation3 + $0x1eb8] sm:$0xff]  ;;  %v1248_v14 = vld [vmem:[#allocation3 + $0x1e30] sm:$0xff]  ;;  %v1270_v45 = vld [vmem:[#allocation3 + $0x1ee0] sm:$0xff] }
 0x227   :  { %v6209_v21 = vpop.f32.mrb[31].mxu0  ;;  %v6246_v22 = vpop.f32.mrb[30].mxu1  ;;  %v8519_v13 = vpack.c.bf16 %v1265_v6, %v1264_v5  ;;  %v1281_v18 = vld [vmem:[#allocation3 + $0x1f38] sm:$0xff]  ;;  %v1254_v52 = vld [vmem:[#allocation3 + $0x1e60] sm:$0xff]  ;;  %v1287_v57 = vld [vmem:[#allocation3 + $0x1f68] sm:$0xff] }
 0x228   :  { %v9715_v25 = vadd.f32 %v6245_v10, %v2935_v16  ;;  %v6210_v26 = vadd.f32 %v6209_v21, %v6208_v37  ;;  %8470 = vmatpush3.bf16.msra.mxu0 %v8469_v8  ;;  %v6247_v27 = vpop.f32.mrb[31].mxu1  ;;  %v1297_v8 = vld [vmem:[#allocation3 + $0x1fb8] sm:$0xff]  ;;  %v151_v10 = vld [vmem:[%s10082_s0 + $0x1e8] sm:$0xff]  ;;  %v1280_v37 = vld [vmem:[#allocation3 + $0x1f30] sm:$0xff]  ;;  %v8533_v3 = vpack.c.bf16 %v1255_v53, %v1254_v52  ;;  %v8565_v9 = vpack.c.bf16 %v1287_v57, %v1286_v54 }
 0x229   :  { %v6248_v29 = vadd.f32 %v6247_v27, %v6246_v22  ;;  %8502 = vmatpush3.bf16.msra.mxu1 %v8501_v15  ;;  %8472 = vmatprep.subr.bf16.mxu0 %v8471_v11  ;;  %v8517_v15 = vpack.c.bf16 %v1247_v2, %v1246_v1  ;;  %v153_v11 = vld [vmem:[%s10082_s0 + $0x1f8] sm:$0xff]  ;;  %v1298_v21 = vld [vmem:[#allocation3 + $0x1fc0] sm:$0xff]  ;;  %v1299_v22 = vld [vmem:[#allocation3 + $0x1fc8] sm:$0xff]  ;;  %v8553_v24 = vpack.c.bf16 %v1281_v18, %v1280_v37 }
 0x22a   :  { %v2940_v34 = vadd.f32 %v6210_v26, %v9694_v50  ;;  %8504 = vmatprep.subr.bf16.mxu1 %v8503_v17  ;;  %v243_v50 = vld [vmem:[%s10082_s0 + $0x4c8] sm:$0xff]  ;;  %v1249_v16 = vld [vmem:[#allocation3 + $0x1e38] sm:$0xff]  ;;  %v8551_v17 = vpack.c.bf16 %v1297_v8, %v1296_v7  ;;  %v8523_v26 = vpack.c.bf16 %v1267_v20, %v1266_v19  ;;  %v1250_v27 = vld [vmem:[#allocation3 + $0x1e40] sm:$0xff] }
 0x22b   :  { %v8521_v23 = vpack.c.bf16 %v1249_v16, %v1248_v14  ;;  %v1272_v58 = vld [vmem:[#allocation3 + $0x1ef0] sm:$0xff]  ;;  %v1257_v7 = vld [vmem:[#allocation3 + $0x1e78] sm:$0xff]  ;;  %v1323_v14 = vld [vmem:[#allocation3 + $0x2088] sm:$0xff] }
 0x22c   :  { %v9724_v44 = vadd.f32 %v6248_v29, %v2940_v34  ;;  %8474 = vmatpush3.bf16.msra.mxu0 %v8473_v28  ;;  %v1251_v28 = vld [vmem:[#allocation3 + $0x1e48] sm:$0xff]  ;;  %v1282_v29 = vld [vmem:[#allocation3 + $0x1f40] sm:$0xff]  ;;  %v1300_v34 = vld [vmem:[#allocation3 + $0x1fd0] sm:$0xff] }
 0x22d   :  { %8506 = vmatpush3.bf16.msra.mxu1 %v8505_v31  ;;  %8508 = vmatprep.subr.bf16.mxu0 %v8507_v30  ;;  %v8555_v31 = vpack.c.bf16 %v1299_v22, %v1298_v21  ;;  %v1283_v30 = vld [vmem:[#allocation3 + $0x1f48] sm:$0xff]  ;;  %v1256_v6 = vld [vmem:[#allocation3 + $0x1e70] sm:$0xff]  ;;  %v246_v53 = vld [vmem:[%s10082_s0 + $0x4e0] sm:$0xff] }
 0x22e   :  { %8540 = vmatprep.subr.bf16.mxu1 %v8539_v38  ;;  %v8525_v38 = vpack.c.bf16 %v1251_v28, %v1250_v27  ;;  %v8557_v36 = vpack.c.bf16 %v1283_v30, %v1282_v29  ;;  %v1288_v8 = vld [vmem:[#allocation3 + $0x1f70] sm:$0xff]  ;;  %v1355_v18 = vld [vmem:[#allocation3 + $0x2188] sm:$0xff]  ;;  %v8537_v22 = vpack.c.bf16 %v1257_v7, %v1256_v6  ;;  %v150_v29 = vld [vmem:[%s10082_s0 + $0x1e0] sm:$0xff] }
 0x22f   :  { %3983 = vmatmul.mubr.f32.vlgmr.msra.gmra.mrb[56].mxu0 %v146_v35  ;;  %v1301_v35 = vld [vmem:[#allocation3 + $0x1fd8] sm:$0xff]  ;;  %v1307_v27 = vld [vmem:[#allocation3 + $0x2008] sm:$0xff]  ;;  %v1338_v30 = vld [vmem:[#allocation3 + $0x2100] sm:$0xff] }
 0x230   :  { %8510 = vmatpush3.bf16.msra.mxu0 %v8509_v43  ;;  %4058 = vmatmul.mubr.f32.vlgmr.msra.gmra.mrb[56].mxu1 %v148_v40  ;;  %v1252_v40 = vld [vmem:[#allocation3 + $0x1e50] sm:$0xff]  ;;  %v8559_v43 = vpack.c.bf16 %v1301_v35, %v1300_v34  ;;  %v1339_v32 = vld [vmem:[#allocation3 + $0x2108] sm:$0xff]  ;;  %v1325_v35 = vld [vmem:[#allocation3 + $0x2098] sm:$0xff] }
 0x231   :  { %8542 = vmatpush3.bf16.msra.mxu1 %v8541_v47  ;;  %3987 = vmatprep.mubr.f32.mxu0 %v243_v50  ;;  %v1285_v50 = vld [vmem:[#allocation3 + $0x1f58] sm:$0xff]  ;;  %v1302_v47 = vld [vmem:[#allocation3 + $0x1fe0] sm:$0xff]  ;;  %v8529_v49 = vpack.c.bf16 %v1253_v41, %v1252_v40  ;;  %v1324_v34 = vld [vmem:[#allocation3 + $0x2090] sm:$0xff]  ;;  %v8605_v41 = vpack.c.bf16 %v1339_v32, %v1338_v30 }
 0x232   :  { %8512 = vmatprep.subr.bf16.mxu0 %v8511_v51  ;;  %4062 = vmatprep.mubr.f32.mxu1 %v245_v55  ;;  %v8561_v56 = vpack.c.bf16 %v1285_v50, %v1284_v42  ;;  %v8531_v51 = vpack.c.bf16 %v1271_v46, %v1270_v45  ;;  %v1357_v40 = vld [vmem:[#allocation3 + $0x2198] sm:$0xff]  ;;  %v1308_v42 = vld [vmem:[#allocation3 + $0x2010] sm:$0xff]  ;;  %v8575_v45 = vpack.c.bf16 %v1325_v35, %v1324_v34  ;;  %v1359_v52 = vld [vmem:[#allocation3 + $0x21a8] sm:$0xff] }
 0x233   :  { %3988 = vmatmul.mubr.f32.gmra.mrb[58].mxu0 %v242_v59  ;;  %8544 = vmatprep.subr.bf16.mxu1 %v8543_v62  ;;  %v8563_v62 = vpack.c.bf16 %v1303_v48, %v1302_v47  ;;  %v1273_v59 = vld [vmem:[#allocation3 + $0x1ef8] sm:$0xff]  ;;  %v1340_v50 = vld [vmem:[#allocation3 + $0x2110] sm:$0xff]  ;;  %v1326_v47 = vld [vmem:[#allocation3 + $0x20a0] sm:$0xff] }
 0x234   :  { %8514 = vmatpush3.bf16.msra.mxu0 %v8513_v60  ;;  %4063 = vmatmul.mubr.f32.gmra.mrb[58].mxu1 %v244_v61  ;;  %v8535_v5 = vpack.c.bf16 %v1273_v59, %v1272_v58  ;;  %v1341_v46 = vld [vmem:[#allocation3 + $0x2118] sm:$0xff]  ;;  %v1327_v48 = vld [vmem:[#allocation3 + $0x20a8] sm:$0xff]  ;;  %v1310_v58 = vld [vmem:[#allocation3 + $0x2020] sm:$0xff] }
 0x235   :  { %8546 = vmatpush3.bf16.msra.mxu1 %v8545_v0  ;;  %8516 = vmatprep.subr.bf16.mxu0 %v8515_v63  ;;  %v1304_v0 = vld [vmem:[#allocation3 + $0x1ff0] sm:$0xff]  ;;  %v1305_v63 = vld [vmem:[#allocation3 + $0x1ff8] sm:$0xff]  ;;  %v8579_v57 = vpack.c.bf16 %v1327_v48, %v1326_v47  ;;  %v1311_v59 = vld [vmem:[#allocation3 + $0x2028] sm:$0xff] }
 0x236   :  { %8548 = vmatprep.subr.bf16.mxu1 %v8547_v4  ;;  %4132 = vmatprep.mubr.f32.mxu0 %v151_v10  ;;  %v1317_v34 = vld [vmem:[#allocation3 + $0x2058] sm:$0xff]  ;;  %v1348_v35 = vld [vmem:[#allocation3 + $0x2150] sm:$0xff]  ;;  %v1319_v47 = vld [vmem:[#allocation3 + $0x2068] sm:$0xff] }
 0x237   :  { %4207 = vmatprep.mubr.f32.mxu1 %v153_v11  ;;  %v8567_v11 = vpack.c.bf16 %v1305_v63, %v1304_v0  ;;  %v1343_v0 = vld [vmem:[#allocation3 + $0x2128] sm:$0xff]  ;;  %v1328_v63 = vld [vmem:[#allocation3 + $0x20b0] sm:$0xff]  ;;  %v1350_v48 = vld [vmem:[#allocation3 + $0x2160] sm:$0xff] }
 0x238   :  { %8518 = vmatpush3.bf16.msra.mxu0 %v8517_v15 }
 0x239   :  { %8550 = vmatpush3.bf16.msra.mxu1 %v8549_v12  ;;  %8520 = vmatprep.subr.bf16.mxu0 %v8519_v13  ;;  %v1289_v12 = vld [vmem:[#allocation3 + $0x1f78] sm:$0xff]  ;;  %v1322_v13 = vld [vmem:[#allocation3 + $0x2080] sm:$0xff] }
 0x23a   :  { %8552 = vmatprep.subr.bf16.mxu1 %v8551_v17  ;;  %v1354_v17 = vld [vmem:[#allocation3 + $0x2180] sm:$0xff] }
 0x23c   :  { %8522 = vmatpush3.bf16.msra.mxu0 %v8521_v23 }
 0x23d   :  { %8554 = vmatpush3.bf16.msra.mxu1 %v8553_v24  ;;  %8524 = vmatprep.subr.bf16.mxu0 %v8523_v26  ;;  %v8571_v24 = vpack.c.bf16 %v1323_v14, %v1322_v13  ;;  %v1306_v26 = vld [vmem:[#allocation3 + $0x2000] sm:$0xff]  ;;  %v1331_v14 = vld [vmem:[#allocation3 + $0x20c8] sm:$0xff] }
 0x23e   :  { %8556 = vmatprep.subr.bf16.mxu1 %v8555_v31  ;;  %v8603_v31 = vpack.c.bf16 %v1355_v18, %v1354_v17  ;;  %v1330_v13 = vld [vmem:[#allocation3 + $0x20c0] sm:$0xff] }
 0x240   :  { %8526 = vmatpush3.bf16.msra.mxu0 %v8525_v38 }
 0x241   :  { %8558 = vmatpush3.bf16.msra.mxu1 %v8557_v36  ;;  %8528 = vmatprep.subr.bf16.mxu0 %v8527_v39  ;;  %v8573_v36 = vpack.c.bf16 %v1307_v27, %v1306_v26  ;;  %v1356_v39 = vld [vmem:[#allocation3 + $0x2190] sm:$0xff]  ;;  %v1333_v27 = vld [vmem:[#allocation3 + $0x20d8] sm:$0xff] }
 0x242   :  { %v6281_v55 = vpop.f32.mrb[32].mxu0  ;;  %8560 = vmatprep.subr.bf16.mxu1 %v8559_v43  ;;  %v1309_v43 = vld [vmem:[#allocation3 + $0x2018] sm:$0xff]  ;;  %v1332_v26 = vld [vmem:[#allocation3 + $0x20d0] sm:$0xff] }
 0x243   :  { %v6282_v60 = vpop.f32.mrb[33].mxu0  ;;  %v6319_v61 = vpop.f32.mrb[32].mxu1  ;;  %v8577_v54 = vpack.c.bf16 %v1309_v43, %v1308_v42  ;;  %v8591_v32 = vpack.c.bf16 %v1333_v27, %v1332_v26  ;;  %v1367_v42 = vld [vmem:[#allocation3 + $0x21e8] sm:$0xff]  ;;  %v156_v27 = vld [vmem:[%s10082_s0 + $0x210] sm:$0xff] }
 0x244   :  { %v6283_v1 = vadd.f32 %v6282_v60, %v6281_v55  ;;  %8530 = vmatpush3.bf16.msra.mxu0 %v8529_v49  ;;  %v6320_v2 = vpop.f32.mrb[33].mxu1  ;;  %v249_v49 = vld [vmem:[%s10082_s0 + $0x4f8] sm:$0xff]  ;;  %v248_v55 = vld [vmem:[%s10082_s0 + $0x4f0] sm:$0xff]  ;;  %v1342_v60 = vld [vmem:[#allocation3 + $0x2120] sm:$0xff] }
 0x245   :  { %v6321_v4 = vadd.f32 %v6320_v2, %v6319_v61  ;;  %8562 = vmatpush3.bf16.msra.mxu1 %v8561_v56  ;;  %8532 = vmatprep.subr.bf16.mxu0 %v8531_v51  ;;  %v8607_v56 = vpack.c.bf16 %v1357_v40, %v1356_v39  ;;  %v1358_v51 = vld [vmem:[#allocation3 + $0x21a0] sm:$0xff]  ;;  %v1360_v2 = vld [vmem:[#allocation3 + $0x21b0] sm:$0xff]  ;;  %v8613_v6 = vpack.c.bf16 %v1343_v0, %v1342_v60  ;;  %v1335_v40 = vld [vmem:[#allocation3 + $0x20e8] sm:$0xff] }
 0x246   :  { %v3085_v10 = vadd.f32 %v6283_v1, %v9715_v25  ;;  %v6284_v15 = vpop.f32.mrb[34].mxu0  ;;  %8564 = vmatprep.subr.bf16.mxu1 %v8563_v62  ;;  %v8569_v25 = vpack.c.bf16 %v1289_v12, %v1288_v8  ;;  %v8609_v62 = vpack.c.bf16 %v1341_v46, %v1340_v50  ;;  %v8611_v61 = vpack.c.bf16 %v1359_v52, %v1358_v51  ;;  %v1329_v1 = vld [vmem:[#allocation3 + $0x20b8] sm:$0xff]  ;;  %v1312_v8 = vld [vmem:[#allocation3 + $0x2030] sm:$0xff]  ;;  %v1334_v39 = vld [vmem:[#allocation3 + $0x20e0] sm:$0xff] }
 0x247   :  { %v6285_v16 = vpop.f32.mrb[35].mxu0  ;;  %v6322_v37 = vpop.f32.mrb[34].mxu1  ;;  %v8583_v7 = vpack.c.bf16 %v1329_v1, %v1328_v63  ;;  %v1345_v12 = vld [vmem:[#allocation3 + $0x2138] sm:$0xff]  ;;  %v1318_v46 = vld [vmem:[#allocation3 + $0x2060] sm:$0xff]  ;;  %v1351_v51 = vld [vmem:[#allocation3 + $0x2168] sm:$0xff] }
 0x248   :  { %v9745_v19 = vadd.f32 %v6321_v4, %v3085_v10  ;;  %v6286_v20 = vadd.f32 %v6285_v16, %v6284_v15  ;;  %8534 = vmatpush3.bf16.msra.mxu0 %v8533_v3  ;;  %v6323_v21 = vpop.f32.mrb[35].mxu1  ;;  %v1361_v3 = vld [vmem:[#allocation3 + $0x21b8] sm:$0xff]  ;;  %v155_v4 = vld [vmem:[%s10082_s0 + $0x208] sm:$0xff]  ;;  %v1344_v15 = vld [vmem:[#allocation3 + $0x2130] sm:$0xff]  ;;  %v8597_v60 = vpack.c.bf16 %v1319_v47, %v1318_v46  ;;  %v8629_v0 = vpack.c.bf16 %v1351_v51, %v1350_v48 }
 0x249   :  { %v6324_v23 = vadd.f32 %v6323_v21, %v6322_v37  ;;  %8566 = vmatpush3.bf16.msra.mxu1 %v8565_v9  ;;  %8536 = vmatprep.subr.bf16.mxu0 %v8535_v5  ;;  %v8581_v9 = vpack.c.bf16 %v1311_v59, %v1310_v58  ;;  %v157_v5 = vld [vmem:[%s10082_s0 + $0x218] sm:$0xff]  ;;  %v1362_v16 = vld [vmem:[#allocation3 + $0x21c0] sm:$0xff]  ;;  %v1363_v37 = vld [vmem:[#allocation3 + $0x21c8] sm:$0xff]  ;;  %v8617_v18 = vpack.c.bf16 %v1345_v12, %v1344_v15 }
 0x24a   :  { %v3090_v28 = vadd.f32 %v6286_v20, %v9724_v44  ;;  %8568 = vmatprep.subr.bf16.mxu1 %v8567_v11  ;;  %v247_v44 = vld [vmem:[%s10082_s0 + $0x4e8] sm:$0xff]  ;;  %v1313_v10 = vld [vmem:[#allocation3 + $0x2038] sm:$0xff]  ;;  %v8615_v11 = vpack.c.bf16 %v1361_v3, %v1360_v2  ;;  %v8587_v20 = vpack.c.bf16 %v1331_v14, %v1330_v13  ;;  %v1314_v21 = vld [vmem:[#allocation3 + $0x2040] sm:$0xff] }
 0x24b   :  { %v8585_v17 = vpack.c.bf16 %v1313_v10, %v1312_v8  ;;  %v1336_v52 = vld [vmem:[#allocation3 + $0x20f0] sm:$0xff]  ;;  %v1321_v2 = vld [vmem:[#allocation3 + $0x2078] sm:$0xff]  ;;  %v1387_v8 = vld [vmem:[#allocation3 + $0x2288] sm:$0xff] }
 0x24c   :  { %v9754_v38 = vadd.f32 %v6324_v23, %v3090_v28  ;;  %8538 = vmatpush3.bf16.msra.mxu0 %v8537_v22  ;;  %v1315_v22 = vld [vmem:[#allocation3 + $0x2048] sm:$0xff]  ;;  %v1346_v23 = vld [vmem:[#allocation3 + $0x2140] sm:$0xff]  ;;  %v1364_v28 = vld [vmem:[#allocation3 + $0x21d0] sm:$0xff] }
 0x24d   :  { %8570 = vmatpush3.bf16.msra.mxu1 %v8569_v25  ;;  %8572 = vmatprep.subr.bf16.mxu0 %v8571_v24  ;;  %v8619_v25 = vpack.c.bf16 %v1363_v37, %v1362_v16  ;;  %v1347_v24 = vld [vmem:[#allocation3 + $0x2148] sm:$0xff]  ;;  %v1320_v1 = vld [vmem:[#allocation3 + $0x2070] sm:$0xff]  ;;  %v250_v47 = vld [vmem:[%s10082_s0 + $0x500] sm:$0xff] }
 0x24e   :  { %8604 = vmatprep.subr.bf16.mxu1 %v8603_v31  ;;  %v8589_v31 = vpack.c.bf16 %v1315_v22, %v1314_v21  ;;  %v8621_v30 = vpack.c.bf16 %v1347_v24, %v1346_v23  ;;  %v1352_v3 = vld [vmem:[#allocation3 + $0x2170] sm:$0xff]  ;;  %v1419_v12 = vld [vmem:[#allocation3 + $0x2388] sm:$0xff]  ;;  %v8601_v37 = vpack.c.bf16 %v1321_v2, %v1320_v1  ;;  %v154_v23 = vld [vmem:[%s10082_s0 + $0x200] sm:$0xff] }
 0x24f   :  { %4133 = vmatmul.mubr.f32.vlgmr.msra.gmra.mrb[60].mxu0 %v150_v29  ;;  %v1365_v29 = vld [vmem:[#allocation3 + $0x21d8] sm:$0xff]  ;;  %v1371_v21 = vld [vmem:[#allocation3 + $0x2208] sm:$0xff]  ;;  %v1402_v24 = vld [vmem:[#allocation3 + $0x2300] sm:$0xff] }
 0x250   :  { %8574 = vmatpush3.bf16.msra.mxu0 %v8573_v36  ;;  %4208 = vmatmul.mubr.f32.vlgmr.msra.gmra.mrb[60].mxu1 %v152_v33  ;;  %v1316_v33 = vld [vmem:[#allocation3 + $0x2050] sm:$0xff]  ;;  %v8623_v36 = vpack.c.bf16 %v1365_v29, %v1364_v28  ;;  %v1403_v26 = vld [vmem:[#allocation3 + $0x2308] sm:$0xff]  ;;  %v1389_v29 = vld [vmem:[#allocation3 + $0x2298] sm:$0xff] }
 0x251   :  { %8606 = vmatpush3.bf16.msra.mxu1 %v8605_v41  ;;  %4137 = vmatprep.mubr.f32.mxu0 %v247_v44  ;;  %v1349_v44 = vld [vmem:[#allocation3 + $0x2158] sm:$0xff]  ;;  %v1366_v41 = vld [vmem:[#allocation3 + $0x21e0] sm:$0xff]  ;;  %v8593_v43 = vpack.c.bf16 %v1317_v34, %v1316_v33  ;;  %v1388_v28 = vld [vmem:[#allocation3 + $0x2290] sm:$0xff]  ;;  %v8669_v34 = vpack.c.bf16 %v1403_v26, %v1402_v24 }
 0x252   :  { %8576 = vmatprep.subr.bf16.mxu0 %v8575_v45  ;;  %4212 = vmatprep.mubr.f32.mxu1 %v249_v49  ;;  %v8625_v50 = vpack.c.bf16 %v1349_v44, %v1348_v35  ;;  %v8595_v45 = vpack.c.bf16 %v1335_v40, %v1334_v39  ;;  %v1421_v33 = vld [vmem:[#allocation3 + $0x2398] sm:$0xff]  ;;  %v1372_v35 = vld [vmem:[#allocation3 + $0x2210] sm:$0xff]  ;;  %v8639_v39 = vpack.c.bf16 %v1389_v29, %v1388_v28  ;;  %v1423_v46 = vld [vmem:[#allocation3 + $0x23a8] sm:$0xff] }
 0x253   :  { %4138 = vmatmul.mubr.f32.gmra.mrb[62].mxu0 %v246_v53  ;;  %8608 = vmatprep.subr.bf16.mxu1 %v8607_v56  ;;  %v8627_v56 = vpack.c.bf16 %v1367_v42, %v1366_v41  ;;  %v1337_v53 = vld [vmem:[#allocation3 + $0x20f8] sm:$0xff]  ;;  %v1404_v44 = vld [vmem:[#allocation3 + $0x2310] sm:$0xff]  ;;  %v1390_v41 = vld [vmem:[#allocation3 + $0x22a0] sm:$0xff] }
 0x254   :  { %8578 = vmatpush3.bf16.msra.mxu0 %v8577_v54  ;;  %4213 = vmatmul.mubr.f32.gmra.mrb[62].mxu1 %v248_v55  ;;  %v8599_v63 = vpack.c.bf16 %v1337_v53, %v1336_v52  ;;  %v1405_v40 = vld [vmem:[#allocation3 + $0x2318] sm:$0xff]  ;;  %v1391_v42 = vld [vmem:[#allocation3 + $0x22a8] sm:$0xff]  ;;  %v1374_v52 = vld [vmem:[#allocation3 + $0x2220] sm:$0xff] }
 0x255   :  { %8610 = vmatpush3.bf16.msra.mxu1 %v8609_v62  ;;  %8580 = vmatprep.subr.bf16.mxu0 %v8579_v57  ;;  %v1368_v62 = vld [vmem:[#allocation3 + $0x21f0] sm:$0xff]  ;;  %v1369_v57 = vld [vmem:[#allocation3 + $0x21f8] sm:$0xff]  ;;  %v8643_v51 = vpack.c.bf16 %v1391_v42, %v1390_v41  ;;  %v1375_v53 = vld [vmem:[#allocation3 + $0x2228] sm:$0xff] }
 0x256   :  { %8612 = vmatprep.subr.bf16.mxu1 %v8611_v61  ;;  %4282 = vmatprep.mubr.f32.mxu0 %v155_v4  ;;  %v1381_v28 = vld [vmem:[#allocation3 + $0x2258] sm:$0xff]  ;;  %v1412_v29 = vld [vmem:[#allocation3 + $0x2350] sm:$0xff]  ;;  %v1383_v41 = vld [vmem:[#allocation3 + $0x2268] sm:$0xff] }
 0x257   :  { %4357 = vmatprep.mubr.f32.mxu1 %v157_v5  ;;  %v8631_v5 = vpack.c.bf16 %v1369_v57, %v1368_v62  ;;  %v1407_v62 = vld [vmem:[#allocation3 + $0x2328] sm:$0xff]  ;;  %v1392_v57 = vld [vmem:[#allocation3 + $0x22b0] sm:$0xff]  ;;  %v1414_v42 = vld [vmem:[#allocation3 + $0x2360] sm:$0xff] }
 0x258   :  { %8582 = vmatpush3.bf16.msra.mxu0 %v8581_v9 }
 0x259   :  { %8614 = vmatpush3.bf16.msra.mxu1 %v8613_v6  ;;  %8584 = vmatprep.subr.bf16.mxu0 %v8583_v7  ;;  %v1353_v6 = vld [vmem:[#allocation3 + $0x2178] sm:$0xff]  ;;  %v1386_v7 = vld [vmem:[#allocation3 + $0x2280] sm:$0xff] }
 0x25a   :  { %8616 = vmatprep.subr.bf16.mxu1 %v8615_v11  ;;  %v1418_v11 = vld [vmem:[#allocation3 + $0x2380] sm:$0xff] }
 0x25c   :  { %8586 = vmatpush3.bf16.msra.mxu0 %v8585_v17 }
 0x25d   :  { %8618 = vmatpush3.bf16.msra.mxu1 %v8617_v18  ;;  %8588 = vmatprep.subr.bf16.mxu0 %v8587_v20  ;;  %v8635_v18 = vpack.c.bf16 %v1387_v8, %v1386_v7  ;;  %v1370_v20 = vld [vmem:[#allocation3 + $0x2200] sm:$0xff]  ;;  %v1395_v8 = vld [vmem:[#allocation3 + $0x22c8] sm:$0xff] }
 0x25e   :  { %8620 = vmatprep.subr.bf16.mxu1 %v8619_v25  ;;  %v8667_v25 = vpack.c.bf16 %v1419_v12, %v1418_v11  ;;  %v1394_v7 = vld [vmem:[#allocation3 + $0x22c0] sm:$0xff] }
 0x260   :  { %8590 = vmatpush3.bf16.msra.mxu0 %v8589_v31 }
 0x261   :  { %8622 = vmatpush3.bf16.msra.mxu1 %v8621_v30  ;;  %8592 = vmatprep.subr.bf16.mxu0 %v8591_v32  ;;  %v8637_v30 = vpack.c.bf16 %v1371_v21, %v1370_v20  ;;  %v1420_v32 = vld [vmem:[#allocation3 + $0x2390] sm:$0xff]  ;;  %v1397_v21 = vld [vmem:[#allocation3 + $0x22d8] sm:$0xff] }
 0x262   :  { %v6357_v49 = vpop.f32.mrb[36].mxu0  ;;  %8624 = vmatprep.subr.bf16.mxu1 %v8623_v36  ;;  %v1373_v36 = vld [vmem:[#allocation3 + $0x2218] sm:$0xff]  ;;  %v1396_v20 = vld [vmem:[#allocation3 + $0x22d0] sm:$0xff] }
 0x263   :  { %v6358_v54 = vpop.f32.mrb[37].mxu0  ;;  %v6395_v55 = vpop.f32.mrb[36].mxu1  ;;  %v8641_v48 = vpack.c.bf16 %v1373_v36, %v1372_v35  ;;  %v8655_v26 = vpack.c.bf16 %v1397_v21, %v1396_v20  ;;  %v1431_v35 = vld [vmem:[#allocation3 + $0x23e8] sm:$0xff]  ;;  %v160_v21 = vld [vmem:[%s10082_s0 + $0x230] sm:$0xff] }
 0x264   :  { %v6359_v58 = vadd.f32 %v6358_v54, %v6357_v49  ;;  %8594 = vmatpush3.bf16.msra.mxu0 %v8593_v43  ;;  %v6396_v59 = vpop.f32.mrb[37].mxu1  ;;  %v253_v43 = vld [vmem:[%s10082_s0 + $0x518] sm:$0xff]  ;;  %v252_v49 = vld [vmem:[%s10082_s0 + $0x510] sm:$0xff]  ;;  %v1406_v54 = vld [vmem:[#allocation3 + $0x2320] sm:$0xff] }
 0x265   :  { %v6397_v61 = vadd.f32 %v6396_v59, %v6395_v55  ;;  %8626 = vmatpush3.bf16.msra.mxu1 %v8625_v50  ;;  %8596 = vmatprep.subr.bf16.mxu0 %v8595_v45  ;;  %v8671_v50 = vpack.c.bf16 %v1421_v33, %v1420_v32  ;;  %v1422_v45 = vld [vmem:[#allocation3 + $0x23a0] sm:$0xff]  ;;  %v1424_v59 = vld [vmem:[#allocation3 + $0x23b0] sm:$0xff]  ;;  %v8677_v1 = vpack.c.bf16 %v1407_v62, %v1406_v54  ;;  %v1399_v33 = vld [vmem:[#allocation3 + $0x22e8] sm:$0xff] }
 0x266   :  { %v3235_v4 = vadd.f32 %v6359_v58, %v9745_v19  ;;  %v6360_v9 = vpop.f32.mrb[38].mxu0  ;;  %8628 = vmatprep.subr.bf16.mxu1 %v8627_v56  ;;  %v8633_v19 = vpack.c.bf16 %v1353_v6, %v1352_v3  ;;  %v8673_v56 = vpack.c.bf16 %v1405_v40, %v1404_v44  ;;  %v8675_v55 = vpack.c.bf16 %v1423_v46, %v1422_v45  ;;  %v1393_v58 = vld [vmem:[#allocation3 + $0x22b8] sm:$0xff]  ;;  %v1376_v3 = vld [vmem:[#allocation3 + $0x2230] sm:$0xff]  ;;  %v1398_v32 = vld [vmem:[#allocation3 + $0x22e0] sm:$0xff] }
 0x267   :  { %v6361_v10 = vpop.f32.mrb[39].mxu0  ;;  %v6398_v15 = vpop.f32.mrb[38].mxu1  ;;  %v8647_v2 = vpack.c.bf16 %v1393_v58, %v1392_v57  ;;  %v1409_v6 = vld [vmem:[#allocation3 + $0x2338] sm:$0xff]  ;;  %v1382_v40 = vld [vmem:[#allocation3 + $0x2260] sm:$0xff]  ;;  %v1415_v45 = vld [vmem:[#allocation3 + $0x2368] sm:$0xff] }
 0x268   :  { %v9775_v13 = vadd.f32 %v6397_v61, %v3235_v4  ;;  %v6362_v14 = vadd.f32 %v6361_v10, %v6360_v9  ;;  %8598 = vmatpush3.bf16.msra.mxu0 %v8597_v60  ;;  %v6399_v16 = vpop.f32.mrb[39].mxu1  ;;  %v1425_v60 = vld [vmem:[#allocation3 + $0x23b8] sm:$0xff]  ;;  %v159_v61 = vld [vmem:[%s10082_s0 + $0x228] sm:$0xff]  ;;  %v1408_v9 = vld [vmem:[#allocation3 + $0x2330] sm:$0xff]  ;;  %v8661_v54 = vpack.c.bf16 %v1383_v41, %v1382_v40  ;;  %v8693_v62 = vpack.c.bf16 %v1415_v45, %v1414_v42 }
 0x269   :  { %v6400_v17 = vadd.f32 %v6399_v16, %v6398_v15  ;;  %8630 = vmatpush3.bf16.msra.mxu1 %v8629_v0  ;;  %8600 = vmatprep.subr.bf16.mxu0 %v8599_v63  ;;  %v8645_v0 = vpack.c.bf16 %v1375_v53, %v1374_v52  ;;  %v161_v63 = vld [vmem:[%s10082_s0 + $0x238] sm:$0xff]  ;;  %v1426_v10 = vld [vmem:[#allocation3 + $0x23c0] sm:$0xff]  ;;  %v1427_v15 = vld [vmem:[#allocation3 + $0x23c8] sm:$0xff]  ;;  %v8681_v12 = vpack.c.bf16 %v1409_v6, %v1408_v9 }
 0x26a   :  { %v3240_v22 = vadd.f32 %v6362_v14, %v9754_v38  ;;  %8632 = vmatprep.subr.bf16.mxu1 %v8631_v5  ;;  %v251_v38 = vld [vmem:[%s10082_s0 + $0x508] sm:$0xff]  ;;  %v1377_v4 = vld [vmem:[#allocation3 + $0x2238] sm:$0xff]  ;;  %v8679_v5 = vpack.c.bf16 %v1425_v60, %v1424_v59  ;;  %v8651_v14 = vpack.c.bf16 %v1395_v8, %v1394_v7  ;;  %v1378_v16 = vld [vmem:[#allocation3 + $0x2240] sm:$0xff] }
 0x26b   :  { %v8649_v11 = vpack.c.bf16 %v1377_v4, %v1376_v3  ;;  %v1400_v46 = vld [vmem:[#allocation3 + $0x22f0] sm:$0xff]  ;;  %v1385_v59 = vld [vmem:[#allocation3 + $0x2278] sm:$0xff]  ;;  %v1451_v3 = vld [vmem:[#allocation3 + $0x2488] sm:$0xff] }
 0x26c   :  { %v9784_v31 = vadd.f32 %v6400_v17, %v3240_v22  ;;  %8602 = vmatpush3.bf16.msra.mxu0 %v8601_v37  ;;  %v1379_v37 = vld [vmem:[#allocation3 + $0x2248] sm:$0xff]  ;;  %v1410_v17 = vld [vmem:[#allocation3 + $0x2340] sm:$0xff]  ;;  %v1428_v22 = vld [vmem:[#allocation3 + $0x23d0] sm:$0xff] }
 0x26d   :  { %8634 = vmatpush3.bf16.msra.mxu1 %v8633_v19  ;;  %8636 = vmatprep.subr.bf16.mxu0 %v8635_v18  ;;  %v8683_v19 = vpack.c.bf16 %v1427_v15, %v1426_v10  ;;  %v1411_v18 = vld [vmem:[#allocation3 + $0x2348] sm:$0xff]  ;;  %v1384_v58 = vld [vmem:[#allocation3 + $0x2270] sm:$0xff]  ;;  %v254_v41 = vld [vmem:[%s10082_s0 + $0x520] sm:$0xff] }
 0x26e   :  { %8668 = vmatprep.subr.bf16.mxu1 %v8667_v25  ;;  %v8653_v25 = vpack.c.bf16 %v1379_v37, %v1378_v16  ;;  %v8685_v24 = vpack.c.bf16 %v1411_v18, %v1410_v17  ;;  %v1416_v60 = vld [vmem:[#allocation3 + $0x2370] sm:$0xff]  ;;  %v1483_v6 = vld [vmem:[#allocation3 + $0x2588] sm:$0xff]  ;;  %v8665_v15 = vpack.c.bf16 %v1385_v59, %v1384_v58  ;;  %v158_v17 = vld [vmem:[%s10082_s0 + $0x220] sm:$0xff] }
 0x26f   :  { %4283 = vmatmul.mubr.f32.vlgmr.msra.gmra.mrb[64].mxu0 %v154_v23  ;;  %v1429_v23 = vld [vmem:[#allocation3 + $0x23d8] sm:$0xff]  ;;  %v1435_v16 = vld [vmem:[#allocation3 + $0x2408] sm:$0xff]  ;;  %v1466_v18 = vld [vmem:[#allocation3 + $0x2500] sm:$0xff] }
 0x270   :  { %8638 = vmatpush3.bf16.msra.mxu0 %v8637_v30  ;;  %4358 = vmatmul.mubr.f32.vlgmr.msra.gmra.mrb[64].mxu1 %v156_v27  ;;  %v1380_v27 = vld [vmem:[#allocation3 + $0x2250] sm:$0xff]  ;;  %v8687_v30 = vpack.c.bf16 %v1429_v23, %v1428_v22  ;;  %v1467_v20 = vld [vmem:[#allocation3 + $0x2508] sm:$0xff]  ;;  %v1453_v23 = vld [vmem:[#allocation3 + $0x2498] sm:$0xff] }
 0x271   :  { %8670 = vmatpush3.bf16.msra.mxu1 %v8669_v34  ;;  %4287 = vmatprep.mubr.f32.mxu0 %v251_v38  ;;  %v1413_v38 = vld [vmem:[#allocation3 + $0x2358] sm:$0xff]  ;;  %v1430_v34 = vld [vmem:[#allocation3 + $0x23e0] sm:$0xff]  ;;  %v8657_v36 = vpack.c.bf16 %v1381_v28, %v1380_v27  ;;  %v1452_v22 = vld [vmem:[#allocation3 + $0x2490] sm:$0xff]  ;;  %v8733_v28 = vpack.c.bf16 %v1467_v20, %v1466_v18 }
 0x272   :  { %8640 = vmatprep.subr.bf16.mxu0 %v8639_v39  ;;  %4362 = vmatprep.mubr.f32.mxu1 %v253_v43  ;;  %v8689_v44 = vpack.c.bf16 %v1413_v38, %v1412_v29  ;;  %v8659_v39 = vpack.c.bf16 %v1399_v33, %v1398_v32  ;;  %v1485_v27 = vld [vmem:[#allocation3 + $0x2598] sm:$0xff]  ;;  %v1436_v29 = vld [vmem:[#allocation3 + $0x2410] sm:$0xff]  ;;  %v8703_v32 = vpack.c.bf16 %v1453_v23, %v1452_v22  ;;  %v1487_v40 = vld [vmem:[#allocation3 + $0x25a8] sm:$0xff] }
 0x273   :  { %4288 = vmatmul.mubr.f32.gmra.mrb[66].mxu0 %v250_v47  ;;  %8672 = vmatprep.subr.bf16.mxu1 %v8671_v50  ;;  %v8691_v50 = vpack.c.bf16 %v1431_v35, %v1430_v34  ;;  %v1401_v47 = vld [vmem:[#allocation3 + $0x22f8] sm:$0xff]  ;;  %v1468_v38 = vld [vmem:[#allocation3 + $0x2510] sm:$0xff]  ;;  %v1454_v34 = vld [vmem:[#allocation3 + $0x24a0] sm:$0xff] }
 0x274   :  { %8642 = vmatpush3.bf16.msra.mxu0 %v8641_v48  ;;  %4363 = vmatmul.mubr.f32.gmra.mrb[66].mxu1 %v252_v49  ;;  %v8663_v57 = vpack.c.bf16 %v1401_v47, %v1400_v46  ;;  %v1469_v33 = vld [vmem:[#allocation3 + $0x2518] sm:$0xff]  ;;  %v1455_v35 = vld [vmem:[#allocation3 + $0x24a8] sm:$0xff]  ;;  %v1438_v46 = vld [vmem:[#allocation3 + $0x2420] sm:$0xff] }
 0x275   :  { %8674 = vmatpush3.bf16.msra.mxu1 %v8673_v56  ;;  %8644 = vmatprep.subr.bf16.mxu0 %v8643_v51  ;;  %v1432_v56 = vld [vmem:[#allocation3 + $0x23f0] sm:$0xff]  ;;  %v1433_v51 = vld [vmem:[#allocation3 + $0x23f8] sm:$0xff]  ;;  %v8707_v45 = vpack.c.bf16 %v1455_v35, %v1454_v34  ;;  %v1439_v47 = vld [vmem:[#allocation3 + $0x2428] sm:$0xff] }
 0x276   :  { %8676 = vmatprep.subr.bf16.mxu1 %v8675_v55  ;;  %4432 = vmatprep.mubr.f32.mxu0 %v159_v61  ;;  %v1445_v22 = vld [vmem:[#allocation3 + $0x2458] sm:$0xff]  ;;  %v1476_v23 = vld [vmem:[#allocation3 + $0x2550] sm:$0xff]  ;;  %v1447_v34 = vld [vmem:[#allocation3 + $0x2468] sm:$0xff] }
 0x277   :  { %4507 = vmatprep.mubr.f32.mxu1 %v161_v63  ;;  %v8695_v63 = vpack.c.bf16 %v1433_v51, %v1432_v56  ;;  %v1471_v56 = vld [vmem:[#allocation3 + $0x2528] sm:$0xff]  ;;  %v1456_v51 = vld [vmem:[#allocation3 + $0x24b0] sm:$0xff]  ;;  %v1478_v35 = vld [vmem:[#allocation3 + $0x2560] sm:$0xff] }
 0x278   :  { %8646 = vmatpush3.bf16.msra.mxu0 %v8645_v0 }
 0x279   :  { %8678 = vmatpush3.bf16.msra.mxu1 %v8677_v1  ;;  %8648 = vmatprep.subr.bf16.mxu0 %v8647_v2  ;;  %v1417_v1 = vld [vmem:[#allocation3 + $0x2378] sm:$0xff]  ;;  %v1450_v2 = vld [vmem:[#allocation3 + $0x2480] sm:$0xff] }
 0x27a   :  { %8680 = vmatprep.subr.bf16.mxu1 %v8679_v5  ;;  %v1482_v5 = vld [vmem:[#allocation3 + $0x2580] sm:$0xff] }
 0x27c   :  { %8650 = vmatpush3.bf16.msra.mxu0 %v8649_v11 }
 0x27d   :  { %8682 = vmatpush3.bf16.msra.mxu1 %v8681_v12  ;;  %8652 = vmatprep.subr.bf16.mxu0 %v8651_v14  ;;  %v8699_v12 = vpack.c.bf16 %v1451_v3, %v1450_v2  ;;  %v1434_v14 = vld [vmem:[#allocation3 + $0x2400] sm:$0xff]  ;;  %v1459_v3 = vld [vmem:[#allocation3 + $0x24c8] sm:$0xff] }
 0x27e   :  { %8684 = vmatprep.subr.bf16.mxu1 %v8683_v19  ;;  %v8731_v19 = vpack.c.bf16 %v1483_v6, %v1482_v5  ;;  %v1458_v2 = vld [vmem:[#allocation3 + $0x24c0] sm:$0xff] }
 0x280   :  { %8654 = vmatpush3.bf16.msra.mxu0 %v8653_v25 }
 0x281   :  { %8686 = vmatpush3.bf16.msra.mxu1 %v8685_v24  ;;  %8656 = vmatprep.subr.bf16.mxu0 %v8655_v26  ;;  %v8701_v24 = vpack.c.bf16 %v1435_v16, %v1434_v14  ;;  %v1484_v26 = vld [vmem:[#allocation3 + $0x2590] sm:$0xff]  ;;  %v1461_v16 = vld [vmem:[#allocation3 + $0x24d8] sm:$0xff] }
 0x282   :  { %v6433_v43 = vpop.f32.mrb[40].mxu0  ;;  %8688 = vmatprep.subr.bf16.mxu1 %v8687_v30  ;;  %v1437_v30 = vld [vmem:[#allocation3 + $0x2418] sm:$0xff]  ;;  %v1460_v14 = vld [vmem:[#allocation3 + $0x24d0] sm:$0xff] }
 0x283   :  { %v6434_v48 = vpop.f32.mrb[41].mxu0  ;;  %v6471_v49 = vpop.f32.mrb[40].mxu1  ;;  %v8705_v42 = vpack.c.bf16 %v1437_v30, %v1436_v29  ;;  %v8719_v20 = vpack.c.bf16 %v1461_v16, %v1460_v14  ;;  %v1495_v29 = vld [vmem:[#allocation3 + $0x25e8] sm:$0xff]  ;;  %v164_v16 = vld [vmem:[%s10082_s0 + $0x250] sm:$0xff] }
 0x284   :  { %v6435_v52 = vadd.f32 %v6434_v48, %v6433_v43  ;;  %8658 = vmatpush3.bf16.msra.mxu0 %v8657_v36  ;;  %v6472_v53 = vpop.f32.mrb[41].mxu1  ;;  %v257_v36 = vld [vmem:[%s10082_s0 + $0x538] sm:$0xff]  ;;  %v256_v43 = vld [vmem:[%s10082_s0 + $0x530] sm:$0xff]  ;;  %v1470_v48 = vld [vmem:[#allocation3 + $0x2520] sm:$0xff] }
 0x285   :  { %v6473_v55 = vadd.f32 %v6472_v53, %v6471_v49  ;;  %8690 = vmatpush3.bf16.msra.mxu1 %v8689_v44  ;;  %8660 = vmatprep.subr.bf16.mxu0 %v8659_v39  ;;  %v8735_v44 = vpack.c.bf16 %v1485_v27, %v1484_v26  ;;  %v1486_v39 = vld [vmem:[#allocation3 + $0x25a0] sm:$0xff]  ;;  %v1488_v53 = vld [vmem:[#allocation3 + $0x25b0] sm:$0xff]  ;;  %v8741_v58 = vpack.c.bf16 %v1471_v56, %v1470_v48  ;;  %v1463_v27 = vld [vmem:[#allocation3 + $0x24e8] sm:$0xff] }
 0x286   :  { %v3385_v61 = vadd.f32 %v6435_v52, %v9775_v13  ;;  %v6436_v0 = vpop.f32.mrb[42].mxu0  ;;  %8692 = vmatprep.subr.bf16.mxu1 %v8691_v50  ;;  %v8697_v13 = vpack.c.bf16 %v1417_v1, %v1416_v60  ;;  %v8737_v50 = vpack.c.bf16 %v1469_v33, %v1468_v38  ;;  %v8739_v49 = vpack.c.bf16 %v1487_v40, %v1486_v39  ;;  %v1457_v52 = vld [vmem:[#allocation3 + $0x24b8] sm:$0xff]  ;;  %v1440_v60 = vld [vmem:[#allocation3 + $0x2430] sm:$0xff]  ;;  %v1462_v26 = vld [vmem:[#allocation3 + $0x24e0] sm:$0xff] }
 0x287   :  { %v6437_v4 = vpop.f32.mrb[43].mxu0  ;;  %v6474_v9 = vpop.f32.mrb[42].mxu1  ;;  %v8711_v59 = vpack.c.bf16 %v1457_v52, %v1456_v51  ;;  %v1473_v1 = vld [vmem:[#allocation3 + $0x2538] sm:$0xff]  ;;  %v1446_v33 = vld [vmem:[#allocation3 + $0x2460] sm:$0xff]  ;;  %v1479_v39 = vld [vmem:[#allocation3 + $0x2568] sm:$0xff] }
 0x288   :  { %v9805_v7 = vadd.f32 %v6473_v55, %v3385_v61  ;;  %v6438_v8 = vadd.f32 %v6437_v4, %v6436_v0  ;;  %8662 = vmatpush3.bf16.msra.mxu0 %v8661_v54  ;;  %v6475_v10 = vpop.f32.mrb[43].mxu1  ;;  %v1489_v54 = vld [vmem:[#allocation3 + $0x25b8] sm:$0xff]  ;;  %v163_v55 = vld [vmem:[%s10082_s0 + $0x248] sm:$0xff]  ;;  %v1472_v0 = vld [vmem:[#allocation3 + $0x2530] sm:$0xff]  ;;  %v8725_v48 = vpack.c.bf16 %v1447_v34, %v1446_v33  ;;  %v8757_v56 = vpack.c.bf16 %v1479_v39, %v1478_v35 }
 0x289   :  { %v6476_v11 = vadd.f32 %v6475_v10, %v6474_v9  ;;  %8694 = vmatpush3.bf16.msra.mxu1 %v8693_v62  ;;  %8664 = vmatprep.subr.bf16.mxu0 %v8663_v57  ;;  %v8709_v62 = vpack.c.bf16 %v1439_v47, %v1438_v46  ;;  %v165_v57 = vld [vmem:[%s10082_s0 + $0x258] sm:$0xff]  ;;  %v1490_v4 = vld [vmem:[#allocation3 + $0x25c0] sm:$0xff]  ;;  %v1491_v9 = vld [vmem:[#allocation3 + $0x25c8] sm:$0xff]  ;;  %v8745_v6 = vpack.c.bf16 %v1473_v1, %v1472_v0 }
 0x28a   :  { %v3390_v37 = vadd.f32 %v6438_v8, %v9784_v31  ;;  %8696 = vmatprep.subr.bf16.mxu1 %v8695_v63  ;;  %v255_v31 = vld [vmem:[%s10082_s0 + $0x528] sm:$0xff]  ;;  %v1441_v61 = vld [vmem:[#allocation3 + $0x2438] sm:$0xff]  ;;  %v8743_v63 = vpack.c.bf16 %v1489_v54, %v1488_v53  ;;  %v8715_v8 = vpack.c.bf16 %v1459_v3, %v1458_v2  ;;  %v1442_v10 = vld [vmem:[#allocation3 + $0x2440] sm:$0xff] }
 0x28b   :  { %v8713_v5 = vpack.c.bf16 %v1441_v61, %v1440_v60  ;;  %v1464_v40 = vld [vmem:[#allocation3 + $0x24f0] sm:$0xff]  ;;  %v1449_v53 = vld [vmem:[#allocation3 + $0x2478] sm:$0xff]  ;;  %v1515_v60 = vld [vmem:[#allocation3 + $0x2688] sm:$0xff] }
 0x28c   :  { %v9814_v25 = vadd.f32 %v6476_v11, %v3390_v37  ;;  %8666 = vmatpush3.bf16.msra.mxu0 %v8665_v15  ;;  %v1443_v15 = vld [vmem:[#allocation3 + $0x2448] sm:$0xff]  ;;  %v1474_v11 = vld [vmem:[#allocation3 + $0x2540] sm:$0xff]  ;;  %v1492_v37 = vld [vmem:[#allocation3 + $0x25d0] sm:$0xff] }
 0x28d   :  { %8698 = vmatpush3.bf16.msra.mxu1 %v8697_v13  ;;  %8700 = vmatprep.subr.bf16.mxu0 %v8699_v12  ;;  %v8747_v13 = vpack.c.bf16 %v1491_v9, %v1490_v4  ;;  %v1475_v12 = vld [vmem:[#allocation3 + $0x2548] sm:$0xff]  ;;  %v1448_v52 = vld [vmem:[#allocation3 + $0x2470] sm:$0xff]  ;;  %v258_v34 = vld [vmem:[%s10082_s0 + $0x540] sm:$0xff] }
 0x28e   :  { %8732 = vmatprep.subr.bf16.mxu1 %v8731_v19  ;;  %v8717_v19 = vpack.c.bf16 %v1443_v15, %v1442_v10  ;;  %v8749_v18 = vpack.c.bf16 %v1475_v12, %v1474_v11  ;;  %v1480_v54 = vld [vmem:[#allocation3 + $0x2570] sm:$0xff]  ;;  %v1547_v1 = vld [vmem:[#allocation3 + $0x2788] sm:$0xff]  ;;  %v8729_v9 = vpack.c.bf16 %v1449_v53, %v1448_v52  ;;  %v162_v11 = vld [vmem:[%s10082_s0 + $0x240] sm:$0xff] }
 0x28f   :  { %4433 = vmatmul.mubr.f32.vlgmr.msra.gmra.mrb[68].mxu0 %v158_v17  ;;  %v1493_v17 = vld [vmem:[#allocation3 + $0x25d8] sm:$0xff]  ;;  %v1499_v10 = vld [vmem:[#allocation3 + $0x2608] sm:$0xff]  ;;  %v1530_v12 = vld [vmem:[#allocation3 + $0x2700] sm:$0xff] }
 0x290   :  { %8702 = vmatpush3.bf16.msra.mxu0 %v8701_v24  ;;  %4508 = vmatmul.mubr.f32.vlgmr.msra.gmra.mrb[68].mxu1 %v160_v21  ;;  %v1444_v21 = vld [vmem:[#allocation3 + $0x2450] sm:$0xff]  ;;  %v8751_v24 = vpack.c.bf16 %v1493_v17, %v1492_v37  ;;  %v1531_v14 = vld [vmem:[#allocation3 + $0x2708] sm:$0xff]  ;;  %v1517_v17 = vld [vmem:[#allocation3 + $0x2698] sm:$0xff] }
 0x291   :  { %8734 = vmatpush3.bf16.msra.mxu1 %v8733_v28  ;;  %4437 = vmatprep.mubr.f32.mxu0 %v255_v31  ;;  %v1477_v31 = vld [vmem:[#allocation3 + $0x2558] sm:$0xff]  ;;  %v1494_v28 = vld [vmem:[#allocation3 + $0x25e0] sm:$0xff]  ;;  %v8721_v30 = vpack.c.bf16 %v1445_v22, %v1444_v21  ;;  %v1516_v37 = vld [vmem:[#allocation3 + $0x2690] sm:$0xff]  ;;  %v8797_v22 = vpack.c.bf16 %v1531_v14, %v1530_v12 }
 0x292   :  { %8704 = vmatprep.subr.bf16.mxu0 %v8703_v32  ;;  %4512 = vmatprep.mubr.f32.mxu1 %v257_v36  ;;  %v8753_v38 = vpack.c.bf16 %v1477_v31, %v1476_v23  ;;  %v8723_v32 = vpack.c.bf16 %v1463_v27, %v1462_v26  ;;  %v1549_v21 = vld [vmem:[#allocation3 + $0x2798] sm:$0xff]  ;;  %v1500_v23 = vld [vmem:[#allocation3 + $0x2610] sm:$0xff]  ;;  %v8767_v26 = vpack.c.bf16 %v1517_v17, %v1516_v37  ;;  %v1551_v33 = vld [vmem:[#allocation3 + $0x27a8] sm:$0xff] }
 0x293   :  { %4438 = vmatmul.mubr.f32.gmra.mrb[70].mxu0 %v254_v41  ;;  %8736 = vmatprep.subr.bf16.mxu1 %v8735_v44  ;;  %v8755_v44 = vpack.c.bf16 %v1495_v29, %v1494_v28  ;;  %v1465_v41 = vld [vmem:[#allocation3 + $0x24f8] sm:$0xff]  ;;  %v1532_v31 = vld [vmem:[#allocation3 + $0x2710] sm:$0xff]  ;;  %v1518_v28 = vld [vmem:[#allocation3 + $0x26a0] sm:$0xff] }
 0x294   :  { %8706 = vmatpush3.bf16.msra.mxu0 %v8705_v42  ;;  %4513 = vmatmul.mubr.f32.gmra.mrb[70].mxu1 %v256_v43  ;;  %v8727_v51 = vpack.c.bf16 %v1465_v41, %v1464_v40  ;;  %v1533_v27 = vld [vmem:[#allocation3 + $0x2718] sm:$0xff]  ;;  %v1519_v29 = vld [vmem:[#allocation3 + $0x26a8] sm:$0xff]  ;;  %v1502_v40 = vld [vmem:[#allocation3 + $0x2620] sm:$0xff] }
 0x295   :  { %8738 = vmatpush3.bf16.msra.mxu1 %v8737_v50  ;;  %8708 = vmatprep.subr.bf16.mxu0 %v8707_v45  ;;  %v1496_v50 = vld [vmem:[#allocation3 + $0x25f0] sm:$0xff]  ;;  %v1497_v45 = vld [vmem:[#allocation3 + $0x25f8] sm:$0xff]  ;;  %v8771_v39 = vpack.c.bf16 %v1519_v29, %v1518_v28  ;;  %v1503_v41 = vld [vmem:[#allocation3 + $0x2628] sm:$0xff] }
 0x296   :  { %8740 = vmatprep.subr.bf16.mxu1 %v8739_v49  ;;  %4582 = vmatprep.mubr.f32.mxu0 %v163_v55  ;;  %v1509_v37 = vld [vmem:[#allocation3 + $0x2658] sm:$0xff]  ;;  %v1540_v17 = vld [vmem:[#allocation3 + $0x2750] sm:$0xff]  ;;  %v1511_v28 = vld [vmem:[#allocation3 + $0x2668] sm:$0xff] }
 0x297   :  { %4657 = vmatprep.mubr.f32.mxu1 %v165_v57  ;;  %v8759_v57 = vpack.c.bf16 %v1497_v45, %v1496_v50  ;;  %v1535_v50 = vld [vmem:[#allocation3 + $0x2728] sm:$0xff]  ;;  %v1520_v45 = vld [vmem:[#allocation3 + $0x26b0] sm:$0xff]  ;;  %v1542_v29 = vld [vmem:[#allocation3 + $0x2760] sm:$0xff] }
 0x298   :  { %8710 = vmatpush3.bf16.msra.mxu0 %v8709_v62 }
 0x299   :  { %8742 = vmatpush3.bf16.msra.mxu1 %v8741_v58  ;;  %8712 = vmatprep.subr.bf16.mxu0 %v8711_v59  ;;  %v1481_v58 = vld [vmem:[#allocation3 + $0x2578] sm:$0xff]  ;;  %v1514_v59 = vld [vmem:[#allocation3 + $0x2680] sm:$0xff] }
 0x29a   :  { %8744 = vmatprep.subr.bf16.mxu1 %v8743_v63  ;;  %v1546_v63 = vld [vmem:[#allocation3 + $0x2780] sm:$0xff] }
 0x29c   :  { %8714 = vmatpush3.bf16.msra.mxu0 %v8713_v5 }
 0x29d   :  { %8746 = vmatpush3.bf16.msra.mxu1 %v8745_v6  ;;  %8716 = vmatprep.subr.bf16.mxu0 %v8715_v8  ;;  %v8763_v6 = vpack.c.bf16 %v1515_v60, %v1514_v59  ;;  %v1498_v8 = vld [vmem:[#allocation3 + $0x2600] sm:$0xff]  ;;  %v1523_v60 = vld [vmem:[#allocation3 + $0x26c8] sm:$0xff] }
 0x29e   :  { %8748 = vmatprep.subr.bf16.mxu1 %v8747_v13  ;;  %v8795_v13 = vpack.c.bf16 %v1547_v1, %v1546_v63  ;;  %v1522_v59 = vld [vmem:[#allocation3 + $0x26c0] sm:$0xff] }
 0x2a0   :  { %8718 = vmatpush3.bf16.msra.mxu0 %v8717_v19 }
 0x2a1   :  { %8750 = vmatpush3.bf16.msra.mxu1 %v8749_v18  ;;  %8720 = vmatprep.subr.bf16.mxu0 %v8719_v20  ;;  %v8765_v18 = vpack.c.bf16 %v1499_v10, %v1498_v8  ;;  %v1548_v20 = vld [vmem:[#allocation3 + $0x2790] sm:$0xff]  ;;  %v1525_v10 = vld [vmem:[#allocation3 + $0x26d8] sm:$0xff] }
 0x2a2   :  { %v6509_v36 = vpop.f32.mrb[44].mxu0  ;;  %8752 = vmatprep.subr.bf16.mxu1 %v8751_v24  ;;  %v1501_v24 = vld [vmem:[#allocation3 + $0x2618] sm:$0xff]  ;;  %v1524_v8 = vld [vmem:[#allocation3 + $0x26d0] sm:$0xff] }
 0x2a3   :  { %v6510_v42 = vpop.f32.mrb[45].mxu0  ;;  %v6547_v43 = vpop.f32.mrb[44].mxu1  ;;  %v8769_v35 = vpack.c.bf16 %v1501_v24, %v1500_v23  ;;  %v8783_v14 = vpack.c.bf16 %v1525_v10, %v1524_v8  ;;  %v1559_v23 = vld [vmem:[#allocation3 + $0x27e8] sm:$0xff]  ;;  %v168_v10 = vld [vmem:[%s10082_s0 + $0x270] sm:$0xff] }
 0x2a4   :  { %v6511_v46 = vadd.f32 %v6510_v42, %v6509_v36  ;;  %8722 = vmatpush3.bf16.msra.mxu0 %v8721_v30  ;;  %v6548_v47 = vpop.f32.mrb[45].mxu1  ;;  %v261_v30 = vld [vmem:[%s10082_s0 + $0x558] sm:$0xff]  ;;  %v260_v36 = vld [vmem:[%s10082_s0 + $0x550] sm:$0xff]  ;;  %v1534_v42 = vld [vmem:[#allocation3 + $0x2720] sm:$0xff] }
 0x2a5   :  { %v6549_v49 = vadd.f32 %v6548_v47, %v6547_v43  ;;  %8754 = vmatpush3.bf16.msra.mxu1 %v8753_v38  ;;  %8724 = vmatprep.subr.bf16.mxu0 %v8723_v32  ;;  %v8799_v38 = vpack.c.bf16 %v1549_v21, %v1548_v20  ;;  %v1550_v32 = vld [vmem:[#allocation3 + $0x27a0] sm:$0xff]  ;;  %v1552_v47 = vld [vmem:[#allocation3 + $0x27b0] sm:$0xff]  ;;  %v8805_v52 = vpack.c.bf16 %v1535_v50, %v1534_v42  ;;  %v1527_v21 = vld [vmem:[#allocation3 + $0x26e8] sm:$0xff] }
 0x2a6   :  { %v3535_v55 = vadd.f32 %v6511_v46, %v9805_v7  ;;  %v6512_v62 = vpop.f32.mrb[46].mxu0  ;;  %8756 = vmatprep.subr.bf16.mxu1 %v8755_v44  ;;  %v8761_v7 = vpack.c.bf16 %v1481_v58, %v1480_v54  ;;  %v8801_v44 = vpack.c.bf16 %v1533_v27, %v1532_v31  ;;  %v8803_v43 = vpack.c.bf16 %v1551_v33, %v1550_v32  ;;  %v1521_v46 = vld [vmem:[#allocation3 + $0x26b8] sm:$0xff]  ;;  %v1504_v54 = vld [vmem:[#allocation3 + $0x2630] sm:$0xff]  ;;  %v1526_v20 = vld [vmem:[#allocation3 + $0x26e0] sm:$0xff] }
 0x2a7   :  { %v6513_v61 = vpop.f32.mrb[47].mxu0  ;;  %v6550_v0 = vpop.f32.mrb[46].mxu1  ;;  %v8775_v53 = vpack.c.bf16 %v1521_v46, %v1520_v45  ;;  %v1537_v58 = vld [vmem:[#allocation3 + $0x2738] sm:$0xff]  ;;  %v1510_v27 = vld [vmem:[#allocation3 + $0x2660] sm:$0xff]  ;;  %v1543_v32 = vld [vmem:[#allocation3 + $0x2768] sm:$0xff] }
 0x2a8   :  { %v9835_v2 = vadd.f32 %v6549_v49, %v3535_v55  ;;  %v6514_v3 = vadd.f32 %v6513_v61, %v6512_v62  ;;  %8726 = vmatpush3.bf16.msra.mxu0 %v8725_v48  ;;  %v6551_v4 = vpop.f32.mrb[47].mxu1  ;;  %v1553_v48 = vld [vmem:[#allocation3 + $0x27b8] sm:$0xff]  ;;  %v167_v49 = vld [vmem:[%s10082_s0 + $0x268] sm:$0xff]  ;;  %v1536_v62 = vld [vmem:[#allocation3 + $0x2730] sm:$0xff]  ;;  %v8789_v42 = vpack.c.bf16 %v1511_v28, %v1510_v27  ;;  %v8821_v50 = vpack.c.bf16 %v1543_v32, %v1542_v29 }
 0x2a9   :  { %v6552_v5 = vadd.f32 %v6551_v4, %v6550_v0  ;;  %8758 = vmatpush3.bf16.msra.mxu1 %v8757_v56  ;;  %8728 = vmatprep.subr.bf16.mxu0 %v8727_v51  ;;  %v8773_v56 = vpack.c.bf16 %v1503_v41, %v1502_v40  ;;  %v169_v51 = vld [vmem:[%s10082_s0 + $0x278] sm:$0xff]  ;;  %v1554_v61 = vld [vmem:[#allocation3 + $0x27c0] sm:$0xff]  ;;  %v1555_v0 = vld [vmem:[#allocation3 + $0x27c8] sm:$0xff]  ;;  %v8809_v1 = vpack.c.bf16 %v1537_v58, %v1536_v62 }
 0x2aa   :  { %v3540_v15 = vadd.f32 %v6514_v3, %v9814_v25  ;;  %8760 = vmatprep.subr.bf16.mxu1 %v8759_v57  ;;  %v259_v25 = vld [vmem:[%s10082_s0 + $0x548] sm:$0xff]  ;;  %v1505_v55 = vld [vmem:[#allocation3 + $0x2638] sm:$0xff]  ;;  %v8807_v57 = vpack.c.bf16 %v1553_v48, %v1552_v47  ;;  %v8779_v3 = vpack.c.bf16 %v1523_v60, %v1522_v59  ;;  %v1506_v4 = vld [vmem:[#allocation3 + $0x2640] sm:$0xff] }
 0x2ab   :  { %v8777_v63 = vpack.c.bf16 %v1505_v55, %v1504_v54  ;;  %v1528_v33 = vld [vmem:[#allocation3 + $0x26f0] sm:$0xff]  ;;  %v1513_v47 = vld [vmem:[#allocation3 + $0x2678] sm:$0xff]  ;;  %v1579_v54 = vld [vmem:[#allocation3 + $0x2888] sm:$0xff] }
 0x2ac   :  { %v9844_v19 = vadd.f32 %v6552_v5, %v3540_v15  ;;  %8730 = vmatpush3.bf16.msra.mxu0 %v8729_v9  ;;  %v1507_v9 = vld [vmem:[#allocation3 + $0x2648] sm:$0xff]  ;;  %v1538_v5 = vld [vmem:[#allocation3 + $0x2740] sm:$0xff]  ;;  %v1556_v15 = vld [vmem:[#allocation3 + $0x27d0] sm:$0xff] }
 0x2ad   :  { %8762 = vmatpush3.bf16.msra.mxu1 %v8761_v7  ;;  %8764 = vmatprep.subr.bf16.mxu0 %v8763_v6  ;;  %v8811_v7 = vpack.c.bf16 %v1555_v0, %v1554_v61  ;;  %v1539_v6 = vld [vmem:[#allocation3 + $0x2748] sm:$0xff]  ;;  %v1512_v46 = vld [vmem:[#allocation3 + $0x2670] sm:$0xff]  ;;  %v262_v28 = vld [vmem:[%s10082_s0 + $0x560] sm:$0xff] }
 0x2ae   :  { %8796 = vmatprep.subr.bf16.mxu1 %v8795_v13  ;;  %v8781_v13 = vpack.c.bf16 %v1507_v9, %v1506_v4  ;;  %v8813_v12 = vpack.c.bf16 %v1539_v6, %v1538_v5  ;;  %v1544_v48 = vld [vmem:[#allocation3 + $0x2770] sm:$0xff]  ;;  %v1611_v58 = vld [vmem:[#allocation3 + $0x2988] sm:$0xff]  ;;  %v8793_v0 = vpack.c.bf16 %v1513_v47, %v1512_v46  ;;  %v166_v5 = vld [vmem:[%s10082_s0 + $0x260] sm:$0xff] }
 0x2af   :  { %4583 = vmatmul.mubr.f32.vlgmr.msra.gmra.mrb[72].mxu0 %v162_v11  ;;  %v1557_v11 = vld [vmem:[#allocation3 + $0x27d8] sm:$0xff]  ;;  %v1563_v4 = vld [vmem:[#allocation3 + $0x2808] sm:$0xff]  ;;  %v1594_v6 = vld [vmem:[#allocation3 + $0x2900] sm:$0xff] }
 0x2b0   :  { %8766 = vmatpush3.bf16.msra.mxu0 %v8765_v18  ;;  %4658 = vmatmul.mubr.f32.vlgmr.msra.gmra.mrb[72].mxu1 %v164_v16  ;;  %v1508_v16 = vld [vmem:[#allocation3 + $0x2650] sm:$0xff]  ;;  %v8815_v18 = vpack.c.bf16 %v1557_v11, %v1556_v15  ;;  %v1595_v8 = vld [vmem:[#allocation3 + $0x2908] sm:$0xff]  ;;  %v1581_v11 = vld [vmem:[#allocation3 + $0x2898] sm:$0xff] }
 0x2b1   :  { %8798 = vmatpush3.bf16.msra.mxu1 %v8797_v22  ;;  %4587 = vmatprep.mubr.f32.mxu0 %v259_v25  ;;  %v1541_v25 = vld [vmem:[#allocation3 + $0x2758] sm:$0xff]  ;;  %v1558_v22 = vld [vmem:[#allocation3 + $0x27e0] sm:$0xff]  ;;  %v8785_v24 = vpack.c.bf16 %v1509_v37, %v1508_v16  ;;  %v1580_v15 = vld [vmem:[#allocation3 + $0x2890] sm:$0xff]  ;;  %v8861_v37 = vpack.c.bf16 %v1595_v8, %v1594_v6 }
 0x2b2   :  { %8768 = vmatprep.subr.bf16.mxu0 %v8767_v26  ;;  %4662 = vmatprep.mubr.f32.mxu1 %v261_v30  ;;  %v8817_v31 = vpack.c.bf16 %v1541_v25, %v1540_v17  ;;  %v8787_v26 = vpack.c.bf16 %v1527_v21, %v1526_v20  ;;  %v1613_v16 = vld [vmem:[#allocation3 + $0x2998] sm:$0xff]  ;;  %v1564_v17 = vld [vmem:[#allocation3 + $0x2810] sm:$0xff]  ;;  %v8831_v20 = vpack.c.bf16 %v1581_v11, %v1580_v15  ;;  %v1615_v27 = vld [vmem:[#allocation3 + $0x29a8] sm:$0xff] }
 0x2b3   :  { %4588 = vmatmul.mubr.f32.gmra.mrb[74].mxu0 %v258_v34  ;;  %8800 = vmatprep.subr.bf16.mxu1 %v8799_v38  ;;  %v8819_v38 = vpack.c.bf16 %v1559_v23, %v1558_v22  ;;  %v1529_v34 = vld [vmem:[#allocation3 + $0x26f8] sm:$0xff]  ;;  %v1596_v25 = vld [vmem:[#allocation3 + $0x2910] sm:$0xff]  ;;  %v1582_v22 = vld [vmem:[#allocation3 + $0x28a0] sm:$0xff] }
 0x2b4   :  { %8770 = vmatpush3.bf16.msra.mxu0 %v8769_v35  ;;  %4663 = vmatmul.mubr.f32.gmra.mrb[74].mxu1 %v260_v36  ;;  %v8791_v45 = vpack.c.bf16 %v1529_v34, %v1528_v33  ;;  %v1597_v21 = vld [vmem:[#allocation3 + $0x2918] sm:$0xff]  ;;  %v1583_v23 = vld [vmem:[#allocation3 + $0x28a8] sm:$0xff]  ;;  %v1566_v33 = vld [vmem:[#allocation3 + $0x2820] sm:$0xff] }
 0x2b5   :  { %8802 = vmatpush3.bf16.msra.mxu1 %v8801_v44  ;;  %8772 = vmatprep.subr.bf16.mxu0 %v8771_v39  ;;  %v1560_v44 = vld [vmem:[#allocation3 + $0x27f0] sm:$0xff]  ;;  %v1561_v39 = vld [vmem:[#allocation3 + $0x27f8] sm:$0xff]  ;;  %v8835_v32 = vpack.c.bf16 %v1583_v23, %v1582_v22  ;;  %v1567_v34 = vld [vmem:[#allocation3 + $0x2828] sm:$0xff] }
 0x2b6   :  { %8804 = vmatprep.subr.bf16.mxu1 %v8803_v43  ;;  %4732 = vmatprep.mubr.f32.mxu0 %v167_v49  ;;  %v1573_v15 = vld [vmem:[#allocation3 + $0x2858] sm:$0xff]  ;;  %v1604_v11 = vld [vmem:[#allocation3 + $0x2950] sm:$0xff]  ;;  %v1575_v22 = vld [vmem:[#allocation3 + $0x2868] sm:$0xff] }
 0x2b7   :  { %4807 = vmatprep.mubr.f32.mxu1 %v169_v51  ;;  %v8823_v51 = vpack.c.bf16 %v1561_v39, %v1560_v44  ;;  %v1599_v44 = vld [vmem:[#allocation3 + $0x2928] sm:$0xff]  ;;  %v1584_v39 = vld [vmem:[#allocation3 + $0x28b0] sm:$0xff]  ;;  %v1606_v23 = vld [vmem:[#allocation3 + $0x2960] sm:$0xff] }
 0x2b8   :  { %8774 = vmatpush3.bf16.msra.mxu0 %v8773_v56 }
 0x2b9   :  { %8806 = vmatpush3.bf16.msra.mxu1 %v8805_v52  ;;  %8776 = vmatprep.subr.bf16.mxu0 %v8775_v53  ;;  %v1545_v52 = vld [vmem:[#allocation3 + $0x2778] sm:$0xff]  ;;  %v1578_v53 = vld [vmem:[#allocation3 + $0x2880] sm:$0xff] }
 0x2ba   :  { %8808 = vmatprep.subr.bf16.mxu1 %v8807_v57  ;;  %v1610_v57 = vld [vmem:[#allocation3 + $0x2980] sm:$0xff] }
 0x2bc   :  { %8778 = vmatpush3.bf16.msra.mxu0 %v8777_v63 }
 0x2bd   :  { %8810 = vmatpush3.bf16.msra.mxu1 %v8809_v1  ;;  %8780 = vmatprep.subr.bf16.mxu0 %v8779_v3  ;;  %v8827_v1 = vpack.c.bf16 %v1579_v54, %v1578_v53  ;;  %v1562_v3 = vld [vmem:[#allocation3 + $0x2800] sm:$0xff]  ;;  %v1587_v54 = vld [vmem:[#allocation3 + $0x28c8] sm:$0xff] }
 0x2be   :  { %8812 = vmatprep.subr.bf16.mxu1 %v8811_v7  ;;  %v8859_v7 = vpack.c.bf16 %v1611_v58, %v1610_v57  ;;  %v1586_v53 = vld [vmem:[#allocation3 + $0x28c0] sm:$0xff] }
 0x2c0   :  { %8782 = vmatpush3.bf16.msra.mxu0 %v8781_v13 }
 0x2c1   :  { %8814 = vmatpush3.bf16.msra.mxu1 %v8813_v12  ;;  %8784 = vmatprep.subr.bf16.mxu0 %v8783_v14  ;;  %v8829_v12 = vpack.c.bf16 %v1563_v4, %v1562_v3  ;;  %v1612_v14 = vld [vmem:[#allocation3 + $0x2990] sm:$0xff]  ;;  %v1589_v4 = vld [vmem:[#allocation3 + $0x28d8] sm:$0xff] }
 0x2c2   :  { %v6585_v30 = vpop.f32.mrb[48].mxu0  ;;  %8816 = vmatprep.subr.bf16.mxu1 %v8815_v18  ;;  %v1565_v18 = vld [vmem:[#allocation3 + $0x2818] sm:$0xff]  ;;  %v1588_v3 = vld [vmem:[#allocation3 + $0x28d0] sm:$0xff] }
 0x2c3   :  { %v6586_v35 = vpop.f32.mrb[49].mxu0  ;;  %v6623_v36 = vpop.f32.mrb[48].mxu1  ;;  %v8833_v29 = vpack.c.bf16 %v1565_v18, %v1564_v17  ;;  %v8847_v8 = vpack.c.bf16 %v1589_v4, %v1588_v3  ;;  %v1623_v17 = vld [vmem:[#allocation3 + $0x29e8] sm:$0xff]  ;;  %v172_v4 = vld [vmem:[%s10082_s0 + $0x290] sm:$0xff] }
 0x2c4   :  { %v6587_v40 = vadd.f32 %v6586_v35, %v6585_v30  ;;  %8786 = vmatpush3.bf16.msra.mxu0 %v8785_v24  ;;  %v6624_v41 = vpop.f32.mrb[49].mxu1  ;;  %v265_v24 = vld [vmem:[%s10082_s0 + $0x578] sm:$0xff]  ;;  %v264_v30 = vld [vmem:[%s10082_s0 + $0x570] sm:$0xff]  ;;  %v1598_v35 = vld [vmem:[#allocation3 + $0x2920] sm:$0xff] }
 0x2c5   :  { %v6625_v43 = vadd.f32 %v6624_v41, %v6623_v36  ;;  %8818 = vmatpush3.bf16.msra.mxu1 %v8817_v31  ;;  %8788 = vmatprep.subr.bf16.mxu0 %v8787_v26  ;;  %v8863_v31 = vpack.c.bf16 %v1613_v16, %v1612_v14  ;;  %v1614_v26 = vld [vmem:[#allocation3 + $0x29a0] sm:$0xff]  ;;  %v1616_v41 = vld [vmem:[#allocation3 + $0x29b0] sm:$0xff]  ;;  %v8869_v46 = vpack.c.bf16 %v1599_v44, %v1598_v35  ;;  %v1591_v16 = vld [vmem:[#allocation3 + $0x28e8] sm:$0xff] }
 0x2c6   :  { %v3685_v49 = vadd.f32 %v6587_v40, %v9835_v2  ;;  %v6588_v56 = vpop.f32.mrb[50].mxu0  ;;  %8820 = vmatprep.subr.bf16.mxu1 %v8819_v38  ;;  %v8825_v2 = vpack.c.bf16 %v1545_v52, %v1544_v48  ;;  %v8865_v38 = vpack.c.bf16 %v1597_v21, %v1596_v25  ;;  %v8867_v36 = vpack.c.bf16 %v1615_v27, %v1614_v26  ;;  %v1585_v40 = vld [vmem:[#allocation3 + $0x28b8] sm:$0xff]  ;;  %v1568_v48 = vld [vmem:[#allocation3 + $0x2830] sm:$0xff]  ;;  %v1590_v14 = vld [vmem:[#allocation3 + $0x28e0] sm:$0xff] }
 0x2c7   :  { %v6589_v55 = vpop.f32.mrb[51].mxu0  ;;  %v6626_v62 = vpop.f32.mrb[50].mxu1  ;;  %v8839_v47 = vpack.c.bf16 %v1585_v40, %v1584_v39  ;;  %v1601_v52 = vld [vmem:[#allocation3 + $0x2938] sm:$0xff]  ;;  %v1574_v21 = vld [vmem:[#allocation3 + $0x2860] sm:$0xff]  ;;  %v1607_v26 = vld [vmem:[#allocation3 + $0x2968] sm:$0xff] }
 0x2c8   :  { %v9865_v59 = vadd.f32 %v6625_v43, %v3685_v49  ;;  %v6590_v60 = vadd.f32 %v6589_v55, %v6588_v56  ;;  %8790 = vmatpush3.bf16.msra.mxu0 %v8789_v42  ;;  %v6627_v61 = vpop.f32.mrb[51].mxu1  ;;  %v1617_v42 = vld [vmem:[#allocation3 + $0x29b8] sm:$0xff]  ;;  %v171_v43 = vld [vmem:[%s10082_s0 + $0x288] sm:$0xff]  ;;  %v1600_v56 = vld [vmem:[#allocation3 + $0x2930] sm:$0xff]  ;;  %v8853_v35 = vpack.c.bf16 %v1575_v22, %v1574_v21  ;;  %v8885_v44 = vpack.c.bf16 %v1607_v26, %v1606_v23 }
 0x2c9   :  { %v6628_v63 = vadd.f32 %v6627_v61, %v6626_v62  ;;  %8822 = vmatpush3.bf16.msra.mxu1 %v8821_v50  ;;  %8792 = vmatprep.subr.bf16.mxu0 %v8791_v45  ;;  %v8837_v50 = vpack.c.bf16 %v1567_v34, %v1566_v33  ;;  %v173_v45 = vld [vmem:[%s10082_s0 + $0x298] sm:$0xff]  ;;  %v1618_v55 = vld [vmem:[#allocation3 + $0x29c0] sm:$0xff]  ;;  %v1619_v62 = vld [vmem:[#allocation3 + $0x29c8] sm:$0xff]  ;;  %v8873_v58 = vpack.c.bf16 %v1601_v52, %v1600_v56 }
 0x2ca   :  { %v3690_v9 = vadd.f32 %v6590_v60, %v9844_v19  ;;  %8824 = vmatprep.subr.bf16.mxu1 %v8823_v51  ;;  %v263_v19 = vld [vmem:[%s10082_s0 + $0x568] sm:$0xff]  ;;  %v1569_v49 = vld [vmem:[#allocation3 + $0x2838] sm:$0xff]  ;;  %v8871_v51 = vpack.c.bf16 %v1617_v42, %v1616_v41  ;;  %v8843_v60 = vpack.c.bf16 %v1587_v54, %v1586_v53  ;;  %v1570_v61 = vld [vmem:[#allocation3 + $0x2840] sm:$0xff] }
 0x2cb   :  { %v8841_v57 = vpack.c.bf16 %v1569_v49, %v1568_v48  ;;  %v1592_v27 = vld [vmem:[#allocation3 + $0x28f0] sm:$0xff]  ;;  %v1577_v41 = vld [vmem:[#allocation3 + $0x2878] sm:$0xff]  ;;  %v1643_v48 = vld [vmem:[#allocation3 + $0x2a88] sm:$0xff] }
 0x2cc   :  { %v9874_v13 = vadd.f32 %v6628_v63, %v3690_v9  ;;  %8794 = vmatpush3.bf16.msra.mxu0 %v8793_v0  ;;  %v1571_v0 = vld [vmem:[#allocation3 + $0x2848] sm:$0xff]  ;;  %v1602_v63 = vld [vmem:[#allocation3 + $0x2940] sm:$0xff]  ;;  %v1620_v9 = vld [vmem:[#allocation3 + $0x29d0] sm:$0xff] }
 0x2cd   :  { %8826 = vmatpush3.bf16.msra.mxu1 %v8825_v2  ;;  %8828 = vmatprep.subr.bf16.mxu0 %v8827_v1  ;;  %v8875_v2 = vpack.c.bf16 %v1619_v62, %v1618_v55  ;;  %v1603_v1 = vld [vmem:[#allocation3 + $0x2948] sm:$0xff]  ;;  %v1576_v40 = vld [vmem:[#allocation3 + $0x2870] sm:$0xff]  ;;  %v266_v22 = vld [vmem:[%s10082_s0 + $0x580] sm:$0xff] }
 0x2ce   :  { %8860 = vmatprep.subr.bf16.mxu1 %v8859_v7  ;;  %v8845_v7 = vpack.c.bf16 %v1571_v0, %v1570_v61  ;;  %v8877_v6 = vpack.c.bf16 %v1603_v1, %v1602_v63  ;;  %v1608_v42 = vld [vmem:[#allocation3 + $0x2970] sm:$0xff]  ;;  %v1675_v52 = vld [vmem:[#allocation3 + $0x2b88] sm:$0xff]  ;;  %v8857_v62 = vpack.c.bf16 %v1577_v41, %v1576_v40  ;;  %v170_v63 = vld [vmem:[%s10082_s0 + $0x280] sm:$0xff] }
 0x2cf   :  { %4733 = vmatmul.mubr.f32.vlgmr.msra.gmra.mrb[76].mxu0 %v166_v5  ;;  %v1621_v5 = vld [vmem:[#allocation3 + $0x29d8] sm:$0xff]  ;;  %v1627_v61 = vld [vmem:[#allocation3 + $0x2a08] sm:$0xff]  ;;  %v1658_v1 = vld [vmem:[#allocation3 + $0x2b00] sm:$0xff] }
 0x2d0   :  { %8830 = vmatpush3.bf16.msra.mxu0 %v8829_v12  ;;  %4808 = vmatmul.mubr.f32.vlgmr.msra.gmra.mrb[76].mxu1 %v168_v10  ;;  %v1572_v10 = vld [vmem:[#allocation3 + $0x2850] sm:$0xff]  ;;  %v8879_v12 = vpack.c.bf16 %v1621_v5, %v1620_v9  ;;  %v1659_v3 = vld [vmem:[#allocation3 + $0x2b08] sm:$0xff]  ;;  %v1645_v5 = vld [vmem:[#allocation3 + $0x2a98] sm:$0xff] }
 0x2d1   :  { %8862 = vmatpush3.bf16.msra.mxu1 %v8861_v37  ;;  %4737 = vmatprep.mubr.f32.mxu0 %v263_v19  ;;  %v1605_v19 = vld [vmem:[#allocation3 + $0x2958] sm:$0xff]  ;;  %v1622_v37 = vld [vmem:[#allocation3 + $0x29e0] sm:$0xff]  ;;  %v8849_v18 = vpack.c.bf16 %v1573_v15, %v1572_v10  ;;  %v1644_v9 = vld [vmem:[#allocation3 + $0x2a90] sm:$0xff]  ;;  %v8925_v15 = vpack.c.bf16 %v1659_v3, %v1658_v1 }
 0x2d2   :  { %8832 = vmatprep.subr.bf16.mxu0 %v8831_v20  ;;  %4812 = vmatprep.mubr.f32.mxu1 %v265_v24  ;;  %v8881_v25 = vpack.c.bf16 %v1605_v19, %v1604_v11  ;;  %v8851_v20 = vpack.c.bf16 %v1591_v16, %v1590_v14  ;;  %v1677_v10 = vld [vmem:[#allocation3 + $0x2b98] sm:$0xff]  ;;  %v1628_v11 = vld [vmem:[#allocation3 + $0x2a10] sm:$0xff]  ;;  %v8895_v14 = vpack.c.bf16 %v1645_v5, %v1644_v9  ;;  %v1679_v21 = vld [vmem:[#allocation3 + $0x2ba8] sm:$0xff] }
 0x2d3   :  { %4738 = vmatmul.mubr.f32.gmra.mrb[78].mxu0 %v262_v28  ;;  %8864 = vmatprep.subr.bf16.mxu1 %v8863_v31  ;;  %v8883_v31 = vpack.c.bf16 %v1623_v17, %v1622_v37  ;;  %v1593_v28 = vld [vmem:[#allocation3 + $0x28f8] sm:$0xff]  ;;  %v1660_v19 = vld [vmem:[#allocation3 + $0x2b10] sm:$0xff]  ;;  %v1646_v37 = vld [vmem:[#allocation3 + $0x2aa0] sm:$0xff] }
 0x2d4   :  { %8834 = vmatpush3.bf16.msra.mxu0 %v8833_v29  ;;  %4813 = vmatmul.mubr.f32.gmra.mrb[78].mxu1 %v264_v30  ;;  %v8855_v39 = vpack.c.bf16 %v1593_v28, %v1592_v27  ;;  %v1661_v16 = vld [vmem:[#allocation3 + $0x2b18] sm:$0xff]  ;;  %v1647_v17 = vld [vmem:[#allocation3 + $0x2aa8] sm:$0xff]  ;;  %v1630_v27 = vld [vmem:[#allocation3 + $0x2a20] sm:$0xff] }
 0x2d5   :  { %8866 = vmatpush3.bf16.msra.mxu1 %v8865_v38  ;;  %8836 = vmatprep.subr.bf16.mxu0 %v8835_v32  ;;  %v1624_v38 = vld [vmem:[#allocation3 + $0x29f0] sm:$0xff]  ;;  %v1625_v32 = vld [vmem:[#allocation3 + $0x29f8] sm:$0xff]  ;;  %v8899_v26 = vpack.c.bf16 %v1647_v17, %v1646_v37  ;;  %v1631_v28 = vld [vmem:[#allocation3 + $0x2a28] sm:$0xff] }
 0x2d6   :  { %8868 = vmatprep.subr.bf16.mxu1 %v8867_v36  ;;  %4882 = vmatprep.mubr.f32.mxu0 %v171_v43  ;;  %v1637_v9 = vld [vmem:[#allocation3 + $0x2a58] sm:$0xff]  ;;  %v1668_v5 = vld [vmem:[#allocation3 + $0x2b50] sm:$0xff]  ;;  %v1639_v37 = vld [vmem:[#allocation3 + $0x2a68] sm:$0xff] }
 0x2d7   :  { %4957 = vmatprep.mubr.f32.mxu1 %v173_v45  ;;  %v8887_v45 = vpack.c.bf16 %v1625_v32, %v1624_v38  ;;  %v1663_v38 = vld [vmem:[#allocation3 + $0x2b28] sm:$0xff]  ;;  %v1648_v32 = vld [vmem:[#allocation3 + $0x2ab0] sm:$0xff]  ;;  %v1670_v17 = vld [vmem:[#allocation3 + $0x2b60] sm:$0xff] }
 0x2d8   :  { %8838 = vmatpush3.bf16.msra.mxu0 %v8837_v50 }
 0x2d9   :  { %8870 = vmatpush3.bf16.msra.mxu1 %v8869_v46  ;;  %8840 = vmatprep.subr.bf16.mxu0 %v8839_v47  ;;  %v1609_v46 = vld [vmem:[#allocation3 + $0x2978] sm:$0xff]  ;;  %v1642_v47 = vld [vmem:[#allocation3 + $0x2a80] sm:$0xff] }
 0x2da   :  { %8872 = vmatprep.subr.bf16.mxu1 %v8871_v51  ;;  %v1674_v51 = vld [vmem:[#allocation3 + $0x2b80] sm:$0xff] }
 0x2dc   :  { %8842 = vmatpush3.bf16.msra.mxu0 %v8841_v57 }
 0x2dd   :  { %8874 = vmatpush3.bf16.msra.mxu1 %v8873_v58  ;;  %8844 = vmatprep.subr.bf16.mxu0 %v8843_v60  ;;  %v8891_v58 = vpack.c.bf16 %v1643_v48, %v1642_v47  ;;  %v1626_v60 = vld [vmem:[#allocation3 + $0x2a00] sm:$0xff]  ;;  %v1651_v48 = vld [vmem:[#allocation3 + $0x2ac8] sm:$0xff] }
 0x2de   :  { %8876 = vmatprep.subr.bf16.mxu1 %v8875_v2  ;;  %v8923_v2 = vpack.c.bf16 %v1675_v52, %v1674_v51  ;;  %v1650_v47 = vld [vmem:[#allocation3 + $0x2ac0] sm:$0xff] }
 0x2e0   :  { %8846 = vmatpush3.bf16.msra.mxu0 %v8845_v7 }
 0x2e1   :  { %8878 = vmatpush3.bf16.msra.mxu1 %v8877_v6  ;;  %8848 = vmatprep.subr.bf16.mxu0 %v8847_v8  ;;  %v8893_v6 = vpack.c.bf16 %v1627_v61, %v1626_v60  ;;  %v1676_v8 = vld [vmem:[#allocation3 + $0x2b90] sm:$0xff]  ;;  %v1653_v61 = vld [vmem:[#allocation3 + $0x2ad8] sm:$0xff] }
 0x2e2   :  { %v6661_v24 = vpop.f32.mrb[52].mxu0  ;;  %8880 = vmatprep.subr.bf16.mxu1 %v8879_v12  ;;  %v1629_v12 = vld [vmem:[#allocation3 + $0x2a18] sm:$0xff]  ;;  %v1652_v60 = vld [vmem:[#allocation3 + $0x2ad0] sm:$0xff] }
 0x2e3   :  { %v6662_v29 = vpop.f32.mrb[53].mxu0  ;;  %v6699_v30 = vpop.f32.mrb[52].mxu1  ;;  %v8897_v23 = vpack.c.bf16 %v1629_v12, %v1628_v11  ;;  %v8911_v3 = vpack.c.bf16 %v1653_v61, %v1652_v60  ;;  %v1687_v11 = vld [vmem:[#allocation3 + $0x2be8] sm:$0xff]  ;;  %v176_v61 = vld [vmem:[%s10082_s0 + $0x2b0] sm:$0xff] }
 0x2e4   :  { %v6663_v33 = vadd.f32 %v6662_v29, %v6661_v24  ;;  %8850 = vmatpush3.bf16.msra.mxu0 %v8849_v18  ;;  %v6700_v34 = vpop.f32.mrb[53].mxu1  ;;  %v269_v18 = vld [vmem:[%s10082_s0 + $0x598] sm:$0xff]  ;;  %v268_v24 = vld [vmem:[%s10082_s0 + $0x590] sm:$0xff]  ;;  %v1662_v29 = vld [vmem:[#allocation3 + $0x2b20] sm:$0xff] }
 0x2e5   :  { %v6701_v36 = vadd.f32 %v6700_v34, %v6699_v30  ;;  %8882 = vmatpush3.bf16.msra.mxu1 %v8881_v25  ;;  %8852 = vmatprep.subr.bf16.mxu0 %v8851_v20  ;;  %v8927_v25 = vpack.c.bf16 %v1677_v10, %v1676_v8  ;;  %v1678_v20 = vld [vmem:[#allocation3 + $0x2ba0] sm:$0xff]  ;;  %v1680_v34 = vld [vmem:[#allocation3 + $0x2bb0] sm:$0xff]  ;;  %v8933_v40 = vpack.c.bf16 %v1663_v38, %v1662_v29  ;;  %v1655_v10 = vld [vmem:[#allocation3 + $0x2ae8] sm:$0xff] }
 0x2e6   :  { %v3835_v43 = vadd.f32 %v6663_v33, %v9865_v59  ;;  %v6664_v50 = vpop.f32.mrb[54].mxu0  ;;  %8884 = vmatprep.subr.bf16.mxu1 %v8883_v31  ;;  %v8889_v59 = vpack.c.bf16 %v1609_v46, %v1608_v42  ;;  %v8929_v31 = vpack.c.bf16 %v1661_v16, %v1660_v19  ;;  %v8931_v30 = vpack.c.bf16 %v1679_v21, %v1678_v20  ;;  %v1649_v33 = vld [vmem:[#allocation3 + $0x2ab8] sm:$0xff]  ;;  %v1632_v42 = vld [vmem:[#allocation3 + $0x2a30] sm:$0xff]  ;;  %v1654_v8 = vld [vmem:[#allocation3 + $0x2ae0] sm:$0xff] }
 0x2e7   :  { %v6665_v49 = vpop.f32.mrb[55].mxu0  ;;  %v6702_v56 = vpop.f32.mrb[54].mxu1  ;;  %v8903_v41 = vpack.c.bf16 %v1649_v33, %v1648_v32  ;;  %v1665_v46 = vld [vmem:[#allocation3 + $0x2b38] sm:$0xff]  ;;  %v1638_v16 = vld [vmem:[#allocation3 + $0x2a60] sm:$0xff]  ;;  %v1671_v20 = vld [vmem:[#allocation3 + $0x2b68] sm:$0xff] }
 0x2e8   :  { %v9895_v53 = vadd.f32 %v6701_v36, %v3835_v43  ;;  %v6666_v54 = vadd.f32 %v6665_v49, %v6664_v50  ;;  %8854 = vmatpush3.bf16.msra.mxu0 %v8853_v35  ;;  %v6703_v55 = vpop.f32.mrb[55].mxu1  ;;  %v1681_v35 = vld [vmem:[#allocation3 + $0x2bb8] sm:$0xff]  ;;  %v175_v36 = vld [vmem:[%s10082_s0 + $0x2a8] sm:$0xff]  ;;  %v1664_v50 = vld [vmem:[#allocation3 + $0x2b30] sm:$0xff]  ;;  %v8917_v29 = vpack.c.bf16 %v1639_v37, %v1638_v16  ;;  %v8949_v38 = vpack.c.bf16 %v1671_v20, %v1670_v17 }
 0x2e9   :  { %v6704_v57 = vadd.f32 %v6703_v55, %v6702_v56  ;;  %8886 = vmatpush3.bf16.msra.mxu1 %v8885_v44  ;;  %8856 = vmatprep.subr.bf16.mxu0 %v8855_v39  ;;  %v8901_v44 = vpack.c.bf16 %v1631_v28, %v1630_v27  ;;  %v177_v39 = vld [vmem:[%s10082_s0 + $0x2b8] sm:$0xff]  ;;  %v1682_v49 = vld [vmem:[#allocation3 + $0x2bc0] sm:$0xff]  ;;  %v1683_v56 = vld [vmem:[#allocation3 + $0x2bc8] sm:$0xff]  ;;  %v8937_v52 = vpack.c.bf16 %v1665_v46, %v1664_v50 }
 0x2ea   :  { %v3840_v0 = vadd.f32 %v6666_v54, %v9874_v13  ;;  %8888 = vmatprep.subr.bf16.mxu1 %v8887_v45  ;;  %v267_v13 = vld [vmem:[%s10082_s0 + $0x588] sm:$0xff]  ;;  %v1633_v43 = vld [vmem:[#allocation3 + $0x2a38] sm:$0xff]  ;;  %v8935_v45 = vpack.c.bf16 %v1681_v35, %v1680_v34  ;;  %v8907_v54 = vpack.c.bf16 %v1651_v48, %v1650_v47  ;;  %v1634_v55 = vld [vmem:[#allocation3 + $0x2a40] sm:$0xff] }
 0x2eb   :  { %v8905_v51 = vpack.c.bf16 %v1633_v43, %v1632_v42  ;;  %v1656_v21 = vld [vmem:[#allocation3 + $0x2af0] sm:$0xff]  ;;  %v1641_v34 = vld [vmem:[#allocation3 + $0x2a78] sm:$0xff]  ;;  %v1707_v42 = vld [vmem:[#allocation3 + $0x2c88] sm:$0xff] }
 0x2ec   :  { %v9904_v7 = vadd.f32 %v6704_v57, %v3840_v0  ;;  %8858 = vmatpush3.bf16.msra.mxu0 %v8857_v62  ;;  %v1635_v62 = vld [vmem:[#allocation3 + $0x2a48] sm:$0xff]  ;;  %v1666_v57 = vld [vmem:[#allocation3 + $0x2b40] sm:$0xff]  ;;  %v1684_v0 = vld [vmem:[#allocation3 + $0x2bd0] sm:$0xff] }
 0x2ed   :  { %8890 = vmatpush3.bf16.msra.mxu1 %v8889_v59  ;;  %8892 = vmatprep.subr.bf16.mxu0 %v8891_v58  ;;  %v8939_v59 = vpack.c.bf16 %v1683_v56, %v1682_v49  ;;  %v1667_v58 = vld [vmem:[#allocation3 + $0x2b48] sm:$0xff]  ;;  %v1640_v33 = vld [vmem:[#allocation3 + $0x2a70] sm:$0xff]  ;;  %v270_v37 = vld [vmem:[%s10082_s0 + $0x5a0] sm:$0xff] }
 0x2ee   :  { %8924 = vmatprep.subr.bf16.mxu1 %v8923_v2  ;;  %v8909_v2 = vpack.c.bf16 %v1635_v62, %v1634_v55  ;;  %v8941_v1 = vpack.c.bf16 %v1667_v58, %v1666_v57  ;;  %v1672_v35 = vld [vmem:[#allocation3 + $0x2b70] sm:$0xff]  ;;  %v1739_v46 = vld [vmem:[#allocation3 + $0x2d88] sm:$0xff]  ;;  %v8921_v56 = vpack.c.bf16 %v1641_v34, %v1640_v33  ;;  %v174_v57 = vld [vmem:[%s10082_s0 + $0x2a0] sm:$0xff] }
 0x2ef   :  { %4883 = vmatmul.mubr.f32.vlgmr.msra.gmra.mrb[80].mxu0 %v170_v63  ;;  %v1685_v63 = vld [vmem:[#allocation3 + $0x2bd8] sm:$0xff]  ;;  %v1691_v55 = vld [vmem:[#allocation3 + $0x2c08] sm:$0xff]  ;;  %v1722_v58 = vld [vmem:[#allocation3 + $0x2d00] sm:$0xff] }
 0x2f0   :  { %8894 = vmatpush3.bf16.msra.mxu0 %v8893_v6  ;;  %4958 = vmatmul.mubr.f32.vlgmr.msra.gmra.mrb[80].mxu1 %v172_v4  ;;  %v1636_v4 = vld [vmem:[#allocation3 + $0x2a50] sm:$0xff]  ;;  %v8943_v6 = vpack.c.bf16 %v1685_v63, %v1684_v0  ;;  %v1723_v60 = vld [vmem:[#allocation3 + $0x2d08] sm:$0xff]  ;;  %v1709_v63 = vld [vmem:[#allocation3 + $0x2c98] sm:$0xff] }
 0x2f1   :  { %8926 = vmatpush3.bf16.msra.mxu1 %v8925_v15  ;;  %4887 = vmatprep.mubr.f32.mxu0 %v267_v13  ;;  %v1669_v13 = vld [vmem:[#allocation3 + $0x2b58] sm:$0xff]  ;;  %v1686_v15 = vld [vmem:[#allocation3 + $0x2be0] sm:$0xff]  ;;  %v8913_v12 = vpack.c.bf16 %v1637_v9, %v1636_v4  ;;  %v1708_v0 = vld [vmem:[#allocation3 + $0x2c90] sm:$0xff]  ;;  %v8989_v9 = vpack.c.bf16 %v1723_v60, %v1722_v58 }
 0x2f2   :  { %8896 = vmatprep.subr.bf16.mxu0 %v8895_v14  ;;  %4962 = vmatprep.mubr.f32.mxu1 %v269_v18  ;;  %v8945_v19 = vpack.c.bf16 %v1669_v13, %v1668_v5  ;;  %v8915_v14 = vpack.c.bf16 %v1655_v10, %v1654_v8  ;;  %v1741_v4 = vld [vmem:[#allocation3 + $0x2d98] sm:$0xff]  ;;  %v1692_v5 = vld [vmem:[#allocation3 + $0x2c10] sm:$0xff]  ;;  %v8959_v8 = vpack.c.bf16 %v1709_v63, %v1708_v0  ;;  %v1743_v16 = vld [vmem:[#allocation3 + $0x2da8] sm:$0xff] }
 0x2f3   :  { %4888 = vmatmul.mubr.f32.gmra.mrb[82].mxu0 %v266_v22  ;;  %8928 = vmatprep.subr.bf16.mxu1 %v8927_v25  ;;  %v8947_v25 = vpack.c.bf16 %v1687_v11, %v1686_v15  ;;  %v1657_v22 = vld [vmem:[#allocation3 + $0x2af8] sm:$0xff]  ;;  %v1724_v13 = vld [vmem:[#allocation3 + $0x2d10] sm:$0xff]  ;;  %v1710_v15 = vld [vmem:[#allocation3 + $0x2ca0] sm:$0xff] }
 0x2f4   :  { %8898 = vmatpush3.bf16.msra.mxu0 %v8897_v23  ;;  %4963 = vmatmul.mubr.f32.gmra.mrb[82].mxu1 %v268_v24  ;;  %v8919_v32 = vpack.c.bf16 %v1657_v22, %v1656_v21  ;;  %v1725_v10 = vld [vmem:[#allocation3 + $0x2d18] sm:$0xff]  ;;  %v1711_v11 = vld [vmem:[#allocation3 + $0x2ca8] sm:$0xff]  ;;  %v1694_v21 = vld [vmem:[#allocation3 + $0x2c20] sm:$0xff] }
 0x2f5   :  { %8930 = vmatpush3.bf16.msra.mxu1 %v8929_v31  ;;  %8900 = vmatprep.subr.bf16.mxu0 %v8899_v26  ;;  %v1688_v31 = vld [vmem:[#allocation3 + $0x2bf0] sm:$0xff]  ;;  %v1689_v26 = vld [vmem:[#allocation3 + $0x2bf8] sm:$0xff]  ;;  %v8963_v20 = vpack.c.bf16 %v1711_v11, %v1710_v15  ;;  %v1695_v22 = vld [vmem:[#allocation3 + $0x2c28] sm:$0xff] }
 0x2f6   :  { %8932 = vmatprep.subr.bf16.mxu1 %v8931_v30  ;;  %5032 = vmatprep.mubr.f32.mxu0 %v175_v36  ;;  %v1701_v0 = vld [vmem:[#allocation3 + $0x2c58] sm:$0xff]  ;;  %v1732_v63 = vld [vmem:[#allocation3 + $0x2d50] sm:$0xff]  ;;  %v1703_v15 = vld [vmem:[#allocation3 + $0x2c68] sm:$0xff] }
 0x2f7   :  { %5107 = vmatprep.mubr.f32.mxu1 %v177_v39  ;;  %v8951_v39 = vpack.c.bf16 %v1689_v26, %v1688_v31  ;;  %v1727_v31 = vld [vmem:[#allocation3 + $0x2d28] sm:$0xff]  ;;  %v1712_v26 = vld [vmem:[#allocation3 + $0x2cb0] sm:$0xff]  ;;  %v1734_v11 = vld [vmem:[#allocation3 + $0x2d60] sm:$0xff] }
 0x2f8   :  { %8902 = vmatpush3.bf16.msra.mxu0 %v8901_v44 }
 0x2f9   :  { %8934 = vmatpush3.bf16.msra.mxu1 %v8933_v40  ;;  %8904 = vmatprep.subr.bf16.mxu0 %v8903_v41  ;;  %v1673_v40 = vld [vmem:[#allocation3 + $0x2b78] sm:$0xff]  ;;  %v1706_v41 = vld [vmem:[#allocation3 + $0x2c80] sm:$0xff] }
 0x2fa   :  { %8936 = vmatprep.subr.bf16.mxu1 %v8935_v45  ;;  %v1738_v45 = vld [vmem:[#allocation3 + $0x2d80] sm:$0xff] }
 0x2fc   :  { %8906 = vmatpush3.bf16.msra.mxu0 %v8905_v51 }
 0x2fd   :  { %8938 = vmatpush3.bf16.msra.mxu1 %v8937_v52  ;;  %8908 = vmatprep.subr.bf16.mxu0 %v8907_v54  ;;  %v8955_v52 = vpack.c.bf16 %v1707_v42, %v1706_v41  ;;  %v1690_v54 = vld [vmem:[#allocation3 + $0x2c00] sm:$0xff]  ;;  %v1715_v42 = vld [vmem:[#allocation3 + $0x2cc8] sm:$0xff] }
 0x2fe   :  { %8940 = vmatprep.subr.bf16.mxu1 %v8939_v59  ;;  %v8987_v59 = vpack.c.bf16 %v1739_v46, %v1738_v45  ;;  %v1714_v41 = vld [vmem:[#allocation3 + $0x2cc0] sm:$0xff] }
 0x300   :  { %8910 = vmatpush3.bf16.msra.mxu0 %v8909_v2 }
 0x301   :  { %8942 = vmatpush3.bf16.msra.mxu1 %v8941_v1  ;;  %8912 = vmatprep.subr.bf16.mxu0 %v8911_v3  ;;  %v8957_v1 = vpack.c.bf16 %v1691_v55, %v1690_v54  ;;  %v1740_v3 = vld [vmem:[#allocation3 + $0x2d90] sm:$0xff]  ;;  %v1717_v55 = vld [vmem:[#allocation3 + $0x2cd8] sm:$0xff] }
 0x302   :  { %v6737_v18 = vpop.f32.mrb[56].mxu0  ;;  %8944 = vmatprep.subr.bf16.mxu1 %v8943_v6  ;;  %v1693_v6 = vld [vmem:[#allocation3 + $0x2c18] sm:$0xff]  ;;  %v1716_v54 = vld [vmem:[#allocation3 + $0x2cd0] sm:$0xff] }
 0x303   :  { %v6738_v23 = vpop.f32.mrb[57].mxu0  ;;  %v6775_v24 = vpop.f32.mrb[56].mxu1  ;;  %v8961_v17 = vpack.c.bf16 %v1693_v6, %v1692_v5  ;;  %v8975_v60 = vpack.c.bf16 %v1717_v55, %v1716_v54  ;;  %v1751_v5 = vld [vmem:[#allocation3 + $0x2de8] sm:$0xff]  ;;  %v180_v55 = vld [vmem:[%s10082_s0 + $0x2d0] sm:$0xff] }
 0x304   :  { %v6739_v27 = vadd.f32 %v6738_v23, %v6737_v18  ;;  %8914 = vmatpush3.bf16.msra.mxu0 %v8913_v12  ;;  %v6776_v28 = vpop.f32.mrb[57].mxu1  ;;  %v273_v12 = vld [vmem:[%s10082_s0 + $0x5b8] sm:$0xff]  ;;  %v272_v18 = vld [vmem:[%s10082_s0 + $0x5b0] sm:$0xff]  ;;  %v1726_v23 = vld [vmem:[#allocation3 + $0x2d20] sm:$0xff] }
 0x305   :  { %v6777_v30 = vadd.f32 %v6776_v28, %v6775_v24  ;;  %8946 = vmatpush3.bf16.msra.mxu1 %v8945_v19  ;;  %8916 = vmatprep.subr.bf16.mxu0 %v8915_v14  ;;  %v8991_v19 = vpack.c.bf16 %v1741_v4, %v1740_v3  ;;  %v1742_v14 = vld [vmem:[#allocation3 + $0x2da0] sm:$0xff]  ;;  %v1744_v28 = vld [vmem:[#allocation3 + $0x2db0] sm:$0xff]  ;;  %v8997_v33 = vpack.c.bf16 %v1727_v31, %v1726_v23  ;;  %v1719_v4 = vld [vmem:[#allocation3 + $0x2ce8] sm:$0xff] }
 0x306   :  { %v3985_v36 = vadd.f32 %v6739_v27, %v9895_v53  ;;  %v6740_v44 = vpop.f32.mrb[58].mxu0  ;;  %8948 = vmatprep.subr.bf16.mxu1 %v8947_v25  ;;  %v8953_v53 = vpack.c.bf16 %v1673_v40, %v1672_v35  ;;  %v8993_v25 = vpack.c.bf16 %v1725_v10, %v1724_v13  ;;  %v8995_v24 = vpack.c.bf16 %v1743_v16, %v1742_v14  ;;  %v1713_v27 = vld [vmem:[#allocation3 + $0x2cb8] sm:$0xff]  ;;  %v1696_v35 = vld [vmem:[#allocation3 + $0x2c30] sm:$0xff]  ;;  %v1718_v3 = vld [vmem:[#allocation3 + $0x2ce0] sm:$0xff] }
 0x307   :  { %v6741_v43 = vpop.f32.mrb[59].mxu0  ;;  %v6778_v50 = vpop.f32.mrb[58].mxu1  ;;  %v8967_v34 = vpack.c.bf16 %v1713_v27, %v1712_v26  ;;  %v1729_v40 = vld [vmem:[#allocation3 + $0x2d38] sm:$0xff]  ;;  %v1702_v10 = vld [vmem:[#allocation3 + $0x2c60] sm:$0xff]  ;;  %v1735_v14 = vld [vmem:[#allocation3 + $0x2d68] sm:$0xff] }
 0x308   :  { %v9925_v47 = vadd.f32 %v6777_v30, %v3985_v36  ;;  %v6742_v48 = vadd.f32 %v6741_v43, %v6740_v44  ;;  %8918 = vmatpush3.bf16.msra.mxu0 %v8917_v29  ;;  %v6779_v49 = vpop.f32.mrb[59].mxu1  ;;  %v1745_v29 = vld [vmem:[#allocation3 + $0x2db8] sm:$0xff]  ;;  %v179_v30 = vld [vmem:[%s10082_s0 + $0x2c8] sm:$0xff]  ;;  %v1728_v44 = vld [vmem:[#allocation3 + $0x2d30] sm:$0xff]  ;;  %v8981_v23 = vpack.c.bf16 %v1703_v15, %v1702_v10  ;;  %v9013_v31 = vpack.c.bf16 %v1735_v14, %v1734_v11 }
 0x309   :  { %v6780_v51 = vadd.f32 %v6779_v49, %v6778_v50  ;;  %8950 = vmatpush3.bf16.msra.mxu1 %v8949_v38  ;;  %8920 = vmatprep.subr.bf16.mxu0 %v8919_v32  ;;  %v8965_v38 = vpack.c.bf16 %v1695_v22, %v1694_v21  ;;  %v181_v32 = vld [vmem:[%s10082_s0 + $0x2d8] sm:$0xff]  ;;  %v1746_v43 = vld [vmem:[#allocation3 + $0x2dc0] sm:$0xff]  ;;  %v1747_v50 = vld [vmem:[#allocation3 + $0x2dc8] sm:$0xff]  ;;  %v9001_v46 = vpack.c.bf16 %v1729_v40, %v1728_v44 }
 0x30a   :  { %v3990_v62 = vadd.f32 %v6742_v48, %v9904_v7  ;;  %8952 = vmatprep.subr.bf16.mxu1 %v8951_v39  ;;  %v271_v7 = vld [vmem:[%s10082_s0 + $0x5a8] sm:$0xff]  ;;  %v1697_v36 = vld [vmem:[#allocation3 + $0x2c38] sm:$0xff]  ;;  %v8999_v39 = vpack.c.bf16 %v1745_v29, %v1744_v28  ;;  %v8971_v48 = vpack.c.bf16 %v1715_v42, %v1714_v41  ;;  %v1698_v49 = vld [vmem:[#allocation3 + $0x2c40] sm:$0xff] }
 0x30b   :  { %v8969_v45 = vpack.c.bf16 %v1697_v36, %v1696_v35  ;;  %v1720_v16 = vld [vmem:[#allocation3 + $0x2cf0] sm:$0xff]  ;;  %v1705_v28 = vld [vmem:[#allocation3 + $0x2c78] sm:$0xff]  ;;  %v1771_v35 = vld [vmem:[#allocation3 + $0x2e88] sm:$0xff] }
 0x30c   :  { %v9934_v2 = vadd.f32 %v6780_v51, %v3990_v62  ;;  %8922 = vmatpush3.bf16.msra.mxu0 %v8921_v56  ;;  %v1699_v56 = vld [vmem:[#allocation3 + $0x2c48] sm:$0xff]  ;;  %v1730_v51 = vld [vmem:[#allocation3 + $0x2d40] sm:$0xff]  ;;  %v1748_v62 = vld [vmem:[#allocation3 + $0x2dd0] sm:$0xff] }
 0x30d   :  { %8954 = vmatpush3.bf16.msra.mxu1 %v8953_v53  ;;  %8956 = vmatprep.subr.bf16.mxu0 %v8955_v52  ;;  %v9003_v53 = vpack.c.bf16 %v1747_v50, %v1746_v43  ;;  %v1731_v52 = vld [vmem:[#allocation3 + $0x2d48] sm:$0xff]  ;;  %v1704_v27 = vld [vmem:[#allocation3 + $0x2c70] sm:$0xff]  ;;  %v274_v15 = vld [vmem:[%s10082_s0 + $0x5c0] sm:$0xff] }
 0x30e   :  { %8988 = vmatprep.subr.bf16.mxu1 %v8987_v59  ;;  %v8973_v59 = vpack.c.bf16 %v1699_v56, %v1698_v49  ;;  %v9005_v58 = vpack.c.bf16 %v1731_v52, %v1730_v51  ;;  %v1736_v29 = vld [vmem:[#allocation3 + $0x2d70] sm:$0xff]  ;;  %v1803_v40 = vld [vmem:[#allocation3 + $0x2f88] sm:$0xff]  ;;  %v8985_v50 = vpack.c.bf16 %v1705_v28, %v1704_v27  ;;  %v178_v51 = vld [vmem:[%s10082_s0 + $0x2c0] sm:$0xff] }
 0x30f   :  { %5033 = vmatmul.mubr.f32.vlgmr.msra.gmra.mrb[84].mxu0 %v174_v57  ;;  %v1749_v57 = vld [vmem:[#allocation3 + $0x2dd8] sm:$0xff]  ;;  %v1755_v49 = vld [vmem:[#allocation3 + $0x2e08] sm:$0xff]  ;;  %v1786_v52 = vld [vmem:[#allocation3 + $0x2f00] sm:$0xff] }
 0x310   :  { %8958 = vmatpush3.bf16.msra.mxu0 %v8957_v1  ;;  %5108 = vmatmul.mubr.f32.vlgmr.msra.gmra.mrb[84].mxu1 %v176_v61  ;;  %v1700_v61 = vld [vmem:[#allocation3 + $0x2c50] sm:$0xff]  ;;  %v9007_v1 = vpack.c.bf16 %v1749_v57, %v1748_v62  ;;  %v1787_v54 = vld [vmem:[#allocation3 + $0x2f08] sm:$0xff]  ;;  %v1773_v57 = vld [vmem:[#allocation3 + $0x2e98] sm:$0xff] }
 0x311   :  { %8990 = vmatpush3.bf16.msra.mxu1 %v8989_v9  ;;  %5037 = vmatprep.mubr.f32.mxu0 %v271_v7  ;;  %v1733_v7 = vld [vmem:[#allocation3 + $0x2d58] sm:$0xff]  ;;  %v1750_v9 = vld [vmem:[#allocation3 + $0x2de0] sm:$0xff]  ;;  %v8977_v6 = vpack.c.bf16 %v1701_v0, %v1700_v61  ;;  %v1772_v62 = vld [vmem:[#allocation3 + $0x2e90] sm:$0xff]  ;;  %v9053_v0 = vpack.c.bf16 %v1787_v54, %v1786_v52 }
 0x312   :  { %8960 = vmatprep.subr.bf16.mxu0 %v8959_v8  ;;  %5112 = vmatprep.mubr.f32.mxu1 %v273_v12  ;;  %v9009_v13 = vpack.c.bf16 %v1733_v7, %v1732_v63  ;;  %v8979_v8 = vpack.c.bf16 %v1719_v4, %v1718_v3  ;;  %v1805_v61 = vld [vmem:[#allocation3 + $0x2f98] sm:$0xff]  ;;  %v1756_v63 = vld [vmem:[#allocation3 + $0x2e10] sm:$0xff]  ;;  %v9023_v3 = vpack.c.bf16 %v1773_v57, %v1772_v62  ;;  %v1807_v10 = vld [vmem:[#allocation3 + $0x2fa8] sm:$0xff] }
 0x313   :  { %5038 = vmatmul.mubr.f32.gmra.mrb[86].mxu0 %v270_v37  ;;  %8992 = vmatprep.subr.bf16.mxu1 %v8991_v19  ;;  %v9011_v19 = vpack.c.bf16 %v1751_v5, %v1750_v9  ;;  %v1721_v37 = vld [vmem:[#allocation3 + $0x2cf8] sm:$0xff]  ;;  %v1788_v7 = vld [vmem:[#allocation3 + $0x2f10] sm:$0xff]  ;;  %v1774_v9 = vld [vmem:[#allocation3 + $0x2ea0] sm:$0xff] }
 0x314   :  { %8962 = vmatpush3.bf16.msra.mxu0 %v8961_v17  ;;  %5113 = vmatmul.mubr.f32.gmra.mrb[86].mxu1 %v272_v18  ;;  %v8983_v26 = vpack.c.bf16 %v1721_v37, %v1720_v16  ;;  %v1789_v4 = vld [vmem:[#allocation3 + $0x2f18] sm:$0xff]  ;;  %v1775_v5 = vld [vmem:[#allocation3 + $0x2ea8] sm:$0xff]  ;;  %v1758_v16 = vld [vmem:[#allocation3 + $0x2e20] sm:$0xff] }
 0x315   :  { %8994 = vmatpush3.bf16.msra.mxu1 %v8993_v25  ;;  %8964 = vmatprep.subr.bf16.mxu0 %v8963_v20  ;;  %v1752_v25 = vld [vmem:[#allocation3 + $0x2df0] sm:$0xff]  ;;  %v1753_v20 = vld [vmem:[#allocation3 + $0x2df8] sm:$0xff]  ;;  %v9027_v14 = vpack.c.bf16 %v1775_v5, %v1774_v9  ;;  %v1759_v37 = vld [vmem:[#allocation3 + $0x2e28] sm:$0xff] }
 0x316   :  { %8996 = vmatprep.subr.bf16.mxu1 %v8995_v24  ;;  %5182 = vmatprep.mubr.f32.mxu0 %v179_v30  ;;  %v1765_v62 = vld [vmem:[#allocation3 + $0x2e58] sm:$0xff]  ;;  %v1796_v57 = vld [vmem:[#allocation3 + $0x2f50] sm:$0xff]  ;;  %v1767_v9 = vld [vmem:[#allocation3 + $0x2e68] sm:$0xff] }
 0x317   :  { %5257 = vmatprep.mubr.f32.mxu1 %v181_v32  ;;  %v9015_v32 = vpack.c.bf16 %v1753_v20, %v1752_v25  ;;  %v1791_v25 = vld [vmem:[#allocation3 + $0x2f28] sm:$0xff]  ;;  %v1776_v20 = vld [vmem:[#allocation3 + $0x2eb0] sm:$0xff]  ;;  %v1798_v5 = vld [vmem:[#allocation3 + $0x2f60] sm:$0xff] }
 0x318   :  { %8966 = vmatpush3.bf16.msra.mxu0 %v8965_v38 }
 0x319   :  { %8998 = vmatpush3.bf16.msra.mxu1 %v8997_v33  ;;  %8968 = vmatprep.subr.bf16.mxu0 %v8967_v34  ;;  %v1737_v33 = vld [vmem:[#allocation3 + $0x2d78] sm:$0xff]  ;;  %v1770_v34 = vld [vmem:[#allocation3 + $0x2e80] sm:$0xff] }
 0x31a   :  { %9000 = vmatprep.subr.bf16.mxu1 %v8999_v39  ;;  %v1802_v39 = vld [vmem:[#allocation3 + $0x2f80] sm:$0xff] }
 0x31c   :  { %8970 = vmatpush3.bf16.msra.mxu0 %v8969_v45 }
 0x31d   :  { %9002 = vmatpush3.bf16.msra.mxu1 %v9001_v46  ;;  %8972 = vmatprep.subr.bf16.mxu0 %v8971_v48  ;;  %v9019_v46 = vpack.c.bf16 %v1771_v35, %v1770_v34  ;;  %v1754_v48 = vld [vmem:[#allocation3 + $0x2e00] sm:$0xff]  ;;  %v1779_v35 = vld [vmem:[#allocation3 + $0x2ec8] sm:$0xff] }
 0x31e   :  { %9004 = vmatprep.subr.bf16.mxu1 %v9003_v53  ;;  %v9051_v53 = vpack.c.bf16 %v1803_v40, %v1802_v39  ;;  %v1778_v34 = vld [vmem:[#allocation3 + $0x2ec0] sm:$0xff] }
 0x320   :  { %8974 = vmatpush3.bf16.msra.mxu0 %v8973_v59 }
 0x321   :  { %9006 = vmatpush3.bf16.msra.mxu1 %v9005_v58  ;;  %8976 = vmatprep.subr.bf16.mxu0 %v8975_v60  ;;  %v9021_v58 = vpack.c.bf16 %v1755_v49, %v1754_v48  ;;  %v1804_v60 = vld [vmem:[#allocation3 + $0x2f90] sm:$0xff]  ;;  %v1781_v49 = vld [vmem:[#allocation3 + $0x2ed8] sm:$0xff] }
 0x322   :  { %v6813_v12 = vpop.f32.mrb[60].mxu0  ;;  %9008 = vmatprep.subr.bf16.mxu1 %v9007_v1  ;;  %v1757_v1 = vld [vmem:[#allocation3 + $0x2e18] sm:$0xff]  ;;  %v1780_v48 = vld [vmem:[#allocation3 + $0x2ed0] sm:$0xff] }
 0x323   :  { %v6814_v17 = vpop.f32.mrb[61].mxu0  ;;  %v6851_v18 = vpop.f32.mrb[60].mxu1  ;;  %v9025_v11 = vpack.c.bf16 %v1757_v1, %v1756_v63  ;;  %v9039_v54 = vpack.c.bf16 %v1781_v49, %v1780_v48  ;;  %v1815_v63 = vld [vmem:[#allocation3 + $0x2fe8] sm:$0xff] }
 0x324   :  { %v6815_v21 = vadd.f32 %v6814_v17, %v6813_v12  ;;  %8978 = vmatpush3.bf16.msra.mxu0 %v8977_v6  ;;  %v6852_v22 = vpop.f32.mrb[61].mxu1  ;;  %v277_v6 = vld [vmem:[%s10082_s0 + $0x5d8] sm:$0xff]  ;;  %v276_v12 = vld [vmem:[%s10082_s0 + $0x5d0] sm:$0xff]  ;;  %v1790_v17 = vld [vmem:[#allocation3 + $0x2f20] sm:$0xff] }
 0x325   :  { %v6853_v24 = vadd.f32 %v6852_v22, %v6851_v18  ;;  %9010 = vmatpush3.bf16.msra.mxu1 %v9009_v13  ;;  %8980 = vmatprep.subr.bf16.mxu0 %v8979_v8  ;;  %v9055_v13 = vpack.c.bf16 %v1805_v61, %v1804_v60  ;;  %v1806_v8 = vld [vmem:[#allocation3 + $0x2fa0] sm:$0xff]  ;;  %v1808_v22 = vld [vmem:[#allocation3 + $0x2fb0] sm:$0xff]  ;;  %v9061_v27 = vpack.c.bf16 %v1791_v25, %v1790_v17  ;;  %v1783_v61 = vld [vmem:[#allocation3 + $0x2ee8] sm:$0xff] }
 0x326   :  { %v4135_v30 = vadd.f32 %v6815_v21, %v9925_v47  ;;  %v6816_v38 = vpop.f32.mrb[62].mxu0  ;;  %9012 = vmatprep.subr.bf16.mxu1 %v9011_v19  ;;  %v9017_v47 = vpack.c.bf16 %v1737_v33, %v1736_v29  ;;  %v9057_v19 = vpack.c.bf16 %v1789_v4, %v1788_v7  ;;  %v9059_v18 = vpack.c.bf16 %v1807_v10, %v1806_v8  ;;  %v1777_v21 = vld [vmem:[#allocation3 + $0x2eb8] sm:$0xff]  ;;  %v1760_v29 = vld [vmem:[#allocation3 + $0x2e30] sm:$0xff]  ;;  %v1782_v60 = vld [vmem:[#allocation3 + $0x2ee0] sm:$0xff] }
 0x327   :  { %v6817_v36 = vpop.f32.mrb[63].mxu0  ;;  %v6854_v44 = vpop.f32.mrb[62].mxu1  ;;  %v9031_v28 = vpack.c.bf16 %v1777_v21, %v1776_v20  ;;  %v1793_v33 = vld [vmem:[#allocation3 + $0x2f38] sm:$0xff]  ;;  %v1766_v4 = vld [vmem:[#allocation3 + $0x2e60] sm:$0xff]  ;;  %v1799_v8 = vld [vmem:[#allocation3 + $0x2f68] sm:$0xff] }
 0x328   :  { %v9955_v41 = vadd.f32 %v6853_v24, %v4135_v30  ;;  %v6818_v42 = vadd.f32 %v6817_v36, %v6816_v38  ;;  %8982 = vmatpush3.bf16.msra.mxu0 %v8981_v23  ;;  %v6855_v43 = vpop.f32.mrb[63].mxu1  ;;  %v1809_v23 = vld [vmem:[#allocation3 + $0x2fb8] sm:$0xff]  ;;  %v183_v24 = vld [vmem:[%s10082_s0 + $0x2e8] sm:$0xff]  ;;  %v1792_v38 = vld [vmem:[#allocation3 + $0x2f30] sm:$0xff]  ;;  %v9045_v17 = vpack.c.bf16 %v1767_v9, %v1766_v4  ;;  %v9077_v25 = vpack.c.bf16 %v1799_v8, %v1798_v5 }
 0x329   :  { %v6856_v45 = vadd.f32 %v6855_v43, %v6854_v44  ;;  %9014 = vmatpush3.bf16.msra.mxu1 %v9013_v31  ;;  %8984 = vmatprep.subr.bf16.mxu0 %v8983_v26  ;;  %v9029_v31 = vpack.c.bf16 %v1759_v37, %v1758_v16  ;;  %v185_v26 = vld [vmem:[%s10082_s0 + $0x2f8] sm:$0xff]  ;;  %v1810_v36 = vld [vmem:[#allocation3 + $0x2fc0] sm:$0xff]  ;;  %v1811_v44 = vld [vmem:[#allocation3 + $0x2fc8] sm:$0xff]  ;;  %v9065_v40 = vpack.c.bf16 %v1793_v33, %v1792_v38 }
 0x32a   :  { %v4140_v56 = vadd.f32 %v6818_v42, %v9934_v2  ;;  %9016 = vmatprep.subr.bf16.mxu1 %v9015_v32  ;;  %v275_v2 = vld [vmem:[%s10082_s0 + $0x5c8] sm:$0xff]  ;;  %v1761_v30 = vld [vmem:[#allocation3 + $0x2e38] sm:$0xff]  ;;  %v9063_v32 = vpack.c.bf16 %v1809_v23, %v1808_v22  ;;  %v9035_v42 = vpack.c.bf16 %v1779_v35, %v1778_v34  ;;  %v1762_v43 = vld [vmem:[#allocation3 + $0x2e40] sm:$0xff] }
 0x32b   :  { %v9033_v39 = vpack.c.bf16 %v1761_v30, %v1760_v29  ;;  %v1784_v10 = vld [vmem:[#allocation3 + $0x2ef0] sm:$0xff]  ;;  %v1769_v22 = vld [vmem:[#allocation3 + $0x2e78] sm:$0xff] }
 0x32c   :  { %v9964_v59 = vadd.f32 %v6856_v45, %v4140_v56  ;;  %8986 = vmatpush3.bf16.msra.mxu0 %v8985_v50  ;;  %v1763_v50 = vld [vmem:[#allocation3 + $0x2e48] sm:$0xff]  ;;  %v1794_v45 = vld [vmem:[#allocation3 + $0x2f40] sm:$0xff]  ;;  %v1812_v56 = vld [vmem:[#allocation3 + $0x2fd0] sm:$0xff] }
 0x32d   :  { %9018 = vmatpush3.bf16.msra.mxu1 %v9017_v47  ;;  %9020 = vmatprep.subr.bf16.mxu0 %v9019_v46  ;;  %v9067_v47 = vpack.c.bf16 %v1811_v44, %v1810_v36  ;;  %v1795_v46 = vld [vmem:[#allocation3 + $0x2f48] sm:$0xff]  ;;  %v1768_v21 = vld [vmem:[#allocation3 + $0x2e70] sm:$0xff]  ;;  %v182_v44 = vld [vmem:[%s10082_s0 + $0x2e0] sm:$0xff] }
 0x32e   :  { %9052 = vmatprep.subr.bf16.mxu1 %v9051_v53  ;;  %v9037_v53 = vpack.c.bf16 %v1763_v50, %v1762_v43  ;;  %v9069_v52 = vpack.c.bf16 %v1795_v46, %v1794_v45  ;;  %v9049_v33 = vpack.c.bf16 %v1769_v22, %v1768_v21  ;;  %v280_v43 = vld [vmem:[%s10082_s0 + $0x5f0] sm:$0xff]  ;;  %v5436_v22 = vld [vmem:[%s10085_s3 + $0x38] sm:$0xff] }
 0x32f   :  { %5183 = vmatmul.mubr.f32.vlgmr.msra.gmra.mrb[88].mxu0 %v178_v51  ;;  %v1813_v51 = vld [vmem:[#allocation3 + $0x2fd8] sm:$0xff]  ;;  %v5435_v21 = vld [vmem:[%s10085_s3 + $0x30] sm:$0xff] }
 0x330   :  { %9022 = vmatpush3.bf16.msra.mxu0 %v9021_v58  ;;  %5258 = vmatmul.mubr.f32.vlgmr.msra.gmra.mrb[88].mxu1 %v180_v55  ;;  %v1764_v55 = vld [vmem:[#allocation3 + $0x2e50] sm:$0xff]  ;;  %v9071_v58 = vpack.c.bf16 %v1813_v51, %v1812_v56 }
 0x331   :  { %9054 = vmatpush3.bf16.msra.mxu1 %v9053_v0  ;;  %5187 = vmatprep.mubr.f32.mxu0 %v275_v2  ;;  %v1797_v2 = vld [vmem:[#allocation3 + $0x2f58] sm:$0xff]  ;;  %v1814_v0 = vld [vmem:[#allocation3 + $0x2fe0] sm:$0xff]  ;;  %v9041_v1 = vpack.c.bf16 %v1765_v62, %v1764_v55 }
 0x332   :  { %9024 = vmatprep.subr.bf16.mxu0 %v9023_v3  ;;  %5262 = vmatprep.mubr.f32.mxu1 %v277_v6  ;;  %v9073_v7 = vpack.c.bf16 %v1797_v2, %v1796_v57  ;;  %v9043_v3 = vpack.c.bf16 %v1783_v61, %v1782_v60 }
 0x333   :  { %5188 = vmatmul.mubr.f32.gmra.mrb[90].mxu0 %v274_v15  ;;  %9056 = vmatprep.subr.bf16.mxu1 %v9055_v13  ;;  %v9075_v13 = vpack.c.bf16 %v1815_v63, %v1814_v0  ;;  %v1785_v15 = vld [vmem:[#allocation3 + $0x2ef8] sm:$0xff] }
 0x334   :  { %9026 = vmatpush3.bf16.msra.mxu0 %v9025_v11  ;;  %5263 = vmatmul.mubr.f32.gmra.mrb[90].mxu1 %v276_v12  ;;  %v9047_v20 = vpack.c.bf16 %v1785_v15, %v1784_v10 }
 0x335   :  { %9058 = vmatpush3.bf16.msra.mxu1 %v9057_v19  ;;  %9028 = vmatprep.subr.bf16.mxu0 %v9027_v14  ;;  %v1816_v19 = vld [vmem:[#allocation3 + $0x2ff0] sm:$0xff]  ;;  %v1817_v14 = vld [vmem:[#allocation3 + $0x2ff8] sm:$0xff] }
 0x336   :  { %9060 = vmatprep.subr.bf16.mxu1 %v9059_v18  ;;  %5332 = vmatprep.mubr.f32.mxu0 %v183_v24 }
 0x337   :  { %5407 = vmatprep.mubr.f32.mxu1 %v185_v26  ;;  %v1800_v26 = vld [vmem:[#allocation3 + $0x2f70] sm:$0xff] }
 0x338   :  { %9030 = vmatpush3.bf16.msra.mxu0 %v9029_v31  ;;  %v9079_v31 = vpack.c.bf16 %v1817_v14, %v1816_v19  ;;  %v5430_v19 = vld [vmem:[%s10085_s3 + $0x8] sm:$0xff]  ;;  %v5431_v14 = vld [vmem:[%s10085_s3 + $0x10] sm:$0xff] }
 0x339   :  { %9062 = vmatpush3.bf16.msra.mxu1 %v9061_v27  ;;  %9032 = vmatprep.subr.bf16.mxu0 %v9031_v28  ;;  %v1801_v27 = vld [vmem:[#allocation3 + $0x2f78] sm:$0xff] }
 0x33a   :  { %9064 = vmatprep.subr.bf16.mxu1 %v9063_v32  ;;  %v9081_v35 = vpack.c.bf16 %v1801_v27, %v1800_v26 }
 0x33c   :  { %9034 = vmatpush3.bf16.msra.mxu0 %v9033_v39  ;;  %v184_v39 = vld [vmem:[%s10082_s0 + $0x2f0] sm:$0xff] }
 0x33d   :  { %9066 = vmatpush3.bf16.msra.mxu1 %v9065_v40  ;;  %9036 = vmatprep.subr.bf16.mxu0 %v9035_v42  ;;  %v279_v40 = vld [vmem:[%s10082_s0 + $0x5e8] sm:$0xff]  ;;  %v278_v42 = vld [vmem:[%s10082_s0 + $0x5e0] sm:$0xff] }
 0x33e   :  { %9068 = vmatprep.subr.bf16.mxu1 %v9067_v47 }
 0x340   :  { %9038 = vmatpush3.bf16.msra.mxu0 %v9037_v53 }
 0x341   :  { %9070 = vmatpush3.bf16.msra.mxu1 %v9069_v52  ;;  %9040 = vmatprep.subr.bf16.mxu0 %v9039_v54 }
 0x342   :  { %v6889_v6 = vpop.f32.mrb[64].mxu0  ;;  %9072 = vmatprep.subr.bf16.mxu1 %v9071_v58 }
 0x343   :  { %v6890_v11 = vpop.f32.mrb[65].mxu0  ;;  %v6927_v12 = vpop.f32.mrb[64].mxu1 }
 0x344   :  { %v6891_v16 = vadd.f32 %v6890_v11, %v6889_v6  ;;  %9042 = vmatpush3.bf16.msra.mxu0 %v9041_v1  ;;  %v6928_v37 = vpop.f32.mrb[65].mxu1 }
 0x345   :  { %v6929_v18 = vadd.f32 %v6928_v37, %v6927_v12  ;;  %9074 = vmatpush3.bf16.msra.mxu1 %v9073_v7  ;;  %9044 = vmatprep.subr.bf16.mxu0 %v9043_v3  ;;  %v5429_v12 = vld [vmem:[%s10085_s3] sm:$0xff]  ;;  %v5432_v37 = vld [vmem:[%s10085_s3 + $0x18] sm:$0xff] }
 0x346   :  { %v4285_v23 = vadd.f32 %v6891_v16, %v9955_v41  ;;  %v6892_v24 = vpop.f32.mrb[66].mxu0  ;;  %9076 = vmatprep.subr.bf16.mxu1 %v9075_v13  ;;  %v9083_v16 = vpack.c.bf16 %v5430_v19, %v5429_v12 }
 0x347   :  { %v6893_v28 = vpop.f32.mrb[67].mxu0  ;;  %v6930_v29 = vpop.f32.mrb[66].mxu1 }
 0x348   :  { %v4360_v30 = vadd.f32 %v6929_v18, %v4285_v23  ;;  %v6894_v38 = vadd.f32 %v6893_v28, %v6892_v24  ;;  %9046 = vmatpush3.bf16.msra.mxu0 %v9045_v17  ;;  %v6931_v32 = vpop.f32.mrb[67].mxu1  ;;  %v9087_v17 = vpack.c.bf16 %v5432_v37, %v5431_v14  ;;  %v5433_v18 = vld [vmem:[%s10085_s3 + $0x20] sm:$0xff]  ;;  %v9095_v23 = vpack.c.bf16 %v5436_v22, %v5435_v21 }
 0x349   :  { %v6932_v34 = vadd.f32 %v6931_v32, %v6930_v29  ;;  %9078 = vmatpush3.bf16.msra.mxu1 %v9077_v25  ;;  %9048 = vmatprep.subr.bf16.mxu0 %v9047_v20  ;;  %v5434_v25 = vld [vmem:[%s10085_s3 + $0x28] sm:$0xff]  ;;  %v5437_v24 = vld [vmem:[%s10085_s3 + $0x40] sm:$0xff]  ;;  %v5439_v32 = vld [vmem:[%s10085_s3 + $0x50] sm:$0xff] }
 0x34a   :  { %v4290_v36 = vadd.f32 %v6894_v38, %v9964_v59  ;;  %9080 = vmatprep.subr.bf16.mxu1 %v9079_v31  ;;  %v281_v59 = vld [vmem:[%s10082_s0 + $0x5f8] sm:$0xff]  ;;  %v9091_v20 = vpack.c.bf16 %v5434_v25, %v5433_v18  ;;  %v5438_v31 = vld [vmem:[%s10085_s3 + $0x48] sm:$0xff] }
 0x34b   :  { %v9099_v26 = vpack.c.bf16 %v5438_v31, %v5437_v24 }
 0x34c   :  { %v4365_v41 = vadd.f32 %v6932_v34, %v4290_v36  ;;  %9050 = vmatpush3.bf16.msra.mxu0 %v9049_v33  ;;  %v5440_v33 = vld [vmem:[%s10085_s3 + $0x58] sm:$0xff] }
 0x34d   :  { %9082 = vmatpush3.bf16.msra.mxu1 %v9081_v35  ;;  %9084 = vmatprep.subr.bf16.mxu0 %v9083_v16  ;;  %v9103_v35 = vpack.c.bf16 %v5440_v33, %v5439_v32 }
 0x34f   :  { %5333 = vmatmul.mubr.f32.vlgmr.msra.gmra.mrb[92].mxu0 %v182_v44 }
 0x350   :  { %5408 = vmatmul.mubr.f32.vlgmr.msra.gmra.mrb[92].mxu1 %v184_v39  ;;  %5337 = vmatprep.mubr.f32.mxu0 %v279_v40 }
 0x351   :  { %5412 = vmatprep.mubr.f32.mxu1 %v281_v59  ;;  %9086 = vmatpush3.bf16.msra.mxu0 %v9083_v16 }
 0x352   :  { %9088 = vmatprep.subr.bf16.mxu0 %v9087_v17 }
 0x353   :  { %5338 = vmatmul.mubr.f32.gmra.mrb[94].mxu0 %v278_v42 }
 0x354   :  { %5413 = vmatmul.mubr.f32.gmra.mrb[94].mxu1 %v280_v43  ;;  %v5441_v43 = vld [vmem:[%s10085_s3 + $0x60] sm:$0xff] }
 0x355   :  { %9090 = vmatpush3.bf16.msra.mxu0 %v9087_v17 }
 0x356   :  { %9092 = vmatprep.subr.bf16.mxu0 %v9091_v20 }
 0x359   :  { %9094 = vmatpush3.bf16.msra.mxu0 %v9091_v20 }
 0x35a   :  { %9096 = vmatprep.subr.bf16.mxu0 %v9095_v23 }
 0x35d   :  { %9098 = vmatpush3.bf16.msra.mxu0 %v9095_v23 }
 0x35e   :  { %9100 = vmatprep.subr.bf16.mxu0 %v9099_v26 }
 0x361   :  { %9102 = vmatpush3.bf16.msra.mxu0 %v9099_v26 }
 0x362   :  { %v6965_v50 = vpop.f32.mrb[68].mxu0  ;;  %9104 = vmatprep.subr.bf16.mxu0 %v9103_v35 }
 0x363   :  { %v6966_v45 = vpop.f32.mrb[69].mxu0  ;;  %v7003_v47 = vpop.f32.mrb[68].mxu1 }
 0x364   :  { %v6967_v46 = vadd.f32 %v6966_v45, %v6965_v50  ;;  %v7004_v48 = vpop.f32.mrb[69].mxu1  ;;  %v5442_v50 = vld [vmem:[%s10085_s3 + $0x68] sm:$0xff] }
 0x365   :  { %v7005_v49 = vadd.f32 %v7004_v48, %v7003_v47  ;;  %9106 = vmatpush3.bf16.msra.mxu0 %v9103_v35  ;;  %v9107_v47 = vpack.c.bf16 %v5442_v50, %v5441_v43 }
 0x366   :  { %v4435_v56 = vadd.f32 %v6967_v46, %v4360_v30  ;;  %v6968_v51 = vpop.f32.mrb[70].mxu0 }
 0x367   :  { %v6969_v53 = vpop.f32.mrb[71].mxu0  ;;  %v7006_v52 = vpop.f32.mrb[70].mxu1  ;;  %9108 = vmatprep.subr.bf16.mxu0 %v9107_v47 }
 0x368   :  { %v4510_v54 = vadd.f32 %v7005_v49, %v4435_v56  ;;  %v6970_v55 = vadd.f32 %v6969_v53, %v6968_v51  ;;  %v7007_v62 = vpop.f32.mrb[71].mxu1  ;;  %v5443_v49 = vld [vmem:[%s10085_s3 + $0x70] sm:$0xff]  ;;  %v5444_v56 = vld [vmem:[%s10085_s3 + $0x78] sm:$0xff]  ;;  %v5529_v53 = vld [vmem:[%s10087_s5] sm:$0xff] }
 0x369   :  { %v7008_v57 = vadd.f32 %v7007_v62, %v7006_v52  ;;  %9110 = vmatpush3.bf16.msra.mxu0 %v9107_v47  ;;  %v9111_v51 = vpack.c.bf16 %v5444_v56, %v5443_v49  ;;  %v5530_v52 = vld [vmem:[%s10087_s5 + $0x8] sm:$0xff]  ;;  %v5532_v62 = vld [vmem:[%s10087_s5 + $0x18] sm:$0xff] }
 0x36a   :  { %v4440_v58 = vadd.f32 %v6970_v55, %v4365_v41  ;;  %v9115_v55 = vpack.c.bf16 %v5530_v52, %v5529_v53 }
 0x36b   :  { %9112 = vmatprep.subr.bf16.mxu0 %v9111_v51 }
 0x36c   :  { %v4515_v2 = vadd.f32 %v7008_v57, %v4440_v58  ;;  %v5533_v58 = vld [vmem:[%s10087_s5 + $0x20] sm:$0xff]  ;;  %9116 = vmatprep.subr.bf16.mxu1 %v9115_v55 }
 0x36d   :  { %9114 = vmatpush3.bf16.msra.mxu0 %v9111_v51  ;;  %9118 = vmatpush3.bf16.msra.mxu1 %v9115_v55  ;;  %v5636_v55 = vld [vmem:[#allocation5] ss:$0 sm:$0xff] }
 0x382   :  { %v7041_v60 = vpop.f32.mrb[72].mxu0 }
 0x383   :  { %v7042_v61 = vpop.f32.mrb[73].mxu0  ;;  %v7079_v0 = vpop.f32.mrb[72].mxu1 }
 0x384   :  { %v7043_v63 = vadd.f32 %v7042_v61, %v7041_v60  ;;  %v7080_v1 = vpop.f32.mrb[73].mxu1 }
 0x385   :  { %v7081_v7 = vadd.f32 %v7080_v1, %v7079_v0 }
 0x386   :  { %v4585_v3 = vadd.f32 %v7043_v63, %v4510_v54  ;;  %v7044_v4 = vpop.f32.mrb[74].mxu0  ;;  %v5531_v54 = vld [vmem:[%s10087_s5 + $0x10] sm:$0xff] }
 0x387   :  { %v7045_v9 = vpop.f32.mrb[75].mxu0  ;;  %v7082_v5 = vpop.f32.mrb[74].mxu1  ;;  %v9119_v57 = vpack.c.bf16 %v5532_v62, %v5531_v54 }
 0x388   :  { %v4660_v6 = vadd.f32 %v7081_v7, %v4585_v3  ;;  %v7046_v13 = vadd.f32 %v7045_v9, %v7044_v4  ;;  %v7083_v8 = vpop.f32.mrb[75].mxu1 }
 0x389   :  { %v7084_v10 = vadd.f32 %v7083_v8, %v7082_v5  ;;  %9120 = vmatprep.subr.bf16.mxu1 %v9119_v57 }
 0x38a   :  { %v4590_v15 = vadd.f32 %v7046_v13, %v4515_v2  ;;  %v5534_v2 = vld [vmem:[%s10087_s5 + $0x28] sm:$0xff]  ;;  %9122 = vmatpush3.bf16.msra.mxu1 %v9119_v57 }
 0x38b   :  { %v9123_v60 = vpack.c.bf16 %v5534_v2, %v5533_v58 }
 0x38c   :  { %v4665_v11 = vadd.f32 %v7084_v10, %v4590_v15 }
 0x38d   :  { %9124 = vmatprep.subr.bf16.mxu1 %v9123_v60 }
 0x38e   :  { %9126 = vmatpush3.bf16.msra.mxu1 %v9123_v60 }
 0x3a2   :  { %v7117_v27 = vpop.f32.mrb[76].mxu0 }
 0x3a3   :  { %v7118_v28 = vpop.f32.mrb[77].mxu0  ;;  %v7155_v29 = vpop.f32.mrb[76].mxu1 }
 0x3a4   :  { %v7119_v30 = vadd.f32 %v7118_v28, %v7117_v27  ;;  %v7156_v38 = vpop.f32.mrb[77].mxu1 }
 0x3a5   :  { %v7157_v34 = vadd.f32 %v7156_v38, %v7155_v29 }
 0x3a6   :  { %v4735_v36 = vadd.f32 %v7119_v30, %v4660_v6  ;;  %v7120_v41 = vpop.f32.mrb[78].mxu0 }
 0x3a7   :  { %v7121_v44 = vpop.f32.mrb[79].mxu0  ;;  %v7158_v39 = vpop.f32.mrb[78].mxu1 }
 0x3a8   :  { %v4810_v40 = vadd.f32 %v7157_v34, %v4735_v36  ;;  %v7122_v59 = vadd.f32 %v7121_v44, %v7120_v41  ;;  %v7159_v42 = vpop.f32.mrb[79].mxu1 }
 0x3a9   :  { %v7160_v45 = vadd.f32 %v7159_v42, %v7158_v39 }
 0x3aa   :  { %v4740_v46 = vadd.f32 %v7122_v59, %v4665_v11 }
 0x3ac   :  { %v4815_v48 = vadd.f32 %v7160_v45, %v4740_v46 }
 0x3c2   :  { %v7193_v61 = vpop.f32.mrb[80].mxu0 }
 0x3c3   :  { %v7194_v0 = vpop.f32.mrb[81].mxu0  ;;  %v7231_v63 = vpop.f32.mrb[80].mxu1 }
 0x3c4   :  { %v7195_v1 = vadd.f32 %v7194_v0, %v7193_v61  ;;  %v7232_v7 = vpop.f32.mrb[81].mxu1 }
 0x3c5   :  { %v7233_v3 = vadd.f32 %v7232_v7, %v7231_v63 }
 0x3c6   :  { %v4885_v4 = vadd.f32 %v7195_v1, %v4810_v40  ;;  %v7196_v9 = vpop.f32.mrb[82].mxu0 }
 0x3c7   :  { %v7197_v5 = vpop.f32.mrb[83].mxu0  ;;  %v7234_v6 = vpop.f32.mrb[82].mxu1 }
 0x3c8   :  { %v4960_v13 = vadd.f32 %v7233_v3, %v4885_v4  ;;  %v7198_v8 = vadd.f32 %v7197_v5, %v7196_v9  ;;  %v7235_v10 = vpop.f32.mrb[83].mxu1  ;;  %v5535_v3 = vld [vmem:[%s10087_s5 + $0x30] sm:$0xff]  ;;  %v5536_v4 = vld [vmem:[%s10087_s5 + $0x38] sm:$0xff]  ;;  %v5637_v5 = vld [vmem:[#allocation7] ss:$0 sm:$0xff] }
 0x3c9   :  { %v7236_v15 = vadd.f32 %v7235_v10, %v7234_v6  ;;  %v9127_v9 = vpack.c.bf16 %v5536_v4, %v5535_v3 }
 0x3ca   :  { %v4890_v11 = vadd.f32 %v7198_v8, %v4815_v48 }
 0x3cb   :  { %9128 = vmatprep.subr.bf16.mxu1 %v9127_v9 }
 0x3cc   :  { %v4965_v12 = vadd.f32 %v7236_v15, %v4890_v11  ;;  %9130 = vmatpush3.bf16.msra.mxu1 %v9127_v9 }
 0x3e2   :  { %v7269_v19 = vpop.f32.mrb[84].mxu0 }
 0x3e3   :  { %v7270_v14 = vpop.f32.mrb[85].mxu0  ;;  %v7307_v16 = vpop.f32.mrb[84].mxu1 }
 0x3e4   :  { %v7271_v37 = vadd.f32 %v7270_v14, %v7269_v19  ;;  %v7308_v17 = vpop.f32.mrb[85].mxu1 }
 0x3e5   :  { %v7309_v18 = vadd.f32 %v7308_v17, %v7307_v16 }
 0x3e6   :  { %v5035_v25 = vadd.f32 %v7271_v37, %v4960_v13  ;;  %v7272_v20 = vpop.f32.mrb[86].mxu0 }
 0x3e7   :  { %v7273_v21 = vpop.f32.mrb[87].mxu0  ;;  %v7310_v22 = vpop.f32.mrb[86].mxu1 }
 0x3e8   :  { %v5110_v23 = vadd.f32 %v7309_v18, %v5035_v25  ;;  %v7274_v24 = vadd.f32 %v7273_v21, %v7272_v20  ;;  %v7311_v31 = vpop.f32.mrb[87].mxu1 }
 0x3e9   :  { %v7312_v26 = vadd.f32 %v7311_v31, %v7310_v22 }
 0x3ea   :  { %v5040_v27 = vadd.f32 %v7274_v24, %v4965_v12  ;;  %v5638_v12 = vld [vmem:[#allocation8] ss:$0 sm:$0xff] }
 0x3ec   :  { %v5115_v28 = vadd.f32 %v7312_v26, %v5040_v27 }
 0x402   :  { %v7345_v29 = vpop.f32.mrb[88].mxu0 }
 0x403   :  { %v7346_v30 = vpop.f32.mrb[89].mxu0  ;;  %v7383_v38 = vpop.f32.mrb[88].mxu1 }
 0x404   :  { %v7347_v32 = vadd.f32 %v7346_v30, %v7345_v29  ;;  %v7384_v33 = vpop.f32.mrb[89].mxu1 }
 0x405   :  { %v7385_v34 = vadd.f32 %v7384_v33, %v7383_v38 }
 0x406   :  { %v5185_v35 = vadd.f32 %v7347_v32, %v5110_v23  ;;  %v7348_v36 = vpop.f32.mrb[90].mxu0 }
 0x407   :  { %v7349_v41 = vpop.f32.mrb[91].mxu0  ;;  %v7386_v44 = vpop.f32.mrb[90].mxu1 }
 0x408   :  { %v5260_v39 = vadd.f32 %v7385_v34, %v5185_v35  ;;  %v7350_v40 = vadd.f32 %v7349_v41, %v7348_v36  ;;  %v7387_v59 = vpop.f32.mrb[91].mxu1 }
 0x409   :  { %v7388_v42 = vadd.f32 %v7387_v59, %v7386_v44 }
 0x40a   :  { %v5190_v43 = vadd.f32 %v7350_v40, %v5115_v28 }
 0x40c   :  { %v5265_v50 = vadd.f32 %v7388_v42, %v5190_v43 }
 0x422   :  { %v7421_v45 = vpop.f32.mrb[92].mxu0 }
 0x423   :  { %v7422_v47 = vpop.f32.mrb[93].mxu0  ;;  %v7459_v46 = vpop.f32.mrb[92].mxu1 }
 0x424   :  { %v7423_v48 = vadd.f32 %v7422_v47, %v7421_v45  ;;  %v7460_v49 = vpop.f32.mrb[93].mxu1 }
 0x425   :  { %v7461_v56 = vadd.f32 %v7460_v49, %v7459_v46 }
 0x426   :  { %v5335_v51 = vadd.f32 %v7423_v48, %v5260_v39  ;;  %v7424_v53 = vpop.f32.mrb[94].mxu0 }
 0x427   :  { %v7425_v52 = vpop.f32.mrb[95].mxu0  ;;  %v7462_v54 = vpop.f32.mrb[94].mxu1 }
 0x428   :  { %v5410_v62 = vadd.f32 %v7461_v56, %v5335_v51  ;;  %v7426_v57 = vadd.f32 %v7425_v52, %v7424_v53  ;;  %v7463_v58 = vpop.f32.mrb[95].mxu1 }
 0x429   :  { %v7464_v2 = vadd.f32 %v7463_v58, %v7462_v54 }
 0x42a   :  { %v5340_v60 = vadd.f32 %v7426_v57, %v5265_v50  ;;  %v5418_v61 = vadd.f32 %v5636_v55, %v5410_v62 }
 0x42c   :  { %v5415_v0 = vadd.f32 %v7464_v2, %v5340_v60  ;;  %v5427_v63 = vmax.f32 %v5418_v61, 0.0 }
 0x42e   :  { %v5419_v1 = vadd.f32 %v5636_v55, %v5415_v0  ;;  %7525 = vmatprep.mubr.f32.mxu0 %v5427_v63 }
 0x430   :  { %v5428_v7 = vmax.f32 %v5419_v1, 0.0 }
 0x432   :  { %7526 = vmatmul.mubr.f32.vlgmr.msra.gmra.mrb[96].mxu0 %v5428_v7 }
 0x505   :  { %v7527_v6 = vpop.f32.mrb[96].mxu0 }
 0x506   :  { %v5524_v13 = vadd.f32 %v7527_v6, %v5637_v5  ;;  %v5518_v8 = vpop.f32.mrb[97].mxu0 }
 0x507   :  { %v5519_v10 = vadd.f32 %v5637_v5, %v5518_v8 }
 0x508   :  { %v5528_v11 = vmax.f32 %v5524_v13, 0.0 }
 0x509   :  { %v5527_v15 = vmax.f32 %v5519_v10, 0.0 }
 0x50b   :  { %7544 = vmatprep.mubr.msk.f32.mxu1 %vm5544_vm0, %v5527_v15 }
 0x50c   :  { %7545 = vmatmul.mubr.msk.f32.vlgmr.msra.gmra.mrb[96].mxu1 %vm5544_vm0, %v5528_v11 }
 0x5df   :  { %v7546_v19 = vpop.f32.mrb[96].mxu1 }
 0x5e0   :  { %v5623_v14 = vadd.f32 %v7546_v19, %v5638_v12  ;;  %v5617_v16 = vpop.f32.mrb[97].mxu1 }
 0x5e1   :  { %v5618_v37 = vadd.f32 %v5638_v12, %v5617_v16 }
 0x5e2   :  { %5628 = vst.msk [vmem:[%s10089_s7 + $0x8] sm:$0xff] %vm5626_vm1, %v5623_v14 }
 0x5e3   :  { %5627 = vst.msk [vmem:[%s10089_s7] sm:$0xff] %vm5626_vm1, %v5618_v37 }
 0x5e4   :  { %5633 = vsyncpa [#allocation4], 1 }
 0x5e5   :  { %5634 = vsyncpa [#allocation6], 1 }
 0x5e6   :  { %5635 = vsyncpa [#allocation9], 1 }

</bundles_post_ra>
